<compile_context>
chip_gen: v6e
topology: v6e:2x2x1
jax: 0.10.0
libtpu: 0.0.40
codegen_flags: <defaults>
</compile_context>

<pallas_src>
import functools

import jax
import jax.numpy as jnp
from jax import lax
from jax.experimental import pallas as pl
from jax.experimental.pallas import tpu as pltpu


# ------------------------------- the kernel -------------------------------- #

def base_cnn_kernel(p1t_ref, w1bd_ref, b1r_ref, mask1_ref, w2g_ref, b2r_ref,
                    wf1p_ref, bf1_ref, wf2_ref, bf2_ref, out_ref,
                    m2_scr, feats_scr, *, n_batch):
    f32 = jnp.float32
    bf16 = jnp.bfloat16

    # ---- Stage 1: conv1(1->32) + bias + ReLU + 2x2 maxpool, ONE GEMM -------
    # Rows = n*256 + (1+yo)*16 + (1+xo)  (zero-padded 16x16 grid per sample of
    # the 14x14 pooled positions).  Cols of w1bd = pool_tap*32 + channel.
    a1 = jnp.dot(p1t_ref[...], w1bd_ref[...], preferred_element_type=f32)  # (R,128)
    a1 = jnp.maximum(a1 + b1r_ref[...], 0.0)
    pooled1 = jnp.maximum(jnp.maximum(a1[:, 0:32], a1[:, 32:64]),
                          jnp.maximum(a1[:, 64:96], a1[:, 96:128]))        # (R,32)
    # zero the padding ring so it doubles as conv2's zero padding
    pooled1 = (pooled1 * mask1_ref[...]).astype(bf16)

    # ---- Stage 2: conv2(32->64) with in-VMEM shifted-window im2col ---------
    def shift_rows(v, d):
        # out[r] = v[r + d], zero-filled at the edges (edges land in pad rows)
        if d == 0:
            return v
        pad = jnp.zeros((abs(d), v.shape[1]), v.dtype)
        if d > 0:
            return jnp.concatenate([v[d:, :], pad], axis=0)
        return jnp.concatenate([pad, v[:d, :]], axis=0)

    slabs = [shift_rows(pooled1, (dy - 1) * 16 + (dx - 1))
             for dy in range(3) for dx in range(3)]
    patches2 = jnp.concatenate(slabs, axis=1)                              # (R,288)
    a2 = jnp.dot(patches2, w2g_ref[...], preferred_element_type=f32)       # (R,64)
    a2 = jnp.maximum(a2 + b2r_ref[...], 0.0)

    # 2x2 maxpool: window max via two shifted maxes (valid at even positions)
    m = jnp.maximum(a2, shift_rows(a2, 1))
    m = jnp.maximum(m, shift_rows(m, 16))
    m2_scr[...] = m

    # ---- NCHW flatten: gather the 7x7 pooled grid into (N, 3136) ------------
    # fc1 weights were host-permuted to the (spatial-major, channel-minor)
    # order produced here, so this is pure VMEM layout plumbing.
    for n in range(n_batch):
        for yp in range(7):
            for xp in range(7):
                r = n * 256 + (1 + 2 * yp) * 16 + (1 + 2 * xp)
                s = yp * 7 + xp
                feats_scr[n:n + 1, s * 64:(s + 1) * 64] = m2_scr[r:r + 1, :]

    # ---- Classifier head: fc1 + ReLU + fc2 (hidden stays in VMEM) ----------
    h = jnp.dot(feats_scr[...].astype(bf16), wf1p_ref[...],
                preferred_element_type=f32)                                # (N,128)
    h = jnp.maximum(h + bf1_ref[...], 0.0)
    out = jnp.dot(h.astype(bf16), wf2_ref[...],
                  preferred_element_type=f32) + bf2_ref[...]               # (N,10)
    out_ref[...] = out.astype(out_ref.dtype)


# ------------------------------ pallas wrapper ------------------------------ #

_VMEM_LIMIT = 32 * 1024 * 1024


def fused_forward(p1t, mask1, p, n_batch):
    R = n_batch * 256
    kernel = functools.partial(base_cnn_kernel, n_batch=n_batch)

    def full(shape):
        return pl.BlockSpec(shape, lambda i, _s=shape: (0,) * len(_s))

    return pl.pallas_call(
        kernel,
        out_shape=jax.ShapeDtypeStruct((n_batch, 10), jnp.float32),
        grid=(1,),
        in_specs=[
            full((R, 36)),        # conv1 pool-ordered patches
            full((36, 128)),      # conv1 block-diag weights
            full((1, 128)),       # conv1 bias (tiled x4)
            full((R, 1)),         # valid-position mask
            full((288, 64)),      # conv2 weights
            full((1, 64)),        # conv2 bias
            full((3136, 128)),    # fc1 weights (permuted)
            full((1, 128)),       # fc1 bias
            full((128, 10)),      # fc2 weights
            full((1, 10)),        # fc2 bias
        ],
        out_specs=full((n_batch, 10)),
        scratch_shapes=[pltpu.VMEM((R, 64), jnp.float32),      # pooled-max map
                        pltpu.VMEM((n_batch, 3136), jnp.float32)],  # flat feats
        compiler_params=pltpu.CompilerParams(
            dimension_semantics=("arbitrary",),
            vmem_limit_bytes=_VMEM_LIMIT),
    )(p1t, p["w1bd"], p["b1r"], mask1, p["w2g"], p["b2r"],
      p["wf1p"], p["bf1"], p["wf2"], p["bf2"])


# ------------------------- tiny pre-kernel JAX glue ------------------------- #

def build_conv1_patches(x_nchw):
    """Pool-ordered 3x3/pad=1 im2col of the input in the padded-flat layout.

    Returns (N*256, 36) f32 with
      row  = n*256 + (1+yo)*16 + (1+xo)          (yo,xo in [0,14))
      col  = (2*di+dj)*9 + 3*dy + dx
      val  = xpad[n, 2*yo+di+dy, 2*xo+dj+dx]
    and zeros at the 16x16 padding ring rows.
    """
    N = x_nchw.shape[0]
    xp = jnp.pad(x_nchw[:, 0], ((0, 0), (1, 1), (1, 1)))          # (N,30,30)
    taps = []
    for di in range(2):
        for dj in range(2):
            for dy in range(3):
                for dx in range(3):
                    r0, c0 = di + dy, dj + dx
                    taps.append(xp[:, r0:r0 + 28:2, c0:c0 + 28:2])  # (N,14,14)
    cols = jnp.stack(taps, axis=-1)                                # (N,14,14,36)
    buf = jnp.zeros((N, 16, 16, 36), cols.dtype).at[:, 1:15, 1:15, :].set(cols)
    return buf.reshape(N * 256, 36).astype(jnp.float32)


def build_valid_mask(n_batch):
    m = jnp.zeros((n_batch, 16, 16), jnp.float32).at[:, 1:15, 1:15].set(1.0)
    return m.reshape(n_batch * 256, 1)


def prepare_params(params):
    """Hoist every transpose / permutation / dtype cast out of the forward."""
    w1, b1, w2, b2, wf1, bf1, wf2, bf2 = params
    w1g = jnp.transpose(w1, (2, 3, 1, 0)).reshape(9, 32)           # (k, co)
    w1bd = jnp.kron(jnp.eye(4, dtype=w1g.dtype), w1g)              # (36, 128)
    w2g = jnp.transpose(w2, (2, 3, 1, 0)).reshape(288, 64)         # ((dy,dx,ci), co)
    # PyTorch flatten index is co*49+s; kernel produces s*64+co -> permute.
    wf1p = jnp.transpose(wf1.reshape(128, 64, 49), (2, 1, 0)).reshape(3136, 128)
    return dict(
        w1bd=w1bd.astype(jnp.float32),
        b1r=jnp.tile(b1, 4).reshape(1, 128).astype(jnp.float32),
        w2g=w2g.astype(jnp.bfloat16),
        b2r=b2.reshape(1, 64).astype(jnp.float32),
        wf1p=wf1p.astype(jnp.bfloat16),
        bf1=bf1.reshape(1, 128).astype(jnp.float32),
        wf2=wf2.T.astype(jnp.bfloat16),
        bf2=bf2.reshape(1, 10).astype(jnp.float32),
    )


@jax.jit
def base_cnn_forward(x_nchw, p):
    n_batch = x_nchw.shape[0]
    p1t = build_conv1_patches(x_nchw)
    mask1 = build_valid_mask(n_batch)
    return fused_forward(p1t, mask1, p, n_batch)


# ---------------------- pure-JAX reference (PyTorch semantics) -------------- #

def reference_forward(x_nchw, params):
    w1, b1, w2, b2, wf1, bf1, wf2, bf2 = params
    dn = ("NCHW", "OIHW", "NCHW")
    hp = lax.Precision.HIGHEST
    y = lax.conv_general_dilated(x_nchw, w1, (1, 1), ((1, 1), (1, 1)),
                                 dimension_numbers=dn, precision=hp)
    y = jax.nn.relu(y + b1[None, :, None, None])
    y = lax.reduce_window(y, -jnp.inf, lax.max, (1, 1, 2, 2), (1, 1, 2, 2), "VALID")
    y = lax.conv_general_dilated(y, w2, (1, 1), ((1, 1), (1, 1)),
                                 dimension_numbers=dn, precision=hp)
    y = jax.nn.relu(y + b2[None, :, None, None])
    y = lax.reduce_window(y, -jnp.inf, lax.max, (1, 1, 2, 2), (1, 1, 2, 2), "VALID")
    f = y.reshape(y.shape[0], -1)
    h = jax.nn.relu(jnp.dot(f, wf1.T, precision=hp) + bf1)
    return jnp.dot(h, wf2.T, precision=hp) + bf2


# ----------------------------------- main ----------------------------------- #

if __name__ == "__main__":
    key = jax.random.PRNGKey(0)
    ks = jax.random.split(key, 9)

    # MNIST-like input (Linear(64*7*7,128) implies 28x28 spatial), batch=2.
    x = jax.random.normal(ks[0], (2, 1, 28, 28), dtype=jnp.float32)

    # Deterministic parameters, PyTorch layouts: conv (Cout,Cin,KH,KW), linear (out,in).
    w1 = jax.random.normal(ks[1], (32, 1, 3, 3), jnp.float32) / 3.0
    b1 = 0.1 * jax.random.normal(ks[2], (32,), jnp.float32)
    w2 = jax.random.normal(ks[3], (64, 32, 3, 3), jnp.float32) / jnp.sqrt(288.0)
    b2 = 0.1 * jax.random.normal(ks[4], (64,), jnp.float32)
    wf1 = jax.random.normal(ks[5], (128, 64 * 7 * 7), jnp.float32) / jnp.sqrt(3136.0)
    bf1 = 0.1 * jax.random.normal(ks[6], (128,), jnp.float32)
    wf2 = jax.random.normal(ks[7], (10, 128), jnp.float32) / jnp.sqrt(128.0)
    bf2 = 0.1 * jax.random.normal(ks[8], (10,), jnp.float32)
    params = (w1, b1, w2, b2, wf1, bf1, wf2, bf2)

    prepped = prepare_params(params)
    out = jax.block_until_ready(base_cnn_forward(x, prepped))

    assert out.shape == (2, 10) and out.dtype == jnp.float32
    ref = reference_forward(x, params)
    assert bool(jnp.allclose(out, ref, atol=2e-2, rtol=2e-2)), (
        float(jnp.max(jnp.abs(out - ref))))

    print("KERNEL_OK")
</pallas_src>

<mosaic_0001>
module attributes {stable_mosaic.version = 11 : i64} {
  func.func @base_cnn_kernel(%arg0: i32, %arg1: memref<512x36xf32, #tpu.memory_space<vmem>>, %arg2: memref<36x128xf32, #tpu.memory_space<vmem>>, %arg3: memref<1x128xf32, #tpu.memory_space<vmem>>, %arg4: memref<512x1xf32, #tpu.memory_space<vmem>>, %arg5: memref<288x64xbf16, #tpu.memory_space<vmem>>, %arg6: memref<1x64xf32, #tpu.memory_space<vmem>>, %arg7: memref<3136x128xbf16, #tpu.memory_space<vmem>>, %arg8: memref<1x128xf32, #tpu.memory_space<vmem>>, %arg9: memref<128x10xbf16, #tpu.memory_space<vmem>>, %arg10: memref<1x10xf32, #tpu.memory_space<vmem>>, %arg11: memref<2x10xf32, #tpu.memory_space<vmem>>, %arg12: memref<512x64xf32, #tpu.memory_space<vmem>>, %arg13: memref<2x3136xf32, #tpu.memory_space<vmem>>) attributes {dimension_semantics = [#tpu.dimension_semantics<arbitrary>], iteration_bounds = array<i64: 1>, scalar_prefetch = 0 : i64, scratch_operands = 2 : i64, tpu.core_type = #tpu.core_type<tc>, window_params = [{pipeline_mode = #tpu.pipeline_mode<synchronous>, transform_indices = @transform_0, window_bounds = array<i64: 512, 36>}, {pipeline_mode = #tpu.pipeline_mode<synchronous>, transform_indices = @transform_1, window_bounds = array<i64: 36, 128>}, {pipeline_mode = #tpu.pipeline_mode<synchronous>, transform_indices = @transform_2, window_bounds = array<i64: 1, 128>}, {pipeline_mode = #tpu.pipeline_mode<synchronous>, transform_indices = @transform_3, window_bounds = array<i64: 512, 1>}, {pipeline_mode = #tpu.pipeline_mode<synchronous>, transform_indices = @transform_4, window_bounds = array<i64: 288, 64>}, {pipeline_mode = #tpu.pipeline_mode<synchronous>, transform_indices = @transform_5, window_bounds = array<i64: 1, 64>}, {pipeline_mode = #tpu.pipeline_mode<synchronous>, transform_indices = @transform_6, window_bounds = array<i64: 3136, 128>}, {pipeline_mode = #tpu.pipeline_mode<synchronous>, transform_indices = @transform_7, window_bounds = array<i64: 1, 128>}, {pipeline_mode = #tpu.pipeline_mode<synchronous>, transform_indices = @transform_8, window_bounds = array<i64: 128, 10>}, {pipeline_mode = #tpu.pipeline_mode<synchronous>, transform_indices = @transform_9, window_bounds = array<i64: 1, 10>}, {pipeline_mode = #tpu.pipeline_mode<synchronous>, transform_indices = @transform_10, window_bounds = array<i64: 2, 10>}]} {
    %c0 = arith.constant 0 : index
    %c0_0 = arith.constant 0 : index
    %0 = vector.load %arg1[%c0, %c0_0] : memref<512x36xf32, #tpu.memory_space<vmem>>, vector<512x36xf32>
    %c0_1 = arith.constant 0 : index
    %c0_2 = arith.constant 0 : index
    %1 = vector.load %arg2[%c0_1, %c0_2] : memref<36x128xf32, #tpu.memory_space<vmem>>, vector<36x128xf32>
    %cst = arith.constant dense<0.000000e+00> : vector<512x128xf32>
    %2 = tpu.matmul %0, %1, %cst {dimension_numbers = #tpu.dot_dimension_numbers<[1], [0], [0], [1], [0, 0, 1, 1], [], []>} : vector<512x36xf32>, vector<36x128xf32>, vector<512x128xf32> -> vector<512x128xf32>
    %c0_3 = arith.constant 0 : index
    %c0_4 = arith.constant 0 : index
    %3 = vector.load %arg3[%c0_3, %c0_4] : memref<1x128xf32, #tpu.memory_space<vmem>>, vector<1x128xf32>
    %4 = vector.broadcast %3 : vector<1x128xf32> to vector<512x128xf32>
    %5 = arith.addf %2, %4 : vector<512x128xf32>
    %cst_5 = arith.constant 0.000000e+00 : f32
    %6 = vector.broadcast %cst_5 : f32 to vector<512x128xf32>
    %7 = arith.maximumf %5, %6 : vector<512x128xf32>
    %8 = vector.extract_strided_slice %7 {offsets = [0, 0], sizes = [512, 32], strides = [1, 1]} : vector<512x128xf32> to vector<512x32xf32>
    %9 = vector.extract_strided_slice %7 {offsets = [0, 32], sizes = [512, 32], strides = [1, 1]} : vector<512x128xf32> to vector<512x32xf32>
    %10 = arith.maximumf %8, %9 : vector<512x32xf32>
    %11 = vector.extract_strided_slice %7 {offsets = [0, 64], sizes = [512, 32], strides = [1, 1]} : vector<512x128xf32> to vector<512x32xf32>
    %12 = vector.extract_strided_slice %7 {offsets = [0, 96], sizes = [512, 32], strides = [1, 1]} : vector<512x128xf32> to vector<512x32xf32>
    %13 = arith.maximumf %11, %12 : vector<512x32xf32>
    %14 = arith.maximumf %10, %13 : vector<512x32xf32>
    %c0_6 = arith.constant 0 : index
    %c0_7 = arith.constant 0 : index
    %15 = vector.load %arg4[%c0_6, %c0_7] : memref<512x1xf32, #tpu.memory_space<vmem>>, vector<512x1xf32>
    %16 = vector.broadcast %15 : vector<512x1xf32> to vector<512x32xf32>
    %17 = arith.mulf %14, %16 : vector<512x32xf32>
    %18 = arith.truncf %17 : vector<512x32xf32> to vector<512x32xbf16>
    %cst_8 = arith.constant 0.000000e+00 : bf16
    %19 = vector.broadcast %cst_8 : bf16 to vector<17x32xbf16>
    %20 = vector.extract_strided_slice %18 {offsets = [0, 0], sizes = [495, 32], strides = [1, 1]} : vector<512x32xbf16> to vector<495x32xbf16>
    %21 = tpu.concatenate %19, %20 in 0 : vector<17x32xbf16>, vector<495x32xbf16> -> vector<512x32xbf16>
    %cst_9 = arith.constant 0.000000e+00 : bf16
    %22 = vector.broadcast %cst_9 : bf16 to vector<16x32xbf16>
    %23 = vector.extract_strided_slice %18 {offsets = [0, 0], sizes = [496, 32], strides = [1, 1]} : vector<512x32xbf16> to vector<496x32xbf16>
    %24 = tpu.concatenate %22, %23 in 0 : vector<16x32xbf16>, vector<496x32xbf16> -> vector<512x32xbf16>
    %cst_10 = arith.constant 0.000000e+00 : bf16
    %25 = vector.broadcast %cst_10 : bf16 to vector<15x32xbf16>
    %26 = vector.extract_strided_slice %18 {offsets = [0, 0], sizes = [497, 32], strides = [1, 1]} : vector<512x32xbf16> to vector<497x32xbf16>
    %27 = tpu.concatenate %25, %26 in 0 : vector<15x32xbf16>, vector<497x32xbf16> -> vector<512x32xbf16>
    %cst_11 = arith.constant 0.000000e+00 : bf16
    %28 = vector.broadcast %cst_11 : bf16 to vector<1x32xbf16>
    %29 = vector.extract_strided_slice %18 {offsets = [0, 0], sizes = [511, 32], strides = [1, 1]} : vector<512x32xbf16> to vector<511x32xbf16>
    %30 = tpu.concatenate %28, %29 in 0 : vector<1x32xbf16>, vector<511x32xbf16> -> vector<512x32xbf16>
    %cst_12 = arith.constant 0.000000e+00 : bf16
    %31 = vector.broadcast %cst_12 : bf16 to vector<1x32xbf16>
    %32 = vector.extract_strided_slice %18 {offsets = [1, 0], sizes = [511, 32], strides = [1, 1]} : vector<512x32xbf16> to vector<511x32xbf16>
    %33 = tpu.concatenate %32, %31 in 0 : vector<511x32xbf16>, vector<1x32xbf16> -> vector<512x32xbf16>
    %cst_13 = arith.constant 0.000000e+00 : bf16
    %34 = vector.broadcast %cst_13 : bf16 to vector<15x32xbf16>
    %35 = vector.extract_strided_slice %18 {offsets = [15, 0], sizes = [497, 32], strides = [1, 1]} : vector<512x32xbf16> to vector<497x32xbf16>
    %36 = tpu.concatenate %35, %34 in 0 : vector<497x32xbf16>, vector<15x32xbf16> -> vector<512x32xbf16>
    %cst_14 = arith.constant 0.000000e+00 : bf16
    %37 = vector.broadcast %cst_14 : bf16 to vector<16x32xbf16>
    %38 = vector.extract_strided_slice %18 {offsets = [16, 0], sizes = [496, 32], strides = [1, 1]} : vector<512x32xbf16> to vector<496x32xbf16>
    %39 = tpu.concatenate %38, %37 in 0 : vector<496x32xbf16>, vector<16x32xbf16> -> vector<512x32xbf16>
    %cst_15 = arith.constant 0.000000e+00 : bf16
    %40 = vector.broadcast %cst_15 : bf16 to vector<17x32xbf16>
    %41 = vector.extract_strided_slice %18 {offsets = [17, 0], sizes = [495, 32], strides = [1, 1]} : vector<512x32xbf16> to vector<495x32xbf16>
    %42 = tpu.concatenate %41, %40 in 0 : vector<495x32xbf16>, vector<17x32xbf16> -> vector<512x32xbf16>
    %43 = tpu.concatenate %21, %24, %27, %30, %18, %33, %36, %39, %42 in 1 : vector<512x32xbf16>, vector<512x32xbf16>, vector<512x32xbf16>, vector<512x32xbf16>, vector<512x32xbf16>, vector<512x32xbf16>, vector<512x32xbf16>, vector<512x32xbf16>, vector<512x32xbf16> -> vector<512x288xbf16>
    %c0_16 = arith.constant 0 : index
    %c0_17 = arith.constant 0 : index
    %44 = vector.load %arg5[%c0_16, %c0_17] : memref<288x64xbf16, #tpu.memory_space<vmem>>, vector<288x64xbf16>
    %cst_18 = arith.constant dense<0.000000e+00> : vector<512x64xf32>
    %45 = tpu.matmul %43, %44, %cst_18 {dimension_numbers = #tpu.dot_dimension_numbers<[1], [0], [0], [1], [0, 0, 1, 1], [], []>} : vector<512x288xbf16>, vector<288x64xbf16>, vector<512x64xf32> -> vector<512x64xf32>
    %c0_19 = arith.constant 0 : index
    %c0_20 = arith.constant 0 : index
    %46 = vector.load %arg6[%c0_19, %c0_20] : memref<1x64xf32, #tpu.memory_space<vmem>>, vector<1x64xf32>
    %47 = vector.broadcast %46 : vector<1x64xf32> to vector<512x64xf32>
    %48 = arith.addf %45, %47 : vector<512x64xf32>
    %cst_21 = arith.constant 0.000000e+00 : f32
    %49 = vector.broadcast %cst_21 : f32 to vector<512x64xf32>
    %50 = arith.maximumf %48, %49 : vector<512x64xf32>
    %cst_22 = arith.constant 0.000000e+00 : f32
    %51 = vector.broadcast %cst_22 : f32 to vector<1x64xf32>
    %52 = vector.extract_strided_slice %50 {offsets = [1, 0], sizes = [511, 64], strides = [1, 1]} : vector<512x64xf32> to vector<511x64xf32>
    %53 = tpu.concatenate %52, %51 in 0 : vector<511x64xf32>, vector<1x64xf32> -> vector<512x64xf32>
    %54 = arith.maximumf %50, %53 : vector<512x64xf32>
    %cst_23 = arith.constant 0.000000e+00 : f32
    %55 = vector.broadcast %cst_23 : f32 to vector<16x64xf32>
    %56 = vector.extract_strided_slice %54 {offsets = [16, 0], sizes = [496, 64], strides = [1, 1]} : vector<512x64xf32> to vector<496x64xf32>
    %57 = tpu.concatenate %56, %55 in 0 : vector<496x64xf32>, vector<16x64xf32> -> vector<512x64xf32>
    %58 = arith.maximumf %54, %57 : vector<512x64xf32>
    %c0_24 = arith.constant 0 : index
    %c0_25 = arith.constant 0 : index
    %59 = vector.load %arg12[%c0_24, %c0_25] : memref<512x64xf32, #tpu.memory_space<vmem>>, vector<512x64xf32>
    tpu.vector_store %arg12[%c0_24, %c0_25], %58 {strides = array<i32>} : memref<512x64xf32, #tpu.memory_space<vmem>>, vector<512x64xf32>,
    %c17 = arith.constant 17 : index
    %c0_26 = arith.constant 0 : index
    %60 = vector.load %arg12[%c17, %c0_26] : memref<512x64xf32, #tpu.memory_space<vmem>>, vector<1x64xf32>
    %c0_27 = arith.constant 0 : index
    %c0_28 = arith.constant 0 : index
    %61 = vector.load %arg13[%c0_27, %c0_28] : memref<2x3136xf32, #tpu.memory_space<vmem>>, vector<1x64xf32>
    tpu.vector_store %arg13[%c0_27, %c0_28], %60 {strides = array<i32>} : memref<2x3136xf32, #tpu.memory_space<vmem>>, vector<1x64xf32>,
    %c19 = arith.constant 19 : index
    %c0_29 = arith.constant 0 : index
    %62 = vector.load %arg12[%c19, %c0_29] : memref<512x64xf32, #tpu.memory_space<vmem>>, vector<1x64xf32>
    %c0_30 = arith.constant 0 : index
    %c64 = arith.constant 64 : index
    %63 = vector.load %arg13[%c0_30, %c64] : memref<2x3136xf32, #tpu.memory_space<vmem>>, vector<1x64xf32>
    tpu.vector_store %arg13[%c0_30, %c64], %62 {strides = array<i32>} : memref<2x3136xf32, #tpu.memory_space<vmem>>, vector<1x64xf32>,
    %c21 = arith.constant 21 : index
    %c0_31 = arith.constant 0 : index
    %64 = vector.load %arg12[%c21, %c0_31] : memref<512x64xf32, #tpu.memory_space<vmem>>, vector<1x64xf32>
    %c0_32 = arith.constant 0 : index
    %c128 = arith.constant 128 : index
    %65 = vector.load %arg13[%c0_32, %c128] : memref<2x3136xf32, #tpu.memory_space<vmem>>, vector<1x64xf32>
    tpu.vector_store %arg13[%c0_32, %c128], %64 {strides = array<i32>} : memref<2x3136xf32, #tpu.memory_space<vmem>>, vector<1x64xf32>,
    %c23 = arith.constant 23 : index
    %c0_33 = arith.constant 0 : index
    %66 = vector.load %arg12[%c23, %c0_33] : memref<512x64xf32, #tpu.memory_space<vmem>>, vector<1x64xf32>
    %c0_34 = arith.constant 0 : index
    %c192 = arith.constant 192 : index
    %67 = vector.load %arg13[%c0_34, %c192] : memref<2x3136xf32, #tpu.memory_space<vmem>>, vector<1x64xf32>
    tpu.vector_store %arg13[%c0_34, %c192], %66 {strides = array<i32>} : memref<2x3136xf32, #tpu.memory_space<vmem>>, vector<1x64xf32>,
    %c25 = arith.constant 25 : index
    %c0_35 = arith.constant 0 : index
    %68 = vector.load %arg12[%c25, %c0_35] : memref<512x64xf32, #tpu.memory_space<vmem>>, vector<1x64xf32>
    %c0_36 = arith.constant 0 : index
    %c256 = arith.constant 256 : index
    %69 = vector.load %arg13[%c0_36, %c256] : memref<2x3136xf32, #tpu.memory_space<vmem>>, vector<1x64xf32>
    tpu.vector_store %arg13[%c0_36, %c256], %68 {strides = array<i32>} : memref<2x3136xf32, #tpu.memory_space<vmem>>, vector<1x64xf32>,
    %c27 = arith.constant 27 : index
    %c0_37 = arith.constant 0 : index
    %70 = vector.load %arg12[%c27, %c0_37] : memref<512x64xf32, #tpu.memory_space<vmem>>, vector<1x64xf32>
    %c0_38 = arith.constant 0 : index
    %c320 = arith.constant 320 : index
    %71 = vector.load %arg13[%c0_38, %c320] : memref<2x3136xf32, #tpu.memory_space<vmem>>, vector<1x64xf32>
    tpu.vector_store %arg13[%c0_38, %c320], %70 {strides = array<i32>} : memref<2x3136xf32, #tpu.memory_space<vmem>>, vector<1x64xf32>,
    %c29 = arith.constant 29 : index
    %c0_39 = arith.constant 0 : index
    %72 = vector.load %arg12[%c29, %c0_39] : memref<512x64xf32, #tpu.memory_space<vmem>>, vector<1x64xf32>
    %c0_40 = arith.constant 0 : index
    %c384 = arith.constant 384 : index
    %73 = vector.load %arg13[%c0_40, %c384] : memref<2x3136xf32, #tpu.memory_space<vmem>>, vector<1x64xf32>
    tpu.vector_store %arg13[%c0_40, %c384], %72 {strides = array<i32>} : memref<2x3136xf32, #tpu.memory_space<vmem>>, vector<1x64xf32>,
    %c49 = arith.constant 49 : index
    %c0_41 = arith.constant 0 : index
    %74 = vector.load %arg12[%c49, %c0_41] : memref<512x64xf32, #tpu.memory_space<vmem>>, vector<1x64xf32>
    %c0_42 = arith.constant 0 : index
    %c448 = arith.constant 448 : index
    %75 = vector.load %arg13[%c0_42, %c448] : memref<2x3136xf32, #tpu.memory_space<vmem>>, vector<1x64xf32>
    tpu.vector_store %arg13[%c0_42, %c448], %74 {strides = array<i32>} : memref<2x3136xf32, #tpu.memory_space<vmem>>, vector<1x64xf32>,
    %c51 = arith.constant 51 : index
    %c0_43 = arith.constant 0 : index
    %76 = vector.load %arg12[%c51, %c0_43] : memref<512x64xf32, #tpu.memory_space<vmem>>, vector<1x64xf32>
    %c0_44 = arith.constant 0 : index
    %c512 = arith.constant 512 : index
    %77 = vector.load %arg13[%c0_44, %c512] : memref<2x3136xf32, #tpu.memory_space<vmem>>, vector<1x64xf32>
    tpu.vector_store %arg13[%c0_44, %c512], %76 {strides = array<i32>} : memref<2x3136xf32, #tpu.memory_space<vmem>>, vector<1x64xf32>,
    %c53 = arith.constant 53 : index
    %c0_45 = arith.constant 0 : index
    %78 = vector.load %arg12[%c53, %c0_45] : memref<512x64xf32, #tpu.memory_space<vmem>>, vector<1x64xf32>
    %c0_46 = arith.constant 0 : index
    %c576 = arith.constant 576 : index
    %79 = vector.load %arg13[%c0_46, %c576] : memref<2x3136xf32, #tpu.memory_space<vmem>>, vector<1x64xf32>
    tpu.vector_store %arg13[%c0_46, %c576], %78 {strides = array<i32>} : memref<2x3136xf32, #tpu.memory_space<vmem>>, vector<1x64xf32>,
    %c55 = arith.constant 55 : index
    %c0_47 = arith.constant 0 : index
    %80 = vector.load %arg12[%c55, %c0_47] : memref<512x64xf32, #tpu.memory_space<vmem>>, vector<1x64xf32>
    %c0_48 = arith.constant 0 : index
    %c640 = arith.constant 640 : index
    %81 = vector.load %arg13[%c0_48, %c640] : memref<2x3136xf32, #tpu.memory_space<vmem>>, vector<1x64xf32>
    tpu.vector_store %arg13[%c0_48, %c640], %80 {strides = array<i32>} : memref<2x3136xf32, #tpu.memory_space<vmem>>, vector<1x64xf32>,
    %c57 = arith.constant 57 : index
    %c0_49 = arith.constant 0 : index
    %82 = vector.load %arg12[%c57, %c0_49] : memref<512x64xf32, #tpu.memory_space<vmem>>, vector<1x64xf32>
    %c0_50 = arith.constant 0 : index
    %c704 = arith.constant 704 : index
    %83 = vector.load %arg13[%c0_50, %c704] : memref<2x3136xf32, #tpu.memory_space<vmem>>, vector<1x64xf32>
    tpu.vector_store %arg13[%c0_50, %c704], %82 {strides = array<i32>} : memref<2x3136xf32, #tpu.memory_space<vmem>>, vector<1x64xf32>,
    %c59 = arith.constant 59 : index
    %c0_51 = arith.constant 0 : index
    %84 = vector.load %arg12[%c59, %c0_51] : memref<512x64xf32, #tpu.memory_space<vmem>>, vector<1x64xf32>
    %c0_52 = arith.constant 0 : index
    %c768 = arith.constant 768 : index
    %85 = vector.load %arg13[%c0_52, %c768] : memref<2x3136xf32, #tpu.memory_space<vmem>>, vector<1x64xf32>
    tpu.vector_store %arg13[%c0_52, %c768], %84 {strides = array<i32>} : memref<2x3136xf32, #tpu.memory_space<vmem>>, vector<1x64xf32>,
    %c61 = arith.constant 61 : index
    %c0_53 = arith.constant 0 : index
    %86 = vector.load %arg12[%c61, %c0_53] : memref<512x64xf32, #tpu.memory_space<vmem>>, vector<1x64xf32>
    %c0_54 = arith.constant 0 : index
    %c832 = arith.constant 832 : index
    %87 = vector.load %arg13[%c0_54, %c832] : memref<2x3136xf32, #tpu.memory_space<vmem>>, vector<1x64xf32>
    tpu.vector_store %arg13[%c0_54, %c832], %86 {strides = array<i32>} : memref<2x3136xf32, #tpu.memory_space<vmem>>, vector<1x64xf32>,
    %c81 = arith.constant 81 : index
    %c0_55 = arith.constant 0 : index
    %88 = vector.load %arg12[%c81, %c0_55] : memref<512x64xf32, #tpu.memory_space<vmem>>, vector<1x64xf32>
    %c0_56 = arith.constant 0 : index
    %c896 = arith.constant 896 : index
    %89 = vector.load %arg13[%c0_56, %c896] : memref<2x3136xf32, #tpu.memory_space<vmem>>, vector<1x64xf32>
    tpu.vector_store %arg13[%c0_56, %c896], %88 {strides = array<i32>} : memref<2x3136xf32, #tpu.memory_space<vmem>>, vector<1x64xf32>,
    %c83 = arith.constant 83 : index
    %c0_57 = arith.constant 0 : index
    %90 = vector.load %arg12[%c83, %c0_57] : memref<512x64xf32, #tpu.memory_space<vmem>>, vector<1x64xf32>
    %c0_58 = arith.constant 0 : index
    %c960 = arith.constant 960 : index
    %91 = vector.load %arg13[%c0_58, %c960] : memref<2x3136xf32, #tpu.memory_space<vmem>>, vector<1x64xf32>
    tpu.vector_store %arg13[%c0_58, %c960], %90 {strides = array<i32>} : memref<2x3136xf32, #tpu.memory_space<vmem>>, vector<1x64xf32>,
    %c85 = arith.constant 85 : index
    %c0_59 = arith.constant 0 : index
    %92 = vector.load %arg12[%c85, %c0_59] : memref<512x64xf32, #tpu.memory_space<vmem>>, vector<1x64xf32>
    %c0_60 = arith.constant 0 : index
    %c1024 = arith.constant 1024 : index
    %93 = vector.load %arg13[%c0_60, %c1024] : memref<2x3136xf32, #tpu.memory_space<vmem>>, vector<1x64xf32>
    tpu.vector_store %arg13[%c0_60, %c1024], %92 {strides = array<i32>} : memref<2x3136xf32, #tpu.memory_space<vmem>>, vector<1x64xf32>,
    %c87 = arith.constant 87 : index
    %c0_61 = arith.constant 0 : index
    %94 = vector.load %arg12[%c87, %c0_61] : memref<512x64xf32, #tpu.memory_space<vmem>>, vector<1x64xf32>
    %c0_62 = arith.constant 0 : index
    %c1088 = arith.constant 1088 : index
    %95 = vector.load %arg13[%c0_62, %c1088] : memref<2x3136xf32, #tpu.memory_space<vmem>>, vector<1x64xf32>
    tpu.vector_store %arg13[%c0_62, %c1088], %94 {strides = array<i32>} : memref<2x3136xf32, #tpu.memory_space<vmem>>, vector<1x64xf32>,
    %c89 = arith.constant 89 : index
    %c0_63 = arith.constant 0 : index
    %96 = vector.load %arg12[%c89, %c0_63] : memref<512x64xf32, #tpu.memory_space<vmem>>, vector<1x64xf32>
    %c0_64 = arith.constant 0 : index
    %c1152 = arith.constant 1152 : index
    %97 = vector.load %arg13[%c0_64, %c1152] : memref<2x3136xf32, #tpu.memory_space<vmem>>, vector<1x64xf32>
    tpu.vector_store %arg13[%c0_64, %c1152], %96 {strides = array<i32>} : memref<2x3136xf32, #tpu.memory_space<vmem>>, vector<1x64xf32>,
    %c91 = arith.constant 91 : index
    %c0_65 = arith.constant 0 : index
    %98 = vector.load %arg12[%c91, %c0_65] : memref<512x64xf32, #tpu.memory_space<vmem>>, vector<1x64xf32>
    %c0_66 = arith.constant 0 : index
    %c1216 = arith.constant 1216 : index
    %99 = vector.load %arg13[%c0_66, %c1216] : memref<2x3136xf32, #tpu.memory_space<vmem>>, vector<1x64xf32>
    tpu.vector_store %arg13[%c0_66, %c1216], %98 {strides = array<i32>} : memref<2x3136xf32, #tpu.memory_space<vmem>>, vector<1x64xf32>,
    %c93 = arith.constant 93 : index
    %c0_67 = arith.constant 0 : index
    %100 = vector.load %arg12[%c93, %c0_67] : memref<512x64xf32, #tpu.memory_space<vmem>>, vector<1x64xf32>
    %c0_68 = arith.constant 0 : index
    %c1280 = arith.constant 1280 : index
    %101 = vector.load %arg13[%c0_68, %c1280] : memref<2x3136xf32, #tpu.memory_space<vmem>>, vector<1x64xf32>
    tpu.vector_store %arg13[%c0_68, %c1280], %100 {strides = array<i32>} : memref<2x3136xf32, #tpu.memory_space<vmem>>, vector<1x64xf32>,
    %c113 = arith.constant 113 : index
    %c0_69 = arith.constant 0 : index
    %102 = vector.load %arg12[%c113, %c0_69] : memref<512x64xf32, #tpu.memory_space<vmem>>, vector<1x64xf32>
    %c0_70 = arith.constant 0 : index
    %c1344 = arith.constant 1344 : index
    %103 = vector.load %arg13[%c0_70, %c1344] : memref<2x3136xf32, #tpu.memory_space<vmem>>, vector<1x64xf32>
    tpu.vector_store %arg13[%c0_70, %c1344], %102 {strides = array<i32>} : memref<2x3136xf32, #tpu.memory_space<vmem>>, vector<1x64xf32>,
    %c115 = arith.constant 115 : index
    %c0_71 = arith.constant 0 : index
    %104 = vector.load %arg12[%c115, %c0_71] : memref<512x64xf32, #tpu.memory_space<vmem>>, vector<1x64xf32>
    %c0_72 = arith.constant 0 : index
    %c1408 = arith.constant 1408 : index
    %105 = vector.load %arg13[%c0_72, %c1408] : memref<2x3136xf32, #tpu.memory_space<vmem>>, vector<1x64xf32>
    tpu.vector_store %arg13[%c0_72, %c1408], %104 {strides = array<i32>} : memref<2x3136xf32, #tpu.memory_space<vmem>>, vector<1x64xf32>,
    %c117 = arith.constant 117 : index
    %c0_73 = arith.constant 0 : index
    %106 = vector.load %arg12[%c117, %c0_73] : memref<512x64xf32, #tpu.memory_space<vmem>>, vector<1x64xf32>
    %c0_74 = arith.constant 0 : index
    %c1472 = arith.constant 1472 : index
    %107 = vector.load %arg13[%c0_74, %c1472] : memref<2x3136xf32, #tpu.memory_space<vmem>>, vector<1x64xf32>
    tpu.vector_store %arg13[%c0_74, %c1472], %106 {strides = array<i32>} : memref<2x3136xf32, #tpu.memory_space<vmem>>, vector<1x64xf32>,
    %c119 = arith.constant 119 : index
    %c0_75 = arith.constant 0 : index
    %108 = vector.load %arg12[%c119, %c0_75] : memref<512x64xf32, #tpu.memory_space<vmem>>, vector<1x64xf32>
    %c0_76 = arith.constant 0 : index
    %c1536 = arith.constant 1536 : index
    %109 = vector.load %arg13[%c0_76, %c1536] : memref<2x3136xf32, #tpu.memory_space<vmem>>, vector<1x64xf32>
    tpu.vector_store %arg13[%c0_76, %c1536], %108 {strides = array<i32>} : memref<2x3136xf32, #tpu.memory_space<vmem>>, vector<1x64xf32>,
    %c121 = arith.constant 121 : index
    %c0_77 = arith.constant 0 : index
    %110 = vector.load %arg12[%c121, %c0_77] : memref<512x64xf32, #tpu.memory_space<vmem>>, vector<1x64xf32>
    %c0_78 = arith.constant 0 : index
    %c1600 = arith.constant 1600 : index
    %111 = vector.load %arg13[%c0_78, %c1600] : memref<2x3136xf32, #tpu.memory_space<vmem>>, vector<1x64xf32>
    tpu.vector_store %arg13[%c0_78, %c1600], %110 {strides = array<i32>} : memref<2x3136xf32, #tpu.memory_space<vmem>>, vector<1x64xf32>,
    %c123 = arith.constant 123 : index
    %c0_79 = arith.constant 0 : index
    %112 = vector.load %arg12[%c123, %c0_79] : memref<512x64xf32, #tpu.memory_space<vmem>>, vector<1x64xf32>
    %c0_80 = arith.constant 0 : index
    %c1664 = arith.constant 1664 : index
    %113 = vector.load %arg13[%c0_80, %c1664] : memref<2x3136xf32, #tpu.memory_space<vmem>>, vector<1x64xf32>
    tpu.vector_store %arg13[%c0_80, %c1664], %112 {strides = array<i32>} : memref<2x3136xf32, #tpu.memory_space<vmem>>, vector<1x64xf32>,
    %c125 = arith.constant 125 : index
    %c0_81 = arith.constant 0 : index
    %114 = vector.load %arg12[%c125, %c0_81] : memref<512x64xf32, #tpu.memory_space<vmem>>, vector<1x64xf32>
    %c0_82 = arith.constant 0 : index
    %c1728 = arith.constant 1728 : index
    %115 = vector.load %arg13[%c0_82, %c1728] : memref<2x3136xf32, #tpu.memory_space<vmem>>, vector<1x64xf32>
    tpu.vector_store %arg13[%c0_82, %c1728], %114 {strides = array<i32>} : memref<2x3136xf32, #tpu.memory_space<vmem>>, vector<1x64xf32>,
    %c145 = arith.constant 145 : index
    %c0_83 = arith.constant 0 : index
    %116 = vector.load %arg12[%c145, %c0_83] : memref<512x64xf32, #tpu.memory_space<vmem>>, vector<1x64xf32>
    %c0_84 = arith.constant 0 : index
    %c1792 = arith.constant 1792 : index
    %117 = vector.load %arg13[%c0_84, %c1792] : memref<2x3136xf32, #tpu.memory_space<vmem>>, vector<1x64xf32>
    tpu.vector_store %arg13[%c0_84, %c1792], %116 {strides = array<i32>} : memref<2x3136xf32, #tpu.memory_space<vmem>>, vector<1x64xf32>,
    %c147 = arith.constant 147 : index
    %c0_85 = arith.constant 0 : index
    %118 = vector.load %arg12[%c147, %c0_85] : memref<512x64xf32, #tpu.memory_space<vmem>>, vector<1x64xf32>
    %c0_86 = arith.constant 0 : index
    %c1856 = arith.constant 1856 : index
    %119 = vector.load %arg13[%c0_86, %c1856] : memref<2x3136xf32, #tpu.memory_space<vmem>>, vector<1x64xf32>
    tpu.vector_store %arg13[%c0_86, %c1856], %118 {strides = array<i32>} : memref<2x3136xf32, #tpu.memory_space<vmem>>, vector<1x64xf32>,
    %c149 = arith.constant 149 : index
    %c0_87 = arith.constant 0 : index
    %120 = vector.load %arg12[%c149, %c0_87] : memref<512x64xf32, #tpu.memory_space<vmem>>, vector<1x64xf32>
    %c0_88 = arith.constant 0 : index
    %c1920 = arith.constant 1920 : index
    %121 = vector.load %arg13[%c0_88, %c1920] : memref<2x3136xf32, #tpu.memory_space<vmem>>, vector<1x64xf32>
    tpu.vector_store %arg13[%c0_88, %c1920], %120 {strides = array<i32>} : memref<2x3136xf32, #tpu.memory_space<vmem>>, vector<1x64xf32>,
    %c151 = arith.constant 151 : index
    %c0_89 = arith.constant 0 : index
    %122 = vector.load %arg12[%c151, %c0_89] : memref<512x64xf32, #tpu.memory_space<vmem>>, vector<1x64xf32>
    %c0_90 = arith.constant 0 : index
    %c1984 = arith.constant 1984 : index
    %123 = vector.load %arg13[%c0_90, %c1984] : memref<2x3136xf32, #tpu.memory_space<vmem>>, vector<1x64xf32>
    tpu.vector_store %arg13[%c0_90, %c1984], %122 {strides = array<i32>} : memref<2x3136xf32, #tpu.memory_space<vmem>>, vector<1x64xf32>,
    %c153 = arith.constant 153 : index
    %c0_91 = arith.constant 0 : index
    %124 = vector.load %arg12[%c153, %c0_91] : memref<512x64xf32, #tpu.memory_space<vmem>>, vector<1x64xf32>
    %c0_92 = arith.constant 0 : index
    %c2048 = arith.constant 2048 : index
    %125 = vector.load %arg13[%c0_92, %c2048] : memref<2x3136xf32, #tpu.memory_space<vmem>>, vector<1x64xf32>
    tpu.vector_store %arg13[%c0_92, %c2048], %124 {strides = array<i32>} : memref<2x3136xf32, #tpu.memory_space<vmem>>, vector<1x64xf32>,
    %c155 = arith.constant 155 : index
    %c0_93 = arith.constant 0 : index
    %126 = vector.load %arg12[%c155, %c0_93] : memref<512x64xf32, #tpu.memory_space<vmem>>, vector<1x64xf32>
    %c0_94 = arith.constant 0 : index
    %c2112 = arith.constant 2112 : index
    %127 = vector.load %arg13[%c0_94, %c2112] : memref<2x3136xf32, #tpu.memory_space<vmem>>, vector<1x64xf32>
    tpu.vector_store %arg13[%c0_94, %c2112], %126 {strides = array<i32>} : memref<2x3136xf32, #tpu.memory_space<vmem>>, vector<1x64xf32>,
    %c157 = arith.constant 157 : index
    %c0_95 = arith.constant 0 : index
    %128 = vector.load %arg12[%c157, %c0_95] : memref<512x64xf32, #tpu.memory_space<vmem>>, vector<1x64xf32>
    %c0_96 = arith.constant 0 : index
    %c2176 = arith.constant 2176 : index
    %129 = vector.load %arg13[%c0_96, %c2176] : memref<2x3136xf32, #tpu.memory_space<vmem>>, vector<1x64xf32>
    tpu.vector_store %arg13[%c0_96, %c2176], %128 {strides = array<i32>} : memref<2x3136xf32, #tpu.memory_space<vmem>>, vector<1x64xf32>,
    %c177 = arith.constant 177 : index
    %c0_97 = arith.constant 0 : index
    %130 = vector.load %arg12[%c177, %c0_97] : memref<512x64xf32, #tpu.memory_space<vmem>>, vector<1x64xf32>
    %c0_98 = arith.constant 0 : index
    %c2240 = arith.constant 2240 : index
    %131 = vector.load %arg13[%c0_98, %c2240] : memref<2x3136xf32, #tpu.memory_space<vmem>>, vector<1x64xf32>
    tpu.vector_store %arg13[%c0_98, %c2240], %130 {strides = array<i32>} : memref<2x3136xf32, #tpu.memory_space<vmem>>, vector<1x64xf32>,
    %c179 = arith.constant 179 : index
    %c0_99 = arith.constant 0 : index
    %132 = vector.load %arg12[%c179, %c0_99] : memref<512x64xf32, #tpu.memory_space<vmem>>, vector<1x64xf32>
    %c0_100 = arith.constant 0 : index
    %c2304 = arith.constant 2304 : index
    %133 = vector.load %arg13[%c0_100, %c2304] : memref<2x3136xf32, #tpu.memory_space<vmem>>, vector<1x64xf32>
    tpu.vector_store %arg13[%c0_100, %c2304], %132 {strides = array<i32>} : memref<2x3136xf32, #tpu.memory_space<vmem>>, vector<1x64xf32>,
    %c181 = arith.constant 181 : index
    %c0_101 = arith.constant 0 : index
    %134 = vector.load %arg12[%c181, %c0_101] : memref<512x64xf32, #tpu.memory_space<vmem>>, vector<1x64xf32>
    %c0_102 = arith.constant 0 : index
    %c2368 = arith.constant 2368 : index
    %135 = vector.load %arg13[%c0_102, %c2368] : memref<2x3136xf32, #tpu.memory_space<vmem>>, vector<1x64xf32>
    tpu.vector_store %arg13[%c0_102, %c2368], %134 {strides = array<i32>} : memref<2x3136xf32, #tpu.memory_space<vmem>>, vector<1x64xf32>,
    %c183 = arith.constant 183 : index
    %c0_103 = arith.constant 0 : index
    %136 = vector.load %arg12[%c183, %c0_103] : memref<512x64xf32, #tpu.memory_space<vmem>>, vector<1x64xf32>
    %c0_104 = arith.constant 0 : index
    %c2432 = arith.constant 2432 : index
    %137 = vector.load %arg13[%c0_104, %c2432] : memref<2x3136xf32, #tpu.memory_space<vmem>>, vector<1x64xf32>
    tpu.vector_store %arg13[%c0_104, %c2432], %136 {strides = array<i32>} : memref<2x3136xf32, #tpu.memory_space<vmem>>, vector<1x64xf32>,
    %c185 = arith.constant 185 : index
    %c0_105 = arith.constant 0 : index
    %138 = vector.load %arg12[%c185, %c0_105] : memref<512x64xf32, #tpu.memory_space<vmem>>, vector<1x64xf32>
    %c0_106 = arith.constant 0 : index
    %c2496 = arith.constant 2496 : index
    %139 = vector.load %arg13[%c0_106, %c2496] : memref<2x3136xf32, #tpu.memory_space<vmem>>, vector<1x64xf32>
    tpu.vector_store %arg13[%c0_106, %c2496], %138 {strides = array<i32>} : memref<2x3136xf32, #tpu.memory_space<vmem>>, vector<1x64xf32>,
    %c187 = arith.constant 187 : index
    %c0_107 = arith.constant 0 : index
    %140 = vector.load %arg12[%c187, %c0_107] : memref<512x64xf32, #tpu.memory_space<vmem>>, vector<1x64xf32>
    %c0_108 = arith.constant 0 : index
    %c2560 = arith.constant 2560 : index
    %141 = vector.load %arg13[%c0_108, %c2560] : memref<2x3136xf32, #tpu.memory_space<vmem>>, vector<1x64xf32>
    tpu.vector_store %arg13[%c0_108, %c2560], %140 {strides = array<i32>} : memref<2x3136xf32, #tpu.memory_space<vmem>>, vector<1x64xf32>,
    %c189 = arith.constant 189 : index
    %c0_109 = arith.constant 0 : index
    %142 = vector.load %arg12[%c189, %c0_109] : memref<512x64xf32, #tpu.memory_space<vmem>>, vector<1x64xf32>
    %c0_110 = arith.constant 0 : index
    %c2624 = arith.constant 2624 : index
    %143 = vector.load %arg13[%c0_110, %c2624] : memref<2x3136xf32, #tpu.memory_space<vmem>>, vector<1x64xf32>
    tpu.vector_store %arg13[%c0_110, %c2624], %142 {strides = array<i32>} : memref<2x3136xf32, #tpu.memory_space<vmem>>, vector<1x64xf32>,
    %c209 = arith.constant 209 : index
    %c0_111 = arith.constant 0 : index
    %144 = vector.load %arg12[%c209, %c0_111] : memref<512x64xf32, #tpu.memory_space<vmem>>, vector<1x64xf32>
    %c0_112 = arith.constant 0 : index
    %c2688 = arith.constant 2688 : index
    %145 = vector.load %arg13[%c0_112, %c2688] : memref<2x3136xf32, #tpu.memory_space<vmem>>, vector<1x64xf32>
    tpu.vector_store %arg13[%c0_112, %c2688], %144 {strides = array<i32>} : memref<2x3136xf32, #tpu.memory_space<vmem>>, vector<1x64xf32>,
    %c211 = arith.constant 211 : index
    %c0_113 = arith.constant 0 : index
    %146 = vector.load %arg12[%c211, %c0_113] : memref<512x64xf32, #tpu.memory_space<vmem>>, vector<1x64xf32>
    %c0_114 = arith.constant 0 : index
    %c2752 = arith.constant 2752 : index
    %147 = vector.load %arg13[%c0_114, %c2752] : memref<2x3136xf32, #tpu.memory_space<vmem>>, vector<1x64xf32>
    tpu.vector_store %arg13[%c0_114, %c2752], %146 {strides = array<i32>} : memref<2x3136xf32, #tpu.memory_space<vmem>>, vector<1x64xf32>,
    %c213 = arith.constant 213 : index
    %c0_115 = arith.constant 0 : index
    %148 = vector.load %arg12[%c213, %c0_115] : memref<512x64xf32, #tpu.memory_space<vmem>>, vector<1x64xf32>
    %c0_116 = arith.constant 0 : index
    %c2816 = arith.constant 2816 : index
    %149 = vector.load %arg13[%c0_116, %c2816] : memref<2x3136xf32, #tpu.memory_space<vmem>>, vector<1x64xf32>
    tpu.vector_store %arg13[%c0_116, %c2816], %148 {strides = array<i32>} : memref<2x3136xf32, #tpu.memory_space<vmem>>, vector<1x64xf32>,
    %c215 = arith.constant 215 : index
    %c0_117 = arith.constant 0 : index
    %150 = vector.load %arg12[%c215, %c0_117] : memref<512x64xf32, #tpu.memory_space<vmem>>, vector<1x64xf32>
    %c0_118 = arith.constant 0 : index
    %c2880 = arith.constant 2880 : index
    %151 = vector.load %arg13[%c0_118, %c2880] : memref<2x3136xf32, #tpu.memory_space<vmem>>, vector<1x64xf32>
    tpu.vector_store %arg13[%c0_118, %c2880], %150 {strides = array<i32>} : memref<2x3136xf32, #tpu.memory_space<vmem>>, vector<1x64xf32>,
    %c217 = arith.constant 217 : index
    %c0_119 = arith.constant 0 : index
    %152 = vector.load %arg12[%c217, %c0_119] : memref<512x64xf32, #tpu.memory_space<vmem>>, vector<1x64xf32>
    %c0_120 = arith.constant 0 : index
    %c2944 = arith.constant 2944 : index
    %153 = vector.load %arg13[%c0_120, %c2944] : memref<2x3136xf32, #tpu.memory_space<vmem>>, vector<1x64xf32>
    tpu.vector_store %arg13[%c0_120, %c2944], %152 {strides = array<i32>} : memref<2x3136xf32, #tpu.memory_space<vmem>>, vector<1x64xf32>,
    %c219 = arith.constant 219 : index
    %c0_121 = arith.constant 0 : index
    %154 = vector.load %arg12[%c219, %c0_121] : memref<512x64xf32, #tpu.memory_space<vmem>>, vector<1x64xf32>
    %c0_122 = arith.constant 0 : index
    %c3008 = arith.constant 3008 : index
    %155 = vector.load %arg13[%c0_122, %c3008] : memref<2x3136xf32, #tpu.memory_space<vmem>>, vector<1x64xf32>
    tpu.vector_store %arg13[%c0_122, %c3008], %154 {strides = array<i32>} : memref<2x3136xf32, #tpu.memory_space<vmem>>, vector<1x64xf32>,
    %c221 = arith.constant 221 : index
    %c0_123 = arith.constant 0 : index
    %156 = vector.load %arg12[%c221, %c0_123] : memref<512x64xf32, #tpu.memory_space<vmem>>, vector<1x64xf32>
    %c0_124 = arith.constant 0 : index
    %c3072 = arith.constant 3072 : index
    %157 = vector.load %arg13[%c0_124, %c3072] : memref<2x3136xf32, #tpu.memory_space<vmem>>, vector<1x64xf32>
    tpu.vector_store %arg13[%c0_124, %c3072], %156 {strides = array<i32>} : memref<2x3136xf32, #tpu.memory_space<vmem>>, vector<1x64xf32>,
    %c273 = arith.constant 273 : index
    %c0_125 = arith.constant 0 : index
    %158 = vector.load %arg12[%c273, %c0_125] : memref<512x64xf32, #tpu.memory_space<vmem>>, vector<1x64xf32>
    %c1 = arith.constant 1 : index
    %c0_126 = arith.constant 0 : index
    %159 = vector.load %arg13[%c1, %c0_126] : memref<2x3136xf32, #tpu.memory_space<vmem>>, vector<1x64xf32>
    tpu.vector_store %arg13[%c1, %c0_126], %158 {strides = array<i32>} : memref<2x3136xf32, #tpu.memory_space<vmem>>, vector<1x64xf32>,
    %c275 = arith.constant 275 : index
    %c0_127 = arith.constant 0 : index
    %160 = vector.load %arg12[%c275, %c0_127] : memref<512x64xf32, #tpu.memory_space<vmem>>, vector<1x64xf32>
    %c1_128 = arith.constant 1 : index
    %c64_129 = arith.constant 64 : index
    %161 = vector.load %arg13[%c1_128, %c64_129] : memref<2x3136xf32, #tpu.memory_space<vmem>>, vector<1x64xf32>
    tpu.vector_store %arg13[%c1_128, %c64_129], %160 {strides = array<i32>} : memref<2x3136xf32, #tpu.memory_space<vmem>>, vector<1x64xf32>,
    %c277 = arith.constant 277 : index
    %c0_130 = arith.constant 0 : index
    %162 = vector.load %arg12[%c277, %c0_130] : memref<512x64xf32, #tpu.memory_space<vmem>>, vector<1x64xf32>
    %c1_131 = arith.constant 1 : index
    %c128_132 = arith.constant 128 : index
    %163 = vector.load %arg13[%c1_131, %c128_132] : memref<2x3136xf32, #tpu.memory_space<vmem>>, vector<1x64xf32>
    tpu.vector_store %arg13[%c1_131, %c128_132], %162 {strides = array<i32>} : memref<2x3136xf32, #tpu.memory_space<vmem>>, vector<1x64xf32>,
    %c279 = arith.constant 279 : index
    %c0_133 = arith.constant 0 : index
    %164 = vector.load %arg12[%c279, %c0_133] : memref<512x64xf32, #tpu.memory_space<vmem>>, vector<1x64xf32>
    %c1_134 = arith.constant 1 : index
    %c192_135 = arith.constant 192 : index
    %165 = vector.load %arg13[%c1_134, %c192_135] : memref<2x3136xf32, #tpu.memory_space<vmem>>, vector<1x64xf32>
    tpu.vector_store %arg13[%c1_134, %c192_135], %164 {strides = array<i32>} : memref<2x3136xf32, #tpu.memory_space<vmem>>, vector<1x64xf32>,
    %c281 = arith.constant 281 : index
    %c0_136 = arith.constant 0 : index
    %166 = vector.load %arg12[%c281, %c0_136] : memref<512x64xf32, #tpu.memory_space<vmem>>, vector<1x64xf32>
    %c1_137 = arith.constant 1 : index
    %c256_138 = arith.constant 256 : index
    %167 = vector.load %arg13[%c1_137, %c256_138] : memref<2x3136xf32, #tpu.memory_space<vmem>>, vector<1x64xf32>
    tpu.vector_store %arg13[%c1_137, %c256_138], %166 {strides = array<i32>} : memref<2x3136xf32, #tpu.memory_space<vmem>>, vector<1x64xf32>,
    %c283 = arith.constant 283 : index
    %c0_139 = arith.constant 0 : index
    %168 = vector.load %arg12[%c283, %c0_139] : memref<512x64xf32, #tpu.memory_space<vmem>>, vector<1x64xf32>
    %c1_140 = arith.constant 1 : index
    %c320_141 = arith.constant 320 : index
    %169 = vector.load %arg13[%c1_140, %c320_141] : memref<2x3136xf32, #tpu.memory_space<vmem>>, vector<1x64xf32>
    tpu.vector_store %arg13[%c1_140, %c320_141], %168 {strides = array<i32>} : memref<2x3136xf32, #tpu.memory_space<vmem>>, vector<1x64xf32>,
    %c285 = arith.constant 285 : index
    %c0_142 = arith.constant 0 : index
    %170 = vector.load %arg12[%c285, %c0_142] : memref<512x64xf32, #tpu.memory_space<vmem>>, vector<1x64xf32>
    %c1_143 = arith.constant 1 : index
    %c384_144 = arith.constant 384 : index
    %171 = vector.load %arg13[%c1_143, %c384_144] : memref<2x3136xf32, #tpu.memory_space<vmem>>, vector<1x64xf32>
    tpu.vector_store %arg13[%c1_143, %c384_144], %170 {strides = array<i32>} : memref<2x3136xf32, #tpu.memory_space<vmem>>, vector<1x64xf32>,
    %c305 = arith.constant 305 : index
    %c0_145 = arith.constant 0 : index
    %172 = vector.load %arg12[%c305, %c0_145] : memref<512x64xf32, #tpu.memory_space<vmem>>, vector<1x64xf32>
    %c1_146 = arith.constant 1 : index
    %c448_147 = arith.constant 448 : index
    %173 = vector.load %arg13[%c1_146, %c448_147] : memref<2x3136xf32, #tpu.memory_space<vmem>>, vector<1x64xf32>
    tpu.vector_store %arg13[%c1_146, %c448_147], %172 {strides = array<i32>} : memref<2x3136xf32, #tpu.memory_space<vmem>>, vector<1x64xf32>,
    %c307 = arith.constant 307 : index
    %c0_148 = arith.constant 0 : index
    %174 = vector.load %arg12[%c307, %c0_148] : memref<512x64xf32, #tpu.memory_space<vmem>>, vector<1x64xf32>
    %c1_149 = arith.constant 1 : index
    %c512_150 = arith.constant 512 : index
    %175 = vector.load %arg13[%c1_149, %c512_150] : memref<2x3136xf32, #tpu.memory_space<vmem>>, vector<1x64xf32>
    tpu.vector_store %arg13[%c1_149, %c512_150], %174 {strides = array<i32>} : memref<2x3136xf32, #tpu.memory_space<vmem>>, vector<1x64xf32>,
    %c309 = arith.constant 309 : index
    %c0_151 = arith.constant 0 : index
    %176 = vector.load %arg12[%c309, %c0_151] : memref<512x64xf32, #tpu.memory_space<vmem>>, vector<1x64xf32>
    %c1_152 = arith.constant 1 : index
    %c576_153 = arith.constant 576 : index
    %177 = vector.load %arg13[%c1_152, %c576_153] : memref<2x3136xf32, #tpu.memory_space<vmem>>, vector<1x64xf32>
    tpu.vector_store %arg13[%c1_152, %c576_153], %176 {strides = array<i32>} : memref<2x3136xf32, #tpu.memory_space<vmem>>, vector<1x64xf32>,
    %c311 = arith.constant 311 : index
    %c0_154 = arith.constant 0 : index
    %178 = vector.load %arg12[%c311, %c0_154] : memref<512x64xf32, #tpu.memory_space<vmem>>, vector<1x64xf32>
    %c1_155 = arith.constant 1 : index
    %c640_156 = arith.constant 640 : index
    %179 = vector.load %arg13[%c1_155, %c640_156] : memref<2x3136xf32, #tpu.memory_space<vmem>>, vector<1x64xf32>
    tpu.vector_store %arg13[%c1_155, %c640_156], %178 {strides = array<i32>} : memref<2x3136xf32, #tpu.memory_space<vmem>>, vector<1x64xf32>,
    %c313 = arith.constant 313 : index
    %c0_157 = arith.constant 0 : index
    %180 = vector.load %arg12[%c313, %c0_157] : memref<512x64xf32, #tpu.memory_space<vmem>>, vector<1x64xf32>
    %c1_158 = arith.constant 1 : index
    %c704_159 = arith.constant 704 : index
    %181 = vector.load %arg13[%c1_158, %c704_159] : memref<2x3136xf32, #tpu.memory_space<vmem>>, vector<1x64xf32>
    tpu.vector_store %arg13[%c1_158, %c704_159], %180 {strides = array<i32>} : memref<2x3136xf32, #tpu.memory_space<vmem>>, vector<1x64xf32>,
    %c315 = arith.constant 315 : index
    %c0_160 = arith.constant 0 : index
    %182 = vector.load %arg12[%c315, %c0_160] : memref<512x64xf32, #tpu.memory_space<vmem>>, vector<1x64xf32>
    %c1_161 = arith.constant 1 : index
    %c768_162 = arith.constant 768 : index
    %183 = vector.load %arg13[%c1_161, %c768_162] : memref<2x3136xf32, #tpu.memory_space<vmem>>, vector<1x64xf32>
    tpu.vector_store %arg13[%c1_161, %c768_162], %182 {strides = array<i32>} : memref<2x3136xf32, #tpu.memory_space<vmem>>, vector<1x64xf32>,
    %c317 = arith.constant 317 : index
    %c0_163 = arith.constant 0 : index
    %184 = vector.load %arg12[%c317, %c0_163] : memref<512x64xf32, #tpu.memory_space<vmem>>, vector<1x64xf32>
    %c1_164 = arith.constant 1 : index
    %c832_165 = arith.constant 832 : index
    %185 = vector.load %arg13[%c1_164, %c832_165] : memref<2x3136xf32, #tpu.memory_space<vmem>>, vector<1x64xf32>
    tpu.vector_store %arg13[%c1_164, %c832_165], %184 {strides = array<i32>} : memref<2x3136xf32, #tpu.memory_space<vmem>>, vector<1x64xf32>,
    %c337 = arith.constant 337 : index
    %c0_166 = arith.constant 0 : index
    %186 = vector.load %arg12[%c337, %c0_166] : memref<512x64xf32, #tpu.memory_space<vmem>>, vector<1x64xf32>
    %c1_167 = arith.constant 1 : index
    %c896_168 = arith.constant 896 : index
    %187 = vector.load %arg13[%c1_167, %c896_168] : memref<2x3136xf32, #tpu.memory_space<vmem>>, vector<1x64xf32>
    tpu.vector_store %arg13[%c1_167, %c896_168], %186 {strides = array<i32>} : memref<2x3136xf32, #tpu.memory_space<vmem>>, vector<1x64xf32>,
    %c339 = arith.constant 339 : index
    %c0_169 = arith.constant 0 : index
    %188 = vector.load %arg12[%c339, %c0_169] : memref<512x64xf32, #tpu.memory_space<vmem>>, vector<1x64xf32>
    %c1_170 = arith.constant 1 : index
    %c960_171 = arith.constant 960 : index
    %189 = vector.load %arg13[%c1_170, %c960_171] : memref<2x3136xf32, #tpu.memory_space<vmem>>, vector<1x64xf32>
    tpu.vector_store %arg13[%c1_170, %c960_171], %188 {strides = array<i32>} : memref<2x3136xf32, #tpu.memory_space<vmem>>, vector<1x64xf32>,
    %c341 = arith.constant 341 : index
    %c0_172 = arith.constant 0 : index
    %190 = vector.load %arg12[%c341, %c0_172] : memref<512x64xf32, #tpu.memory_space<vmem>>, vector<1x64xf32>
    %c1_173 = arith.constant 1 : index
    %c1024_174 = arith.constant 1024 : index
    %191 = vector.load %arg13[%c1_173, %c1024_174] : memref<2x3136xf32, #tpu.memory_space<vmem>>, vector<1x64xf32>
    tpu.vector_store %arg13[%c1_173, %c1024_174], %190 {strides = array<i32>} : memref<2x3136xf32, #tpu.memory_space<vmem>>, vector<1x64xf32>,
    %c343 = arith.constant 343 : index
    %c0_175 = arith.constant 0 : index
    %192 = vector.load %arg12[%c343, %c0_175] : memref<512x64xf32, #tpu.memory_space<vmem>>, vector<1x64xf32>
    %c1_176 = arith.constant 1 : index
    %c1088_177 = arith.constant 1088 : index
    %193 = vector.load %arg13[%c1_176, %c1088_177] : memref<2x3136xf32, #tpu.memory_space<vmem>>, vector<1x64xf32>
    tpu.vector_store %arg13[%c1_176, %c1088_177], %192 {strides = array<i32>} : memref<2x3136xf32, #tpu.memory_space<vmem>>, vector<1x64xf32>,
    %c345 = arith.constant 345 : index
    %c0_178 = arith.constant 0 : index
    %194 = vector.load %arg12[%c345, %c0_178] : memref<512x64xf32, #tpu.memory_space<vmem>>, vector<1x64xf32>
    %c1_179 = arith.constant 1 : index
    %c1152_180 = arith.constant 1152 : index
    %195 = vector.load %arg13[%c1_179, %c1152_180] : memref<2x3136xf32, #tpu.memory_space<vmem>>, vector<1x64xf32>
    tpu.vector_store %arg13[%c1_179, %c1152_180], %194 {strides = array<i32>} : memref<2x3136xf32, #tpu.memory_space<vmem>>, vector<1x64xf32>,
    %c347 = arith.constant 347 : index
    %c0_181 = arith.constant 0 : index
    %196 = vector.load %arg12[%c347, %c0_181] : memref<512x64xf32, #tpu.memory_space<vmem>>, vector<1x64xf32>
    %c1_182 = arith.constant 1 : index
    %c1216_183 = arith.constant 1216 : index
    %197 = vector.load %arg13[%c1_182, %c1216_183] : memref<2x3136xf32, #tpu.memory_space<vmem>>, vector<1x64xf32>
    tpu.vector_store %arg13[%c1_182, %c1216_183], %196 {strides = array<i32>} : memref<2x3136xf32, #tpu.memory_space<vmem>>, vector<1x64xf32>,
    %c349 = arith.constant 349 : index
    %c0_184 = arith.constant 0 : index
    %198 = vector.load %arg12[%c349, %c0_184] : memref<512x64xf32, #tpu.memory_space<vmem>>, vector<1x64xf32>
    %c1_185 = arith.constant 1 : index
    %c1280_186 = arith.constant 1280 : index
    %199 = vector.load %arg13[%c1_185, %c1280_186] : memref<2x3136xf32, #tpu.memory_space<vmem>>, vector<1x64xf32>
    tpu.vector_store %arg13[%c1_185, %c1280_186], %198 {strides = array<i32>} : memref<2x3136xf32, #tpu.memory_space<vmem>>, vector<1x64xf32>,
    %c369 = arith.constant 369 : index
    %c0_187 = arith.constant 0 : index
    %200 = vector.load %arg12[%c369, %c0_187] : memref<512x64xf32, #tpu.memory_space<vmem>>, vector<1x64xf32>
    %c1_188 = arith.constant 1 : index
    %c1344_189 = arith.constant 1344 : index
    %201 = vector.load %arg13[%c1_188, %c1344_189] : memref<2x3136xf32, #tpu.memory_space<vmem>>, vector<1x64xf32>
    tpu.vector_store %arg13[%c1_188, %c1344_189], %200 {strides = array<i32>} : memref<2x3136xf32, #tpu.memory_space<vmem>>, vector<1x64xf32>,
    %c371 = arith.constant 371 : index
    %c0_190 = arith.constant 0 : index
    %202 = vector.load %arg12[%c371, %c0_190] : memref<512x64xf32, #tpu.memory_space<vmem>>, vector<1x64xf32>
    %c1_191 = arith.constant 1 : index
    %c1408_192 = arith.constant 1408 : index
    %203 = vector.load %arg13[%c1_191, %c1408_192] : memref<2x3136xf32, #tpu.memory_space<vmem>>, vector<1x64xf32>
    tpu.vector_store %arg13[%c1_191, %c1408_192], %202 {strides = array<i32>} : memref<2x3136xf32, #tpu.memory_space<vmem>>, vector<1x64xf32>,
    %c373 = arith.constant 373 : index
    %c0_193 = arith.constant 0 : index
    %204 = vector.load %arg12[%c373, %c0_193] : memref<512x64xf32, #tpu.memory_space<vmem>>, vector<1x64xf32>
    %c1_194 = arith.constant 1 : index
    %c1472_195 = arith.constant 1472 : index
    %205 = vector.load %arg13[%c1_194, %c1472_195] : memref<2x3136xf32, #tpu.memory_space<vmem>>, vector<1x64xf32>
    tpu.vector_store %arg13[%c1_194, %c1472_195], %204 {strides = array<i32>} : memref<2x3136xf32, #tpu.memory_space<vmem>>, vector<1x64xf32>,
    %c375 = arith.constant 375 : index
    %c0_196 = arith.constant 0 : index
    %206 = vector.load %arg12[%c375, %c0_196] : memref<512x64xf32, #tpu.memory_space<vmem>>, vector<1x64xf32>
    %c1_197 = arith.constant 1 : index
    %c1536_198 = arith.constant 1536 : index
    %207 = vector.load %arg13[%c1_197, %c1536_198] : memref<2x3136xf32, #tpu.memory_space<vmem>>, vector<1x64xf32>
    tpu.vector_store %arg13[%c1_197, %c1536_198], %206 {strides = array<i32>} : memref<2x3136xf32, #tpu.memory_space<vmem>>, vector<1x64xf32>,
    %c377 = arith.constant 377 : index
    %c0_199 = arith.constant 0 : index
    %208 = vector.load %arg12[%c377, %c0_199] : memref<512x64xf32, #tpu.memory_space<vmem>>, vector<1x64xf32>
    %c1_200 = arith.constant 1 : index
    %c1600_201 = arith.constant 1600 : index
    %209 = vector.load %arg13[%c1_200, %c1600_201] : memref<2x3136xf32, #tpu.memory_space<vmem>>, vector<1x64xf32>
    tpu.vector_store %arg13[%c1_200, %c1600_201], %208 {strides = array<i32>} : memref<2x3136xf32, #tpu.memory_space<vmem>>, vector<1x64xf32>,
    %c379 = arith.constant 379 : index
    %c0_202 = arith.constant 0 : index
    %210 = vector.load %arg12[%c379, %c0_202] : memref<512x64xf32, #tpu.memory_space<vmem>>, vector<1x64xf32>
    %c1_203 = arith.constant 1 : index
    %c1664_204 = arith.constant 1664 : index
    %211 = vector.load %arg13[%c1_203, %c1664_204] : memref<2x3136xf32, #tpu.memory_space<vmem>>, vector<1x64xf32>
    tpu.vector_store %arg13[%c1_203, %c1664_204], %210 {strides = array<i32>} : memref<2x3136xf32, #tpu.memory_space<vmem>>, vector<1x64xf32>,
    %c381 = arith.constant 381 : index
    %c0_205 = arith.constant 0 : index
    %212 = vector.load %arg12[%c381, %c0_205] : memref<512x64xf32, #tpu.memory_space<vmem>>, vector<1x64xf32>
    %c1_206 = arith.constant 1 : index
    %c1728_207 = arith.constant 1728 : index
    %213 = vector.load %arg13[%c1_206, %c1728_207] : memref<2x3136xf32, #tpu.memory_space<vmem>>, vector<1x64xf32>
    tpu.vector_store %arg13[%c1_206, %c1728_207], %212 {strides = array<i32>} : memref<2x3136xf32, #tpu.memory_space<vmem>>, vector<1x64xf32>,
    %c401 = arith.constant 401 : index
    %c0_208 = arith.constant 0 : index
    %214 = vector.load %arg12[%c401, %c0_208] : memref<512x64xf32, #tpu.memory_space<vmem>>, vector<1x64xf32>
    %c1_209 = arith.constant 1 : index
    %c1792_210 = arith.constant 1792 : index
    %215 = vector.load %arg13[%c1_209, %c1792_210] : memref<2x3136xf32, #tpu.memory_space<vmem>>, vector<1x64xf32>
    tpu.vector_store %arg13[%c1_209, %c1792_210], %214 {strides = array<i32>} : memref<2x3136xf32, #tpu.memory_space<vmem>>, vector<1x64xf32>,
    %c403 = arith.constant 403 : index
    %c0_211 = arith.constant 0 : index
    %216 = vector.load %arg12[%c403, %c0_211] : memref<512x64xf32, #tpu.memory_space<vmem>>, vector<1x64xf32>
    %c1_212 = arith.constant 1 : index
    %c1856_213 = arith.constant 1856 : index
    %217 = vector.load %arg13[%c1_212, %c1856_213] : memref<2x3136xf32, #tpu.memory_space<vmem>>, vector<1x64xf32>
    tpu.vector_store %arg13[%c1_212, %c1856_213], %216 {strides = array<i32>} : memref<2x3136xf32, #tpu.memory_space<vmem>>, vector<1x64xf32>,
    %c405 = arith.constant 405 : index
    %c0_214 = arith.constant 0 : index
    %218 = vector.load %arg12[%c405, %c0_214] : memref<512x64xf32, #tpu.memory_space<vmem>>, vector<1x64xf32>
    %c1_215 = arith.constant 1 : index
    %c1920_216 = arith.constant 1920 : index
    %219 = vector.load %arg13[%c1_215, %c1920_216] : memref<2x3136xf32, #tpu.memory_space<vmem>>, vector<1x64xf32>
    tpu.vector_store %arg13[%c1_215, %c1920_216], %218 {strides = array<i32>} : memref<2x3136xf32, #tpu.memory_space<vmem>>, vector<1x64xf32>,
    %c407 = arith.constant 407 : index
    %c0_217 = arith.constant 0 : index
    %220 = vector.load %arg12[%c407, %c0_217] : memref<512x64xf32, #tpu.memory_space<vmem>>, vector<1x64xf32>
    %c1_218 = arith.constant 1 : index
    %c1984_219 = arith.constant 1984 : index
    %221 = vector.load %arg13[%c1_218, %c1984_219] : memref<2x3136xf32, #tpu.memory_space<vmem>>, vector<1x64xf32>
    tpu.vector_store %arg13[%c1_218, %c1984_219], %220 {strides = array<i32>} : memref<2x3136xf32, #tpu.memory_space<vmem>>, vector<1x64xf32>,
    %c409 = arith.constant 409 : index
    %c0_220 = arith.constant 0 : index
    %222 = vector.load %arg12[%c409, %c0_220] : memref<512x64xf32, #tpu.memory_space<vmem>>, vector<1x64xf32>
    %c1_221 = arith.constant 1 : index
    %c2048_222 = arith.constant 2048 : index
    %223 = vector.load %arg13[%c1_221, %c2048_222] : memref<2x3136xf32, #tpu.memory_space<vmem>>, vector<1x64xf32>
    tpu.vector_store %arg13[%c1_221, %c2048_222], %222 {strides = array<i32>} : memref<2x3136xf32, #tpu.memory_space<vmem>>, vector<1x64xf32>,
    %c411 = arith.constant 411 : index
    %c0_223 = arith.constant 0 : index
    %224 = vector.load %arg12[%c411, %c0_223] : memref<512x64xf32, #tpu.memory_space<vmem>>, vector<1x64xf32>
    %c1_224 = arith.constant 1 : index
    %c2112_225 = arith.constant 2112 : index
    %225 = vector.load %arg13[%c1_224, %c2112_225] : memref<2x3136xf32, #tpu.memory_space<vmem>>, vector<1x64xf32>
    tpu.vector_store %arg13[%c1_224, %c2112_225], %224 {strides = array<i32>} : memref<2x3136xf32, #tpu.memory_space<vmem>>, vector<1x64xf32>,
    %c413 = arith.constant 413 : index
    %c0_226 = arith.constant 0 : index
    %226 = vector.load %arg12[%c413, %c0_226] : memref<512x64xf32, #tpu.memory_space<vmem>>, vector<1x64xf32>
    %c1_227 = arith.constant 1 : index
    %c2176_228 = arith.constant 2176 : index
    %227 = vector.load %arg13[%c1_227, %c2176_228] : memref<2x3136xf32, #tpu.memory_space<vmem>>, vector<1x64xf32>
    tpu.vector_store %arg13[%c1_227, %c2176_228], %226 {strides = array<i32>} : memref<2x3136xf32, #tpu.memory_space<vmem>>, vector<1x64xf32>,
    %c433 = arith.constant 433 : index
    %c0_229 = arith.constant 0 : index
    %228 = vector.load %arg12[%c433, %c0_229] : memref<512x64xf32, #tpu.memory_space<vmem>>, vector<1x64xf32>
    %c1_230 = arith.constant 1 : index
    %c2240_231 = arith.constant 2240 : index
    %229 = vector.load %arg13[%c1_230, %c2240_231] : memref<2x3136xf32, #tpu.memory_space<vmem>>, vector<1x64xf32>
    tpu.vector_store %arg13[%c1_230, %c2240_231], %228 {strides = array<i32>} : memref<2x3136xf32, #tpu.memory_space<vmem>>, vector<1x64xf32>,
    %c435 = arith.constant 435 : index
    %c0_232 = arith.constant 0 : index
    %230 = vector.load %arg12[%c435, %c0_232] : memref<512x64xf32, #tpu.memory_space<vmem>>, vector<1x64xf32>
    %c1_233 = arith.constant 1 : index
    %c2304_234 = arith.constant 2304 : index
    %231 = vector.load %arg13[%c1_233, %c2304_234] : memref<2x3136xf32, #tpu.memory_space<vmem>>, vector<1x64xf32>
    tpu.vector_store %arg13[%c1_233, %c2304_234], %230 {strides = array<i32>} : memref<2x3136xf32, #tpu.memory_space<vmem>>, vector<1x64xf32>,
    %c437 = arith.constant 437 : index
    %c0_235 = arith.constant 0 : index
    %232 = vector.load %arg12[%c437, %c0_235] : memref<512x64xf32, #tpu.memory_space<vmem>>, vector<1x64xf32>
    %c1_236 = arith.constant 1 : index
    %c2368_237 = arith.constant 2368 : index
    %233 = vector.load %arg13[%c1_236, %c2368_237] : memref<2x3136xf32, #tpu.memory_space<vmem>>, vector<1x64xf32>
    tpu.vector_store %arg13[%c1_236, %c2368_237], %232 {strides = array<i32>} : memref<2x3136xf32, #tpu.memory_space<vmem>>, vector<1x64xf32>,
    %c439 = arith.constant 439 : index
    %c0_238 = arith.constant 0 : index
    %234 = vector.load %arg12[%c439, %c0_238] : memref<512x64xf32, #tpu.memory_space<vmem>>, vector<1x64xf32>
    %c1_239 = arith.constant 1 : index
    %c2432_240 = arith.constant 2432 : index
    %235 = vector.load %arg13[%c1_239, %c2432_240] : memref<2x3136xf32, #tpu.memory_space<vmem>>, vector<1x64xf32>
    tpu.vector_store %arg13[%c1_239, %c2432_240], %234 {strides = array<i32>} : memref<2x3136xf32, #tpu.memory_space<vmem>>, vector<1x64xf32>,
    %c441 = arith.constant 441 : index
    %c0_241 = arith.constant 0 : index
    %236 = vector.load %arg12[%c441, %c0_241] : memref<512x64xf32, #tpu.memory_space<vmem>>, vector<1x64xf32>
    %c1_242 = arith.constant 1 : index
    %c2496_243 = arith.constant 2496 : index
    %237 = vector.load %arg13[%c1_242, %c2496_243] : memref<2x3136xf32, #tpu.memory_space<vmem>>, vector<1x64xf32>
    tpu.vector_store %arg13[%c1_242, %c2496_243], %236 {strides = array<i32>} : memref<2x3136xf32, #tpu.memory_space<vmem>>, vector<1x64xf32>,
    %c443 = arith.constant 443 : index
    %c0_244 = arith.constant 0 : index
    %238 = vector.load %arg12[%c443, %c0_244] : memref<512x64xf32, #tpu.memory_space<vmem>>, vector<1x64xf32>
    %c1_245 = arith.constant 1 : index
    %c2560_246 = arith.constant 2560 : index
    %239 = vector.load %arg13[%c1_245, %c2560_246] : memref<2x3136xf32, #tpu.memory_space<vmem>>, vector<1x64xf32>
    tpu.vector_store %arg13[%c1_245, %c2560_246], %238 {strides = array<i32>} : memref<2x3136xf32, #tpu.memory_space<vmem>>, vector<1x64xf32>,
    %c445 = arith.constant 445 : index
    %c0_247 = arith.constant 0 : index
    %240 = vector.load %arg12[%c445, %c0_247] : memref<512x64xf32, #tpu.memory_space<vmem>>, vector<1x64xf32>
    %c1_248 = arith.constant 1 : index
    %c2624_249 = arith.constant 2624 : index
    %241 = vector.load %arg13[%c1_248, %c2624_249] : memref<2x3136xf32, #tpu.memory_space<vmem>>, vector<1x64xf32>
    tpu.vector_store %arg13[%c1_248, %c2624_249], %240 {strides = array<i32>} : memref<2x3136xf32, #tpu.memory_space<vmem>>, vector<1x64xf32>,
    %c465 = arith.constant 465 : index
    %c0_250 = arith.constant 0 : index
    %242 = vector.load %arg12[%c465, %c0_250] : memref<512x64xf32, #tpu.memory_space<vmem>>, vector<1x64xf32>
    %c1_251 = arith.constant 1 : index
    %c2688_252 = arith.constant 2688 : index
    %243 = vector.load %arg13[%c1_251, %c2688_252] : memref<2x3136xf32, #tpu.memory_space<vmem>>, vector<1x64xf32>
    tpu.vector_store %arg13[%c1_251, %c2688_252], %242 {strides = array<i32>} : memref<2x3136xf32, #tpu.memory_space<vmem>>, vector<1x64xf32>,
    %c467 = arith.constant 467 : index
    %c0_253 = arith.constant 0 : index
    %244 = vector.load %arg12[%c467, %c0_253] : memref<512x64xf32, #tpu.memory_space<vmem>>, vector<1x64xf32>
    %c1_254 = arith.constant 1 : index
    %c2752_255 = arith.constant 2752 : index
    %245 = vector.load %arg13[%c1_254, %c2752_255] : memref<2x3136xf32, #tpu.memory_space<vmem>>, vector<1x64xf32>
    tpu.vector_store %arg13[%c1_254, %c2752_255], %244 {strides = array<i32>} : memref<2x3136xf32, #tpu.memory_space<vmem>>, vector<1x64xf32>,
    %c469 = arith.constant 469 : index
    %c0_256 = arith.constant 0 : index
    %246 = vector.load %arg12[%c469, %c0_256] : memref<512x64xf32, #tpu.memory_space<vmem>>, vector<1x64xf32>
    %c1_257 = arith.constant 1 : index
    %c2816_258 = arith.constant 2816 : index
    %247 = vector.load %arg13[%c1_257, %c2816_258] : memref<2x3136xf32, #tpu.memory_space<vmem>>, vector<1x64xf32>
    tpu.vector_store %arg13[%c1_257, %c2816_258], %246 {strides = array<i32>} : memref<2x3136xf32, #tpu.memory_space<vmem>>, vector<1x64xf32>,
    %c471 = arith.constant 471 : index
    %c0_259 = arith.constant 0 : index
    %248 = vector.load %arg12[%c471, %c0_259] : memref<512x64xf32, #tpu.memory_space<vmem>>, vector<1x64xf32>
    %c1_260 = arith.constant 1 : index
    %c2880_261 = arith.constant 2880 : index
    %249 = vector.load %arg13[%c1_260, %c2880_261] : memref<2x3136xf32, #tpu.memory_space<vmem>>, vector<1x64xf32>
    tpu.vector_store %arg13[%c1_260, %c2880_261], %248 {strides = array<i32>} : memref<2x3136xf32, #tpu.memory_space<vmem>>, vector<1x64xf32>,
    %c473 = arith.constant 473 : index
    %c0_262 = arith.constant 0 : index
    %250 = vector.load %arg12[%c473, %c0_262] : memref<512x64xf32, #tpu.memory_space<vmem>>, vector<1x64xf32>
    %c1_263 = arith.constant 1 : index
    %c2944_264 = arith.constant 2944 : index
    %251 = vector.load %arg13[%c1_263, %c2944_264] : memref<2x3136xf32, #tpu.memory_space<vmem>>, vector<1x64xf32>
    tpu.vector_store %arg13[%c1_263, %c2944_264], %250 {strides = array<i32>} : memref<2x3136xf32, #tpu.memory_space<vmem>>, vector<1x64xf32>,
    %c475 = arith.constant 475 : index
    %c0_265 = arith.constant 0 : index
    %252 = vector.load %arg12[%c475, %c0_265] : memref<512x64xf32, #tpu.memory_space<vmem>>, vector<1x64xf32>
    %c1_266 = arith.constant 1 : index
    %c3008_267 = arith.constant 3008 : index
    %253 = vector.load %arg13[%c1_266, %c3008_267] : memref<2x3136xf32, #tpu.memory_space<vmem>>, vector<1x64xf32>
    tpu.vector_store %arg13[%c1_266, %c3008_267], %252 {strides = array<i32>} : memref<2x3136xf32, #tpu.memory_space<vmem>>, vector<1x64xf32>,
    %c477 = arith.constant 477 : index
    %c0_268 = arith.constant 0 : index
    %254 = vector.load %arg12[%c477, %c0_268] : memref<512x64xf32, #tpu.memory_space<vmem>>, vector<1x64xf32>
    %c1_269 = arith.constant 1 : index
    %c3072_270 = arith.constant 3072 : index
    %255 = vector.load %arg13[%c1_269, %c3072_270] : memref<2x3136xf32, #tpu.memory_space<vmem>>, vector<1x64xf32>
    tpu.vector_store %arg13[%c1_269, %c3072_270], %254 {strides = array<i32>} : memref<2x3136xf32, #tpu.memory_space<vmem>>, vector<1x64xf32>,
    %c0_271 = arith.constant 0 : index
    %c0_272 = arith.constant 0 : index
    %256 = vector.load %arg13[%c0_271, %c0_272] : memref<2x3136xf32, #tpu.memory_space<vmem>>, vector<2x3136xf32>
    %257 = arith.truncf %256 : vector<2x3136xf32> to vector<2x3136xbf16>
    %c0_273 = arith.constant 0 : index
    %c0_274 = arith.constant 0 : index
    %258 = vector.load %arg7[%c0_273, %c0_274] : memref<3136x128xbf16, #tpu.memory_space<vmem>>, vector<3136x128xbf16>
    %cst_275 = arith.constant dense<0.000000e+00> : vector<2x128xf32>
    %259 = tpu.matmul %257, %258, %cst_275 {dimension_numbers = #tpu.dot_dimension_numbers<[1], [0], [0], [1], [0, 0, 1, 1], [], []>} : vector<2x3136xbf16>, vector<3136x128xbf16>, vector<2x128xf32> -> vector<2x128xf32>
    %c0_276 = arith.constant 0 : index
    %c0_277 = arith.constant 0 : index
    %260 = vector.load %arg8[%c0_276, %c0_277] : memref<1x128xf32, #tpu.memory_space<vmem>>, vector<1x128xf32>
    %261 = vector.broadcast %260 : vector<1x128xf32> to vector<2x128xf32>
    %262 = arith.addf %259, %261 : vector<2x128xf32>
    %cst_278 = arith.constant 0.000000e+00 : f32
    %263 = vector.broadcast %cst_278 : f32 to vector<2x128xf32>
    %264 = arith.maximumf %262, %263 : vector<2x128xf32>
    %265 = arith.truncf %264 : vector<2x128xf32> to vector<2x128xbf16>
    %c0_279 = arith.constant 0 : index
    %c0_280 = arith.constant 0 : index
    %266 = vector.load %arg9[%c0_279, %c0_280] : memref<128x10xbf16, #tpu.memory_space<vmem>>, vector<128x10xbf16>
    %cst_281 = arith.constant dense<0.000000e+00> : vector<2x10xf32>
    %267 = tpu.matmul %265, %266, %cst_281 {dimension_numbers = #tpu.dot_dimension_numbers<[1], [0], [0], [1], [0, 0, 1, 1], [], []>} : vector<2x128xbf16>, vector<128x10xbf16>, vector<2x10xf32> -> vector<2x10xf32>
    %c0_282 = arith.constant 0 : index
    %c0_283 = arith.constant 0 : index
    %268 = vector.load %arg10[%c0_282, %c0_283] : memref<1x10xf32, #tpu.memory_space<vmem>>, vector<1x10xf32>
    %269 = vector.broadcast %268 : vector<1x10xf32> to vector<2x10xf32>
    %270 = arith.addf %267, %269 : vector<2x10xf32>
    %c0_284 = arith.constant 0 : index
    %c0_285 = arith.constant 0 : index
    %271 = vector.load %arg11[%c0_284, %c0_285] : memref<2x10xf32, #tpu.memory_space<vmem>>, vector<2x10xf32>
    tpu.vector_store %arg11[%c0_284, %c0_285], %270 {strides = array<i32>} : memref<2x10xf32, #tpu.memory_space<vmem>>, vector<2x10xf32>,
    return
  }
  func.func @transform_0(%arg0: i32) -> (i32, i32) {
    %c0_i32 = arith.constant 0 : i32
    %c0_i32_0 = arith.constant 0 : i32
    %c0_i32_1 = arith.constant 0 : i32
    return %c0_i32, %c0_i32_0 : i32, i32
  }
  func.func @transform_1(%arg0: i32) -> (i32, i32) {
    %c0_i32 = arith.constant 0 : i32
    %c0_i32_0 = arith.constant 0 : i32
    %c0_i32_1 = arith.constant 0 : i32
    return %c0_i32, %c0_i32_0 : i32, i32
  }
  func.func @transform_2(%arg0: i32) -> (i32, i32) {
    %c0_i32 = arith.constant 0 : i32
    %c0_i32_0 = arith.constant 0 : i32
    %c0_i32_1 = arith.constant 0 : i32
    return %c0_i32, %c0_i32_0 : i32, i32
  }
  func.func @transform_3(%arg0: i32) -> (i32, i32) {
    %c0_i32 = arith.constant 0 : i32
    %c0_i32_0 = arith.constant 0 : i32
    %c0_i32_1 = arith.constant 0 : i32
    return %c0_i32, %c0_i32_0 : i32, i32
  }
  func.func @transform_4(%arg0: i32) -> (i32, i32) {
    %c0_i32 = arith.constant 0 : i32
    %c0_i32_0 = arith.constant 0 : i32
    %c0_i32_1 = arith.constant 0 : i32
    return %c0_i32, %c0_i32_0 : i32, i32
  }
  func.func @transform_5(%arg0: i32) -> (i32, i32) {
    %c0_i32 = arith.constant 0 : i32
    %c0_i32_0 = arith.constant 0 : i32
    %c0_i32_1 = arith.constant 0 : i32
    return %c0_i32, %c0_i32_0 : i32, i32
  }
  func.func @transform_6(%arg0: i32) -> (i32, i32) {
    %c0_i32 = arith.constant 0 : i32
    %c0_i32_0 = arith.constant 0 : i32
    %c0_i32_1 = arith.constant 0 : i32
    return %c0_i32, %c0_i32_0 : i32, i32
  }
  func.func @transform_7(%arg0: i32) -> (i32, i32) {
    %c0_i32 = arith.constant 0 : i32
    %c0_i32_0 = arith.constant 0 : i32
    %c0_i32_1 = arith.constant 0 : i32
    return %c0_i32, %c0_i32_0 : i32, i32
  }
  func.func @transform_8(%arg0: i32) -> (i32, i32) {
    %c0_i32 = arith.constant 0 : i32
    %c0_i32_0 = arith.constant 0 : i32
    %c0_i32_1 = arith.constant 0 : i32
    return %c0_i32, %c0_i32_0 : i32, i32
  }
  func.func @transform_9(%arg0: i32) -> (i32, i32) {
    %c0_i32 = arith.constant 0 : i32
    %c0_i32_0 = arith.constant 0 : i32
    %c0_i32_1 = arith.constant 0 : i32
    return %c0_i32, %c0_i32_0 : i32, i32
  }
  func.func @transform_10(%arg0: i32) -> (i32, i32) {
    %c0_i32 = arith.constant 0 : i32
    %c0_i32_0 = arith.constant 0 : i32
    %c0_i32_1 = arith.constant 0 : i32
    return %c0_i32, %c0_i32_0 : i32, i32
  }
}

</mosaic_0001>

<bundles_post_ra>
// kernel: base_cnn_forward.1
= control target key start
LH: loop header
LB: loop body
LE: loop exit
PB: predicated region body
PF: predicated region fallthrough
CT: control target
= control target key end

     0   :  { %vm306_vm0 = vcmask 1043456   ;;  %v12813_v3 = vmov 0   ;;  %vm113_vm1 = vcmask 293888   ;;  %s8833_s29 = smov 32   ;;  %s12802_s0 = inlined_call_operand.vmem [shape: f32[512,36], index: 0, kind: input, shape index: {}]   ;;  %s12803_s1 = inlined_call_operand.vmem [shape: f32[36,128], index: 1, kind: input, shape index: {}]   ;;  %s12804_s2 = inlined_call_operand.vmem [shape: f32[1,128], index: 2, kind: input, shape index: {}]   ;;  %s12805_s3 = inlined_call_operand.vmem [shape: f32[512,1], index: 3, kind: input, shape index: {}]   ;;  %s12806_s4 = inlined_call_operand.vmem [shape: bf16[288,64], index: 4, kind: input, shape index: {}]   ;;  %s12807_s5 = inlined_call_operand.vmem [shape: f32[1,64], index: 5, kind: input, shape index: {}]   ;;  %s12808_s6 = inlined_call_operand.vmem [shape: bf16[3136,128], index: 6, kind: input, shape index: {}]   ;;  %s12809_s7 = inlined_call_operand.vmem [shape: f32[1,128], index: 7, kind: input, shape index: {}]   ;;  %s12810_s8 = inlined_call_operand.vmem [shape: bf16[128,10], index: 8, kind: input, shape index: {}]   ;;  %s12811_s9 = inlined_call_operand.vmem [shape: f32[1,10], index: 9, kind: input, shape index: {}]   ;;  %s12812_s10 = inlined_call_operand.hbm [shape: f32[2,10], index: 10, kind: output, shape index: {}]  }
   0x1   :  { %v105_v0 = vld [vmem:[%s12803_s1 + $0x20] sm:$0xf]  ;;  %v104_v2 = vld [vmem:[%s12803_s1 + $0x18] sm:$0xff]  ;;  %8577 = vset.pattern.permute.xlu0 %v12813_v3  ;;  %v103_v4 = vld [vmem:[%s12803_s1 + $0x10] sm:$0xff]  ;;  %8578 = vset.pattern.permute.xlu1 %v12813_v3 }
   0x2   :  { %v1399_v1 = vld [vmem:[%s12805_s3] sm:$0xff]  ;;  %8363 = vmatprep.subr.msk.mxu0 %vm306_vm0, %v105_v0  ;;  %v1402_v6 = vld [vmem:[%s12805_s3 + $0x18] sm:$0xff]  ;;  %v1400_v7 = vld [vmem:[%s12805_s3 + $0x8] sm:$0xff]  ;;  %3393 = vmatprep.subr.bf16.mxu1 %v12813_v3 }
   0x3   :  { %8364 = vmatpush3.msk.msra.mxu0 %vm306_vm0, %v105_v0  ;;  %1465 = vperm.xlu0 %8577, %v1399_v1   ;;  %v37_v5 = vld [vmem:[%s12802_s0] sm:$0xff]  ;;  %v102_v8 = vld [vmem:[%s12803_s1 + $0x8] sm:$0xff]  ;;  %v1401_v10 = vld [vmem:[%s12805_s3 + $0x10] sm:$0xff] }
   0x4   :  { %8365 = vmatprep.subr.mxu0 %v104_v2  ;;  %8373 = vmatprep.mubr.msk.f32.mxu0 %vm113_vm1, %v37_v5  ;;  %v101_v9 = vld [vmem:[%s12803_s1] sm:$0xff]  ;;  %v1404_v11 = vld [vmem:[%s12805_s3 + $0x28] sm:$0xff]  ;;  %v39_v13 = vld [vmem:[%s12802_s0 + $0x10] sm:$0xff] }
   0x5   :  { %8366 = vmatpush3.msra.mxu0 %v104_v2  ;;  %1470 = vperm.xlu1 %8578, %v1400_v7   ;;  %v38_v12 = vld [vmem:[%s12802_s0 + $0x8] sm:$0xff]  ;;  %v1403_v14 = vld [vmem:[%s12805_s3 + $0x20] sm:$0xff]  ;;  %v1406_v15 = vld [vmem:[%s12805_s3 + $0x38] sm:$0xff] }
   0x6   :  { %8367 = vmatprep.subr.mxu0 %v103_v4  ;;  %v40_v16 = vld [vmem:[%s12802_s0 + $0x18] sm:$0xff]  ;;  %v41_v17 = vld [vmem:[%s12802_s0 + $0x20] sm:$0xff]  ;;  %v1405_v18 = vld [vmem:[%s12805_s3 + $0x30] sm:$0xff] }
   0x7   :  { %8368 = vmatpush3.msra.mxu0 %v103_v4  ;;  %1480 = vperm.xlu0 %8577, %v1402_v6   ;;  %v1408_v19 = vld [vmem:[%s12805_s3 + $0x48] sm:$0xff]  ;;  %v43_v21 = vld [vmem:[%s12802_s0 + $0x30] sm:$0xff]  ;;  %v1407_v22 = vld [vmem:[%s12805_s3 + $0x40] sm:$0xff] }
   0x8   :  { %8369 = vmatprep.subr.mxu0 %v102_v8  ;;  %v42_v20 = vld [vmem:[%s12802_s0 + $0x28] sm:$0xff]  ;;  %v1410_v23 = vld [vmem:[%s12805_s3 + $0x58] sm:$0xff]  ;;  %v45_v25 = vld [vmem:[%s12802_s0 + $0x40] sm:$0xff] }
   0x9   :  { %8370 = vmatpush3.msra.mxu0 %v102_v8  ;;  %1475 = vperm.xlu1 %8578, %v1401_v10   ;;  %v44_v24 = vld [vmem:[%s12802_s0 + $0x38] sm:$0xff]  ;;  %v1409_v26 = vld [vmem:[%s12805_s3 + $0x50] sm:$0xff]  ;;  %v1412_v27 = vld [vmem:[%s12805_s3 + $0x68] sm:$0xff] }
   0xa   :  { %8371 = vmatprep.subr.mxu0 %v101_v9  ;;  %v46_v28 = vld [vmem:[%s12802_s0 + $0x48] sm:$0xff]  ;;  %v47_v29 = vld [vmem:[%s12802_s0 + $0x50] sm:$0xff]  ;;  %v1411_v30 = vld [vmem:[%s12805_s3 + $0x60] sm:$0xff] }
   0xb   :  { %8372 = vmatpush3.msra.mxu0 %v101_v9  ;;  %1490 = vperm.xlu0 %8577, %v1404_v11   ;;  %v1414_v31 = vld [vmem:[%s12805_s3 + $0x78] sm:$0xff]  ;;  %v49_v33 = vld [vmem:[%s12802_s0 + $0x60] sm:$0xff]  ;;  %v1413_v34 = vld [vmem:[%s12805_s3 + $0x70] sm:$0xff] }
   0xc   :  { %8374 = vmatmul.mubr.msk.f32.vlgmr.msra.gmra.mxu0 %vm113_vm1, %v38_v12  ;;  %v48_v32 = vld [vmem:[%s12802_s0 + $0x58] sm:$0xff]  ;;  %v1416_v35 = vld [vmem:[%s12805_s3 + $0x88] sm:$0xff]  ;;  %v51_v37 = vld [vmem:[%s12802_s0 + $0x70] sm:$0xff] }
   0xd   :  { %8376 = vmatprep.mubr.msk.f32.mxu0 %vm113_vm1, %v39_v13  ;;  %1485 = vperm.xlu1 %8578, %v1403_v14   ;;  %v50_v36 = vld [vmem:[%s12802_s0 + $0x68] sm:$0xff]  ;;  %v1418_v38 = vld [vmem:[%s12805_s3 + $0x98] sm:$0xff]  ;;  %v1415_v39 = vld [vmem:[%s12805_s3 + $0x80] sm:$0xff] }
   0xe   :  { %v52_v40 = vld [vmem:[%s12802_s0 + $0x78] sm:$0xff]  ;;  %v53_v41 = vld [vmem:[%s12802_s0 + $0x80] sm:$0xff]  ;;  %v1420_v42 = vld [vmem:[%s12805_s3 + $0xa8] sm:$0xff] }
   0xf   :  { %1500 = vperm.xlu0 %8577, %v1406_v15   ;;  %v1417_v43 = vld [vmem:[%s12805_s3 + $0x90] sm:$0xff]  ;;  %v54_v44 = vld [vmem:[%s12802_s0 + $0x88] sm:$0xff]  ;;  %v1419_v46 = vld [vmem:[%s12805_s3 + $0xa0] sm:$0xff] }
  0x10   :  { %8377 = vmatmul.mubr.msk.f32.gmra.mxu0 %vm113_vm1, %v40_v16  ;;  %v55_v45 = vld [vmem:[%s12802_s0 + $0x90] sm:$0xff]  ;;  %v56_v47 = vld [vmem:[%s12802_s0 + $0x98] sm:$0xff]  ;;  %v57_v48 = vld [vmem:[%s12802_s0 + $0xa0] sm:$0xff] }
  0x11   :  { %8379 = vmatprep.mubr.msk.f32.mxu0 %vm113_vm1, %v41_v17  ;;  %1495 = vperm.xlu1 %8578, %v1405_v18   ;;  %v1421_v49 = vld [vmem:[%s12805_s3 + $0xb0] sm:$0xff]  ;;  %v1422_v50 = vld [vmem:[%s12805_s3 + $0xb8] sm:$0xff]  ;;  %v58_v51 = vld [vmem:[%s12802_s0 + $0xa8] sm:$0xff] }
  0x12   :  { %v59_v52 = vld [vmem:[%s12802_s0 + $0xb0] sm:$0xff]  ;;  %v1423_v53 = vld [vmem:[%s12805_s3 + $0xc0] sm:$0xff]  ;;  %v1424_v54 = vld [vmem:[%s12805_s3 + $0xc8] sm:$0xff] }
  0x13   :  { %1510 = vperm.xlu0 %8577, %v1408_v19   ;;  %v60_v55 = vld [vmem:[%s12802_s0 + $0xb8] sm:$0xff]  ;;  %v61_v56 = vld [vmem:[%s12802_s0 + $0xc0] sm:$0xff]  ;;  %v1425_v57 = vld [vmem:[%s12805_s3 + $0xd0] sm:$0xff] }
  0x14   :  { %8380 = vmatmul.mubr.msk.f32.gmra.mxu0 %vm113_vm1, %v42_v20  ;;  %v1426_v58 = vld [vmem:[%s12805_s3 + $0xd8] sm:$0xff]  ;;  %v62_v59 = vld [vmem:[%s12802_s0 + $0xc8] sm:$0xff]  ;;  %v63_v60 = vld [vmem:[%s12802_s0 + $0xd0] sm:$0xff] }
  0x15   :  { %8382 = vmatprep.mubr.msk.f32.mxu0 %vm113_vm1, %v43_v21  ;;  %1505 = vperm.xlu1 %8578, %v1407_v22   ;;  %v1427_v61 = vld [vmem:[%s12805_s3 + $0xe0] sm:$0xff]  ;;  %v1428_v62 = vld [vmem:[%s12805_s3 + $0xe8] sm:$0xff]  ;;  %v64_v63 = vld [vmem:[%s12802_s0 + $0xd8] sm:$0xff] }
  0x16   :  { %v65_v0 = vld [vmem:[%s12802_s0 + $0xe0] sm:$0xff]  ;;  %v1429_v1 = vld [vmem:[%s12805_s3 + $0xf0] sm:$0xff]  ;;  %v1430_v2 = vld [vmem:[%s12805_s3 + $0xf8] sm:$0xff] }
  0x17   :  { %1520 = vperm.xlu0 %8577, %v1410_v23   ;;  %v66_v4 = vld [vmem:[%s12802_s0 + $0xe8] sm:$0xff]  ;;  %v67_v5 = vld [vmem:[%s12802_s0 + $0xf0] sm:$0xff]  ;;  %v1431_v6 = vld [vmem:[%s12805_s3 + $0x100] sm:$0xff] }
  0x18   :  { %8383 = vmatmul.mubr.msk.f32.gmra.mxu0 %vm113_vm1, %v44_v24  ;;  %v1432_v7 = vld [vmem:[%s12805_s3 + $0x108] sm:$0xff]  ;;  %v68_v8 = vld [vmem:[%s12802_s0 + $0xf8] sm:$0xff]  ;;  %v69_v9 = vld [vmem:[%s12802_s0 + $0x100] sm:$0xff] }
  0x19   :  { %8385 = vmatprep.mubr.msk.f32.mxu0 %vm113_vm1, %v45_v25  ;;  %1515 = vperm.xlu1 %8578, %v1409_v26   ;;  %v1433_v10 = vld [vmem:[%s12805_s3 + $0x110] sm:$0xff]  ;;  %v1434_v11 = vld [vmem:[%s12805_s3 + $0x118] sm:$0xff]  ;;  %v70_v12 = vld [vmem:[%s12802_s0 + $0x108] sm:$0xff] }
  0x1a   :  { %v71_v13 = vld [vmem:[%s12802_s0 + $0x110] sm:$0xff]  ;;  %v1435_v14 = vld [vmem:[%s12805_s3 + $0x120] sm:$0xff]  ;;  %v1436_v15 = vld [vmem:[%s12805_s3 + $0x128] sm:$0xff] }
  0x1b   :  { %1530 = vperm.xlu0 %8577, %v1412_v27   ;;  %v72_v16 = vld [vmem:[%s12802_s0 + $0x118] sm:$0xff]  ;;  %v73_v17 = vld [vmem:[%s12802_s0 + $0x120] sm:$0xff]  ;;  %v1437_v18 = vld [vmem:[%s12805_s3 + $0x130] sm:$0xff] }
  0x1c   :  { %8386 = vmatmul.mubr.msk.f32.gmra.mxu0 %vm113_vm1, %v46_v28  ;;  %v1438_v19 = vld [vmem:[%s12805_s3 + $0x138] sm:$0xff]  ;;  %v74_v20 = vld [vmem:[%s12802_s0 + $0x128] sm:$0xff]  ;;  %v75_v21 = vld [vmem:[%s12802_s0 + $0x130] sm:$0xff] }
  0x1d   :  { %8388 = vmatprep.mubr.msk.f32.mxu0 %vm113_vm1, %v47_v29  ;;  %1525 = vperm.xlu1 %8578, %v1411_v30   ;;  %v1439_v22 = vld [vmem:[%s12805_s3 + $0x140] sm:$0xff]  ;;  %v1440_v23 = vld [vmem:[%s12805_s3 + $0x148] sm:$0xff]  ;;  %v76_v24 = vld [vmem:[%s12802_s0 + $0x138] sm:$0xff] }
  0x1e   :  { %v77_v25 = vld [vmem:[%s12802_s0 + $0x140] sm:$0xff]  ;;  %v1441_v26 = vld [vmem:[%s12805_s3 + $0x150] sm:$0xff]  ;;  %v1442_v27 = vld [vmem:[%s12805_s3 + $0x158] sm:$0xff] }
  0x1f   :  { %1540 = vperm.xlu0 %8577, %v1414_v31   ;;  %v78_v28 = vld [vmem:[%s12802_s0 + $0x148] sm:$0xff]  ;;  %v79_v29 = vld [vmem:[%s12802_s0 + $0x150] sm:$0xff]  ;;  %v1443_v30 = vld [vmem:[%s12805_s3 + $0x160] sm:$0xff] }
  0x20   :  { %8389 = vmatmul.mubr.msk.f32.gmra.mxu0 %vm113_vm1, %v48_v32  ;;  %v1444_v31 = vld [vmem:[%s12805_s3 + $0x168] sm:$0xff]  ;;  %v80_v32 = vld [vmem:[%s12802_s0 + $0x158] sm:$0xff] }
  0x21   :  { %8391 = vmatprep.mubr.msk.f32.mxu0 %vm113_vm1, %v49_v33  ;;  %1535 = vperm.xlu1 %8578, %v1413_v34   ;;  %v81_v33 = vld [vmem:[%s12802_s0 + $0x160] sm:$0xff]  ;;  %v1445_v34 = vld [vmem:[%s12805_s3 + $0x170] sm:$0xff] }
  0x23   :  { %1550 = vperm.xlu0 %8577, %v1416_v35   ;;  %v1446_v35 = vld [vmem:[%s12805_s3 + $0x178] sm:$0xff] }
  0x24   :  { %8392 = vmatmul.mubr.msk.f32.gmra.mxu0 %vm113_vm1, %v50_v36  ;;  %v82_v36 = vld [vmem:[%s12802_s0 + $0x168] sm:$0xff] }
  0x25   :  { %8394 = vmatprep.mubr.msk.f32.mxu0 %vm113_vm1, %v51_v37  ;;  %1545 = vperm.xlu1 %8578, %v1415_v39   ;;  %v83_v37 = vld [vmem:[%s12802_s0 + $0x170] sm:$0xff]  ;;  %v85_v39 = vld [vmem:[%s12802_s0 + $0x180] sm:$0xff] }
  0x27   :  { %1560 = vperm.xlu0 %8577, %v1418_v38   ;;  %v84_v38 = vld [vmem:[%s12802_s0 + $0x178] sm:$0xff] }
  0x28   :  { %8395 = vmatmul.mubr.msk.f32.gmra.mxu0 %vm113_vm1, %v52_v40  ;;  %v86_v40 = vld [vmem:[%s12802_s0 + $0x188] sm:$0xff] }
  0x29   :  { %8397 = vmatprep.mubr.msk.f32.mxu0 %vm113_vm1, %v53_v41  ;;  %1555 = vperm.xlu1 %8578, %v1417_v43   ;;  %v87_v41 = vld [vmem:[%s12802_s0 + $0x190] sm:$0xff]  ;;  %v89_v43 = vld [vmem:[%s12802_s0 + $0x1a0] sm:$0xff] }
  0x2b   :  { %1570 = vperm.xlu0 %8577, %v1420_v42   ;;  %v88_v42 = vld [vmem:[%s12802_s0 + $0x198] sm:$0xff] }
  0x2c   :  { %8398 = vmatmul.mubr.msk.f32.gmra.mxu0 %vm113_vm1, %v54_v44  ;;  %v90_v44 = vld [vmem:[%s12802_s0 + $0x1a8] sm:$0xff] }
  0x2d   :  { %8400 = vmatprep.mubr.msk.f32.mxu0 %vm113_vm1, %v55_v45  ;;  %1565 = vperm.xlu1 %8578, %v1419_v46  }
  0x2f   :  { %2275 = vrot.lane.b32.xlu0 %v12813_v3, %s8833_s29 }
  0x30   :  { %8401 = vmatmul.mubr.msk.f32.gmra.mxu0 %vm113_vm1, %v56_v47 }
  0x31   :  { %8403 = vmatprep.mubr.msk.f32.mxu0 %vm113_vm1, %v57_v48  ;;  %1575 = vperm.xlu1 %8578, %v1421_v49  }
  0x33   :  { %1580 = vperm.xlu0 %8577, %v1422_v50  }
  0x34   :  { %8404 = vmatmul.mubr.msk.f32.gmra.mxu0 %vm113_vm1, %v58_v51 }
  0x35   :  { %8406 = vmatprep.mubr.msk.f32.mxu0 %vm113_vm1, %v59_v52  ;;  %1585 = vperm.xlu1 %8578, %v1423_v53  }
  0x37   :  { %1590 = vperm.xlu0 %8577, %v1424_v54  }
  0x38   :  { %8407 = vmatmul.mubr.msk.f32.gmra.mxu0 %vm113_vm1, %v60_v55 }
  0x39   :  { %8409 = vmatprep.mubr.msk.f32.mxu0 %vm113_vm1, %v61_v56  ;;  %1595 = vperm.xlu1 %8578, %v1425_v57  }
  0x3b   :  { %1600 = vperm.xlu0 %8577, %v1426_v58  }
  0x3c   :  { %8410 = vmatmul.mubr.msk.f32.gmra.mxu0 %vm113_vm1, %v62_v59 }
  0x3d   :  { %8412 = vmatprep.mubr.msk.f32.mxu0 %vm113_vm1, %v63_v60  ;;  %1605 = vperm.xlu1 %8578, %v1427_v61  }
  0x3f   :  { %1610 = vperm.xlu0 %8577, %v1428_v62  }
  0x40   :  { %8413 = vmatmul.mubr.msk.f32.gmra.mxu0 %vm113_vm1, %v64_v63 }
  0x41   :  { %8415 = vmatprep.mubr.msk.f32.mxu0 %vm113_vm1, %v65_v0  ;;  %1615 = vperm.xlu1 %8578, %v1429_v1  }
  0x43   :  { %1620 = vperm.xlu0 %8577, %v1430_v2  }
  0x44   :  { %8416 = vmatmul.mubr.msk.f32.gmra.mxu0 %vm113_vm1, %v66_v4 }
  0x45   :  { %8418 = vmatprep.mubr.msk.f32.mxu0 %vm113_vm1, %v67_v5  ;;  %1625 = vperm.xlu1 %8578, %v1431_v6  }
  0x47   :  { %1630 = vperm.xlu0 %8577, %v1432_v7  }
  0x48   :  { %8419 = vmatmul.mubr.msk.f32.gmra.mxu0 %vm113_vm1, %v68_v8 }
  0x49   :  { %8421 = vmatprep.mubr.msk.f32.mxu0 %vm113_vm1, %v69_v9  ;;  %1635 = vperm.xlu1 %8578, %v1433_v10  }
  0x4b   :  { %1640 = vperm.xlu0 %8577, %v1434_v11  }
  0x4c   :  { %8422 = vmatmul.mubr.msk.f32.gmra.mxu0 %vm113_vm1, %v70_v12 }
  0x4d   :  { %8424 = vmatprep.mubr.msk.f32.mxu0 %vm113_vm1, %v71_v13  ;;  %1645 = vperm.xlu1 %8578, %v1435_v14  }
  0x4f   :  { %1650 = vperm.xlu0 %8577, %v1436_v15  }
  0x50   :  { %8425 = vmatmul.mubr.msk.f32.gmra.mxu0 %vm113_vm1, %v72_v16 }
  0x51   :  { %8427 = vmatprep.mubr.msk.f32.mxu0 %vm113_vm1, %v73_v17  ;;  %1655 = vperm.xlu1 %8578, %v1437_v18  }
  0x53   :  { %1660 = vperm.xlu0 %8577, %v1438_v19  }
  0x54   :  { %8428 = vmatmul.mubr.msk.f32.gmra.mxu0 %vm113_vm1, %v74_v20 }
  0x55   :  { %8430 = vmatprep.mubr.msk.f32.mxu0 %vm113_vm1, %v75_v21  ;;  %1665 = vperm.xlu1 %8578, %v1439_v22  }
  0x57   :  { %1670 = vperm.xlu0 %8577, %v1440_v23  }
  0x58   :  { %8431 = vmatmul.mubr.msk.f32.gmra.mxu0 %vm113_vm1, %v76_v24 }
  0x59   :  { %8433 = vmatprep.mubr.msk.f32.mxu0 %vm113_vm1, %v77_v25  ;;  %1675 = vperm.xlu1 %8578, %v1441_v26  }
  0x5b   :  { %1680 = vperm.xlu0 %8577, %v1442_v27  }
  0x5c   :  { %8434 = vmatmul.mubr.msk.f32.gmra.mxu0 %vm113_vm1, %v78_v28 }
  0x5d   :  { %8436 = vmatprep.mubr.msk.f32.mxu0 %vm113_vm1, %v79_v29  ;;  %1685 = vperm.xlu1 %8578, %v1443_v30  }
  0x5f   :  { %1690 = vperm.xlu0 %8577, %v1444_v31  }
  0x60   :  { %8437 = vmatmul.mubr.msk.f32.gmra.mxu0 %vm113_vm1, %v80_v32 }
  0x61   :  { %8439 = vmatprep.mubr.msk.f32.mxu0 %vm113_vm1, %v81_v33  ;;  %1695 = vperm.xlu1 %8578, %v1445_v34  }
  0x63   :  { %1700 = vperm.xlu0 %8577, %v1446_v35  }
  0x64   :  { %8440 = vmatmul.mubr.msk.f32.gmra.mxu0 %vm113_vm1, %v82_v36 }
  0x65   :  { %8442 = vmatprep.mubr.msk.f32.mxu0 %vm113_vm1, %v83_v37 }
  0x68   :  { %8443 = vmatmul.mubr.msk.f32.gmra.mxu0 %vm113_vm1, %v84_v38 }
  0x69   :  { %8445 = vmatprep.mubr.msk.f32.mxu0 %vm113_vm1, %v85_v39 }
  0x6c   :  { %8446 = vmatmul.mubr.msk.f32.gmra.mxu0 %vm113_vm1, %v86_v40 }
  0x6d   :  { %8448 = vmatprep.mubr.msk.f32.mxu0 %vm113_vm1, %v87_v41 }
  0x70   :  { %8449 = vmatmul.mubr.msk.f32.gmra.mxu0 %vm113_vm1, %v88_v42 }
  0x71   :  { %8451 = vmatprep.mubr.msk.f32.mxu0 %vm113_vm1, %v89_v43 }
  0x74   :  { %8452 = vmatmul.mubr.msk.f32.gmra.mxu0 %vm113_vm1, %v90_v44 }
  0x7e   :  { %v9275_v45 = vpop.permute.xlu0 %1465 }
  0x80   :  { %v9279_v47 = vpop.permute.xlu1 %1470 }
  0x82   :  { %v9277_v46 = vpop.permute.xlu0 %1480 }
  0x83   :  { %12900 = vst [vmem:[#allocation7_spill] sm:$0xff] %v9277_v46 }
  0x84   :  { %15 = vsyncpa [#allocation5], 0  ;;  %v9283_v49 = vpop.permute.xlu1 %1475  ;;  %v9294_v53 = vld [vmem:[%s12804_s2] ss:$0 sm:$0xff]  ;;  %s8834_s25 = smov 96   ;;  %s8835_s17 = smov 64  }
  0x85   :  { %12902 = vst [vmem:[#allocation9_spill] sm:$0xff] %v9283_v49  ;;  %vm2131_vm2 = vsmask.f32 7424  ;;  %vm2230_vm3 = vcmask 1047552   ;;  %vm1879_vm5 = vsmask.f32 256 }
  0x86   :  { %v9281_v48 = vpop.permute.xlu0 %1490  ;;  %vm10190_vm4 = vmand %vm2230_vm3, %vm2131_vm2  ;;  %vm2128_vm6 = vcmask 1040384   ;;  %vm2664_vm8 = vcmask 261120   ;;  %vm2761_vm9 = vcmask 523264   ;;  %vm2826_vm10 = vcmask 785408   ;;  %s8839_s30 = smov [#allocation4]  }
  0x87   :  { %12901 = vst [vmem:[#allocation8_spill] sm:$0xff] %v9281_v48  ;;  %vm10211_vm7 = vmand %vm2128_vm6, %vm1879_vm5  ;;  %vm4099_vm11 = vcmask 1046528   ;;  %vm4485_vm12 = vcmask 516096   ;;  %vm4499_vm13 = vcmask 1040896   ;;  %vm8838_vm14 = vmmov 0   ;;  %s7602_s11 = sshll.u32 %s8839_s30, 4  ;;  %s7603_s11 = int_to_ptr.vmem [resolvable:$true] %s7602_s11 }
  0x88   :  { %v9287_v51 = vpop.permute.xlu1 %1485  ;;  %vm7594_vm15 = vcmask 74752   ;;  %s8810_s12 = scalar_lea.vmem %s7603_s11, 32  ;;  %p8815_p1 = scmp.lt.s32.totalorder %s7603_s11, %s7603_s11 }
  0x89   :  { %12904 = vst [vmem:[#allocation11_spill] sm:$0xff] %v9287_v51  ;;  %p8811_p0 = scmp.ne.s32.totalorder %s7603_s11, %s8810_s12  ;;  %p8816_p2 = scmp.lt.s32.totalorder %s8810_s12, %s8810_s12 }
  0x8a   :  { %v9285_v50 = vpop.permute.xlu0 %1500 }
  0x8b   :  { %12903 = vst [vmem:[#allocation10_spill] sm:$0xff] %v9285_v50  ;;  %p8817_p3 = por %p8816_p2, %p8815_p1 }
  0x8c   :  { %v9296_v54 = vpop.permute.xlu1 %1495 }
  0x8d   :  { %12906 = vst [vmem:[#allocation13_spill] sm:$0xff] %v9296_v54  ;;  %p8818_p4 = pnand %p8817_p3, %p8811_p0 }
  0x8e   :  { %v9289_v52 = vpop.permute.xlu0 %1510 }
  0x8f   :  { %12905 = vst [vmem:[#allocation12_spill] sm:$0xff] %v9289_v52 }
  0x90   :  { %v9307_v62 = vpop.permute.xlu1 %1505 }
  0x91   :  { %12908 = vst [vmem:[#allocation15_spill] sm:$0xff] %v9307_v62 }
  0x92   :  { %v9298_v56 = vpop.permute.xlu0 %1520 }
  0x93   :  { %12907 = vst [vmem:[#allocation14_spill] sm:$0xff] %v9298_v56 }
  0x94   :  { %v9328_v8 = vpop.permute.xlu1 %1515 }
  0x95   :  { %12910 = vst [vmem:[#allocation17_spill] sm:$0xff] %v9328_v8 }
  0x96   :  { %v9315_v1 = vpop.permute.xlu0 %1530 }
  0x97   :  { %12909 = vst [vmem:[#allocation16_spill] sm:$0xff] %v9315_v1 }
  0x98   :  { %v9353_v20 = vpop.permute.xlu1 %1525 }
  0x99   :  { %12912 = vst [vmem:[#allocation19_spill] sm:$0xff] %v9353_v20 }
  0x9a   :  { %v9337_v13 = vpop.permute.xlu0 %1540 }
  0x9b   :  { %12911 = vst [vmem:[#allocation18_spill] sm:$0xff] %v9337_v13 }
  0x9c   :  { %v9379_v32 = vpop.permute.xlu1 %1535 }
  0x9d   :  { %12914 = vst [vmem:[#allocation21_spill] sm:$0xff] %v9379_v32 }
  0x9e   :  { %v9363_v25 = vpop.permute.xlu0 %1550 }
  0x9f   :  { %12913 = vst [vmem:[#allocation20_spill] sm:$0xff] %v9363_v25 }
  0xa0   :  { %v9403_v42 = vpop.permute.xlu1 %1545 }
  0xa1   :  { %12916 = vst [vmem:[#allocation23_spill] sm:$0xff] %v9403_v42 }
  0xa2   :  { %v9387_v35 = vpop.permute.xlu0 %1560 }
  0xa3   :  { %12915 = vst [vmem:[#allocation22_spill] sm:$0xff] %v9387_v35 }
  0xcc   :  { %v8375_v55 = vpop.f32.mrf.mxu0 }
  0xcd   :  { %v9301_v57 = vadd.f32 %v8375_v55, %v9294_v53 }
  0xce   :  { %v376_v58 = vpop.f32.mrf.mxu0 }
  0xcf   :  { %v12837_v59 = vmax.f32 %v9301_v57, 0.0  ;;  %v9305_v60 = vadd.f32 %v9294_v53, %v376_v58 }
  0xd0   :  { %v8378_v61 = vpop.f32.mrf.mxu0 }
  0xd1   :  { %v9310_v63 = vadd.f32 %v8378_v61, %v9294_v53  ;;  %825 = vrot.lane.b32.xlu0 %v12837_v59, %s8834_s25  ;;  %v12833_v2 = vmax.f32 %v9305_v60, 0.0  ;;  %v9413_v61 = vpop.permute.xlu0 %1570 }
  0xd2   :  { %v386_v0 = vpop.f32.mrf.mxu0  ;;  %12917 = vst [vmem:[#allocation24_spill] sm:$0xff] %v9413_v61 }
  0xd3   :  { %v12835_v4 = vmax.f32 %v9310_v63, 0.0  ;;  %v9320_v5 = vadd.f32 %v9294_v53, %v386_v0 }
  0xd4   :  { %v8381_v6 = vpop.f32.mrf.mxu0 }
  0xd5   :  { %829 = vrot.lane.b32.xlu1 %v12835_v4, %s8834_s25  ;;  %823 = vrot.lane.b32.xlu0 %v12833_v2, %s8834_s25  ;;  %v12832_v9 = vmax.f32 %v9320_v5, 0.0  ;;  %v9332_v10 = vadd.f32 %v8381_v6, %v9294_v53 }
  0xd6   :  { %v396_v7 = vpop.f32.mrf.mxu0 }
  0xd7   :  { %v9335_v11 = vadd.f32 %v9294_v53, %v396_v7  ;;  %v12829_v17 = vmax.f32 %v9332_v10, 0.0 }
  0xd8   :  { %v8384_v12 = vpop.f32.mrf.mxu0 }
  0xd9   :  { %v12830_v14 = vmax.f32 %v9335_v11, 0.0  ;;  %v9341_v15 = vadd.f32 %v8384_v12, %v9294_v53  ;;  %827 = vrot.lane.b32.xlu1 %v12832_v9, %s8834_s25 }
  0xda   :  { %v406_v16 = vpop.f32.mrf.mxu0 }
  0xdb   :  { %v9348_v18 = vadd.f32 %v9294_v53, %v406_v16  ;;  %831 = vrot.lane.b32.xlu0 %v12830_v14, %s8834_s25  ;;  %v12825_v21 = vmax.f32 %v9341_v15, 0.0 }
  0xdc   :  { %v8387_v19 = vpop.f32.mrf.mxu0 }
  0xdd   :  { %v12827_v22 = vmax.f32 %v9348_v18, 0.0  ;;  %v9358_v23 = vadd.f32 %v8387_v19, %v9294_v53  ;;  %833 = vrot.lane.b32.xlu1 %v12829_v17, %s8834_s25 }
  0xde   :  { %v416_v24 = vpop.f32.mrf.mxu0 }
  0xdf   :  { %v9366_v26 = vadd.f32 %v9294_v53, %v416_v24  ;;  %835 = vrot.lane.b32.xlu0 %v12827_v22, %s8834_s25  ;;  %v12822_v28 = vmax.f32 %v9358_v23, 0.0  ;;  %v9429_v24 = vpop.permute.xlu1 %1555 }
  0xe0   :  { %v8390_v27 = vpop.f32.mrf.mxu0  ;;  %12918 = vst [vmem:[#allocation25_spill] sm:$0xff] %v9429_v24 }
  0xe1   :  { %v12824_v29 = vmax.f32 %v9366_v26, 0.0  ;;  %v9374_v30 = vadd.f32 %v8390_v27, %v9294_v53  ;;  %837 = vrot.lane.b32.xlu1 %v12825_v21, %s8834_s25 }
  0xe2   :  { %v426_v31 = vpop.f32.mrf.mxu0 }
  0xe3   :  { %v9382_v33 = vadd.f32 %v9294_v53, %v426_v31  ;;  %839 = vrot.lane.b32.xlu0 %v12824_v29, %s8834_s25  ;;  %v12819_v36 = vmax.f32 %v9374_v30, 0.0 }
  0xe4   :  { %v8393_v34 = vpop.f32.mrf.mxu0 }
  0xe5   :  { %v12821_v37 = vmax.f32 %v9382_v33, 0.0  ;;  %v9392_v38 = vadd.f32 %v8393_v34, %v9294_v53  ;;  %841 = vrot.lane.b32.xlu1 %v12822_v28, %s8834_s25  ;;  %v9437_v34 = vpop.permute.xlu0 %2275 }
  0xe6   :  { %v436_v39 = vpop.f32.mrf.mxu0  ;;  %12919 = vst [vmem:[#allocation26_spill] sm:$0xff] %v9437_v34 }
  0xe7   :  { %v9398_v40 = vadd.f32 %v9294_v53, %v436_v39  ;;  %843 = vrot.lane.b32.xlu0 %v12821_v37, %s8834_s25  ;;  %v12816_v43 = vmax.f32 %v9392_v38, 0.0 }
  0xe8   :  { %v8396_v41 = vpop.f32.mrf.mxu0 }
  0xe9   :  { %v12817_v44 = vmax.f32 %v9398_v40, 0.0  ;;  %v9408_v55 = vadd.f32 %v8396_v41, %v9294_v53  ;;  %845 = vrot.lane.b32.xlu1 %v12819_v36, %s8834_s25  ;;  %v9463_v36 = vpop.permute.xlu0 %1580 }
  0xea   :  { %v446_v58 = vpop.f32.mrf.mxu0  ;;  %12921 = vst [vmem:[#allocation28_spill] sm:$0xff] %v9463_v36 }
  0xeb   :  { %v9416_v0 = vadd.f32 %v9294_v53, %v446_v58  ;;  %847 = vrot.lane.b32.xlu0 %v12817_v44, %s8834_s25  ;;  %v12818_v7 = vmax.f32 %v9408_v55, 0.0 }
  0xec   :  { %v8399_v6 = vpop.f32.mrf.mxu0 }
  0xed   :  { %v12815_v12 = vmax.f32 %v9416_v0, 0.0  ;;  %v9424_v16 = vadd.f32 %v8399_v6, %v9294_v53  ;;  %849 = vrot.lane.b32.xlu1 %v12816_v43, %s8834_s25  ;;  %v9454_v43 = vpop.permute.xlu1 %1565  ;;  %v9488_v22 = vpop.permute.xlu0 %1590 }
  0xee   :  { %v456_v19 = vpop.f32.mrf.mxu0  ;;  %12920 = vst [vmem:[#allocation27_spill] sm:$0xff] %v9454_v43  ;;  %12923 = vst [vmem:[#allocation30_spill] sm:$0xff] %v9488_v22 }
  0xef   :  { %v9432_v27 = vadd.f32 %v9294_v53, %v456_v19  ;;  %851 = vrot.lane.b32.xlu0 %v12815_v12, %s8834_s25  ;;  %v12823_v39 = vmax.f32 %v9424_v16, 0.0 }
  0xf0   :  { %v8402_v31 = vpop.f32.mrf.mxu0 }
  0xf1   :  { %v12820_v41 = vmax.f32 %v9432_v27, 0.0  ;;  %853 = vrot.lane.b32.xlu1 %v12818_v7, %s8834_s25  ;;  %v9445_v58 = vadd.f32 %v8402_v31, %v9294_v53  ;;  %v9479_v29 = vpop.permute.xlu1 %1575  ;;  %v9513_v4 = vpop.permute.xlu0 %1600 }
  0xf2   :  { %v466_v6 = vpop.f32.mrf.mxu0  ;;  %12922 = vst [vmem:[#allocation29_spill] sm:$0xff] %v9479_v29  ;;  %12925 = vst [vmem:[#allocation32_spill] sm:$0xff] %v9513_v4 }
  0xf3   :  { %v12826_v19 = vmax.f32 %v9445_v58, 0.0  ;;  %855 = vrot.lane.b32.xlu0 %v12820_v41, %s8834_s25  ;;  %v9452_v3 = vadd.f32 %v9294_v53, %v466_v6 }
  0xf4   :  { %v8405_v12 = vpop.f32.mrf.mxu0 }
  0xf5   :  { %v12828_v44 = vmax.f32 %v9452_v3, 0.0  ;;  %857 = vrot.lane.b32.xlu1 %v12823_v39, %s8834_s25  ;;  %v9461_v31 = vadd.f32 %v8405_v12, %v9294_v53  ;;  %v9504_v9 = vpop.permute.xlu1 %1585 }
  0xf6   :  { %v476_v7 = vpop.f32.mrf.mxu0  ;;  %12924 = vst [vmem:[#allocation31_spill] sm:$0xff] %v9504_v9  ;;  %v9538_v9 = vpop.permute.xlu0 %1610 }
  0xf7   :  { %v12831_v41 = vmax.f32 %v9461_v31, 0.0  ;;  %861 = vrot.lane.b32.xlu0 %v12826_v19, %s8834_s25  ;;  %v9470_v6 = vadd.f32 %v9294_v53, %v476_v7  ;;  %12929 = vst [vmem:[#allocation34_spill] sm:$0xff] %v9538_v9 }
  0xf8   :  { %v8408_v37 = vpop.f32.mrf.mxu0 }
  0xf9   :  { %v12834_v28 = vmax.f32 %v9470_v6, 0.0  ;;  %859 = vrot.lane.b32.xlu1 %v12828_v44, %s8834_s25  ;;  %v9477_v12 = vadd.f32 %v8408_v37, %v9294_v53  ;;  %v9529_v4 = vpop.permute.xlu1 %1595 }
  0xfa   :  { %v486_v39 = vpop.f32.mrf.mxu0  ;;  %12927 = vst [vmem:[#allocation33_spill] sm:$0xff] %v9529_v4  ;;  %v9563_v36 = vpop.permute.xlu0 %1620 }
  0xfb   :  { %v12836_v21 = vmax.f32 %v9477_v12, 0.0  ;;  %865 = vrot.lane.b32.xlu0 %v12831_v41, %s8834_s25  ;;  %v9486_v7 = vadd.f32 %v9294_v53, %v486_v39  ;;  %12934 = vst [vmem:[#allocation36_spill] sm:$0xff] %v9563_v36 }
  0xfc   :  { %v8411_v19 = vpop.f32.mrf.mxu0 }
  0xfd   :  { %v12838_v44 = vmax.f32 %v9486_v7, 0.0  ;;  %863 = vrot.lane.b32.xlu1 %v12834_v28, %s8834_s25  ;;  %v9495_v37 = vadd.f32 %v8411_v19, %v9294_v53  ;;  %v9554_v29 = vpop.permute.xlu1 %1605 }
  0xfe   :  { %v496_v17 = vpop.f32.mrf.mxu0  ;;  %12932 = vst [vmem:[#allocation35_spill] sm:$0xff] %v9554_v29  ;;  %v9588_v35 = vpop.permute.xlu0 %1630 }
  0xff   :  { %v12839_v14 = vmax.f32 %v9495_v37, 0.0  ;;  %869 = vrot.lane.b32.xlu0 %v12836_v21, %s8834_s25  ;;  %v9502_v39 = vadd.f32 %v9294_v53, %v496_v17  ;;  %12939 = vst [vmem:[#allocation38_spill] sm:$0xff] %v9588_v35 }
 0x100   :  { %v8414_v41 = vpop.f32.mrf.mxu0 }
 0x101   :  { %867 = vrot.lane.b32.xlu1 %v12838_v44, %s8834_s25  ;;  %v9511_v19 = vadd.f32 %v8414_v41, %v9294_v53  ;;  %v12926_v44 = vmax.f32 %v9502_v39, 0.0  ;;  %v9579_v61 = vpop.permute.xlu1 %1615 }
 0x102   :  { %v506_v28 = vpop.f32.mrf.mxu0  ;;  %12937 = vst [vmem:[#allocation37_spill] sm:$0xff] %v9579_v61  ;;  %v9613_v42 = vpop.permute.xlu0 %1640 }
 0x103   :  { %873 = vrot.lane.b32.xlu0 %v12839_v14, %s8834_s25  ;;  %v9520_v17 = vadd.f32 %v9294_v53, %v506_v28  ;;  %v12928_v14 = vmax.f32 %v9511_v19, 0.0  ;;  %12944 = vst [vmem:[#allocation40_spill] sm:$0xff] %v9613_v42 }
 0x104   :  { %v8417_v59 = vpop.f32.mrf.mxu0 }
 0x105   :  { %871 = vrot.lane.b32.xlu1 %v12926_v44, %s8834_s25  ;;  %v9527_v41 = vadd.f32 %v8417_v59, %v9294_v53  ;;  %v12930_v59 = vmax.f32 %v9520_v17, 0.0  ;;  %v9604_v25 = vpop.permute.xlu1 %1625 }
 0x106   :  { %v516_v34 = vpop.f32.mrf.mxu0  ;;  %12942 = vst [vmem:[#allocation39_spill] sm:$0xff] %v9604_v25  ;;  %v9638_v1 = vpop.permute.xlu0 %1650 }
 0x107   :  { %877 = vrot.lane.b32.xlu0 %v12928_v14, %s8834_s25  ;;  %v9536_v28 = vadd.f32 %v9294_v53, %v516_v34  ;;  %v12931_v14 = vmax.f32 %v9527_v41, 0.0  ;;  %12949 = vst [vmem:[#allocation42_spill] sm:$0xff] %v9638_v1 }
 0x108   :  { %v8420_v2 = vpop.f32.mrf.mxu0 }
 0x109   :  { %875 = vrot.lane.b32.xlu1 %v12930_v59, %s8834_s25  ;;  %v9545_v4 = vadd.f32 %v8420_v2, %v9294_v53  ;;  %v12933_v59 = vmax.f32 %v9536_v28, 0.0  ;;  %v9629_v32 = vpop.permute.xlu1 %1635 }
 0x10a   :  { %v526_v21 = vpop.f32.mrf.mxu0  ;;  %12947 = vst [vmem:[#allocation41_spill] sm:$0xff] %v9629_v32  ;;  %v9663_v8 = vpop.permute.xlu0 %1660 }
 0x10b   :  { %881 = vrot.lane.b32.xlu0 %v12931_v14, %s8834_s25  ;;  %v9552_v34 = vadd.f32 %v9294_v53, %v526_v21  ;;  %v12935_v21 = vmax.f32 %v9545_v4, 0.0  ;;  %12954 = vst [vmem:[#allocation44_spill] sm:$0xff] %v9663_v8 }
 0x10c   :  { %v8423_v9 = vpop.f32.mrf.mxu0 }
 0x10d   :  { %879 = vrot.lane.b32.xlu1 %v12933_v59, %s8834_s25  ;;  %v9561_v2 = vadd.f32 %v8423_v9, %v9294_v53  ;;  %v12936_v59 = vmax.f32 %v9552_v34, 0.0  ;;  %v9654_v56 = vpop.permute.xlu1 %1645 }
 0x10e   :  { %v536_v22 = vpop.f32.mrf.mxu0  ;;  %12952 = vst [vmem:[#allocation43_spill] sm:$0xff] %v9654_v56  ;;  %v9688_v50 = vpop.permute.xlu0 %1670 }
 0x10f   :  { %885 = vrot.lane.b32.xlu0 %v12935_v21, %s8834_s25  ;;  %v9570_v29 = vadd.f32 %v9294_v53, %v536_v22  ;;  %v12938_v21 = vmax.f32 %v9561_v2, 0.0  ;;  %12959 = vst [vmem:[#allocation46_spill] sm:$0xff] %v9688_v50 }
 0x110   :  { %v8426_v44 = vpop.f32.mrf.mxu0 }
 0x111   :  { %883 = vrot.lane.b32.xlu1 %v12936_v59, %s8834_s25  ;;  %v9577_v9 = vadd.f32 %v8426_v44, %v9294_v53  ;;  %v12940_v44 = vmax.f32 %v9570_v29, 0.0  ;;  %v9679_v62 = vpop.permute.xlu1 %1655 }
 0x112   :  { %v546_v36 = vpop.f32.mrf.mxu0  ;;  %12957 = vst [vmem:[#allocation45_spill] sm:$0xff] %v9679_v62  ;;  %v9713_v51 = vpop.permute.xlu0 %1680 }
 0x113   :  { %889 = vrot.lane.b32.xlu0 %v12938_v21, %s8834_s25  ;;  %v9586_v22 = vadd.f32 %v9294_v53, %v546_v36  ;;  %v12941_v21 = vmax.f32 %v9577_v9, 0.0  ;;  %12967 = vst [vmem:[#allocation51_spill] sm:$0xff] %v9713_v51 }
 0x114   :  { %v8429_v43 = vpop.f32.mrf.mxu0 }
 0x115   :  { %887 = vrot.lane.b32.xlu1 %v12940_v44, %s8834_s25  ;;  %v9595_v61 = vadd.f32 %v8429_v43, %v9294_v53  ;;  %v12943_v44 = vmax.f32 %v9586_v22, 0.0  ;;  %v9704_v48 = vpop.permute.xlu1 %1665 }
 0x116   :  { %v556_v14 = vpop.f32.mrf.mxu0  ;;  %12964 = vst [vmem:[#allocation49_spill] sm:$0xff] %v9704_v48  ;;  %v9738_v49 = vpop.permute.xlu0 %1690 }
 0x117   :  { %893 = vrot.lane.b32.xlu0 %v12941_v21, %s8834_s25  ;;  %v9602_v36 = vadd.f32 %v9294_v53, %v556_v14  ;;  %v12945_v14 = vmax.f32 %v9595_v61, 0.0  ;;  %12974 = vst [vmem:[#allocation55_spill] sm:$0xff] %v9738_v49 }
 0x118   :  { %v8432_v35 = vpop.f32.mrf.mxu0 }
 0x119   :  { %891 = vrot.lane.b32.xlu1 %v12943_v44, %s8834_s25  ;;  %v9611_v43 = vadd.f32 %v8432_v35, %v9294_v53  ;;  %v12946_v44 = vmax.f32 %v9602_v36, 0.0  ;;  %v9729_v46 = vpop.permute.xlu1 %1675 }
 0x11a   :  { %v566_v24 = vpop.f32.mrf.mxu0 }
 0x11b   :  { %897 = vrot.lane.b32.xlu0 %v12945_v14, %s8834_s25  ;;  %v9620_v25 = vadd.f32 %v9294_v53, %v566_v24  ;;  %v12948_v14 = vmax.f32 %v9611_v43, 0.0 }
 0x11c   :  { %v8435_v59 = vpop.f32.mrf.mxu0 }
 0x11d   :  { %895 = vrot.lane.b32.xlu1 %v12946_v44, %s8834_s25  ;;  %v9627_v35 = vadd.f32 %v8435_v59, %v9294_v53  ;;  %v12950_v59 = vmax.f32 %v9620_v25, 0.0 }
 0x11e   :  { %v576_v42 = vpop.f32.mrf.mxu0 }
 0x11f   :  { %901 = vrot.lane.b32.xlu0 %v12948_v14, %s8834_s25  ;;  %v9636_v24 = vadd.f32 %v9294_v53, %v576_v42  ;;  %v12951_v14 = vmax.f32 %v9627_v35, 0.0 }
 0x120   :  { %v8438_v13 = vpop.f32.mrf.mxu0 }
 0x121   :  { %899 = vrot.lane.b32.xlu1 %v12950_v59, %s8834_s25  ;;  %v9645_v32 = vadd.f32 %v8438_v13, %v9294_v53  ;;  %v12953_v59 = vmax.f32 %v9636_v24, 0.0 }
 0x122   :  { %v586_v21 = vpop.f32.mrf.mxu0 }
 0x123   :  { %905 = vrot.lane.b32.xlu0 %v12951_v14, %s8834_s25  ;;  %v9652_v42 = vadd.f32 %v9294_v53, %v586_v21  ;;  %v12955_v21 = vmax.f32 %v9645_v32, 0.0 }
 0x124   :  { %v8441_v1 = vpop.f32.mrf.mxu0 }
 0x125   :  { %903 = vrot.lane.b32.xlu1 %v12953_v59, %s8834_s25  ;;  %v9661_v13 = vadd.f32 %v8441_v1, %v9294_v53  ;;  %v12956_v59 = vmax.f32 %v9652_v42, 0.0 }
 0x126   :  { %v596_v20 = vpop.f32.mrf.mxu0 }
 0x127   :  { %909 = vrot.lane.b32.xlu0 %v12955_v21, %s8834_s25  ;;  %v9670_v56 = vadd.f32 %v9294_v53, %v596_v20  ;;  %v12958_v21 = vmax.f32 %v9661_v13, 0.0 }
 0x128   :  { %v8444_v44 = vpop.f32.mrf.mxu0 }
 0x129   :  { %907 = vrot.lane.b32.xlu1 %v12956_v59, %s8834_s25  ;;  %v9677_v1 = vadd.f32 %v8444_v44, %v9294_v53  ;;  %v12960_v44 = vmax.f32 %v9670_v56, 0.0 }
 0x12a   :  { %v606_v8 = vpop.f32.mrf.mxu0 }
 0x12b   :  { %913 = vrot.lane.b32.xlu0 %v12958_v21, %s8834_s25  ;;  %v9686_v20 = vadd.f32 %v9294_v53, %v606_v8  ;;  %v12962_v21 = vmax.f32 %v9677_v1, 0.0 }
 0x12c   :  { %v8447_v52 = vpop.f32.mrf.mxu0 }
 0x12d   :  { %911 = vrot.lane.b32.xlu1 %v12960_v44, %s8834_s25  ;;  %v9695_v62 = vadd.f32 %v8447_v52, %v9294_v53  ;;  %v12965_v44 = vmax.f32 %v9686_v20, 0.0 }
 0x12e   :  { %v616_v14 = vpop.f32.mrf.mxu0 }
 0x12f   :  { %12961 = vst [vmem:[#allocation47_spill] sm:$0xff] %v9695_v62  ;;  %917 = vrot.lane.b32.xlu0 %v12962_v21, %s8834_s25  ;;  %v9702_v8 = vadd.f32 %v9294_v53, %v616_v14  ;;  %v12968_v14 = vmax.f32 %v9695_v62, 0.0 }
 0x130   :  { %v8450_v50 = vpop.f32.mrf.mxu0 }
 0x131   :  { %12963 = vst [vmem:[#allocation48_spill] sm:$0xff] %v9702_v8  ;;  %915 = vrot.lane.b32.xlu1 %v12965_v44, %s8834_s25  ;;  %v9711_v52 = vadd.f32 %v8450_v50, %v9294_v53  ;;  %v12970_v44 = vmax.f32 %v9702_v8, 0.0 }
 0x132   :  { %v626_v54 = vpop.f32.mrf.mxu0 }
 0x133   :  { %12966 = vst [vmem:[#allocation50_spill] sm:$0xff] %v9711_v52  ;;  %921 = vrot.lane.b32.xlu0 %v12968_v14, %s8834_s25  ;;  %v9720_v48 = vadd.f32 %v9294_v53, %v626_v54  ;;  %v12972_v14 = vmax.f32 %v9711_v52, 0.0 }
 0x134   :  { %v8453_v59 = vpop.f32.mrf.mxu0 }
 0x135   :  { %12969 = vst [vmem:[#allocation52_spill] sm:$0xff] %v9720_v48  ;;  %919 = vrot.lane.b32.xlu1 %v12970_v44, %s8834_s25  ;;  %v9727_v50 = vadd.f32 %v8453_v59, %v9294_v53  ;;  %v12975_v59 = vmax.f32 %v9720_v48, 0.0  ;;  %v9747_v44 = vpop.permute.xlu1 %1685 }
 0x136   :  { %v636_v51 = vpop.f32.mrf.mxu0  ;;  %12976 = vst [vmem:[#allocation56_spill] sm:$0xff] %v9747_v44  ;;  %v13047_v44 = vld [vmem:[#allocation10_spill] sm:$0xff] }
 0x137   :  { %12971 = vst [vmem:[#allocation53_spill] sm:$0xff] %v9727_v50  ;;  %v12842_v21 = vmax.f32 %v9727_v50, 0.0  ;;  %925 = vrot.lane.b32.xlu0 %v12972_v14, %s8834_s25  ;;  %v9736_v54 = vadd.f32 %v9294_v53, %v636_v51  ;;  %v91_v51 = vld [vmem:[%s12802_s0 + $0x1b0] sm:$0xff]  ;;  %v92_v53 = vld [vmem:[%s12802_s0 + $0x1b8] sm:$0xff]  ;;  %v9759_v14 = vpop.permute.xlu0 %1700 }
 0x138   :  { %8454 = vmatprep.mubr.msk.f32.mxu0 %vm113_vm1, %v91_v51  ;;  %12977 = vst [vmem:[#allocation57_spill] sm:$0xff] %v9759_v14 }
 0x139   :  { %12973 = vst [vmem:[#allocation54_spill] sm:$0xff] %v9736_v54  ;;  %v12841_v8 = vmax.f32 %v9736_v54, 0.0  ;;  %923 = vrot.lane.b32.xlu1 %v12975_v59, %s8834_s25  ;;  %8455 = vmatmul.mubr.msk.f32.gmra.mxu0 %vm113_vm1, %v92_v53  ;;  %v93_v59 = vld [vmem:[%s12802_s0 + $0x1c0] sm:$0xff]  ;;  %v12979_v54 = vmax.f32 %v9301_v57, 0.0  ;;  %v95_v53 = vld [vmem:[%s12802_s0 + $0x1d0] sm:$0xff]  ;;  %v12980_v57 = vmax.f32 %v9310_v63, 0.0 }
 0x13a   :  { %8457 = vmatprep.mubr.msk.f32.mxu0 %vm113_vm1, %v93_v59  ;;  %v96_v59 = vld [vmem:[%s12802_s0 + $0x1d8] sm:$0xff]  ;;  %v98_v63 = vld [vmem:[%s12802_s0 + $0x1e8] sm:$0xff] }
 0x13b   :  { %929 = vrot.lane.b32.xlu0 %v12842_v21, %s8834_s25  ;;  %v9769_v21 = vpop.permute.xlu1 %1695 }
 0x13c   :  { %12978 = vst [vmem:[#allocation58_spill] sm:$0xff] %v9769_v21 }
 0x13d   :  { %927 = vrot.lane.b32.xlu1 %v12841_v8, %s8834_s25  ;;  %v94_v8 = vld [vmem:[%s12802_s0 + $0x1c8] sm:$0xff] }
 0x13e   :  { %8458 = vmatmul.mubr.msk.f32.gmra.mxu0 %vm113_vm1, %v94_v8 }
 0x13f   :  { %8460 = vmatprep.mubr.msk.f32.mxu0 %vm113_vm1, %v95_v53  ;;  %v97_v53 = vld [vmem:[%s12802_s0 + $0x1e0] sm:$0xff] }
 0x142   :  { %8461 = vmatmul.mubr.msk.f32.gmra.mxu0 %vm113_vm1, %v96_v59  ;;  %v12982_v59 = vmax.f32 %v9320_v5, 0.0  ;;  %v100_v5 = vld [vmem:[%s12802_s0 + $0x1f8] sm:$0xff] }
 0x143   :  { %v826_v51 = vpop.permute.xlu0 %825  ;;  %8463 = vmatprep.mubr.msk.f32.mxu0 %vm113_vm1, %v97_v53 }
 0x144   :  { %v9774_v50 = vmax.f32 %v12979_v54, %v826_v51  ;;  %v12981_v51 = vmax.f32 %v9305_v60, 0.0 }
 0x146   :  { %1145 = vrot.lane.b32.xlu0 %v9774_v50, %s8835_s17  ;;  %8464 = vmatmul.mubr.msk.f32.gmra.mxu0 %vm113_vm1, %v98_v63  ;;  %v8580_v63 = vld [vmem:[%s12806_s4 + $0x80] sm:$0xff]  }
 0x147   :  { %v830_v48 = vpop.permute.xlu1 %829  ;;  %v824_v8 = vpop.permute.xlu0 %823 }
 0x148   :  { %v9788_v54 = vmax.f32 %v12980_v57, %v830_v48  ;;  %v9792_v52 = vmax.f32 %v12981_v51, %v824_v8  ;;  %v8579_v48 = vld [vmem:[%s12806_s4 + $0x88] sm:$0xff]   ;;  %v99_v51 = vld [vmem:[%s12802_s0 + $0x1f0] sm:$0xff] }
 0x149   :  { %8469 = vmatprep.subr.bf16.mxu0 %v8579_v48  ;;  %8466 = vmatprep.mubr.msk.f32.mxu0 %vm113_vm1, %v99_v51 }
 0x14a   :  { %1149 = vrot.lane.b32.xlu0 %v9788_v54, %s8835_s17  ;;  %1143 = vrot.lane.b32.xlu1 %v9792_v52, %s8835_s17 }
 0x14b   :  { %v828_v60 = vpop.permute.xlu1 %827  ;;  %8470 = vmatpush3.bf16.msra.mxu0 %v8579_v48  ;;  %v12983_v48 = vmax.f32 %v9335_v11, 0.0  ;;  %v12985_v11 = vmax.f32 %v9348_v18, 0.0  ;;  %v12988_v18 = vmax.f32 %v9358_v23, 0.0 }
 0x14c   :  { %v9810_v8 = vmax.f32 %v12982_v59, %v828_v60  ;;  %v12984_v59 = vmax.f32 %v9332_v10, 0.0  ;;  %8467 = vmatmul.mubr.msk.f32.gmra.mxu0 %vm113_vm1, %v100_v5  ;;  %8471 = vmatprep.subr.bf16.mxu0 %v8580_v63  ;;  %v12986_v10 = vmax.f32 %v9341_v15, 0.0 }
 0x14d   :  { %v832_v57 = vpop.permute.xlu0 %831 }
 0x14e   :  { %1147 = vrot.lane.b32.xlu1 %v9810_v8, %s8835_s17  ;;  %v9827_v60 = vmax.f32 %v12983_v48, %v832_v57 }
 0x14f   :  { %v834_v53 = vpop.permute.xlu1 %833  ;;  %8472 = vmatpush3.bf16.msra.mxu0 %v8580_v63 }
 0x150   :  { %v9831_v62 = vmax.f32 %v12984_v59, %v834_v53  ;;  %v12987_v59 = vmax.f32 %v9366_v26, 0.0  ;;  %v12990_v26 = vmax.f32 %v9374_v30, 0.0 }
 0x151   :  { %v836_v51 = vpop.permute.xlu0 %835 }
 0x152   :  { %1153 = vrot.lane.b32.xlu0 %v9831_v62, %s8835_s17  ;;  %1151 = vrot.lane.b32.xlu1 %v9827_v60, %s8835_s17  ;;  %v9840_v57 = vmax.f32 %v12985_v11, %v836_v51 }
 0x153   :  { %v838_v14 = vpop.permute.xlu1 %837 }
 0x154   :  { %v9844_v53 = vmax.f32 %v12986_v10, %v838_v14  ;;  %v12989_v14 = vmax.f32 %v9382_v33, 0.0  ;;  %v12992_v33 = vmax.f32 %v9392_v38, 0.0 }
 0x155   :  { %v840_v48 = vpop.permute.xlu0 %839 }
 0x156   :  { %1157 = vrot.lane.b32.xlu0 %v9844_v53, %s8835_s17  ;;  %1155 = vrot.lane.b32.xlu1 %v9840_v57, %s8835_s17  ;;  %v9852_v21 = vmax.f32 %v12987_v59, %v840_v48 }
 0x157   :  { %v842_v5 = vpop.permute.xlu1 %841 }
 0x158   :  { %v9856_v63 = vmax.f32 %v12988_v18, %v842_v5  ;;  %v12991_v5 = vmax.f32 %v9398_v40, 0.0  ;;  %v12994_v40 = vmax.f32 %v9408_v55, 0.0 }
 0x159   :  { %v844_v51 = vpop.permute.xlu0 %843 }
 0x15a   :  { %1161 = vrot.lane.b32.xlu0 %v9856_v63, %s8835_s17  ;;  %1159 = vrot.lane.b32.xlu1 %v9852_v21, %s8835_s17  ;;  %v9864_v11 = vmax.f32 %v12989_v14, %v844_v51 }
 0x15b   :  { %v846_v15 = vpop.permute.xlu1 %845 }
 0x15c   :  { %v9868_v10 = vmax.f32 %v12990_v26, %v846_v15  ;;  %v12993_v15 = vmax.f32 %v9416_v0, 0.0  ;;  %v12996_v0 = vmax.f32 %v9424_v16, 0.0 }
 0x15d   :  { %v848_v48 = vpop.permute.xlu0 %847 }
 0x15e   :  { %1165 = vrot.lane.b32.xlu0 %v9868_v10, %s8835_s17  ;;  %1163 = vrot.lane.b32.xlu1 %v9864_v11, %s8835_s17  ;;  %v9876_v59 = vmax.f32 %v12991_v5, %v848_v48 }
 0x15f   :  { %v850_v23 = vpop.permute.xlu1 %849 }
 0x160   :  { %v9880_v18 = vmax.f32 %v12992_v33, %v850_v23  ;;  %v12995_v23 = vmax.f32 %v9432_v27, 0.0  ;;  %v12998_v27 = vmax.f32 %v9452_v3, 0.0 }
 0x161   :  { %v852_v51 = vpop.permute.xlu0 %851 }
 0x162   :  { %1169 = vrot.lane.b32.xlu0 %v9880_v18, %s8835_s17  ;;  %1167 = vrot.lane.b32.xlu1 %v9876_v59, %s8835_s17  ;;  %v9888_v14 = vmax.f32 %v12993_v15, %v852_v51 }
 0x163   :  { %v854_v30 = vpop.permute.xlu1 %853 }
 0x164   :  { %v9892_v26 = vmax.f32 %v12994_v40, %v854_v30  ;;  %v12997_v30 = vmax.f32 %v9445_v58, 0.0  ;;  %v13000_v58 = vmax.f32 %v9470_v6, 0.0 }
 0x165   :  { %v856_v48 = vpop.permute.xlu0 %855 }
 0x166   :  { %1173 = vrot.lane.b32.xlu0 %v9892_v26, %s8835_s17  ;;  %1171 = vrot.lane.b32.xlu1 %v9888_v14, %s8835_s17  ;;  %v9900_v5 = vmax.f32 %v12995_v23, %v856_v48 }
 0x167   :  { %v858_v38 = vpop.permute.xlu1 %857 }
 0x168   :  { %v9904_v33 = vmax.f32 %v12996_v0, %v858_v38  ;;  %v12999_v38 = vmax.f32 %v9461_v31, 0.0  ;;  %v13002_v31 = vmax.f32 %v9486_v7, 0.0 }
 0x169   :  { %v862_v51 = vpop.permute.xlu0 %861 }
 0x16a   :  { %1177 = vrot.lane.b32.xlu0 %v9904_v33, %s8835_s17  ;;  %1175 = vrot.lane.b32.xlu1 %v9900_v5, %s8835_s17  ;;  %v9912_v15 = vmax.f32 %v12997_v30, %v862_v51 }
 0x16b   :  { %v860_v55 = vpop.permute.xlu1 %859 }
 0x16c   :  { %v9916_v40 = vmax.f32 %v12998_v27, %v860_v55  ;;  %v13001_v55 = vmax.f32 %v9477_v12, 0.0  ;;  %v13004_v12 = vmax.f32 %v9502_v39, 0.0 }
 0x16d   :  { %v866_v48 = vpop.permute.xlu0 %865 }
 0x16e   :  { %1179 = vrot.lane.b32.xlu1 %v9916_v40, %s8835_s17  ;;  %1181 = vrot.lane.b32.xlu0 %v9912_v15, %s8835_s17  ;;  %v9924_v23 = vmax.f32 %v12999_v38, %v866_v48 }
 0x16f   :  { %v864_v16 = vpop.permute.xlu1 %863 }
 0x170   :  { %v9928_v0 = vmax.f32 %v13000_v58, %v864_v16  ;;  %v13003_v16 = vmax.f32 %v9495_v37, 0.0  ;;  %v13006_v37 = vmax.f32 %v9520_v17, 0.0 }
 0x171   :  { %v870_v51 = vpop.permute.xlu0 %869 }
 0x172   :  { %1183 = vrot.lane.b32.xlu0 %v9928_v0, %s8835_s17  ;;  %1185 = vrot.lane.b32.xlu1 %v9924_v23, %s8835_s17  ;;  %v9936_v30 = vmax.f32 %v13001_v55, %v870_v51 }
 0x173   :  { %v868_v3 = vpop.permute.xlu1 %867 }
 0x174   :  { %v9940_v27 = vmax.f32 %v13002_v31, %v868_v3  ;;  %v13005_v3 = vmax.f32 %v9511_v19, 0.0  ;;  %v13008_v19 = vmax.f32 %v9536_v28, 0.0 }
 0x175   :  { %v874_v48 = vpop.permute.xlu0 %873 }
 0x176   :  { %1187 = vrot.lane.b32.xlu0 %v9940_v27, %s8835_s17  ;;  %1189 = vrot.lane.b32.xlu1 %v9936_v30, %s8835_s17  ;;  %v9948_v38 = vmax.f32 %v13003_v16, %v874_v48 }
 0x177   :  { %v872_v6 = vpop.permute.xlu1 %871 }
 0x178   :  { %v9952_v58 = vmax.f32 %v13004_v12, %v872_v6  ;;  %v13007_v6 = vmax.f32 %v9527_v41, 0.0  ;;  %v13010_v41 = vmax.f32 %v9552_v34, 0.0  ;;  %v8581_v34 = vld [vmem:[%s12806_s4 + $0x38] sm:$0xff]  }
 0x179   :  { %v878_v51 = vpop.permute.xlu0 %877  ;;  %3394 = vmatpush1.bf16.msra.mxu1 %v8581_v34 }
 0x17a   :  { %1191 = vrot.lane.b32.xlu0 %v9952_v58, %s8835_s17  ;;  %1193 = vrot.lane.b32.xlu1 %v9948_v38, %s8835_s17  ;;  %v9960_v55 = vmax.f32 %v13005_v3, %v878_v51 }
 0x17b   :  { %v876_v7 = vpop.permute.xlu1 %875 }
 0x17c   :  { %v9964_v31 = vmax.f32 %v13006_v37, %v876_v7  ;;  %v13009_v7 = vmax.f32 %v9545_v4, 0.0  ;;  %v13012_v4 = vmax.f32 %v9570_v29, 0.0  ;;  %v13014_v29 = vmax.f32 %v9586_v22, 0.0 }
 0x17d   :  { %v882_v48 = vpop.permute.xlu0 %881 }
 0x17e   :  { %1195 = vrot.lane.b32.xlu0 %v9964_v31, %s8835_s17  ;;  %1197 = vrot.lane.b32.xlu1 %v9960_v55, %s8835_s17  ;;  %v9972_v16 = vmax.f32 %v13007_v6, %v882_v48 }
 0x17f   :  { %v880_v39 = vpop.permute.xlu1 %879 }
 0x180   :  { %v9976_v12 = vmax.f32 %v13008_v19, %v880_v39  ;;  %v13011_v39 = vmax.f32 %v9561_v2, 0.0  ;;  %v13013_v2 = vmax.f32 %v9577_v9, 0.0 }
 0x181   :  { %v886_v51 = vpop.permute.xlu0 %885 }
 0x182   :  { %1199 = vrot.lane.b32.xlu0 %v9976_v12, %s8835_s17  ;;  %1201 = vrot.lane.b32.xlu1 %v9972_v16, %s8835_s17  ;;  %v9984_v3 = vmax.f32 %v13009_v7, %v886_v51 }
 0x183   :  { %v884_v17 = vpop.permute.xlu1 %883 }
 0x184   :  { %v9988_v37 = vmax.f32 %v13010_v41, %v884_v17 }
 0x185   :  { %v890_v48 = vpop.permute.xlu0 %889 }
 0x186   :  { %1203 = vrot.lane.b32.xlu0 %v9988_v37, %s8835_s17  ;;  %1205 = vrot.lane.b32.xlu1 %v9984_v3, %s8835_s17  ;;  %v9996_v6 = vmax.f32 %v13011_v39, %v890_v48  ;;  %v13015_v48 = vmov 0   ;;  %v8582_v39 = vld [vmem:[%s12806_s4 + $0x30] sm:$0xff]  }
 0x187   :  { %v888_v28 = vpop.permute.xlu1 %887  ;;  %3395 = vmatprep.subr.bf16.mxu1 %v13015_v48 }
 0x188   :  { %v10000_v19 = vmax.f32 %v13012_v4, %v888_v28  ;;  %3396 = vmatpush1.bf16.msra.mxu1 %v8582_v39  ;;  %v13016_v4 = vmax.f32 %v9595_v61, 0.0 }
 0x189   :  { %v894_v51 = vpop.permute.xlu0 %893  ;;  %3397 = vmatprep.subr.bf16.mxu1 %v13015_v48 }
 0x18a   :  { %1207 = vrot.lane.b32.xlu0 %v10000_v19, %s8835_s17  ;;  %1209 = vrot.lane.b32.xlu1 %v9996_v6, %s8835_s17  ;;  %v10011_v7 = vmax.f32 %v13013_v2, %v894_v51  ;;  %v13017_v51 = vmax.f32 %v9602_v36, 0.0  ;;  %v8583_v2 = vld [vmem:[%s12806_s4 + $0x28] sm:$0xff]  }
 0x18b   :  { %v892_v17 = vpop.permute.xlu1 %891 }
 0x18c   :  { %v10015_v41 = vmax.f32 %v13014_v29, %v892_v17  ;;  %3398 = vmatpush1.bf16.msra.mxu1 %v8583_v2  ;;  %v13018_v29 = vmax.f32 %v9611_v43, 0.0 }
 0x18d   :  { %v898_v28 = vpop.permute.xlu0 %897  ;;  %3399 = vmatprep.subr.bf16.mxu1 %v13015_v48 }
 0x18e   :  { %1211 = vrot.lane.b32.xlu0 %v10015_v41, %s8835_s17  ;;  %1213 = vrot.lane.b32.xlu1 %v10011_v7, %s8835_s17  ;;  %v10027_v22 = vmax.f32 %v13016_v4, %v898_v28  ;;  %v13019_v28 = vmax.f32 %v9620_v25, 0.0  ;;  %v8584_v4 = vld [vmem:[%s12806_s4 + $0x20] sm:$0xff]  }
 0x18f   :  { %v896_v9 = vpop.permute.xlu1 %895 }
 0x190   :  { %v10031_v34 = vmax.f32 %v13017_v51, %v896_v9  ;;  %3400 = vmatpush1.bf16.msra.mxu1 %v8584_v4  ;;  %v13020_v51 = vmax.f32 %v9627_v35, 0.0 }
 0x191   :  { %v902_v17 = vpop.permute.xlu0 %901  ;;  %3401 = vmatprep.subr.bf16.mxu1 %v13015_v48 }
 0x192   :  { %1215 = vrot.lane.b32.xlu0 %v10031_v34, %s8835_s17  ;;  %1217 = vrot.lane.b32.xlu1 %v10027_v22, %s8835_s17  ;;  %v10043_v36 = vmax.f32 %v13018_v29, %v902_v17  ;;  %v13021_v17 = vmax.f32 %v9636_v24, 0.0  ;;  %v8585_v29 = vld [vmem:[%s12806_s4 + $0x18] sm:$0xff]  }
 0x193   :  { %v900_v61 = vpop.permute.xlu1 %899 }
 0x194   :  { %v10047_v39 = vmax.f32 %v13019_v28, %v900_v61  ;;  %3402 = vmatpush1.bf16.msra.mxu1 %v8585_v29  ;;  %v13022_v28 = vmax.f32 %v9645_v32, 0.0 }
 0x195   :  { %v906_v9 = vpop.permute.xlu0 %905  ;;  %3403 = vmatprep.subr.bf16.mxu1 %v13015_v48 }
 0x196   :  { %1219 = vrot.lane.b32.xlu0 %v10047_v39, %s8835_s17  ;;  %1221 = vrot.lane.b32.xlu1 %v10043_v36, %s8835_s17  ;;  %v10059_v25 = vmax.f32 %v13020_v51, %v906_v9  ;;  %v13023_v9 = vmax.f32 %v9652_v42, 0.0  ;;  %v8586_v51 = vld [vmem:[%s12806_s4 + $0x10] sm:$0xff]  }
 0x197   :  { %v904_v43 = vpop.permute.xlu1 %903 }
 0x198   :  { %v10063_v2 = vmax.f32 %v13021_v17, %v904_v43  ;;  %3404 = vmatpush1.bf16.msra.mxu1 %v8586_v51  ;;  %v13024_v17 = vmax.f32 %v9661_v13, 0.0 }
 0x199   :  { %v910_v61 = vpop.permute.xlu0 %909  ;;  %3405 = vmatprep.subr.bf16.mxu1 %v13015_v48 }
 0x19a   :  { %1223 = vrot.lane.b32.xlu0 %v10063_v2, %s8835_s17  ;;  %1225 = vrot.lane.b32.xlu1 %v10059_v25, %s8835_s17  ;;  %v10075_v24 = vmax.f32 %v13022_v28, %v910_v61  ;;  %v13026_v61 = vmax.f32 %v9670_v56, 0.0 }
 0x19b   :  { %v908_v35 = vpop.permute.xlu1 %907 }
 0x19c   :  { %v10079_v4 = vmax.f32 %v13023_v9, %v908_v35  ;;  %v8587_v35 = vld [vmem:[%s12806_s4 + $0x8] sm:$0xff]   ;;  %v13027_v9 = vmax.f32 %v9677_v1, 0.0  ;;  %v8589_v1 = vld [vmem:[%s12806_s4 + $0x78] sm:$0xff]  }
 0x19d   :  { %v914_v43 = vpop.permute.xlu0 %913  ;;  %3406 = vmatpush1.bf16.msra.mxu1 %v8587_v35 }
 0x19e   :  { %1227 = vrot.lane.b32.xlu0 %v10079_v4, %s8835_s17  ;;  %1229 = vrot.lane.b32.xlu1 %v10075_v24, %s8835_s17  ;;  %v10091_v42 = vmax.f32 %v13024_v17, %v914_v43  ;;  %v13029_v43 = vmax.f32 %v9686_v20, 0.0  ;;  %v8590_v17 = vld [vmem:[%s12806_s4 + $0x70] sm:$0xff]  }
 0x19f   :  { %v912_v32 = vpop.permute.xlu1 %911  ;;  %3407 = vmatprep.subr.bf16.mxu1 %v13015_v48 }
 0x1a0   :  { %13025 = vst [vmem:[#allocation59_spill] sm:$0xff] %v10091_v42  ;;  %v10095_v29 = vmax.f32 %v13026_v61, %v912_v32  ;;  %v8588_v32 = vld [vmem:[%s12806_s4] sm:$0xff]  }
 0x1a1   :  { %v918_v28 = vpop.permute.xlu0 %917  ;;  %3408 = vmatpush1.bf16.msra.mxu1 %v8588_v32 }
 0x1a2   :  { %1231 = vrot.lane.b32.xlu1 %v10095_v29, %s8835_s17  ;;  %1233 = vrot.lane.b32.xlu0 %v10091_v42, %s8835_s17  ;;  %v10107_v56 = vmax.f32 %v13027_v9, %v918_v28  ;;  %v8591_v28 = vld [vmem:[%s12806_s4 + $0x68] sm:$0xff]  }
 0x1a3   :  { %v916_v13 = vpop.permute.xlu1 %915  ;;  %3409 = vmatprep.subr.bf16.mxu1 %v13015_v48 }
 0x1a4   :  { %13028 = vst [vmem:[#allocation60_spill] sm:$0xff] %v10107_v56  ;;  %v10111_v51 = vmax.f32 %v13029_v43, %v916_v13  ;;  %v8592_v43 = vld [vmem:[%s12806_s4 + $0x60] sm:$0xff]  }
 0x1a5   :  { %v10124_v20 = vpop.permute.xlu0 %921  ;;  %3410 = vmatpush2.bf16.msra.mxu1 %v8589_v1 }
 0x1a6   :  { %13030 = vst [vmem:[#allocation61_spill] sm:$0xff] %v10111_v51  ;;  %1235 = vrot.lane.b32.xlu1 %v10111_v51, %s8835_s17  ;;  %1237 = vrot.lane.b32.xlu0 %v10107_v56, %s8835_s17  ;;  %13031 = vst [vmem:[#allocation62_spill] sm:$0xff] %v10124_v20  ;;  %v13039_v51 = vld [vmem:[#allocation9_spill] sm:$0xff] }
 0x1a7   :  { %v10130_v61 = vpop.permute.xlu1 %919  ;;  %3411 = vmatprep.subr.bf16.mxu1 %v13015_v48 }
 0x1a8   :  { %13032 = vst [vmem:[#allocation63_spill] sm:$0xff] %v10130_v61 }
 0x1a9   :  { %v10133_v35 = vpop.permute.xlu0 %925  ;;  %3412 = vmatpush2.bf16.msra.mxu1 %v8590_v17  ;;  %v8593_v17 = vld [vmem:[%s12806_s4 + $0x58] sm:$0xff]  }
 0x1aa   :  { %13033 = vst [vmem:[#allocation64_spill] sm:$0xff] %v10133_v35  ;;  %3413 = vmatprep.subr.bf16.mxu1 %v13015_v48 }
 0x1ab   :  { %v10139_v13 = vpop.permute.xlu1 %923 }
 0x1ac   :  { %13034 = vst [vmem:[#allocation65_spill] sm:$0xff] %v10139_v13 }
 0x1ad   :  { %3414 = vmatpush2.bf16.msra.mxu1 %v8591_v28  ;;  %v10141_v9 = vpop.permute.xlu0 %929 }
 0x1ae   :  { %13035 = vst [vmem:[#allocation66_spill] sm:$0xff] %v10141_v9  ;;  %3415 = vmatprep.subr.bf16.mxu1 %v13015_v48 }
 0x1af   :  { %v10147_v32 = vpop.permute.xlu1 %927 }
 0x1b0   :  { %13036 = vst [vmem:[#allocation67_spill] sm:$0xff] %v10147_v32 }
 0x1b1   :  { %3416 = vmatpush2.bf16.msra.mxu1 %v8592_v43  ;;  %v8594_v43 = vld [vmem:[%s12806_s4 + $0x50] sm:$0xff]  }
 0x1b2   :  { %3417 = vmatprep.subr.bf16.mxu1 %v13015_v48 }
 0x1b5   :  { %3418 = vmatpush2.bf16.msra.mxu1 %v8593_v17 }
 0x1b6   :  { %3419 = vmatprep.subr.bf16.mxu1 %v13015_v48 }
 0x1b8   :  { %v1146_v1 = vpop.permute.xlu0 %1145 }
 0x1b9   :  { %v1336_v28 = vmax.f32 %v9774_v50, %v1146_v1  ;;  %3420 = vmatpush2.bf16.msra.mxu1 %v8594_v43 }
 0x1ba   :  { %3421 = vmatprep.subr.bf16.mxu1 %v13015_v48 }
 0x1bb   :  { %v1784_v32 = vmul.f32 %v9279_v47, %v1336_v28  ;;  %v13040_v28 = vld [vmem:[#allocation11_spill] sm:$0xff] }
 0x1bc   :  { %v1144_v9 = vpop.permute.xlu1 %1143  ;;  %v1150_v13 = vpop.permute.xlu0 %1149 }
 0x1bd   :  { %v1335_v35 = vmax.f32 %v9792_v52, %v1144_v9  ;;  %v1338_v20 = vmax.f32 %v9788_v54, %v1150_v13  ;;  %v8595_v52 = vld [vmem:[%s12806_s4 + $0x48] sm:$0xff]   ;;  %v13038_v9 = vld [vmem:[#allocation7_spill] sm:$0xff] }
 0x1be   :  { %3422 = vmatpush2.bf16.msra.mxu1 %v8595_v52 }
 0x1bf   :  { %v1783_v61 = vmul.f32 %v9275_v45, %v1335_v35  ;;  %v1786_v17 = vmul.f32 %v13038_v9, %v1338_v20  ;;  %3423 = vmatprep.subr.bf16.mxu1 %v13015_v48  ;;  %v8596_v20 = vld [vmem:[%s12806_s4 + $0x40] sm:$0xff]  }
 0x1c0   :  { %v1148_v56 = vpop.permute.xlu1 %1147 }
 0x1c1   :  { %v10163_v50 = vpack.c.bf16 %v1784_v32, %v1783_v61  ;;  %v1337_v1 = vmax.f32 %v9810_v8, %v1148_v56 }
 0x1c2   :  { %3424 = vmatpush2.bf16.msra.mxu1 %v8596_v20 }
 0x1c3   :  { %13037 = vst [vmem:[#allocation68_spill] sm:$0xff] %v10163_v50  ;;  %v1785_v47 = vmul.f32 %v13039_v51, %v1337_v1  ;;  %2277 = vrot.lane.b32.xlu0 %v10163_v50, %s8833_s29  ;;  %v1881_v45 = vshrl.u32 %v10163_v50, 16  ;;  %v1884_v54 = vshll.u32 %v10163_v50, 16  ;;  %v13041_v1 = vld [vmem:[#allocation8_spill] sm:$0xff]  ;;  %v13046_v50 = vld [vmem:[#allocation13_spill] sm:$0xff] }
 0x1c4   :  { %v1152_v61 = vpop.permute.xlu1 %1151  ;;  %v1154_v35 = vpop.permute.xlu0 %1153 }
 0x1c5   :  { %v10176_v8 = vpack.c.bf16 %v1786_v17, %v1785_v47  ;;  %v1339_v56 = vmax.f32 %v9827_v60, %v1152_v61  ;;  %v1340_v51 = vmax.f32 %v9831_v62, %v1154_v35  ;;  %v2132_v13 = vrot.slane %v1884_v54, 1 }
 0x1c6   :  { %v1883_v32 = vrot.slane %v1881_v45, 7  ;;  %v13042_v60 = vmov 0 }
 0x1c7   :  { %v1787_v43 = vmul.f32 %v13040_v28, %v1339_v56  ;;  %v1788_v52 = vmul.f32 %v13041_v1, %v1340_v51  ;;  %2279 = vrot.lane.b32.xlu0 %v10176_v8, %s8833_s29  ;;  %2600 = vrot.lane.b32.xlu1 %v10176_v8, %s8834_s25  ;;  %v13043_v60 = vsel %vm10190_vm4, 4294967295, %v13042_v60  ;;  %v1891_v17 = vshll.u32 %v10176_v8, 16 }
 0x1c8   :  { %13044 = vst [vmem:[#allocation7_spill] sm:$0xff] %v13043_v60  ;;  %v1156_v62 = vpop.permute.xlu1 %1155  ;;  %v1158_v9 = vpop.permute.xlu0 %1157  ;;  %v1888_v47 = vshrl.u32 %v10176_v8, 16  ;;  %v2232_v51 = vsel %vm10190_vm4, 0, %v2132_v13  ;;  %v1886_v28 = vor.u32 %v1884_v54, %v1883_v32  ;;  %v2133_v54 = vor.u32 %v2132_v13, %v1881_v45  ;;  %v13052_v13 = vld [vmem:[#allocation15_spill] sm:$0xff] }
 0x1c9   :  { %v10196_v61 = vpack.c.bf16 %v1788_v52, %v1787_v43  ;;  %v1341_v35 = vmax.f32 %v9840_v57, %v1156_v62  ;;  %v1342_v56 = vmax.f32 %v9844_v53, %v1158_v9  ;;  %v2134_v1 = vrot.slane %v1891_v17, 1 }
 0x1ca   :  { %v10202_v48 = vrot.slane %v1888_v47, 7  ;;  %v13048_v57 = vmov 0 }
 0x1cb   :  { %13045 = vst [vmem:[#allocation9_spill] sm:$0xff] %v10196_v61  ;;  %v1789_v49 = vmul.f32 %v13046_v50, %v1341_v35  ;;  %v1790_v42 = vmul.f32 %v13047_v44, %v1342_v56  ;;  %2340 = vrot.lane.b32.xlu0 %v2232_v51, %s8835_s17  ;;  %2602 = vrot.lane.b32.xlu1 %v10196_v61, %s8834_s25  ;;  %v13049_v57 = vsel %vm10211_vm7, 4294967295, %v13048_v57  ;;  %v1899_v53 = vshll.u32 %v10196_v61, 16 }
 0x1cc   :  { %13050 = vst [vmem:[#allocation11_spill] sm:$0xff] %v13049_v57  ;;  %v1160_v20 = vpop.permute.xlu1 %1159  ;;  %v1162_v43 = vpop.permute.xlu0 %1161  ;;  %v2136_v50 = vor.u32 %v2134_v1, %v1888_v47  ;;  %v10222_v35 = vsel %vm10211_vm7, 0, %v1886_v28  ;;  %v2135_v56 = vsel %vm2131_vm2, %v2133_v54, %v2134_v1  ;;  %v1896_v51 = vshrl.u32 %v10196_v61, 16  ;;  %v13053_v47 = vld [vmem:[#allocation12_spill] sm:$0xff] }
 0x1cd   :  { %v10216_v52 = vpack.c.bf16 %v1790_v42, %v1789_v49  ;;  %v1343_v44 = vmax.f32 %v9852_v21, %v1160_v20  ;;  %v1344_v62 = vmax.f32 %v9856_v63, %v1162_v43  ;;  %v2137_v9 = vrot.slane %v1899_v53, 1 }
 0x1ce   :  { %v1893_v45 = vor.u32 %v1891_v17, %v10202_v48 }
 0x1cf   :  { %13051 = vst [vmem:[#allocation8_spill] sm:$0xff] %v10216_v52  ;;  %v1791_v60 = vmul.f32 %v13052_v13, %v1343_v44  ;;  %v1792_v49 = vmul.f32 %v13053_v47, %v1344_v62  ;;  %2405 = vrot.lane.b32.xlu0 %v10222_v35, %s8834_s25  ;;  %2470 = vrot.lane.b32.xlu1 %v2135_v56, %s8833_s29  ;;  %v12854_v63 = vshll.u32 %v10216_v52, 16  ;;  %v1904_v44 = vshrl.u32 %v10216_v52, 16  ;;  %v13056_v62 = vld [vmem:[#allocation17_spill] sm:$0xff]  ;;  %v13057_v13 = vld [vmem:[#allocation14_spill] sm:$0xff] }
 0x1d0   :  { %v10233_v21 = vsel %vm2131_vm2, %v2136_v50, %v2137_v9  ;;  %v1164_v42 = vpop.permute.xlu1 %1163  ;;  %v2139_v28 = vor.u32 %v2137_v9, %v1896_v51  ;;  %v1166_v17 = vpop.permute.xlu0 %1165  ;;  %v10245_v50 = vsel %vm1879_vm5, %v1883_v32, %v1893_v45 }
 0x1d1   :  { %8473 = vmatprep.mubr.msk.bf16.mxu0 %vm2664_vm8, %v10233_v21  ;;  %v10238_v1 = vpack.c.bf16 %v1792_v49, %v1791_v60  ;;  %v1345_v54 = vmax.f32 %v9864_v11, %v1164_v42  ;;  %v1346_v20 = vmax.f32 %v9868_v10, %v1166_v17  ;;  %v2140_v43 = vrot.slane %v12854_v63, 1  ;;  %13055 = vst [vmem:[#allocation10_spill] sm:$0xff] %v10245_v50  ;;  %v13060_v63 = vld [vmem:[#allocation16_spill] sm:$0xff] }
 0x1d3   :  { %13054 = vst [vmem:[#allocation13_spill] sm:$0xff] %v10238_v1  ;;  %v1793_v9 = vmul.f32 %v13056_v62, %v1345_v54  ;;  %v1794_v47 = vmul.f32 %v13057_v13, %v1346_v20  ;;  %2281 = vrot.lane.b32.xlu0 %v10196_v61, %s8833_s29  ;;  %2535 = vrot.lane.b32.xlu1 %v10245_v50, %s8835_s17  ;;  %v12856_v10 = vshll.u32 %v10238_v1, 16  ;;  %v12858_v54 = vshrl.u32 %v10238_v1, 16  ;;  %v13059_v62 = vld [vmem:[#allocation19_spill] sm:$0xff] }
 0x1d4   :  { %v10255_v11 = vsel %vm2131_vm2, %v2139_v28, %v2140_v43  ;;  %v1168_v60 = vpop.permute.xlu1 %1167  ;;  %v1170_v32 = vpop.permute.xlu0 %1169  ;;  %v2142_v45 = vor.u32 %v2140_v43, %v1904_v44  ;;  %v10269_v20 = vrot.slane %v1896_v51, 7 }
 0x1d5   :  { %8474 = vmatmul.mubr.msk.bf16.vlgmr.msra.gmra.mxu0 %vm2664_vm8, %v10255_v11  ;;  %v10262_v49 = vpack.c.bf16 %v1794_v47, %v1793_v9  ;;  %v1347_v42 = vmax.f32 %v9876_v59, %v1168_v60  ;;  %v1348_v17 = vmax.f32 %v9880_v18, %v1170_v32  ;;  %v2143_v28 = vrot.slane %v12856_v10, 1 }
 0x1d6   :  { %v1901_v32 = vor.u32 %v1899_v53, %v10269_v20 }
 0x1d7   :  { %13058 = vst [vmem:[#allocation15_spill] sm:$0xff] %v10262_v49  ;;  %v1795_v13 = vmul.f32 %v13059_v62, %v1347_v42  ;;  %v1796_v57 = vmul.f32 %v13060_v63, %v1348_v17  ;;  %2342 = vrot.lane.b32.xlu0 %v2135_v56, %s8835_s17  ;;  %2604 = vrot.lane.b32.xlu1 %v10216_v52, %s8834_s25  ;;  %v12857_v18 = vshll.u32 %v10262_v49, 16  ;;  %v13061_v42 = vld [vmem:[#allocation21_spill] sm:$0xff]  ;;  %v13062_v62 = vld [vmem:[#allocation18_spill] sm:$0xff] }
 0x1d8   :  { %v10277_v59 = vsel %vm2131_vm2, %v2142_v45, %v2143_v28  ;;  %v1172_v43 = vpop.permute.xlu1 %1171  ;;  %v1174_v51 = vpop.permute.xlu0 %1173  ;;  %v2145_v9 = vor.u32 %v2143_v28, %v12858_v54  ;;  %v12864_v45 = vshrl.u32 %v10262_v49, 16 }
 0x1d9   :  { %8477 = vmatprep.mubr.msk.bf16.mxu0 %vm2664_vm8, %v10277_v59  ;;  %v10284_v47 = vpack.c.bf16 %v1796_v57, %v1795_v13  ;;  %v1349_v56 = vmax.f32 %v9888_v14, %v1172_v43  ;;  %v1350_v63 = vmax.f32 %v9892_v26, %v1174_v51  ;;  %v2146_v60 = vrot.slane %v12857_v18, 1  ;;  %v13065_v18 = vld [vmem:[#allocation20_spill] sm:$0xff] }
 0x1db   :  { %v1797_v17 = vmul.f32 %v13061_v42, %v1349_v56  ;;  %v1798_v10 = vmul.f32 %v13062_v62, %v1350_v63  ;;  %2407 = vrot.lane.b32.xlu0 %v10245_v50, %s8834_s25  ;;  %2472 = vrot.lane.b32.xlu1 %v10233_v21, %s8833_s29  ;;  %v10299_v14 = vsel %vm2131_vm2, %v2145_v9, %v2146_v60  ;;  %v12859_v26 = vshll.u32 %v10284_v47, 16  ;;  %v13064_v42 = vld [vmem:[#allocation23_spill] sm:$0xff]  ;;  %v13078_v50 = vld [vmem:[#allocation32_spill] sm:$0xff] }
 0x1dc   :  { %v1176_v57 = vpop.permute.xlu1 %1175  ;;  %v1178_v53 = vpop.permute.xlu0 %1177  ;;  %v2148_v28 = vor.u32 %v2146_v60, %v12864_v45  ;;  %v10314_v56 = vsel %vm1879_vm5, %v10202_v48, %v1901_v32  ;;  %v12861_v63 = vshrl.u32 %v10284_v47, 16 }
 0x1dd   :  { %8478 = vmatmul.mubr.msk.bf16.gmra.mxu0 %vm2664_vm8, %v10299_v14  ;;  %v10306_v13 = vpack.c.bf16 %v1798_v10, %v1797_v17  ;;  %v1351_v43 = vmax.f32 %v9900_v5, %v1176_v57  ;;  %v1352_v51 = vmax.f32 %v9904_v33, %v1178_v53  ;;  %v2149_v9 = vrot.slane %v12859_v26, 1  ;;  %13063 = vst [vmem:[#allocation12_spill] sm:$0xff] %v10314_v56 }
 0x1df   :  { %v1799_v62 = vmul.f32 %v13064_v42, %v1351_v43  ;;  %v1800_v54 = vmul.f32 %v13065_v18, %v1352_v51  ;;  %2283 = vrot.lane.b32.xlu0 %v10216_v52, %s8833_s29  ;;  %2537 = vrot.lane.b32.xlu1 %v10314_v56, %s8835_s17  ;;  %v10324_v5 = vsel %vm2131_vm2, %v2148_v28, %v2149_v9  ;;  %v12860_v33 = vshll.u32 %v10306_v13, 16  ;;  %v13066_v43 = vld [vmem:[#allocation25_spill] sm:$0xff]  ;;  %v13067_v42 = vld [vmem:[#allocation22_spill] sm:$0xff] }
 0x1e0   :  { %v1180_v10 = vpop.permute.xlu1 %1179  ;;  %8481 = vmatprep.mubr.msk.bf16.mxu0 %vm2664_vm8, %v10324_v5  ;;  %v1182_v48 = vpop.permute.xlu0 %1181  ;;  %v2151_v60 = vor.u32 %v2149_v9, %v12861_v63  ;;  %v12863_v53 = vshrl.u32 %v10306_v13, 16  ;;  %v10340_v28 = vrot.slane %v1904_v44, 7 }
 0x1e1   :  { %v10331_v18 = vpack.c.bf16 %v1800_v54, %v1799_v62  ;;  %v1353_v32 = vmax.f32 %v9916_v40, %v1180_v10  ;;  %v1354_v17 = vmax.f32 %v9912_v15, %v1182_v48  ;;  %v2152_v57 = vrot.slane %v12860_v33, 1  ;;  %v13070_v33 = vld [vmem:[#allocation27_spill] sm:$0xff] }
 0x1e3   :  { %v1801_v51 = vmul.f32 %v13066_v43, %v1353_v32  ;;  %v1802_v26 = vmul.f32 %v13067_v42, %v1354_v17  ;;  %2344 = vrot.lane.b32.xlu0 %v10233_v21, %s8835_s17  ;;  %2606 = vrot.lane.b32.xlu1 %v10238_v1, %s8834_s25  ;;  %v10349_v15 = vsel %vm2131_vm2, %v2151_v60, %v2152_v57  ;;  %v12862_v40 = vshll.u32 %v10331_v18, 16  ;;  %v13069_v43 = vld [vmem:[#allocation24_spill] sm:$0xff] }
 0x1e4   :  { %v1186_v54 = vpop.permute.xlu1 %1185  ;;  %v1184_v44 = vpop.permute.xlu0 %1183  ;;  %v2154_v9 = vor.u32 %v2152_v57, %v12863_v53  ;;  %v13068_v60 = vshll.u32 %v10216_v52, 16  ;;  %v12865_v17 = vshrl.u32 %v10331_v18, 16  ;;  %v13073_v53 = vld [vmem:[#allocation29_spill] sm:$0xff]  ;;  %v13076_v52 = vld [vmem:[#allocation31_spill] sm:$0xff] }
 0x1e5   :  { %8482 = vmatmul.mubr.msk.bf16.gmra.mxu0 %vm2664_vm8, %v10349_v15  ;;  %v10356_v62 = vpack.c.bf16 %v1802_v26, %v1801_v51  ;;  %v1356_v21 = vmax.f32 %v9924_v23, %v1186_v54  ;;  %v1355_v10 = vmax.f32 %v9928_v0, %v1184_v44  ;;  %v2155_v48 = vrot.slane %v12862_v40, 1 }
 0x1e6   :  { %v1909_v32 = vor.u32 %v13068_v60, %v10340_v28 }
 0x1e7   :  { %v1804_v42 = vmul.f32 %v13069_v43, %v1356_v21  ;;  %v1803_v63 = vmul.f32 %v13070_v33, %v1355_v10  ;;  %2409 = vrot.lane.b32.xlu0 %v10314_v56, %s8834_s25  ;;  %2474 = vrot.lane.b32.xlu1 %v10255_v11, %s8833_s29  ;;  %v10373_v23 = vsel %vm2131_vm2, %v2154_v9, %v2155_v48  ;;  %v1955_v0 = vshll.u32 %v10356_v62, 16  ;;  %v13072_v43 = vld [vmem:[#allocation28_spill] sm:$0xff] }
 0x1e8   :  { %v1190_v26 = vpop.permute.xlu1 %1189  ;;  %8485 = vmatprep.mubr.msk.bf16.mxu0 %vm2664_vm8, %v10373_v23  ;;  %v1188_v57 = vpop.permute.xlu0 %1187  ;;  %v2157_v51 = vor.u32 %v2155_v48, %v12865_v17  ;;  %v1952_v33 = vshrl.u32 %v10356_v62, 16  ;;  %v10387_v10 = vsel %vm1879_vm5, %v10269_v20, %v1909_v32  ;;  %v13075_v17 = vld [vmem:[#allocation30_spill] sm:$0xff] }
 0x1e9   :  { %v10381_v54 = vpack.c.bf16 %v1804_v42, %v1803_v63  ;;  %v1358_v44 = vmax.f32 %v9936_v30, %v1190_v26  ;;  %v1357_v21 = vmax.f32 %v9940_v27, %v1188_v57  ;;  %v2158_v9 = vrot.slane %v1955_v0, 1  ;;  %13071 = vst [vmem:[#allocation17_spill] sm:$0xff] %v10387_v10 }
 0x1ea   :  { %v1954_v60 = vrot.slane %v1952_v33, 7 }
 0x1eb   :  { %v1806_v40 = vmul.f32 %v13072_v43, %v1358_v44  ;;  %v1805_v45 = vmul.f32 %v13073_v53, %v1357_v21  ;;  %2285 = vrot.lane.b32.xlu0 %v10238_v1, %s8833_s29  ;;  %2539 = vrot.lane.b32.xlu1 %v10387_v10, %s8835_s17  ;;  %v10396_v30 = vsel %vm2131_vm2, %v2157_v51, %v2158_v9  ;;  %v1963_v27 = vshll.u32 %v10381_v54, 16 }
 0x1ec   :  { %v1194_v63 = vpop.permute.xlu1 %1193  ;;  %v1192_v20 = vpop.permute.xlu0 %1191  ;;  %v2160_v48 = vor.u32 %v2158_v9, %v1952_v33  ;;  %v1960_v32 = vshrl.u32 %v10381_v54, 16  ;;  %v10402_v53 = vor.u32 %v1955_v0, %v1954_v60  ;;  %v13074_v44 = vshrl.u32 %v10238_v1, 16 }
 0x1ed   :  { %8486 = vmatmul.mubr.msk.bf16.gmra.mxu0 %vm2664_vm8, %v10396_v30  ;;  %v10404_v42 = vpack.c.bf16 %v1806_v40, %v1805_v45  ;;  %v1360_v26 = vmax.f32 %v9948_v38, %v1194_v63  ;;  %v1359_v57 = vmax.f32 %v9952_v58, %v1192_v20  ;;  %v2161_v51 = vrot.slane %v1963_v27, 1 }
 0x1ee   :  { %v10410_v21 = vrot.slane %v13074_v44, 7  ;;  %v1962_v43 = vrot.slane %v1960_v32, 7 }
 0x1ef   :  { %v1808_v56 = vmul.f32 %v13075_v17, %v1360_v26  ;;  %v1807_v33 = vmul.f32 %v13076_v52, %v1359_v57  ;;  %2346 = vrot.lane.b32.xlu0 %v10255_v11, %s8835_s17  ;;  %2608 = vrot.lane.b32.xlu1 %v10262_v49, %s8834_s25  ;;  %v10419_v38 = vsel %vm2131_vm2, %v2160_v48, %v2161_v51  ;;  %v1971_v58 = vshll.u32 %v10404_v42, 16 }
 0x1f0   :  { %v1198_v45 = vpop.permute.xlu1 %1197  ;;  %8489 = vmatprep.mubr.msk.bf16.mxu0 %vm2664_vm8, %v10419_v38  ;;  %v1196_v40 = vpop.permute.xlu0 %1195  ;;  %v2163_v0 = vor.u32 %v2161_v51, %v1960_v32  ;;  %v1968_v17 = vshrl.u32 %v10404_v42, 16  ;;  %v1965_v52 = vor.u32 %v1963_v27, %v1962_v43  ;;  %v13077_v48 = vshll.u32 %v10238_v1, 16  ;;  %v13079_v51 = vld [vmem:[#allocation33_spill] sm:$0xff] }
 0x1f1   :  { %v10425_v9 = vpack.c.bf16 %v1808_v56, %v1807_v33  ;;  %v1362_v11 = vmax.f32 %v9960_v55, %v1198_v45  ;;  %v1361_v63 = vmax.f32 %v9964_v31, %v1196_v40  ;;  %v2164_v20 = vrot.slane %v1971_v58, 1 }
 0x1f2   :  { %v1917_v26 = vor.u32 %v13077_v48, %v10410_v21  ;;  %v10433_v57 = vsel %vm1879_vm5, %v1954_v60, %v1965_v52  ;;  %v1970_v44 = vrot.slane %v1968_v17, 7 }
 0x1f3   :  { %v1810_v32 = vmul.f32 %v13078_v50, %v1362_v11  ;;  %v1809_v61 = vmul.f32 %v13079_v51, %v1361_v63  ;;  %2411 = vrot.lane.b32.xlu0 %v10387_v10, %s8834_s25  ;;  %2476 = vrot.lane.b32.xlu1 %v10277_v59, %s8833_s29  ;;  %v10442_v55 = vsel %vm2131_vm2, %v2163_v0, %v2164_v20  ;;  %v1979_v31 = vshll.u32 %v10425_v9, 16  ;;  %v13081_v51 = vld [vmem:[#allocation34_spill] sm:$0xff] }
 0x1f4   :  { %v1202_v56 = vpop.permute.xlu1 %1201  ;;  %v1200_v60 = vpop.permute.xlu0 %1199  ;;  %v2166_v27 = vor.u32 %v2164_v20, %v1968_v17  ;;  %v1976_v50 = vshrl.u32 %v10425_v9, 16  ;;  %v1973_v33 = vor.u32 %v1971_v58, %v1970_v44  ;;  %v10454_v0 = vsel %vm1879_vm5, %v10340_v28, %v1917_v26  ;;  %v13082_v20 = vld [vmem:[#allocation35_spill] sm:$0xff] }
 0x1f5   :  { %8490 = vmatmul.mubr.msk.bf16.gmra.mxu0 %vm2664_vm8, %v10442_v55  ;;  %v10448_v45 = vpack.c.bf16 %v1810_v32, %v1809_v61  ;;  %v1364_v40 = vmax.f32 %v9972_v16, %v1202_v56  ;;  %v1363_v52 = vmax.f32 %v9976_v12, %v1200_v60  ;;  %v2167_v11 = vrot.slane %v1979_v31, 1  ;;  %13080 = vst [vmem:[#allocation14_spill] sm:$0xff] %v10454_v0 }
 0x1f6   :  { %v10457_v63 = vsel %vm1879_vm5, %v1962_v43, %v1973_v33  ;;  %v1978_v48 = vrot.slane %v1976_v50, 7 }
 0x1f7   :  { %v1812_v17 = vmul.f32 %v13081_v51, %v1364_v40  ;;  %v1811_v10 = vmul.f32 %v13082_v20, %v1363_v52  ;;  %2287 = vrot.lane.b32.xlu0 %v10262_v49, %s8833_s29  ;;  %2541 = vrot.lane.b32.xlu1 %v10454_v0, %s8835_s17  ;;  %v10466_v16 = vsel %vm2131_vm2, %v2166_v27, %v2167_v11  ;;  %v1987_v12 = vshll.u32 %v10448_v45, 16  ;;  %v13084_v20 = vld [vmem:[#allocation36_spill] sm:$0xff] }
 0x1f8   :  { %v1206_v61 = vpop.permute.xlu1 %1205  ;;  %8493 = vmatprep.mubr.msk.bf16.mxu0 %vm2664_vm8, %v10466_v16  ;;  %v1204_v28 = vpop.permute.xlu0 %1203  ;;  %v2169_v43 = vor.u32 %v2167_v11, %v1976_v50  ;;  %v1984_v58 = vshrl.u32 %v10448_v45, 16  ;;  %v1981_v26 = vor.u32 %v1979_v31, %v1978_v48  ;;  %v13083_v27 = vshrl.u32 %v10262_v49, 16  ;;  %v13085_v11 = vld [vmem:[#allocation37_spill] sm:$0xff] }
 0x1f9   :  { %v10472_v32 = vpack.c.bf16 %v1812_v17, %v1811_v10  ;;  %v1366_v56 = vmax.f32 %v9984_v3, %v1206_v61  ;;  %v1365_v60 = vmax.f32 %v9988_v37, %v1204_v28  ;;  %v2170_v33 = vrot.slane %v1987_v12, 1 }
 0x1fa   :  { %v10478_v40 = vrot.slane %v13083_v27, 7  ;;  %v10481_v52 = vsel %vm1879_vm5, %v1970_v44, %v1981_v26  ;;  %v1986_v51 = vrot.slane %v1984_v58, 7 }
 0x1fb   :  { %v1814_v50 = vmul.f32 %v13084_v20, %v1366_v56  ;;  %v1813_v1 = vmul.f32 %v13085_v11, %v1365_v60  ;;  %2348 = vrot.lane.b32.xlu0 %v10277_v59, %s8835_s17  ;;  %2610 = vrot.lane.b32.xlu1 %v10284_v47, %s8834_s25  ;;  %v10490_v3 = vsel %vm2131_vm2, %v2169_v43, %v2170_v33  ;;  %v1995_v37 = vshll.u32 %v10472_v32, 16  ;;  %v13088_v11 = vld [vmem:[#allocation38_spill] sm:$0xff] }
 0x1fc   :  { %13086 = vst [vmem:[#allocation19_spill] sm:$0xff] %v10490_v3  ;;  %v1210_v10 = vpop.permute.xlu1 %1209  ;;  %v1208_v44 = vpop.permute.xlu0 %1207  ;;  %v2172_v31 = vor.u32 %v2170_v33, %v1984_v58  ;;  %v1992_v17 = vshrl.u32 %v10472_v32, 16  ;;  %v1989_v61 = vor.u32 %v1987_v12, %v1986_v51  ;;  %v13087_v43 = vshll.u32 %v10262_v49, 16  ;;  %v13089_v33 = vld [vmem:[#allocation39_spill] sm:$0xff] }
 0x1fd   :  { %8494 = vmatmul.mubr.msk.bf16.gmra.mxu0 %vm2664_vm8, %v10490_v3  ;;  %v10496_v28 = vpack.c.bf16 %v1814_v50, %v1813_v1  ;;  %v1368_v59 = vmax.f32 %v9996_v6, %v1210_v10  ;;  %v1367_v26 = vmax.f32 %v10000_v19, %v1208_v44  ;;  %v2173_v56 = vrot.slane %v1995_v37, 1 }
 0x1fe   :  { %v1925_v60 = vor.u32 %v13087_v43, %v10478_v40  ;;  %v10504_v27 = vsel %vm1879_vm5, %v1978_v48, %v1989_v61  ;;  %v1994_v20 = vrot.slane %v1992_v17, 7 }
 0x1ff   :  { %v1816_v58 = vmul.f32 %v13088_v11, %v1368_v59  ;;  %v1815_v3 = vmul.f32 %v13089_v33, %v1367_v26  ;;  %2413 = vrot.lane.b32.xlu0 %v10454_v0, %s8834_s25  ;;  %2478 = vrot.lane.b32.xlu1 %v10299_v14, %s8833_s29  ;;  %v10513_v6 = vsel %vm2131_vm2, %v2172_v31, %v2173_v56  ;;  %v2003_v19 = vshll.u32 %v10496_v28, 16  ;;  %v13090_v33 = vld [vmem:[#allocation40_spill] sm:$0xff] }
 0x200   :  { %v1214_v1 = vpop.permute.xlu1 %1213  ;;  %8497 = vmatprep.mubr.msk.bf16.mxu0 %vm2664_vm8, %v10513_v6  ;;  %v1212_v48 = vpop.permute.xlu0 %1211  ;;  %v2175_v12 = vor.u32 %v2173_v56, %v1992_v17  ;;  %v2000_v50 = vshrl.u32 %v10496_v28, 16  ;;  %v1997_v10 = vor.u32 %v1995_v37, %v1994_v20  ;;  %v10525_v31 = vsel %vm1879_vm5, %v10410_v21, %v1925_v60  ;;  %v13091_v56 = vld [vmem:[#allocation41_spill] sm:$0xff] }
 0x201   :  { %v10519_v44 = vpack.c.bf16 %v1816_v58, %v1815_v3  ;;  %v1370_v61 = vmax.f32 %v10011_v7, %v1214_v1  ;;  %v1369_v59 = vmax.f32 %v10015_v41, %v1212_v48  ;;  %v2176_v26 = vrot.slane %v2003_v19, 1 }
 0x202   :  { %v10528_v43 = vsel %vm1879_vm5, %v1986_v51, %v1997_v10  ;;  %v2002_v11 = vrot.slane %v2000_v50, 7 }
 0x203   :  { %v1818_v17 = vmul.f32 %v13090_v33, %v1370_v61  ;;  %v1817_v0 = vmul.f32 %v13091_v56, %v1369_v59  ;;  %2289 = vrot.lane.b32.xlu0 %v10284_v47, %s8833_s29  ;;  %2543 = vrot.lane.b32.xlu1 %v10525_v31, %s8835_s17  ;;  %v10537_v7 = vsel %vm2131_vm2, %v2175_v12, %v2176_v26  ;;  %v2011_v41 = vshll.u32 %v10519_v44, 16  ;;  %v13094_v56 = vld [vmem:[#allocation42_spill] sm:$0xff] }
 0x204   :  { %v1218_v21 = vpop.permute.xlu1 %1217  ;;  %v1216_v51 = vpop.permute.xlu0 %1215  ;;  %v2178_v3 = vor.u32 %v2176_v26, %v2000_v50  ;;  %v2008_v37 = vshrl.u32 %v10519_v44, 16  ;;  %v2005_v60 = vor.u32 %v2003_v19, %v2002_v11  ;;  %v13092_v12 = vshrl.u32 %v10284_v47, 16  ;;  %v13095_v26 = vld [vmem:[#allocation43_spill] sm:$0xff] }
 0x205   :  { %8498 = vmatmul.mubr.msk.bf16.gmra.mxu0 %vm2664_vm8, %v10537_v7  ;;  %v10543_v58 = vpack.c.bf16 %v1818_v17, %v1817_v0  ;;  %v1372_v1 = vmax.f32 %v10027_v22, %v1218_v21  ;;  %v1371_v48 = vmax.f32 %v10031_v34, %v1216_v51  ;;  %v2179_v10 = vrot.slane %v2011_v41, 1 }
 0x206   :  { %v10549_v61 = vrot.slane %v13092_v12, 7  ;;  %v10552_v59 = vsel %vm1879_vm5, %v1994_v20, %v2005_v60  ;;  %v2010_v33 = vrot.slane %v2008_v37, 7 }
 0x207   :  { %13093 = vst [vmem:[#allocation16_spill] sm:$0xff] %v10552_v59  ;;  %v1820_v50 = vmul.f32 %v13094_v56, %v1372_v1  ;;  %v1819_v49 = vmul.f32 %v13095_v26, %v1371_v48  ;;  %2350 = vrot.lane.b32.xlu0 %v10299_v14, %s8835_s17  ;;  %2612 = vrot.lane.b32.xlu1 %v10306_v13, %s8834_s25  ;;  %v2019_v34 = vshll.u32 %v10543_v58, 16  ;;  %v2016_v17 = vshrl.u32 %v10543_v58, 16  ;;  %v13098_v56 = vld [vmem:[#allocation44_spill] sm:$0xff] }
 0x208   :  { %v10561_v22 = vsel %vm2131_vm2, %v2178_v3, %v2179_v10  ;;  %v1222_v0 = vpop.permute.xlu1 %1221  ;;  %v1220_v20 = vpop.permute.xlu0 %1219  ;;  %v2181_v19 = vor.u32 %v2179_v10, %v2008_v37  ;;  %v13097_v3 = vshll.u32 %v10284_v47, 16  ;;  %v2013_v48 = vor.u32 %v2011_v41, %v2010_v33 }
 0x209   :  { %13096 = vst [vmem:[#allocation21_spill] sm:$0xff] %v10561_v22  ;;  %8501 = vmatprep.mubr.msk.bf16.mxu0 %vm2664_vm8, %v10561_v22  ;;  %v10567_v21 = vpack.c.bf16 %v1820_v50, %v1819_v49  ;;  %v1374_v14 = vmax.f32 %v10043_v36, %v1222_v0  ;;  %v1373_v51 = vmax.f32 %v10047_v39, %v1220_v20  ;;  %v2182_v60 = vrot.slane %v2019_v34, 1  ;;  %v13099_v22 = vld [vmem:[#allocation45_spill] sm:$0xff] }
 0x20a   :  { %v1933_v1 = vor.u32 %v13097_v3, %v10549_v61  ;;  %v2018_v12 = vrot.slane %v2016_v17, 7  ;;  %v10588_v50 = vsel %vm1879_vm5, %v2002_v11, %v2013_v48 }
 0x20b   :  { %v1822_v26 = vmul.f32 %v13098_v56, %v1374_v14  ;;  %v1821_v59 = vmul.f32 %v13099_v22, %v1373_v51  ;;  %2415 = vrot.lane.b32.xlu0 %v10525_v31, %s8834_s25  ;;  %2480 = vrot.lane.b32.xlu1 %v10324_v5, %s8833_s29  ;;  %v10581_v36 = vsel %vm2131_vm2, %v2181_v19, %v2182_v60  ;;  %v2027_v39 = vshll.u32 %v10567_v21, 16  ;;  %v13101_v56 = vld [vmem:[#allocation46_spill] sm:$0xff] }
 0x20c   :  { %13100 = vst [vmem:[#allocation18_spill] sm:$0xff] %v10581_v36  ;;  %v1226_v49 = vpop.permute.xlu1 %1225  ;;  %v1224_v41 = vpop.permute.xlu0 %1223  ;;  %v2184_v37 = vor.u32 %v2182_v60, %v2016_v17  ;;  %v2024_v10 = vshrl.u32 %v10567_v21, 16  ;;  %v10596_v14 = vsel %vm1879_vm5, %v10478_v40, %v1933_v1  ;;  %v2021_v51 = vor.u32 %v2019_v34, %v2018_v12  ;;  %v13102_v60 = vld [vmem:[#allocation49_spill] sm:$0xff] }
 0x20d   :  { %8502 = vmatmul.mubr.msk.bf16.gmra.mxu0 %vm2664_vm8, %v10581_v36  ;;  %v10590_v22 = vpack.c.bf16 %v1822_v26, %v1821_v59  ;;  %v1376_v0 = vmax.f32 %v10059_v25, %v1226_v49  ;;  %v1375_v20 = vmax.f32 %v10063_v2, %v1224_v41  ;;  %v2185_v19 = vrot.slane %v2027_v39, 1 }
 0x20e   :  { %v2026_v3 = vrot.slane %v2024_v10, 7  ;;  %v13104_v41 = vshrl.u32 %v10306_v13, 16 }
 0x20f   :  { %v1824_v17 = vmul.f32 %v13101_v56, %v1376_v0  ;;  %v1823_v36 = vmul.f32 %v13102_v60, %v1375_v20  ;;  %2291 = vrot.lane.b32.xlu0 %v10306_v13, %s8833_s29  ;;  %2545 = vrot.lane.b32.xlu1 %v10596_v14, %s8835_s17  ;;  %v10605_v25 = vsel %vm2131_vm2, %v2184_v37, %v2185_v19  ;;  %v2035_v2 = vshll.u32 %v10590_v22, 16  ;;  %v13105_v56 = vld [vmem:[#allocation51_spill] sm:$0xff] }
 0x210   :  { %v1230_v11 = vpop.permute.xlu1 %1229  ;;  %8505 = vmatprep.mubr.msk.bf16.mxu0 %vm2664_vm8, %v10605_v25  ;;  %v1228_v40 = vpop.permute.xlu0 %1227  ;;  %v2187_v59 = vor.u32 %v2185_v19, %v2024_v10  ;;  %v2032_v49 = vshrl.u32 %v10590_v22, 16  ;;  %v10617_v37 = vrot.slane %v13104_v41, 7  ;;  %v10620_v0 = vsel %vm1879_vm5, %v2010_v33, %v2021_v51  ;;  %v13108_v51 = vld [vmem:[#allocation59_spill] sm:$0xff] }
 0x211   :  { %v10610_v34 = vpack.c.bf16 %v1824_v17, %v1823_v36  ;;  %v1378_v1 = vmax.f32 %v10075_v24, %v1230_v11  ;;  %v1377_v48 = vmax.f32 %v10079_v4, %v1228_v40  ;;  %v2188_v26 = vrot.slane %v2035_v2, 1 }
 0x212   :  { %v2029_v20 = vor.u32 %v2027_v39, %v2026_v3  ;;  %v13109_v40 = vshll.u32 %v10306_v13, 16 }
 0x213   :  { %13103 = vst [vmem:[#allocation23_spill] sm:$0xff] %v10610_v34  ;;  %v1826_v60 = vmul.f32 %v13105_v56, %v1378_v1  ;;  %v1825_v36 = vmul.f32 %v9729_v46, %v1377_v48  ;;  %2352 = vrot.lane.b32.xlu0 %v10324_v5, %s8835_s17  ;;  %2614 = vrot.lane.b32.xlu1 %v10331_v18, %s8834_s25  ;;  %v2043_v4 = vshll.u32 %v10610_v34, 16  ;;  %v2040_v19 = vshrl.u32 %v10610_v34, 16  ;;  %v13111_v56 = vld [vmem:[#allocation56_spill] sm:$0xff] }
 0x214   :  { %v10629_v24 = vsel %vm2131_vm2, %v2187_v59, %v2188_v26  ;;  %v1232_v10 = vpop.permute.xlu1 %1231  ;;  %v1234_v33 = vpop.permute.xlu0 %1233  ;;  %v2190_v39 = vor.u32 %v2188_v26, %v2032_v49  ;;  %v1941_v59 = vor.u32 %v13109_v40, %v10617_v37  ;;  %v10643_v1 = vsel %vm1879_vm5, %v2018_v12, %v2029_v20 }
 0x215   :  { %13106 = vst [vmem:[#allocation20_spill] sm:$0xff] %v10629_v24  ;;  %8506 = vmatmul.mubr.msk.bf16.gmra.mxu0 %vm2664_vm8, %v10629_v24  ;;  %v10635_v46 = vpack.c.bf16 %v1826_v60, %v1825_v36  ;;  %v1379_v5 = vmax.f32 %v10095_v29, %v1232_v10  ;;  %v1380_v17 = vmax.f32 %v13108_v51, %v1234_v33  ;;  %v2191_v11 = vrot.slane %v2043_v4, 1  ;;  %v13112_v24 = vld [vmem:[#allocation55_spill] sm:$0xff]  ;;  %v13114_v33 = vld [vmem:[#allocation61_spill] sm:$0xff]  ;;  %v13115_v51 = vld [vmem:[#allocation60_spill] sm:$0xff] }
 0x216   :  { %13110 = vst [vmem:[#allocation22_spill] sm:$0xff] %v10643_v1  ;;  %v2034_v48 = vrot.slane %v2032_v49, 7  ;;  %v2042_v41 = vrot.slane %v2040_v19, 7 }
 0x217   :  { %13107 = vst [vmem:[#allocation25_spill] sm:$0xff] %v10635_v46  ;;  %v1827_v26 = vmul.f32 %v13111_v56, %v1379_v5  ;;  %v1828_v34 = vmul.f32 %v13112_v24, %v1380_v17  ;;  %2417 = vrot.lane.b32.xlu0 %v10596_v14, %s8834_s25  ;;  %2482 = vrot.lane.b32.xlu1 %v10349_v15, %s8833_s29  ;;  %v2051_v60 = vshll.u32 %v10635_v46, 16  ;;  %v2048_v20 = vshrl.u32 %v10635_v46, 16  ;;  %v13117_v46 = vld [vmem:[#allocation57_spill] sm:$0xff] }
 0x218   :  { %v10652_v29 = vsel %vm2131_vm2, %v2190_v39, %v2191_v11  ;;  %v1236_v36 = vpop.permute.xlu1 %1235  ;;  %v1238_v12 = vpop.permute.xlu0 %1237  ;;  %v2193_v49 = vor.u32 %v2191_v11, %v2040_v19  ;;  %v2037_v24 = vor.u32 %v2035_v2, %v2034_v48  ;;  %v10664_v39 = vsel %vm1879_vm5, %v10549_v61, %v1941_v59  ;;  %v13116_v19 = vld [vmem:[#allocation58_spill] sm:$0xff] }
 0x219   :  { %13113 = vst [vmem:[#allocation24_spill] sm:$0xff] %v10652_v29  ;;  %8509 = vmatprep.mubr.msk.bf16.mxu0 %vm2664_vm8, %v10652_v29  ;;  %v10658_v10 = vpack.c.bf16 %v1828_v34, %v1827_v26  ;;  %v1381_v5 = vmax.f32 %v13114_v33, %v1236_v36  ;;  %v1382_v17 = vmax.f32 %v13115_v51, %v1238_v12  ;;  %v2194_v40 = vrot.slane %v2051_v60, 1 }
 0x21a   :  { %v10667_v56 = vsel %vm1879_vm5, %v2026_v3, %v2037_v24  ;;  %v2045_v29 = vor.u32 %v2043_v4, %v2042_v41  ;;  %v2050_v1 = vrot.slane %v2048_v20, 7  ;;  %v13119_v12 = vshrl.u32 %v10331_v18, 16 }
 0x21b   :  { %v1829_v11 = vmul.f32 %v13116_v19, %v1381_v5  ;;  %v1830_v2 = vmul.f32 %v13117_v46, %v1382_v17  ;;  %2293 = vrot.lane.b32.xlu0 %v10331_v18, %s8833_s29  ;;  %2547 = vrot.lane.b32.xlu1 %v10664_v39, %s8835_s17  ;;  %v10676_v34 = vsel %vm2131_vm2, %v2193_v49, %v2194_v40  ;;  %v2059_v61 = vshll.u32 %v10658_v10, 16 }
 0x21c   :  { %v2056_v3 = vshrl.u32 %v10658_v10, 16  ;;  %v10683_v4 = vsel %vm1879_vm5, %v2034_v48, %v2045_v29  ;;  %v2053_v46 = vor.u32 %v2051_v60, %v2050_v1  ;;  %v2196_v26 = vor.u32 %v2194_v40, %v2048_v20 }
 0x21d   :  { %8510 = vmatmul.mubr.msk.bf16.gmra.mxu0 %vm2664_vm8, %v10676_v34  ;;  %13118 = vst [vmem:[#allocation27_spill] sm:$0xff] %v10683_v4  ;;  %v10685_v59 = vpack.c.bf16 %v1830_v2, %v1829_v11  ;;  %v2197_v36 = vrot.slane %v2059_v61, 1  ;;  %v1946_v24 = vrot.slane %v13119_v12, 7  ;;  %v13120_v51 = vshll.u32 %v10331_v18, 16 }
 0x21e   :  { %v10690_v49 = vsel %vm1879_vm5, %v2042_v41, %v2053_v46  ;;  %v2058_v33 = vrot.slane %v2056_v3, 7 }
 0x21f   :  { %2354 = vrot.lane.b32.xlu0 %v10349_v15, %s8835_s17  ;;  %2616 = vrot.lane.b32.xlu1 %v10356_v62, %s8834_s25  ;;  %v10697_v48 = vsel %vm2131_vm2, %v2196_v26, %v2197_v36  ;;  %v2067_v29 = vshll.u32 %v10685_v59, 16  ;;  %v12890_v60 = vshrl.u32 %v10685_v59, 16  ;;  %v2199_v41 = vor.u32 %v2197_v36, %v2056_v3  ;;  %v13121_v36 = vld [vmem:[#allocation68_spill] sm:$0xff] }
 0x220   :  { %8513 = vmatprep.mubr.msk.bf16.mxu0 %vm2664_vm8, %v10697_v48  ;;  %v2061_v20 = vor.u32 %v2059_v61, %v2058_v33  ;;  %v1949_v17 = vor.u32 %v13120_v51, %v1946_v24 }
 0x221   :  { %v10703_v5 = vrot.slane %v2067_v29, 1  ;;  %v10707_v15 = vrot.slane %v12890_v60, 7 }
 0x222   :  { %v10712_v40 = vsel %vm1879_vm5, %v2050_v1, %v2061_v20  ;;  %v10730_v1 = vsel %vm1879_vm5, %v10617_v37, %v1949_v17  ;;  %v10746_v37 = vsel %vm1879_vm5, %v1946_v24, %v10402_v53 }
 0x223   :  { %2419 = vrot.lane.b32.xlu0 %v10664_v39, %s8834_s25  ;;  %2484 = vrot.lane.b32.xlu1 %v10373_v23, %s8833_s29  ;;  %v10720_v19 = vsel %vm2131_vm2, %v2199_v41, %v10703_v5  ;;  %v2069_v11 = vor.u32 %v2067_v29, %v10707_v15  ;;  %v13122_v29 = vld [vmem:[#allocation26_spill] sm:$0xff] }
 0x224   :  { %v2667_v20 = vsel %vm2664_vm8, 0, %v13122_v29 }
 0x225   :  { %8514 = vmatmul.mubr.msk.bf16.gmra.mxu0 %vm2664_vm8, %v10720_v19  ;;  %v10726_v2 = vsel %vm1879_vm5, %v2058_v33, %v2069_v11 }
 0x227   :  { %2295 = vrot.lane.b32.xlu0 %v10356_v62, %s8833_s29  ;;  %2549 = vrot.lane.b32.xlu1 %v10730_v1, %s8835_s17 }
 0x22b   :  { %2356 = vrot.lane.b32.xlu0 %v10373_v23, %s8835_s17  ;;  %2618 = vrot.lane.b32.xlu1 %v10381_v54, %s8834_s25 }
 0x22f   :  { %2421 = vrot.lane.b32.xlu0 %v10730_v1, %s8834_s25  ;;  %2486 = vrot.lane.b32.xlu1 %v10396_v30, %s8833_s29 }
 0x233   :  { %2297 = vrot.lane.b32.xlu0 %v10381_v54, %s8833_s29  ;;  %2551 = vrot.lane.b32.xlu1 %v10746_v37, %s8835_s17 }
 0x235   :  { %v2278_v23 = vpop.permute.xlu0 %2277 }
 0x237   :  { %2358 = vrot.lane.b32.xlu0 %v10396_v30, %s8835_s17  ;;  %2620 = vrot.lane.b32.xlu1 %v10404_v42, %s8834_s25 }
 0x239   :  { %v2601_v61 = vpop.permute.xlu1 %2600  ;;  %v2280_v3 = vpop.permute.xlu0 %2279 }
 0x23b   :  { %2423 = vrot.lane.b32.xlu0 %v10746_v37, %s8834_s25  ;;  %2488 = vrot.lane.b32.xlu1 %v10419_v38, %s8833_s29 }
 0x23d   :  { %v2603_v53 = vpop.permute.xlu1 %2602  ;;  %v2341_v46 = vpop.permute.xlu0 %2340 }
 0x23e   :  { %v2763_v51 = vsel %vm2761_vm9, %v2667_v20, %v2341_v46 }
 0x23f   :  { %2299 = vrot.lane.b32.xlu0 %v10404_v42, %s8833_s29  ;;  %2553 = vrot.lane.b32.xlu1 %v10433_v57, %s8835_s17 }
 0x241   :  { %v2471_v30 = vpop.permute.xlu1 %2470  ;;  %v2406_v26 = vpop.permute.xlu0 %2405 }
 0x242   :  { %v2924_v12 = vsel %vm2664_vm8, %v13121_v36, %v2471_v30  ;;  %v2828_v17 = vsel %vm2826_vm10, %v2763_v51, %v2406_v26 }
 0x243   :  { %2360 = vrot.lane.b32.xlu0 %v10419_v38, %s8835_s17  ;;  %2622 = vrot.lane.b32.xlu1 %v10425_v9, %s8834_s25 }
 0x245   :  { %v2536_v24 = vpop.permute.xlu1 %2535  ;;  %v10770_v33 = vpop.permute.xlu0 %2281 }
 0x246   :  { %v2988_v41 = vsel %vm2761_vm9, %v2924_v12, %v2536_v24  ;;  %v2670_v24 = vsel %vm2664_vm8, %v10222_v35, %v2278_v23 }
 0x247   :  { %2425 = vrot.lane.b32.xlu0 %v10433_v57, %s8834_s25  ;;  %2490 = vrot.lane.b32.xlu1 %v10442_v55, %s8833_s29  ;;  %v3052_v38 = vsel %vm2826_vm10, %v2988_v41, %v2601_v61 }
 0x248   :  { %3425 = vmatprep.mubr.bf16.mxu1 %v3052_v38 }
 0x249   :  { %v2605_v11 = vpop.permute.xlu1 %2604  ;;  %3426 = vmatmul.mubr.bf16.vlgmr.msra.gmra.mxu1 %v2828_v17  ;;  %v2343_v30 = vpop.permute.xlu0 %2342 }
 0x24a   :  { %v2765_v20 = vsel %vm2761_vm9, %v2670_v24, %v2343_v30  ;;  %v13125_v24 = vld [vmem:[#allocation19_spill] sm:$0xff] }
 0x24b   :  { %2301 = vrot.lane.b32.xlu0 %v10425_v9, %s8833_s29  ;;  %2555 = vrot.lane.b32.xlu1 %v10457_v63, %s8835_s17 }
 0x24d   :  { %v2473_v46 = vpop.permute.xlu1 %2472  ;;  %v2408_v36 = vpop.permute.xlu0 %2407 }
 0x24e   :  { %v2926_v61 = vsel %vm2664_vm8, %v10176_v8, %v2473_v46  ;;  %v2831_v8 = vsel %vm2826_vm10, %v2765_v20, %v2408_v36  ;;  %v13124_v46 = vld [vmem:[#allocation10_spill] sm:$0xff] }
 0x24f   :  { %2362 = vrot.lane.b32.xlu0 %v10442_v55, %s8835_s17  ;;  %2624 = vrot.lane.b32.xlu1 %v10448_v45, %s8834_s25  ;;  %v2673_v36 = vsel %vm2664_vm8, %v13124_v46, %v2280_v3 }
 0x251   :  { %v2538_v26 = vpop.permute.xlu1 %2537  ;;  %v2284_v12 = vpop.permute.xlu0 %2283 }
 0x252   :  { %v2990_v29 = vsel %vm2761_vm9, %v2926_v61, %v2538_v26 }
 0x253   :  { %2427 = vrot.lane.b32.xlu0 %v10457_v63, %s8834_s25  ;;  %2492 = vrot.lane.b32.xlu1 %v10466_v16, %s8833_s29  ;;  %v3055_v55 = vsel %vm2826_vm10, %v2990_v29, %v2603_v53  ;;  %v13123_v53 = vld [vmem:[#allocation9_spill] sm:$0xff] }
 0x254   :  { %3433 = vmatprep.mubr.bf16.mxu1 %v3055_v55 }
 0x255   :  { %v2607_v41 = vpop.permute.xlu1 %2606  ;;  %3434 = vmatmul.mubr.bf16.gmra.mxu1 %v2831_v8  ;;  %v2345_v51 = vpop.permute.xlu0 %2344 }
 0x256   :  { %v2767_v26 = vsel %vm2761_vm9, %v2673_v36, %v2345_v51 }
 0x257   :  { %2303 = vrot.lane.b32.xlu0 %v10448_v45, %s8833_s29  ;;  %2557 = vrot.lane.b32.xlu1 %v10481_v52, %s8835_s17 }
 0x259   :  { %v2475_v35 = vpop.permute.xlu1 %2474  ;;  %v2410_v23 = vpop.permute.xlu0 %2409 }
 0x25a   :  { %v2928_v38 = vsel %vm2664_vm8, %v13123_v53, %v2475_v35  ;;  %v2834_v29 = vsel %vm2826_vm10, %v2767_v26, %v2410_v23  ;;  %v13127_v53 = vld [vmem:[#allocation12_spill] sm:$0xff] }
 0x25b   :  { %2364 = vrot.lane.b32.xlu0 %v10466_v16, %s8835_s17  ;;  %2626 = vrot.lane.b32.xlu1 %v10472_v32, %s8834_s25 }
 0x25d   :  { %v2540_v17 = vpop.permute.xlu1 %2539  ;;  %v2286_v30 = vpop.permute.xlu0 %2285 }
 0x25e   :  { %v2992_v61 = vsel %vm2761_vm9, %v2928_v38, %v2540_v17  ;;  %v2676_v38 = vsel %vm2664_vm8, %v13127_v53, %v10770_v33 }
 0x25f   :  { %2494 = vrot.lane.b32.xlu1 %v13125_v24, %s8833_s29  ;;  %2429 = vrot.lane.b32.xlu0 %v10481_v52, %s8834_s25  ;;  %v3058_v16 = vsel %vm2826_vm10, %v2992_v61, %v2605_v11  ;;  %v13126_v11 = vld [vmem:[#allocation8_spill] sm:$0xff] }
 0x260   :  { %3441 = vmatprep.mubr.bf16.mxu1 %v3058_v16 }
 0x261   :  { %v2609_v20 = vpop.permute.xlu1 %2608  ;;  %3442 = vmatmul.mubr.bf16.gmra.mxu1 %v2834_v29  ;;  %v2347_v55 = vpop.permute.xlu0 %2346 }
 0x262   :  { %v2769_v46 = vsel %vm2761_vm9, %v2676_v38, %v2347_v55 }
 0x263   :  { %2559 = vrot.lane.b32.xlu1 %v10504_v27, %s8835_s17  ;;  %2305 = vrot.lane.b32.xlu0 %v10472_v32, %s8833_s29 }
 0x265   :  { %v2477_v3 = vpop.permute.xlu1 %2476  ;;  %v2412_v8 = vpop.permute.xlu0 %2411 }
 0x266   :  { %v2930_v51 = vsel %vm2664_vm8, %v13126_v11, %v2477_v3  ;;  %v2837_v61 = vsel %vm2826_vm10, %v2769_v46, %v2412_v8  ;;  %v13129_v8 = vld [vmem:[#allocation17_spill] sm:$0xff] }
 0x267   :  { %2628 = vrot.lane.b32.xlu1 %v10496_v28, %s8834_s25  ;;  %2366 = vrot.lane.b32.xlu0 %v13125_v24, %s8835_s17  ;;  %v2679_v11 = vsel %vm2664_vm8, %v13129_v8, %v2284_v12  ;;  %v13130_v12 = vld [vmem:[#allocation16_spill] sm:$0xff]  ;;  %v13133_v8 = vld [vmem:[#allocation21_spill] sm:$0xff] }
 0x269   :  { %v2542_v35 = vpop.permute.xlu1 %2541  ;;  %v2288_v23 = vpop.permute.xlu0 %2287 }
 0x26a   :  { %v2994_v17 = vsel %vm2761_vm9, %v2930_v51, %v2542_v35 }
 0x26b   :  { %2496 = vrot.lane.b32.xlu1 %v10513_v6, %s8833_s29  ;;  %2431 = vrot.lane.b32.xlu0 %v10504_v27, %s8834_s25  ;;  %v3061_v36 = vsel %vm2826_vm10, %v2994_v17, %v2607_v41  ;;  %v13128_v41 = vld [vmem:[#allocation13_spill] sm:$0xff] }
 0x26c   :  { %3449 = vmatprep.mubr.bf16.mxu1 %v3061_v36 }
 0x26d   :  { %v2611_v26 = vpop.permute.xlu1 %2610  ;;  %3450 = vmatmul.mubr.bf16.gmra.mxu1 %v2837_v61  ;;  %v2349_v24 = vpop.permute.xlu0 %2348 }
 0x26e   :  { %v2771_v35 = vsel %vm2761_vm9, %v2679_v11, %v2349_v24 }
 0x26f   :  { %2561 = vrot.lane.b32.xlu1 %v10528_v43, %s8835_s17  ;;  %2307 = vrot.lane.b32.xlu0 %v10496_v28, %s8833_s29 }
 0x271   :  { %v2479_v33 = vpop.permute.xlu1 %2478  ;;  %v2414_v16 = vpop.permute.xlu0 %2413 }
 0x272   :  { %v2932_v29 = vsel %vm2664_vm8, %v13128_v41, %v2479_v33  ;;  %v2840_v53 = vsel %vm2826_vm10, %v2771_v35, %v2414_v16  ;;  %v13132_v16 = vld [vmem:[#allocation14_spill] sm:$0xff] }
 0x273   :  { %2630 = vrot.lane.b32.xlu1 %v10519_v44, %s8834_s25  ;;  %2368 = vrot.lane.b32.xlu0 %v10513_v6, %s8835_s17  ;;  %v2682_v41 = vsel %vm2664_vm8, %v13132_v16, %v2286_v30 }
 0x275   :  { %v2544_v55 = vpop.permute.xlu1 %2543  ;;  %v10853_v3 = vpop.permute.xlu0 %2289 }
 0x276   :  { %v2996_v51 = vsel %vm2761_vm9, %v2932_v29, %v2544_v55 }
 0x277   :  { %2498 = vrot.lane.b32.xlu1 %v10537_v7, %s8833_s29  ;;  %2433 = vrot.lane.b32.xlu0 %v10528_v43, %s8834_s25  ;;  %v3064_v6 = vsel %vm2826_vm10, %v2996_v51, %v2609_v20  ;;  %v13131_v20 = vld [vmem:[#allocation15_spill] sm:$0xff] }
 0x278   :  { %3457 = vmatprep.mubr.bf16.mxu1 %v3064_v6 }
 0x279   :  { %v2613_v38 = vpop.permute.xlu1 %2612  ;;  %3458 = vmatmul.mubr.bf16.gmra.mxu1 %v2840_v53  ;;  %v2351_v17 = vpop.permute.xlu0 %2350 }
 0x27a   :  { %v2773_v55 = vsel %vm2761_vm9, %v2682_v41, %v2351_v17 }
 0x27b   :  { %2563 = vrot.lane.b32.xlu1 %v13130_v12, %s8835_s17  ;;  %2309 = vrot.lane.b32.xlu0 %v10519_v44, %s8833_s29 }
 0x27d   :  { %v2481_v46 = vpop.permute.xlu1 %2480  ;;  %v2416_v36 = vpop.permute.xlu0 %2415 }
 0x27e   :  { %v2934_v61 = vsel %vm2664_vm8, %v13131_v20, %v2481_v46  ;;  %v2843_v11 = vsel %vm2826_vm10, %v2773_v55, %v2416_v36  ;;  %v2685_v46 = vsel %vm2664_vm8, %v10525_v31, %v2288_v23 }
 0x27f   :  { %2632 = vrot.lane.b32.xlu1 %v10543_v58, %s8834_s25  ;;  %2370 = vrot.lane.b32.xlu0 %v10537_v7, %s8835_s17 }
 0x281   :  { %v2546_v24 = vpop.permute.xlu1 %2545  ;;  %v10875_v33 = vpop.permute.xlu0 %2291 }
 0x282   :  { %v2998_v29 = vsel %vm2761_vm9, %v2934_v61, %v2546_v24  ;;  %v13134_v61 = vld [vmem:[#allocation18_spill] sm:$0xff] }
 0x283   :  { %2500 = vrot.lane.b32.xlu1 %v13133_v8, %s8833_s29  ;;  %2435 = vrot.lane.b32.xlu0 %v13130_v12, %s8834_s25  ;;  %v3067_v7 = vsel %vm2826_vm10, %v2998_v29, %v2611_v26 }
 0x284   :  { %3465 = vmatprep.mubr.bf16.mxu1 %v3067_v7  ;;  %v2688_v7 = vsel %vm2664_vm8, %v10596_v14, %v10853_v3  ;;  %v10935_v14 = vld [vmem:[%s12804_s2] ss:$0 sm:$0xff] }
 0x285   :  { %v2615_v51 = vpop.permute.xlu1 %2614  ;;  %3466 = vmatmul.mubr.bf16.gmra.mxu1 %v2843_v11  ;;  %v2353_v35 = vpop.permute.xlu0 %2352 }
 0x286   :  { %v2775_v20 = vsel %vm2761_vm9, %v2685_v46, %v2353_v35 }
 0x287   :  { %2565 = vrot.lane.b32.xlu1 %v10588_v50, %s8835_s17  ;;  %2311 = vrot.lane.b32.xlu0 %v10543_v58, %s8833_s29 }
 0x289   :  { %v2483_v30 = vpop.permute.xlu1 %2482  ;;  %v2418_v6 = vpop.permute.xlu0 %2417 }
 0x28a   :  { %v2936_v26 = vsel %vm2664_vm8, %v10284_v47, %v2483_v30  ;;  %v2846_v47 = vsel %vm2826_vm10, %v2775_v20, %v2418_v6 }
 0x28b   :  { %2634 = vrot.lane.b32.xlu1 %v10567_v21, %s8834_s25  ;;  %2372 = vrot.lane.b32.xlu0 %v13133_v8, %s8835_s17 }
 0x28d   :  { %v2548_v53 = vpop.permute.xlu1 %2547  ;;  %v10897_v17 = vpop.permute.xlu0 %2293 }
 0x28e   :  { %v3000_v36 = vsel %vm2761_vm9, %v2936_v26, %v2548_v53 }
 0x28f   :  { %2502 = vrot.lane.b32.xlu1 %v13134_v61, %s8833_s29  ;;  %2437 = vrot.lane.b32.xlu0 %v10588_v50, %s8834_s25  ;;  %v3070_v24 = vsel %vm2826_vm10, %v3000_v36, %v2613_v38  ;;  %v8456_v38 = vpop.f32.mrf.mxu0 }
 0x290   :  { %3473 = vmatprep.mubr.bf16.mxu1 %v3070_v24  ;;  %v10938_v3 = vadd.f32 %v10935_v14, %v8456_v38 }
 0x291   :  { %v2617_v16 = vpop.permute.xlu1 %2616  ;;  %3474 = vmatmul.mubr.bf16.gmra.mxu1 %v2846_v47  ;;  %v2355_v41 = vpop.permute.xlu0 %2354 }
 0x292   :  { %v2777_v35 = vsel %vm2761_vm9, %v2688_v7, %v2355_v41  ;;  %v12897_v46 = vmax.f32 %v10938_v3, 0.0 }
 0x293   :  { %2567 = vrot.lane.b32.xlu1 %v10620_v0, %s8835_s17  ;;  %2374 = vrot.lane.b32.xlu0 %v13134_v61, %s8835_s17 }
 0x295   :  { %v2485_v31 = vpop.permute.xlu1 %2484  ;;  %v2420_v23 = vpop.permute.xlu0 %2419 }
 0x296   :  { %v2938_v29 = vsel %vm2664_vm8, %v10306_v13, %v2485_v31  ;;  %v646_v13 = vpop.f32.mrf.mxu0  ;;  %v2849_v6 = vsel %vm2826_vm10, %v2777_v35, %v2420_v23  ;;  %v2691_v31 = vsel %vm2664_vm8, %v10664_v39, %v10875_v33  ;;  %v13137_v35 = vld [vmem:[#allocation24_spill] sm:$0xff] }
 0x297   :  { %2636 = vrot.lane.b32.xlu1 %v10590_v22, %s8834_s25  ;;  %2439 = vrot.lane.b32.xlu0 %v10620_v0, %s8834_s25  ;;  %v10941_v26 = vadd.f32 %v10935_v14, %v646_v13 }
 0x299   :  { %v2550_v55 = vpop.permute.xlu1 %2549  ;;  %v10919_v8 = vpop.permute.xlu0 %2295  ;;  %v12898_v36 = vmax.f32 %v10941_v26, 0.0 }
 0x29a   :  { %v3002_v11 = vsel %vm2761_vm9, %v2938_v29, %v2550_v55  ;;  %v13136_v29 = vld [vmem:[#allocation20_spill] sm:$0xff] }
 0x29b   :  { %2504 = vrot.lane.b32.xlu1 %v10605_v25, %s8833_s29  ;;  %2376 = vrot.lane.b32.xlu0 %v10605_v25, %s8835_s17  ;;  %v3073_v30 = vsel %vm2826_vm10, %v3002_v11, %v2615_v51  ;;  %v13135_v51 = vld [vmem:[#allocation22_spill] sm:$0xff] }
 0x29c   :  { %3481 = vmatprep.mubr.bf16.mxu1 %v3073_v30 }
 0x29d   :  { %v2619_v53 = vpop.permute.xlu1 %2618  ;;  %3482 = vmatmul.mubr.bf16.gmra.mxu1 %v2849_v6  ;;  %v2357_v25 = vpop.permute.xlu0 %2356  ;;  %v2694_v6 = vsel %vm2664_vm8, %v10730_v1, %v10897_v17  ;;  %v13138_v1 = vld [vmem:[#allocation23_spill] sm:$0xff] }
 0x29e   :  { %v2779_v38 = vsel %vm2761_vm9, %v2691_v31, %v2357_v25 }
 0x29f   :  { %2569 = vrot.lane.b32.xlu1 %v13135_v51, %s8835_s17  ;;  %2441 = vrot.lane.b32.xlu0 %v13135_v51, %s8834_s25 }
 0x2a1   :  { %v2487_v20 = vpop.permute.xlu1 %2486  ;;  %v2422_v61 = vpop.permute.xlu0 %2421 }
 0x2a2   :  { %v2940_v24 = vsel %vm2664_vm8, %v10331_v18, %v2487_v20  ;;  %v2852_v18 = vsel %vm2826_vm10, %v2779_v38, %v2422_v61 }
 0x2a3   :  { %931 = vrot.lane.b32.xlu1 %v12898_v36, %s8834_s25  ;;  %933 = vrot.lane.b32.xlu0 %v12897_v46, %s8834_s25  ;;  %v13156_v46 = vld [vmem:[#allocation54_spill] sm:$0xff] }
 0x2a4   :  { %v13157_v36 = vmax.f32 %v13156_v46, 0.0 }
 0x2a5   :  { %v2552_v47 = vpop.permute.xlu1 %2551  ;;  %v10957_v41 = vpop.permute.xlu0 %2297 }
 0x2a6   :  { %v3004_v23 = vsel %vm2761_vm9, %v2940_v24, %v2552_v47 }
 0x2a7   :  { %2506 = vrot.lane.b32.xlu1 %v13136_v29, %s8833_s29  ;;  %2313 = vrot.lane.b32.xlu0 %v10567_v21, %s8833_s29  ;;  %v3076_v55 = vsel %vm2826_vm10, %v3004_v23, %v2617_v16  ;;  %v8459_v23 = vpop.f32.mrf.mxu0 }
 0x2a8   :  { %3489 = vmatprep.mubr.bf16.mxu1 %v3076_v55  ;;  %v10998_v38 = vadd.f32 %v10935_v14, %v8459_v23 }
 0x2a9   :  { %v2621_v7 = vpop.permute.xlu1 %2620  ;;  %3490 = vmatmul.mubr.bf16.gmra.mxu1 %v2852_v18  ;;  %v2359_v11 = vpop.permute.xlu0 %2358 }
 0x2aa   :  { %v2781_v20 = vsel %vm2761_vm9, %v2694_v6, %v2359_v11  ;;  %v2697_v11 = vsel %vm2664_vm8, %v10746_v37, %v10919_v8  ;;  %v13139_v37 = vld [vmem:[#allocation25_spill] sm:$0xff] }
 0x2ab   :  { %2571 = vrot.lane.b32.xlu1 %v10667_v56, %s8835_s17  ;;  %2378 = vrot.lane.b32.xlu0 %v13136_v29, %s8835_s17  ;;  %v1447_v8 = vld [vmem:[%s12805_s3 + $0x180] sm:$0xff] }
 0x2ad   :  { %v2489_v39 = vpop.permute.xlu1 %2488  ;;  %v2424_v33 = vpop.permute.xlu0 %2423 }
 0x2ae   :  { %v2942_v16 = vsel %vm2664_vm8, %v10356_v62, %v2489_v39  ;;  %v2855_v62 = vsel %vm2826_vm10, %v2781_v20, %v2424_v33  ;;  %v12896_v33 = vmax.f32 %v10998_v38, 0.0  ;;  %v13140_v20 = vld [vmem:[#allocation62_spill] sm:$0xff] }
 0x2af   :  { %2508 = vrot.lane.b32.xlu1 %v13137_v35, %s8833_s29  ;;  %2443 = vrot.lane.b32.xlu0 %v10667_v56, %s8834_s25 }
 0x2b1   :  { %v2554_v30 = vpop.permute.xlu1 %2553  ;;  %v10980_v13 = vpop.permute.xlu0 %2299 }
 0x2b2   :  { %v3006_v25 = vsel %vm2761_vm9, %v2942_v16, %v2554_v30 }
 0x2b3   :  { %2573 = vrot.lane.b32.xlu1 %v10683_v4, %s8835_s17  ;;  %2315 = vrot.lane.b32.xlu0 %v10590_v22, %s8833_s29  ;;  %v3079_v61 = vsel %vm2826_vm10, %v3006_v25, %v2619_v53  ;;  %v1448_v53 = vld [vmem:[%s12805_s3 + $0x188] sm:$0xff]  ;;  %v656_v25 = vpop.f32.mrf.mxu0 }
 0x2b4   :  { %3497 = vmatprep.mubr.bf16.mxu1 %v3079_v61 }
 0x2b5   :  { %v2623_v24 = vpop.permute.xlu1 %2622  ;;  %3498 = vmatmul.mubr.bf16.gmra.mxu1 %v2855_v62  ;;  %v2361_v47 = vpop.permute.xlu0 %2360 }
 0x2b6   :  { %v8462_v23 = vpop.f32.mrf.mxu0 }
 0x2b7   :  { %2638 = vrot.lane.b32.xlu1 %v13138_v1, %s8834_s25  ;;  %2380 = vrot.lane.b32.xlu0 %v13137_v35, %s8835_s17  ;;  %v2783_v35 = vsel %vm2761_vm9, %v2697_v11, %v2361_v47  ;;  %v11035_v47 = vadd.f32 %v10935_v14, %v656_v25 }
 0x2b9   :  { %v2491_v17 = vpop.permute.xlu1 %2490  ;;  %v2426_v31 = vpop.permute.xlu0 %2425 }
 0x2ba   :  { %v2944_v29 = vsel %vm2664_vm8, %v10381_v54, %v2491_v17  ;;  %v2858_v54 = vsel %vm2826_vm10, %v2783_v35, %v2426_v31 }
 0x2bb   :  { %2510 = vrot.lane.b32.xlu1 %v10676_v34, %s8833_s29  ;;  %2445 = vrot.lane.b32.xlu0 %v10683_v4, %s8834_s25 }
 0x2bd   :  { %v2556_v55 = vpop.permute.xlu1 %2555  ;;  %v11009_v18 = vpop.permute.xlu0 %2301 }
 0x2be   :  { %v3008_v39 = vsel %vm2761_vm9, %v2944_v29, %v2556_v55  ;;  %v1450_v29 = vld [vmem:[%s12805_s3 + $0x198] sm:$0xff]  ;;  %v12895_v55 = vmax.f32 %v11035_v47, 0.0 }
 0x2bf   :  { %2575 = vrot.lane.b32.xlu1 %v10690_v49, %s8835_s17  ;;  %1710 = vperm.xlu0 %8577, %v1448_v53   ;;  %v3082_v16 = vsel %vm2826_vm10, %v3008_v39, %v2621_v7  ;;  %v13141_v7 = vld [vmem:[#allocation47_spill] sm:$0xff]  ;;  %v11038_v53 = vadd.f32 %v10935_v14, %v8462_v23 }
 0x2c0   :  { %3505 = vmatprep.mubr.bf16.mxu1 %v3082_v16  ;;  %v13142_v61 = vmax.f32 %v13141_v7, 0.0  ;;  %v666_v16 = vpop.f32.mrf.mxu0 }
 0x2c1   :  { %v2625_v30 = vpop.permute.xlu1 %2624  ;;  %3506 = vmatmul.mubr.bf16.gmra.mxu1 %v2858_v54  ;;  %v2363_v6 = vpop.permute.xlu0 %2362  ;;  %v2700_v54 = vsel %vm2664_vm8, %v10433_v57, %v10957_v41 }
 0x2c2   :  { %v11032_v62 = vmax.f32 %v13142_v61, %v13140_v20  ;;  %v2785_v20 = vsel %vm2761_vm9, %v2700_v54, %v2363_v6  ;;  %v13143_v61 = vld [vmem:[#allocation63_spill] sm:$0xff]  ;;  %v11067_v6 = vadd.f32 %v10935_v14, %v666_v16 }
 0x2c3   :  { %2640 = vrot.lane.b32.xlu1 %v13139_v37, %s8834_s25  ;;  %937 = vrot.lane.b32.xlu0 %v12896_v33, %s8834_s25 }
 0x2c5   :  { %v2493_v17 = vpop.permute.xlu1 %2492  ;;  %v2428_v31 = vpop.permute.xlu0 %2427 }
 0x2c6   :  { %v2946_v11 = vsel %vm2664_vm8, %v10404_v42, %v2493_v17  ;;  %v2861_v7 = vsel %vm2826_vm10, %v2785_v20, %v2428_v31  ;;  %v13144_v17 = vld [vmem:[#allocation48_spill] sm:$0xff] }
 0x2c7   :  { %1705 = vperm.xlu1 %8578, %v1447_v8   ;;  %1241 = vrot.lane.b32.xlu0 %v11032_v62, %s8835_s17  ;;  %v12893_v8 = vmax.f32 %v11038_v53, 0.0  ;;  %v13145_v23 = vmax.f32 %v13144_v17, 0.0  ;;  %v13146_v31 = vld [vmem:[#allocation64_spill] sm:$0xff] }
 0x2c9   :  { %v2558_v39 = vpop.permute.xlu1 %2557  ;;  %v11048_v35 = vpop.permute.xlu0 %2303  ;;  %v11064_v57 = vmax.f32 %v13145_v23, %v13143_v61 }
 0x2ca   :  { %v3010_v25 = vsel %vm2761_vm9, %v2946_v11, %v2558_v39  ;;  %v8465_v39 = vpop.f32.mrf.mxu0 }
 0x2cb   :  { %935 = vrot.lane.b32.xlu1 %v12895_v55, %s8834_s25  ;;  %1720 = vperm.xlu0 %8577, %v1450_v29   ;;  %v3085_v42 = vsel %vm2826_vm10, %v3010_v25, %v2623_v24  ;;  %v11070_v54 = vadd.f32 %v10935_v14, %v8465_v39  ;;  %v1449_v24 = vld [vmem:[%s12805_s3 + $0x190] sm:$0xff] }
 0x2cc   :  { %3513 = vmatprep.mubr.bf16.mxu1 %v3085_v42  ;;  %v13147_v29 = vld [vmem:[#allocation50_spill] sm:$0xff]  ;;  %v676_v60 = vpop.f32.mrf.mxu0 }
 0x2cd   :  { %v2627_v41 = vpop.permute.xlu1 %2626  ;;  %3514 = vmatmul.mubr.bf16.gmra.mxu1 %v2861_v7  ;;  %v2365_v11 = vpop.permute.xlu0 %2364  ;;  %v13148_v25 = vmax.f32 %v13147_v29, 0.0  ;;  %v12891_v7 = vmax.f32 %v11067_v6, 0.0  ;;  %v12892_v61 = vmax.f32 %v11070_v54, 0.0 }
 0x2cf   :  { %1239 = vrot.lane.b32.xlu1 %v11064_v57, %s8835_s17  ;;  %941 = vrot.lane.b32.xlu0 %v12893_v8, %s8834_s25  ;;  %v11083_v20 = vmax.f32 %v13148_v25, %v13146_v31  ;;  %v2703_v31 = vsel %vm2664_vm8, %v10457_v63, %v10980_v13  ;;  %v11098_v25 = vadd.f32 %v10935_v14, %v676_v60  ;;  %v1452_v60 = vld [vmem:[%s12805_s3 + $0x1a8] sm:$0xff]  ;;  %v8468_v8 = vpop.f32.mrf.mxu0 }
 0x2d0   :  { %v13149_v13 = vld [vmem:[#allocation65_spill] sm:$0xff] }
 0x2d1   :  { %v2495_v16 = vpop.permute.xlu1 %2494  ;;  %v2430_v42 = vpop.permute.xlu0 %2429 }
 0x2d2   :  { %v2948_v17 = vsel %vm2664_vm8, %v10425_v9, %v2495_v16  ;;  %v13150_v16 = vld [vmem:[#allocation52_spill] sm:$0xff] }
 0x2d3   :  { %1715 = vperm.xlu1 %8578, %v1449_v24   ;;  %1245 = vrot.lane.b32.xlu0 %v11083_v20, %s8835_s17  ;;  %v2787_v24 = vsel %vm2761_vm9, %v2703_v31, %v2365_v11  ;;  %v13151_v11 = vmax.f32 %v13150_v16, 0.0 }
 0x2d4   :  { %v2864_v63 = vsel %vm2826_vm10, %v2787_v24, %v2430_v42  ;;  %v13153_v42 = vld [vmem:[#allocation53_spill] sm:$0xff] }
 0x2d5   :  { %v2560_v23 = vpop.permute.xlu1 %2559  ;;  %v11091_v39 = vpop.permute.xlu0 %2305 }
 0x2d6   :  { %v3012_v29 = vsel %vm2761_vm9, %v2948_v17, %v2560_v23  ;;  %v11115_v17 = vmax.f32 %v13151_v11, %v13149_v13 }
 0x2d7   :  { %939 = vrot.lane.b32.xlu1 %v12891_v7, %s8834_s25  ;;  %945 = vrot.lane.b32.xlu0 %v12892_v61, %s8834_s25  ;;  %v3088_v9 = vsel %vm2826_vm10, %v3012_v29, %v2625_v30  ;;  %v12894_v7 = vmax.f32 %v11098_v25, 0.0  ;;  %v13152_v30 = vld [vmem:[#allocation66_spill] sm:$0xff]  ;;  %v13154_v29 = vmax.f32 %v13153_v42, 0.0  ;;  %v2706_v42 = vsel %vm2664_vm8, %v10481_v52, %v11009_v18 }
 0x2d8   :  { %3521 = vmatprep.mubr.bf16.mxu1 %v3088_v9 }
 0x2d9   :  { %v2629_v23 = vpop.permute.xlu1 %2628  ;;  %3522 = vmatmul.mubr.bf16.gmra.mxu1 %v2864_v63  ;;  %v2367_v31 = vpop.permute.xlu0 %2366  ;;  %v11123_v24 = vmax.f32 %v13154_v29, %v13152_v30  ;;  %v1451_v63 = vld [vmem:[%s12805_s3 + $0x1a0] sm:$0xff] }
 0x2da   :  { %v686_v30 = vpop.f32.mrf.mxu0  ;;  %v2789_v55 = vsel %vm2761_vm9, %v2706_v42, %v2367_v31  ;;  %v2709_v31 = vsel %vm2664_vm8, %v10504_v27, %v11048_v35 }
 0x2db   :  { %1243 = vrot.lane.b32.xlu1 %v11115_v17, %s8835_s17  ;;  %1730 = vperm.xlu0 %8577, %v1452_v60   ;;  %v1454_v60 = vld [vmem:[%s12805_s3 + $0x1b8] sm:$0xff] }
 0x2dd   :  { %v2497_v9 = vpop.permute.xlu1 %2496  ;;  %v2432_v61 = vpop.permute.xlu0 %2431 }
 0x2de   :  { %v2950_v13 = vsel %vm2664_vm8, %v10448_v45, %v2497_v9  ;;  %v2867_v45 = vsel %vm2826_vm10, %v2789_v55, %v2432_v61  ;;  %v13155_v9 = vld [vmem:[#allocation67_spill] sm:$0xff] }
 0x2df   :  { %943 = vrot.lane.b32.xlu1 %v12894_v7, %s8834_s25  ;;  %1249 = vrot.lane.b32.xlu0 %v11123_v24, %s8835_s17  ;;  %v11143_v7 = vadd.f32 %v10935_v14, %v686_v30  ;;  %v11151_v4 = vmax.f32 %v13157_v36, %v13155_v9  ;;  %v2712_v9 = vsel %vm2664_vm8, %v10528_v43, %v11091_v39 }
 0x2e1   :  { %v2562_v16 = vpop.permute.xlu1 %2561  ;;  %v2308_v11 = vpop.permute.xlu0 %2307 }
 0x2e2   :  { %v3014_v29 = vsel %vm2761_vm9, %v2950_v13, %v2562_v16  ;;  %v757_v13 = vmax.f32 %v11143_v7, 0.0  ;;  %v2715_v43 = vsel %vm2664_vm8, %v13130_v12, %v2308_v11  ;;  %v11206_v11 = vld [vmem:[%s12807_s5] ss:$0 sm:$0xff] }
 0x2e3   :  { %1725 = vperm.xlu1 %8578, %v1451_v63   ;;  %1740 = vperm.xlu0 %8577, %v1454_v60   ;;  %v3091_v33 = vsel %vm2826_vm10, %v3014_v29, %v2627_v41  ;;  %v11171_v60 = vadd.f32 %v10935_v14, %v8468_v8 }
 0x2e4   :  { %3529 = vmatprep.mubr.bf16.mxu1 %v3091_v33  ;;  %v1453_v33 = vld [vmem:[%s12805_s3 + $0x1b0] sm:$0xff] }
 0x2e5   :  { %v2631_v52 = vpop.permute.xlu1 %2630  ;;  %3530 = vmatmul.mubr.bf16.gmra.mxu1 %v2867_v45  ;;  %v2369_v18 = vpop.permute.xlu0 %2368  ;;  %v758_v27 = vmax.f32 %v11171_v60, 0.0 }
 0x2e6   :  { %v2791_v16 = vsel %vm2761_vm9, %v2709_v31, %v2369_v18 }
 0x2e7   :  { %1247 = vrot.lane.b32.xlu1 %v11151_v4, %s8835_s17  ;;  %2317 = vrot.lane.b32.xlu0 %v13138_v1, %s8833_s29 }
 0x2e9   :  { %v2499_v55 = vpop.permute.xlu1 %2498  ;;  %v2434_v41 = vpop.permute.xlu0 %2433 }
 0x2ea   :  { %v2952_v46 = vsel %vm2664_vm8, %v10472_v32, %v2499_v55  ;;  %v2870_v32 = vsel %vm2826_vm10, %v2791_v16, %v2434_v41 }
 0x2eb   :  { %1735 = vperm.xlu1 %8578, %v1453_v33   ;;  %947 = vrot.lane.b32.xlu0 %v757_v13, %s8834_s25 }
 0x2ed   :  { %v2564_v36 = vpop.permute.xlu1 %2563  ;;  %v2310_v61 = vpop.permute.xlu0 %2309 }
 0x2ee   :  { %v3016_v63 = vsel %vm2761_vm9, %v2952_v46, %v2564_v36 }
 0x2ef   :  { %2512 = vrot.lane.b32.xlu1 %v10697_v48, %s8833_s29  ;;  %v3094_v30 = vsel %vm2826_vm10, %v3016_v63, %v2629_v23 }
 0x2f0   :  { %3537 = vmatprep.mubr.bf16.mxu1 %v3094_v30 }
 0x2f1   :  { %v2633_v42 = vpop.permute.xlu1 %2632  ;;  %3538 = vmatmul.mubr.bf16.gmra.mxu1 %v2870_v32  ;;  %v2371_v29 = vpop.permute.xlu0 %2370 }
 0x2f2   :  { %v2793_v33 = vsel %vm2761_vm9, %v2712_v9, %v2371_v29  ;;  %v8475_v32 = vpop.f32.mrf.mxu0 }
 0x2f3   :  { %2577 = vrot.lane.b32.xlu1 %v10712_v40, %s8835_s17 }
 0x2f5   :  { %v2501_v14 = vpop.permute.xlu1 %2500  ;;  %v2436_v35 = vpop.permute.xlu0 %2435 }
 0x2f6   :  { %v2954_v8 = vsel %vm2664_vm8, %v10496_v28, %v2501_v14  ;;  %v2873_v41 = vsel %vm2826_vm10, %v2793_v33, %v2436_v35 }
 0x2f7   :  { %949 = vrot.lane.b32.xlu1 %v758_v27, %s8834_s25 }
 0x2f9   :  { %v2566_v23 = vpop.permute.xlu1 %2565  ;;  %v11186_v45 = vpop.permute.xlu0 %2311 }
 0x2fa   :  { %v3018_v18 = vsel %vm2761_vm9, %v2954_v8, %v2566_v23 }
 0x2fb   :  { %v3097_v55 = vsel %vm2826_vm10, %v3018_v18, %v2631_v52 }
 0x2fc   :  { %3545 = vmatprep.mubr.bf16.mxu1 %v3097_v55 }
 0x2fd   :  { %v2635_v46 = vpop.permute.xlu1 %2634  ;;  %3546 = vmatmul.mubr.bf16.gmra.mxu1 %v2873_v41  ;;  %v2373_v36 = vpop.permute.xlu0 %2372 }
 0x2fe   :  { %v2795_v52 = vsel %vm2761_vm9, %v2715_v43, %v2373_v36 }
 0x301   :  { %v2503_v28 = vpop.permute.xlu1 %2502  ;;  %v2438_v31 = vpop.permute.xlu0 %2437 }
 0x302   :  { %v2956_v63 = vsel %vm2664_vm8, %v10519_v44, %v2503_v28  ;;  %v2876_v14 = vsel %vm2826_vm10, %v2795_v52, %v2438_v31  ;;  %v3716_v44 = vpop.f32.mrf.mxu0  ;;  %v2718_v28 = vsel %vm2664_vm8, %v10588_v50, %v2310_v61 }
 0x303   :  { %v13159_v44 = vmax.f32 %v10938_v3, 0.0 }
 0x304   :  { %v8476_v12 = vpop.f32.mrf.mxu0 }
 0x305   :  { %v2568_v16 = vpop.permute.xlu1 %2567  ;;  %v2375_v30 = vpop.permute.xlu0 %2374 }
 0x306   :  { %v3020_v39 = vsel %vm2761_vm9, %v2956_v63, %v2568_v16  ;;  %v3719_v16 = vpop.f32.mrf.mxu0  ;;  %v2797_v43 = vsel %vm2761_vm9, %v2718_v28, %v2375_v30 }
 0x307   :  { %v3100_v29 = vsel %vm2826_vm10, %v3020_v39, %v2633_v42 }
 0x308   :  { %3553 = vmatprep.mubr.bf16.mxu1 %v3100_v29 }
 0x309   :  { %v2637_v35 = vpop.permute.xlu1 %2636  ;;  %v3427_v8 = vpop.f32.mrf.mxu1  ;;  %3554 = vmatmul.mubr.bf16.gmra.mxu1 %v2876_v14 }
 0x30a   :  { %v2440_v23 = vpop.permute.xlu0 %2439 }
 0x30b   :  { %v3429_v9 = vpop.f32.mrf.mxu1  ;;  %v2879_v52 = vsel %vm2826_vm10, %v2797_v43, %v2440_v23 }
 0x30d   :  { %v2505_v18 = vpop.permute.xlu1 %2504  ;;  %v3430_v33 = vpop.f32.mrf.mxu1 }
 0x30e   :  { %v2377_v55 = vpop.permute.xlu0 %2376  ;;  %v2958_v42 = vsel %vm2664_vm8, %v10543_v58, %v2505_v18  ;;  %v13158_v58 = vmax.f32 %v10941_v26, 0.0 }
 0x30f   :  { %v3432_v41 = vpop.f32.mrf.mxu1 }
 0x310   :  { %v11230_v41 = vpop.f32.mrf.mxu0 }
 0x311   :  { %v2570_v36 = vpop.permute.xlu1 %2569 }
 0x312   :  { %v3022_v31 = vsel %vm2761_vm9, %v2958_v42, %v2570_v36  ;;  %v2442_v63 = vpop.permute.xlu0 %2441 }
 0x313   :  { %v3103_v39 = vsel %vm2826_vm10, %v3022_v31, %v2635_v46  ;;  %v2721_v31 = vsel %vm2664_vm8, %v10620_v0, %v11186_v45 }
 0x314   :  { %3561 = vmatprep.mubr.bf16.mxu1 %v3103_v39 }
 0x315   :  { %v932_v29 = vpop.permute.xlu1 %931  ;;  %v3435_v14 = vpop.f32.mrf.mxu1  ;;  %3562 = vmatmul.mubr.bf16.gmra.mxu1 %v2879_v52  ;;  %v2799_v52 = vsel %vm2761_vm9, %v2721_v31, %v2377_v55 }
 0x316   :  { %v11218_v8 = vmax.f32 %v13158_v58, %v932_v29  ;;  %v3436_v50 = vadd.f32 %v11206_v11, %v3435_v14  ;;  %v934_v61 = vpop.permute.xlu0 %933 }
 0x317   :  { %v11223_v9 = vmax.f32 %v13159_v44, %v934_v61  ;;  %v3437_v30 = vpop.f32.mrf.mxu1 }
 0x318   :  { %v3725_v18 = vadd.f32 %v8475_v32, %v3436_v50  ;;  %1251 = vrot.lane.b32.xlu0 %v11218_v8, %s8835_s17 }
 0x319   :  { %1253 = vrot.lane.b32.xlu1 %v11223_v9, %s8835_s17  ;;  %v2507_v46 = vpop.permute.xlu1 %2506  ;;  %v3438_v23 = vpop.f32.mrf.mxu1 }
 0x31a   :  { %v3439_v26 = vadd.f32 %v11206_v11, %v3438_v23  ;;  %v2314_v33 = vpop.permute.xlu0 %2313  ;;  %v3973_v36 = vmax.f32 %v3725_v18, 0.0  ;;  %v2960_v32 = vsel %vm2664_vm8, %v10567_v21, %v2507_v46  ;;  %v2882_v21 = vsel %vm2826_vm10, %v2799_v52, %v2442_v63 }
 0x31b   :  { %v3440_v42 = vpop.f32.mrf.mxu1  ;;  %v2724_v31 = vsel %vm2664_vm8, %v13135_v51, %v2314_v33 }
 0x31c   :  { %v3728_v3 = vadd.f32 %v8476_v12, %v3439_v26  ;;  %2382 = vrot.lane.b32.xlu0 %v10676_v34, %s8835_s17  ;;  %v3732_v12 = vpop.f32.mrf.mxu0  ;;  %v4103_v29 = vrot.slane %v3973_v36, 1 }
 0x31d   :  { %2642 = vrot.lane.b32.xlu1 %v10658_v10, %s8834_s25  ;;  %v2572_v28 = vpop.permute.xlu1 %2571 }
 0x31e   :  { %v3974_v16 = vmax.f32 %v3728_v3, 0.0  ;;  %v3024_v43 = vsel %vm2761_vm9, %v2960_v32, %v2572_v28  ;;  %v2379_v39 = vpop.permute.xlu0 %2378 }
 0x31f   :  { %v3106_v34 = vsel %vm2826_vm10, %v3024_v43, %v2637_v35  ;;  %v8480_v35 = vpop.f32.mrf.mxu0  ;;  %v2801_v52 = vsel %vm2761_vm9, %v2724_v31, %v2379_v39 }
 0x320   :  { %v4105_v14 = vrot.slane %v3974_v16, 1  ;;  %2447 = vrot.lane.b32.xlu0 %v10690_v49, %s8834_s25  ;;  %3569 = vmatprep.mubr.bf16.mxu1 %v3106_v34 }
 0x321   :  { %2514 = vrot.lane.b32.xlu1 %v10720_v19, %s8833_s29  ;;  %v2509_v0 = vpop.permute.xlu1 %2508  ;;  %v3443_v45 = vpop.f32.mrf.mxu1  ;;  %3570 = vmatmul.mubr.bf16.gmra.mxu1 %v2882_v21 }
 0x322   :  { %v4106_v58 = vsel %vm4099_vm11, %v4103_v29, %v4105_v14  ;;  %v3444_v55 = vadd.f32 %v11206_v11, %v3443_v45  ;;  %v2444_v50 = vpop.permute.xlu0 %2443  ;;  %v3735_v26 = vpop.f32.mrf.mxu0  ;;  %v2962_v3 = vsel %vm2664_vm8, %v10590_v22, %v2509_v0 }
 0x323   :  { %v4294_v61 = vmax.f32 %v3973_v36, %v4106_v58  ;;  %v3445_v44 = vpop.f32.mrf.mxu1  ;;  %v2885_v51 = vsel %vm2826_vm10, %v2801_v52, %v2444_v50 }
 0x324   :  { %v3733_v30 = vadd.f32 %v3732_v12, %v3444_v55  ;;  %2319 = vrot.lane.b32.xlu0 %v13139_v37, %s8833_s29 }
 0x325   :  { %2579 = vrot.lane.b32.xlu1 %v10726_v2, %s8835_s17  ;;  %v2574_v63 = vpop.permute.xlu1 %2573  ;;  %v3446_v18 = vpop.f32.mrf.mxu1 }
 0x326   :  { %v3975_v46 = vmax.f32 %v3733_v30, 0.0  ;;  %v3447_v23 = vadd.f32 %v11206_v11, %v3446_v18  ;;  %v2316_v28 = vpop.permute.xlu0 %2315  ;;  %v3026_v43 = vsel %vm2761_vm9, %v2962_v3, %v2574_v63 }
 0x327   :  { %v3448_v42 = vpop.f32.mrf.mxu1 }
 0x328   :  { %v4107_v32 = vrot.slane %v3975_v46, 1  ;;  %v3736_v36 = vadd.f32 %v3735_v26, %v3447_v23  ;;  %2384 = vrot.lane.b32.xlu0 %v10697_v48, %s8835_s17  ;;  %v1455_v48 = vld [vmem:[%s12805_s3 + $0x1c0] sm:$0xff]  ;;  %v11281_v42 = vpop.f32.mrf.mxu0 }
 0x329   :  { %2644 = vrot.lane.b32.xlu1 %v10685_v59, %s8834_s25  ;;  %v2639_v12 = vpop.permute.xlu1 %2638 }
 0x32a   :  { %v4108_v34 = vsel %vm4099_vm11, %v4105_v14, %v4107_v32  ;;  %v3976_v22 = vmax.f32 %v3736_v36, 0.0  ;;  %v3109_v29 = vsel %vm2826_vm10, %v3026_v43, %v2639_v12  ;;  %v1456_v14 = vld [vmem:[%s12805_s3 + $0x1c8] sm:$0xff]  ;;  %v2381_v58 = vpop.permute.xlu0 %2380 }
 0x32b   :  { %v4295_v21 = vmax.f32 %v3974_v16, %v4108_v34  ;;  %3577 = vmatprep.mubr.bf16.mxu1 %v3109_v29 }
 0x32c   :  { %v4109_v33 = vrot.slane %v3976_v22, 1  ;;  %2449 = vrot.lane.b32.xlu0 %v10712_v40, %s8834_s25  ;;  %3578 = vmatmul.mubr.bf16.gmra.mxu1 %v2885_v51 }
 0x32d   :  { %1745 = vperm.xlu1 %8578, %v1455_v48   ;;  %v2511_v39 = vpop.permute.xlu1 %2510  ;;  %v3451_v0 = vpop.f32.mrf.mxu1 }
 0x32e   :  { %v4110_v45 = vsel %vm4099_vm11, %v4107_v32, %v4109_v33  ;;  %v3452_v16 = vadd.f32 %v11206_v11, %v3451_v0  ;;  %v2964_v32 = vsel %vm2664_vm8, %v13138_v1, %v2511_v39  ;;  %v3748_v48 = vpop.f32.mrf.mxu0 }
 0x32f   :  { %v4296_v55 = vmax.f32 %v3975_v46, %v4110_v45  ;;  %v3453_v44 = vpop.f32.mrf.mxu1  ;;  %v2446_v46 = vpop.permute.xlu0 %2445 }
 0x330   :  { %v3741_v50 = vadd.f32 %v11230_v41, %v3452_v16  ;;  %1750 = vperm.xlu0 %8577, %v1456_v14   ;;  %v2727_v41 = vsel %vm2664_vm8, %v10667_v56, %v2316_v28 }
 0x331   :  { %v4358_v30 = vmax.f32 %v4294_v61, %v4296_v55  ;;  %v2576_v63 = vpop.permute.xlu1 %2575  ;;  %v3454_v18 = vpop.f32.mrf.mxu1  ;;  %v2803_v12 = vsel %vm2761_vm9, %v2727_v41, %v2381_v58 }
 0x332   :  { %v3977_v23 = vmax.f32 %v3741_v50, 0.0  ;;  %v3455_v26 = vadd.f32 %v11206_v11, %v3454_v18  ;;  %v3028_v61 = vsel %vm2761_vm9, %v2964_v32, %v2576_v63  ;;  %v2888_v1 = vsel %vm2826_vm10, %v2803_v12, %v2446_v46 }
 0x333   :  { %4422 = vst.msk [vmem:[#allocation2 + $0x10] sm:$0xff] %vm2761_vm9, %v4358_v30  ;;  %v3456_v3 = vpop.f32.mrf.mxu1  ;;  %v13160_v18 = vmax.f32 %v10998_v38, 0.0 }
 0x334   :  { %v4111_v36 = vrot.slane %v3977_v23, 1  ;;  %v3744_v31 = vadd.f32 %v8480_v35, %v3455_v26 }
 0x335   :  { %v2641_v43 = vpop.permute.xlu1 %2640 }
 0x336   :  { %v4112_v52 = vsel %vm4099_vm11, %v4109_v33, %v4111_v36  ;;  %v3978_v34 = vmax.f32 %v3744_v31, 0.0  ;;  %v3112_v29 = vsel %vm2826_vm10, %v3028_v61, %v2641_v43  ;;  %v8484_v33 = vpop.f32.mrf.mxu0  ;;  %v1458_v61 = vld [vmem:[%s12805_s3 + $0x1d8] sm:$0xff] }
 0x337   :  { %v4297_v51 = vmax.f32 %v3976_v22, %v4112_v52  ;;  %3585 = vmatprep.mubr.bf16.mxu1 %v3112_v29 }
 0x338   :  { %v4113_v39 = vrot.slane %v3978_v34, 1  ;;  %3586 = vmatmul.mubr.bf16.gmra.mxu1 %v2888_v1  ;;  %v3751_v63 = vpop.f32.mrf.mxu0 }
 0x339   :  { %v4359_v35 = vmax.f32 %v4295_v21, %v4297_v51  ;;  %v3459_v56 = vpop.f32.mrf.mxu1 }
 0x33a   :  { %v4114_v28 = vsel %vm4099_vm11, %v4111_v36, %v4113_v39  ;;  %v3460_v0 = vadd.f32 %v11206_v11, %v3459_v56  ;;  %v1711_v14 = vpop.permute.xlu0 %1710  ;;  %v4501_v45 = vld [vmem:[#allocation2 + $0x15] sm:$0x1]  ;;  %v4484_v22 = vld [vmem:[#allocation2 + $0x11] sm:$0x1]  ;;  %v13161_v56 = vmax.f32 %v11035_v47, 0.0 }
 0x33b   :  { %4423 = vst.msk [vmem:[#allocation2 + $0x18] sm:$0xff] %vm2761_vm9, %v4359_v35  ;;  %v4298_v58 = vmax.f32 %v3977_v23, %v4114_v28  ;;  %v3461_v16 = vpop.f32.mrf.mxu1  ;;  %v1457_v47 = vld [vmem:[%s12805_s3 + $0x1d0] sm:$0xff] }
 0x33c   :  { %4502 = vst.msk [vmem:[#allocation3 + $0x2] sm:$0x1] %vm4485_vm12, %v4501_v45  ;;  %v3749_v55 = vadd.f32 %v3748_v48, %v3460_v0  ;;  %4486 = vst.msk [vmem:[#allocation3] sm:$0x1] %vm4485_vm12, %v4484_v22 }
 0x33d   :  { %v3462_v44 = vpop.f32.mrf.mxu1 }
 0x33e   :  { %v3979_v21 = vmax.f32 %v3749_v55, 0.0  ;;  %v3463_v50 = vadd.f32 %v11206_v11, %v3462_v44  ;;  %v938_v30 = vpop.permute.xlu0 %937 }
 0x33f   :  { %v11301_v26 = vmax.f32 %v13160_v18, %v938_v30  ;;  %v3464_v3 = vpop.f32.mrf.mxu1 }
 0x340   :  { %v4115_v32 = vrot.slane %v3979_v21, 1  ;;  %v3752_v23 = vadd.f32 %v3751_v63, %v3463_v50 }
 0x341   :  { %1257 = vrot.lane.b32.xlu0 %v11301_v26, %s8835_s17 }
 0x342   :  { %v4116_v36 = vsel %vm4099_vm11, %v4113_v39, %v4115_v32  ;;  %v3980_v46 = vmax.f32 %v3752_v23, 0.0  ;;  %v1706_v31 = vpop.permute.xlu1 %1705  ;;  %v1242_v41 = vpop.permute.xlu0 %1241  ;;  %v4531_v12 = vld [vmem:[#allocation2 + $0x1d] sm:$0x1]  ;;  %v4516_v38 = vld [vmem:[#allocation2 + $0x19] sm:$0x1] }
 0x343   :  { %v4299_v43 = vmax.f32 %v3978_v34, %v4116_v36  ;;  %4532 = vst.msk [vmem:[#allocation3 + $0x6] sm:$0x1] %vm4485_vm12, %v4531_v12  ;;  %4517 = vst.msk [vmem:[#allocation3 + $0x4] sm:$0x1] %vm4485_vm12, %v4516_v38  ;;  %v1384_v16 = vmax.f32 %v11032_v62, %v1242_v41  ;;  %v13162_v62 = vmax.f32 %v11038_v53, 0.0 }
 0x344   :  { %v4117_v52 = vrot.slane %v3980_v46, 1 }
 0x345   :  { %v3467_v29 = vpop.f32.mrf.mxu1  ;;  %1760 = vperm.xlu0 %8577, %v1458_v61  }
 0x346   :  { %v4118_v48 = vsel %vm4099_vm11, %v4115_v32, %v4117_v52  ;;  %v3468_v51 = vadd.f32 %v11206_v11, %v3467_v29  ;;  %v936_v1 = vpop.permute.xlu1 %935  ;;  %v11313_v39 = vpop.permute.xlu0 %1720  ;;  %v1832_v32 = vmul.f32 %v1711_v14, %v1384_v16  ;;  %v13164_v16 = vshrl.u32 %v10685_v59, 16 }
 0x347   :  { %v4300_v35 = vmax.f32 %v3979_v21, %v4118_v48  ;;  %v11317_v34 = vmax.f32 %v13161_v56, %v936_v1  ;;  %v3469_v28 = vpop.f32.mrf.mxu1  ;;  %v11327_v21 = vpop.f32.mrf.mxu0 }
 0x348   :  { %v3757_v0 = vadd.f32 %v11281_v42, %v3468_v51  ;;  %v13163_v28 = vmax.f32 %v11067_v6, 0.0 }
 0x349   :  { %v4362_v45 = vmax.f32 %v4298_v58, %v4300_v35  ;;  %v3470_v22 = vpop.f32.mrf.mxu1  ;;  %1255 = vrot.lane.b32.xlu1 %v11317_v34, %s8835_s17  ;;  %v3764_v38 = vpop.f32.mrf.mxu0 }
 0x34a   :  { %v3981_v55 = vmax.f32 %v3757_v0, 0.0  ;;  %v3471_v44 = vadd.f32 %v11206_v11, %v3470_v22  ;;  %v1240_v50 = vpop.permute.xlu1 %1239  ;;  %v942_v30 = vpop.permute.xlu0 %941  ;;  %v2202_v22 = vor.u32 %v10703_v5, %v13164_v16 }
 0x34b   :  { %4426 = vst.msk [vmem:[#allocation2 + $0x30] sm:$0xff] %vm2761_vm9, %v4362_v45  ;;  %v1383_v42 = vmax.f32 %v11064_v57, %v1240_v50  ;;  %v11333_v58 = vmax.f32 %v13162_v62, %v942_v30  ;;  %v3472_v63 = vpop.f32.mrf.mxu1 }
 0x34c   :  { %v4119_v18 = vrot.slane %v3981_v55, 1  ;;  %v3760_v3 = vadd.f32 %v8484_v33, %v3471_v44 }
 0x34d   :  { %v1831_v23 = vmul.f32 %v1706_v31, %v1383_v42  ;;  %1755 = vperm.xlu1 %8578, %v1457_v47   ;;  %1261 = vrot.lane.b32.xlu0 %v11333_v58, %s8835_s17 }
 0x34e   :  { %v4120_v36 = vsel %vm4099_vm11, %v4117_v52, %v4119_v18  ;;  %v3982_v41 = vmax.f32 %v3760_v3, 0.0  ;;  %v1716_v61 = vpop.permute.xlu1 %1715  ;;  %v1246_v12 = vpop.permute.xlu0 %1245 }
 0x34f   :  { %v4301_v57 = vmax.f32 %v3980_v46, %v4120_v36  ;;  %v11338_v29 = vpack.c.bf16 %v1832_v32, %v1831_v23  ;;  %v11346_v46 = vpop.f32.mrf.mxu0  ;;  %v1386_v42 = vmax.f32 %v11083_v20, %v1246_v12  ;;  %v1459_v20 = vld [vmem:[%s12805_s3 + $0x1e0] sm:$0xff] }
 0x350   :  { %v4121_v53 = vrot.slane %v3982_v41, 1 }
 0x351   :  { %v4363_v48 = vmax.f32 %v4299_v43, %v4301_v57  ;;  %v3475_v51 = vpop.f32.mrf.mxu1  ;;  %2321 = vrot.lane.b32.xlu0 %v10658_v10, %s8833_s29  ;;  %v2075_v14 = vshll.u32 %v11338_v29, 16  ;;  %v2072_v33 = vshrl.u32 %v11338_v29, 16 }
 0x352   :  { %v4122_v31 = vsel %vm4099_vm11, %v4119_v18, %v4121_v53  ;;  %v3476_v52 = vadd.f32 %v11206_v11, %v3475_v51  ;;  %v940_v1 = vpop.permute.xlu1 %939  ;;  %v946_v35 = vpop.permute.xlu0 %945  ;;  %v4561_v56 = vld [vmem:[#allocation2 + $0x37] sm:$0x1]  ;;  %v4546_v47 = vld [vmem:[#allocation2 + $0x33] sm:$0x1] }
 0x353   :  { %4427 = vst.msk [vmem:[#allocation2 + $0x38] sm:$0xff] %vm2761_vm9, %v4363_v48  ;;  %v11349_v43 = vmax.f32 %v3981_v55, %v4122_v31  ;;  %v11353_v0 = vmax.f32 %v13163_v28, %v940_v1  ;;  %v3477_v45 = vpop.f32.mrf.mxu1  ;;  %v2203_v44 = vrot.slane %v2075_v14, 1  ;;  %v11359_v30 = vrot.slane %v2072_v33, 7  ;;  %v3767_v18 = vpop.f32.mrf.mxu0 }
 0x354   :  { %4562 = vst.msk [vmem:[#allocation3 + $0xa] sm:$0x1] %vm4485_vm12, %v4561_v56  ;;  %v3765_v50 = vadd.f32 %v3764_v38, %v3476_v52  ;;  %4547 = vst.msk [vmem:[#allocation3 + $0x8] sm:$0x1] %vm4485_vm12, %v4546_v47  ;;  %v1834_v38 = vmul.f32 %v11313_v39, %v1386_v42 }
 0x355   :  { %v3478_v55 = vpop.f32.mrf.mxu1  ;;  %1259 = vrot.lane.b32.xlu1 %v11353_v0, %s8835_s17  ;;  %2386 = vrot.lane.b32.xlu0 %v10720_v19, %s8835_s17  ;;  %v11367_v6 = vsel %vm2131_vm2, %v2202_v22, %v2203_v44  ;;  %v2077_v12 = vor.u32 %v2075_v14, %v11359_v30  ;;  %v2205_v47 = vor.u32 %v2203_v44, %v2072_v33 }
 0x356   :  { %v3983_v5 = vmax.f32 %v3765_v50, 0.0  ;;  %v3479_v62 = vadd.f32 %v11206_v11, %v3478_v55  ;;  %v1244_v63 = vpop.permute.xlu1 %1243  ;;  %8517 = vmatprep.mubr.msk.bf16.mxu0 %vm2664_vm8, %v11367_v6  ;;  %v1731_v36 = vpop.permute.xlu0 %1730 }
 0x357   :  { %v1385_v3 = vmax.f32 %v11115_v17, %v1244_v63  ;;  %v3480_v19 = vpop.f32.mrf.mxu1  ;;  %v11386_v28 = vsel %vm1879_vm5, %v10707_v15, %v2077_v12  ;;  %v13165_v15 = vmax.f32 %v11070_v54, 0.0 }
 0x358   :  { %v4123_v32 = vrot.slane %v3983_v5, 1  ;;  %v3768_v23 = vadd.f32 %v3767_v18, %v3479_v62 }
 0x359   :  { %v1833_v57 = vmul.f32 %v1716_v61, %v1385_v3  ;;  %2516 = vrot.lane.b32.xlu1 %v11367_v6, %s8833_s29  ;;  %1765 = vperm.xlu0 %8577, %v1459_v20   ;;  %v11398_v16 = vmax.f32 %v13165_v15, %v946_v35 }
 0x35a   :  { %v4124_v48 = vsel %vm4099_vm11, %v4121_v53, %v4123_v32  ;;  %v3984_v51 = vmax.f32 %v3768_v23, 0.0  ;;  %v944_v31 = vpop.permute.xlu1 %943  ;;  %v4576_v17 = vld [vmem:[#allocation2 + $0x3b] sm:$0x1]  ;;  %v1250_v53 = vpop.permute.xlu0 %1249 }
 0x35b   :  { %v4303_v52 = vmax.f32 %v3982_v41, %v4124_v48  ;;  %v11382_v1 = vpack.c.bf16 %v1834_v38, %v1833_v57  ;;  %4577 = vst.msk [vmem:[#allocation3 + $0xc] sm:$0x1] %vm4485_vm12, %v4576_v17  ;;  %v1388_v63 = vmax.f32 %v11123_v24, %v1250_v53  ;;  %v1460_v24 = vld [vmem:[%s12805_s3 + $0x1e8] sm:$0xff] }
 0x35c   :  { %v4125_v56 = vrot.slane %v3984_v51, 1 }
 0x35d   :  { %v3483_v39 = vpop.f32.mrf.mxu1  ;;  %2581 = vrot.lane.b32.xlu1 %v11386_v28, %s8835_s17  ;;  %2451 = vrot.lane.b32.xlu0 %v10726_v2, %s8834_s25  ;;  %v2083_v61 = vshll.u32 %v11382_v1, 16  ;;  %v2080_v19 = vshrl.u32 %v11382_v1, 16 }
 0x35e   :  { %v4126_v41 = vsel %vm4099_vm11, %v4123_v32, %v4125_v56  ;;  %v3484_v14 = vadd.f32 %v11206_v11, %v3483_v39  ;;  %v1726_v45 = vpop.permute.xlu1 %1725  ;;  %v1836_v32 = vmul.f32 %v1731_v36, %v1388_v63 }
 0x35f   :  { %v4304_v22 = vmax.f32 %v3983_v5, %v4126_v41  ;;  %v3485_v50 = vpop.f32.mrf.mxu1  ;;  %v2206_v42 = vrot.slane %v2083_v61, 1  ;;  %v11433_v36 = vrot.slane %v2080_v19, 7 }
 0x360   :  { %v3773_v55 = vadd.f32 %v11327_v21, %v3484_v14  ;;  %v11416_v21 = vpop.f32.mrf.mxu0 }
 0x361   :  { %v4366_v62 = vmax.f32 %v11349_v43, %v4304_v22  ;;  %v3486_v20 = vpop.f32.mrf.mxu1  ;;  %2646 = vrot.lane.b32.xlu1 %v11338_v29, %s8834_s25  ;;  %1265 = vrot.lane.b32.xlu0 %v11398_v16, %s8835_s17  ;;  %v11408_v54 = vsel %vm2131_vm2, %v2205_v47, %v2206_v42  ;;  %v2208_v50 = vor.u32 %v2206_v42, %v2080_v19 }
 0x362   :  { %v3985_v35 = vmax.f32 %v3773_v55, 0.0  ;;  %v3487_v33 = vadd.f32 %v11206_v11, %v3486_v20  ;;  %v1248_v44 = vpop.permute.xlu1 %1247  ;;  %8518 = vmatmul.mubr.msk.bf16.gmra.mxu0 %vm2664_vm8, %v11408_v54  ;;  %v3780_v48 = vpop.f32.mrf.mxu0 }
 0x363   :  { %4430 = vst.msk [vmem:[#allocation2 + $0x50] sm:$0xff] %vm2761_vm9, %v4366_v62  ;;  %v1387_v43 = vmax.f32 %v11151_v4, %v1248_v44  ;;  %v3488_v5 = vpop.f32.mrf.mxu1  ;;  %v13166_v4 = vmax.f32 %v11098_v25, 0.0  ;;  %v2085_v62 = vor.u32 %v2083_v61, %v11433_v36  ;;  %v1462_v61 = vld [vmem:[%s12805_s3 + $0x1f8] sm:$0xff] }
 0x364   :  { %v4127_v18 = vrot.slane %v3985_v35, 1  ;;  %v3776_v3 = vadd.f32 %v11346_v46, %v3487_v33  ;;  %v8492_v15 = vpop.f32.mrf.mxu0 }
 0x365   :  { %v1835_v23 = vmul.f32 %v1726_v45, %v1387_v43  ;;  %1770 = vperm.xlu1 %8578, %v1460_v24   ;;  %2323 = vrot.lane.b32.xlu0 %v10685_v59, %s8833_s29  ;;  %v11429_v17 = vmax.f32 %v13166_v4, %v944_v31 }
 0x366   :  { %v4128_v12 = vsel %vm4099_vm11, %v4125_v56, %v4127_v18  ;;  %v3986_v38 = vmax.f32 %v3776_v3, 0.0  ;;  %v11425_v57 = vpop.permute.xlu1 %1735  ;;  %v3783_v24 = vpop.f32.mrf.mxu0  ;;  %v11472_v3 = vsel %vm1879_vm5, %v11359_v30, %v2085_v62 }
 0x367   :  { %v4305_v39 = vmax.f32 %v3984_v51, %v4128_v12  ;;  %v11431_v46 = vpack.c.bf16 %v1836_v32, %v1835_v23 }
 0x368   :  { %v4129_v41 = vrot.slane %v3986_v38, 1 }
 0x369   :  { %v4367_v53 = vmax.f32 %v4303_v52, %v4305_v39  ;;  %v3491_v14 = vpop.f32.mrf.mxu1  ;;  %1263 = vrot.lane.b32.xlu1 %v11429_v17, %s8835_s17  ;;  %2388 = vrot.lane.b32.xlu0 %v11367_v6, %s8835_s17  ;;  %v2091_v56 = vshll.u32 %v11431_v46, 16  ;;  %v11450_v6 = vpop.permute.xlu0 %1740 }
 0x36a   :  { %v4130_v25 = vsel %vm4099_vm11, %v4127_v18, %v4129_v41  ;;  %v3492_v31 = vadd.f32 %v11206_v11, %v3491_v14  ;;  %v11442_v51 = vpop.permute.xlu1 %2512  ;;  %v4591_v45 = vld [vmem:[#allocation2 + $0x51] sm:$0x1]  ;;  %v4606_v63 = vld [vmem:[#allocation2 + $0x55] sm:$0x1] }
 0x36b   :  { %4431 = vst.msk [vmem:[#allocation2 + $0x58] sm:$0xff] %vm2761_vm9, %v4367_v53  ;;  %v4306_v52 = vmax.f32 %v3985_v35, %v4130_v25  ;;  %v3493_v22 = vpop.f32.mrf.mxu1  ;;  %v11447_v47 = vrot.slane %v2091_v56, 1 }
 0x36c   :  { %4592 = vst.msk [vmem:[#allocation3 + $0xe] sm:$0x1] %vm4485_vm12, %v4591_v45  ;;  %v3781_v55 = vadd.f32 %v3780_v48, %v3492_v31  ;;  %4607 = vst.msk [vmem:[#allocation3 + $0x10] sm:$0x1] %vm4485_vm12, %v4606_v63  ;;  %v2088_v22 = vshrl.u32 %v11431_v46, 16 }
 0x36d   :  { %v3494_v20 = vpop.f32.mrf.mxu1  ;;  %2518 = vrot.lane.b32.xlu1 %v11408_v54, %s8833_s29  ;;  %2453 = vrot.lane.b32.xlu0 %v11386_v28, %s8834_s25  ;;  %v11459_v42 = vsel %vm2131_vm2, %v2208_v50, %v11447_v47  ;;  %v11476_v19 = vpop.permute.xlu0 %2317 }
 0x36e   :  { %v3987_v35 = vmax.f32 %v3781_v55, 0.0  ;;  %v3495_v33 = vadd.f32 %v11206_v11, %v3494_v20  ;;  %v11463_v44 = vpop.permute.xlu1 %2577  ;;  %8521 = vmatprep.mubr.msk.bf16.mxu0 %vm2664_vm8, %v11459_v42  ;;  %v11499_v20 = vpop.f32.mrf.mxu0 }
 0x36f   :  { %v3496_v43 = vpop.f32.mrf.mxu1 }
 0x370   :  { %v4131_v5 = vrot.slane %v3987_v35, 1  ;;  %v3784_v18 = vadd.f32 %v3783_v24, %v3495_v33 }
 0x371   :  { %2583 = vrot.lane.b32.xlu1 %v11472_v3, %s8835_s17  ;;  %1780 = vperm.xlu0 %8577, %v1462_v61   ;;  %v948_v31 = vpop.permute.xlu0 %947 }
 0x372   :  { %v4132_v32 = vsel %vm4099_vm11, %v4129_v41, %v4131_v5  ;;  %v3988_v23 = vmax.f32 %v3784_v18, 0.0  ;;  %v950_v12 = vpop.permute.xlu1 %949  ;;  %v4636_v39 = vld [vmem:[#allocation2 + $0x5d] sm:$0x1]  ;;  %v4621_v53 = vld [vmem:[#allocation2 + $0x59] sm:$0x1] }
 0x373   :  { %v4307_v48 = vmax.f32 %v3986_v38, %v4132_v32  ;;  %v11481_v4 = vmax.f32 %v758_v27, %v950_v12  ;;  %4637 = vst.msk [vmem:[#allocation3 + $0x14] sm:$0x1] %vm4485_vm12, %v4636_v39  ;;  %4622 = vst.msk [vmem:[#allocation3 + $0x12] sm:$0x1] %vm4485_vm12, %v4621_v53  ;;  %v1461_v27 = vld [vmem:[%s12805_s3 + $0x1f0] sm:$0xff] }
 0x374   :  { %v4133_v14 = vrot.slane %v3988_v23, 1 }
 0x375   :  { %v3499_v30 = vpop.f32.mrf.mxu1  ;;  %2648 = vrot.lane.b32.xlu1 %v11382_v1, %s8834_s25  ;;  %1269 = vrot.lane.b32.xlu0 %v11481_v4, %s8835_s17 }
 0x376   :  { %v4134_v38 = vsel %vm4099_vm11, %v4131_v5, %v4133_v14  ;;  %v3500_v60 = vadd.f32 %v11206_v11, %v3499_v30 }
 0x377   :  { %v4308_v41 = vmax.f32 %v3987_v35, %v4134_v38  ;;  %v3501_v25 = vpop.f32.mrf.mxu1  ;;  %v11503_v35 = vmax.f32 %v757_v13, %v948_v31  ;;  %v3796_v13 = vpop.f32.mrf.mxu0 }
 0x378   :  { %v3789_v45 = vadd.f32 %v11416_v21, %v3500_v60 }
 0x379   :  { %v4370_v50 = vmax.f32 %v4306_v52, %v4308_v41  ;;  %v3502_v55 = vpop.f32.mrf.mxu1  ;;  %1775 = vperm.xlu1 %8578, %v1461_v27   ;;  %2325 = vrot.lane.b32.xlu0 %v11338_v29, %s8833_s29  ;;  %v11508_v52 = vrot.slane %v2088_v22, 7  ;;  %v8496_v53 = vpop.f32.mrf.mxu0 }
 0x37a   :  { %v3989_v62 = vmax.f32 %v3789_v45, 0.0  ;;  %v3503_v63 = vadd.f32 %v11206_v11, %v3502_v55 }
 0x37b   :  { %4434 = vst.msk [vmem:[#allocation2 + $0x70] sm:$0xff] %vm2761_vm9, %v4370_v50  ;;  %v3504_v21 = vpop.f32.mrf.mxu1  ;;  %v3799_v41 = vpop.f32.mrf.mxu0 }
 0x37c   :  { %v4135_v33 = vrot.slane %v3989_v62, 1  ;;  %v3792_v61 = vadd.f32 %v8492_v15, %v3503_v63  ;;  %v2093_v15 = vor.u32 %v2091_v56, %v11508_v52 }
 0x37d   :  { %2390 = vrot.lane.b32.xlu0 %v11408_v54, %s8835_s17  ;;  %1267 = vrot.lane.b32.xlu1 %v11503_v35, %s8835_s17 }
 0x37e   :  { %v4136_v24 = vsel %vm4099_vm11, %v4133_v14, %v4135_v33  ;;  %v3990_v7 = vmax.f32 %v3792_v61, 0.0  ;;  %v11528_v30 = vsel %vm1879_vm5, %v11433_v36, %v2093_v15 }
 0x37f   :  { %v4309_v43 = vmax.f32 %v3988_v23, %v4136_v24 }
 0x380   :  { %v4137_v5 = vrot.slane %v3990_v7, 1 }
 0x381   :  { %v4371_v18 = vmax.f32 %v4307_v48, %v4309_v43  ;;  %v3507_v32 = vpop.f32.mrf.mxu1  ;;  %2455 = vrot.lane.b32.xlu0 %v11472_v3, %s8834_s25  ;;  %2520 = vrot.lane.b32.xlu1 %v11459_v42, %s8833_s29 }
 0x382   :  { %v4138_v54 = vsel %vm4099_vm11, %v4135_v33, %v4137_v5  ;;  %v3508_v12 = vadd.f32 %v11206_v11, %v3507_v32  ;;  %v4651_v39 = vld [vmem:[#allocation2 + $0x73] sm:$0x1]  ;;  %v4666_v56 = vld [vmem:[#allocation2 + $0x77] sm:$0x1] }
 0x383   :  { %4435 = vst.msk [vmem:[#allocation2 + $0x78] sm:$0xff] %vm2761_vm9, %v4371_v18  ;;  %v4310_v23 = vmax.f32 %v3989_v62, %v4138_v54  ;;  %v3509_v14 = vpop.f32.mrf.mxu1  ;;  %v13167_v54 = vld [vmem:[#allocation27_spill] sm:$0xff] }
 0x384   :  { %4652 = vst.msk [vmem:[#allocation3 + $0x16] sm:$0x1] %vm4485_vm12, %v4651_v39  ;;  %v3797_v48 = vadd.f32 %v3796_v13, %v3508_v12  ;;  %4667 = vst.msk [vmem:[#allocation3 + $0x18] sm:$0x1] %vm4485_vm12, %v4666_v56  ;;  %v2730_v12 = vsel %vm2664_vm8, %v13167_v54, %v11476_v19 }
 0x385   :  { %v3510_v38 = vpop.f32.mrf.mxu1  ;;  %2327 = vrot.lane.b32.xlu0 %v11382_v1, %s8833_s29  ;;  %2585 = vrot.lane.b32.xlu1 %v11528_v30, %s8835_s17 }
 0x386   :  { %v3991_v60 = vmax.f32 %v3797_v48, 0.0  ;;  %v3511_v27 = vadd.f32 %v11206_v11, %v3510_v38 }
 0x387   :  { %v3512_v25 = vpop.f32.mrf.mxu1 }
 0x388   :  { %v4139_v31 = vrot.slane %v3991_v60, 1  ;;  %v3800_v45 = vadd.f32 %v3799_v41, %v3511_v27 }
 0x389   :  { %2392 = vrot.lane.b32.xlu0 %v11459_v42, %s8835_s17  ;;  %2650 = vrot.lane.b32.xlu1 %v11431_v46, %s8834_s25 }
 0x38a   :  { %v4140_v36 = vsel %vm4099_vm11, %v4137_v5, %v4139_v31  ;;  %v3992_v50 = vmax.f32 %v3800_v45, 0.0  ;;  %v1252_v55 = vpop.permute.xlu0 %1251  ;;  %v4681_v33 = vld [vmem:[#allocation2 + $0x7b] sm:$0x1]  ;;  %v2211_v45 = vor.u32 %v11447_v47, %v2088_v22 }
 0x38b   :  { %v11541_v62 = vmax.f32 %v3990_v7, %v4140_v36  ;;  %v1254_v63 = vpop.permute.xlu1 %1253  ;;  %v1389_v21 = vmax.f32 %v11218_v8, %v1252_v55  ;;  %4682 = vst.msk [vmem:[#allocation3 + $0x1a] sm:$0x1] %vm4485_vm12, %v4681_v33  ;;  %v2966_v7 = vsel %vm2664_vm8, %v13139_v37, %v11442_v51 }
 0x38c   :  { %v4141_v61 = vrot.slane %v3992_v50, 1  ;;  %v1390_v24 = vmax.f32 %v11223_v9, %v1254_v63  ;;  %v3030_v9 = vsel %vm2761_vm9, %v2966_v7, %v11463_v44  ;;  %v11567_v44 = vpop.f32.mrf.mxu0 }
 0x38d   :  { %v1837_v42 = vmul.f32 %v11425_v57, %v1389_v21  ;;  %v3515_v13 = vpop.f32.mrf.mxu1  ;;  %2457 = vrot.lane.b32.xlu0 %v11528_v30, %s8834_s25 }
 0x38e   :  { %v4142_v43 = vsel %vm4099_vm11, %v4139_v31, %v4141_v61  ;;  %v1838_v8 = vmul.f32 %v11450_v6, %v1390_v24  ;;  %v3516_v5 = vadd.f32 %v11206_v11, %v3515_v13  ;;  %v2383_v15 = vpop.permute.xlu0 %2382  ;;  %v3812_v63 = vpop.f32.mrf.mxu0 }
 0x38f   :  { %v4312_v18 = vmax.f32 %v3991_v60, %v4142_v43  ;;  %v2643_v57 = vpop.permute.xlu1 %2642  ;;  %v3517_v32 = vpop.f32.mrf.mxu1  ;;  %v2805_v14 = vsel %vm2761_vm9, %v2730_v12, %v2383_v15 }
 0x390   :  { %v11560_v39 = vpack.c.bf16 %v1838_v8, %v1837_v42  ;;  %v3805_v37 = vadd.f32 %v11499_v20, %v3516_v5  ;;  %v3115_v51 = vsel %vm2826_vm10, %v3030_v9, %v2643_v57 }
 0x391   :  { %v4374_v6 = vmax.f32 %v4310_v23, %v4312_v18  ;;  %3593 = vmatprep.mubr.bf16.mxu1 %v3115_v51  ;;  %v3518_v56 = vpop.f32.mrf.mxu1  ;;  %2329 = vrot.lane.b32.xlu0 %v11431_v46, %s8833_s29 }
 0x392   :  { %v3993_v48 = vmax.f32 %v3805_v37, 0.0  ;;  %v3519_v38 = vadd.f32 %v11206_v11, %v3518_v56  ;;  %v2448_v19 = vpop.permute.xlu0 %2447  ;;  %v2099_v60 = vshll.u32 %v11560_v39, 16  ;;  %v2096_v20 = vshrl.u32 %v11560_v39, 16 }
 0x393   :  { %4438 = vst.msk [vmem:[#allocation2 + $0x90] sm:$0xff] %vm2761_vm9, %v4374_v6  ;;  %v2515_v23 = vpop.permute.xlu1 %2514  ;;  %v3520_v27 = vpop.f32.mrf.mxu1  ;;  %v2891_v41 = vsel %vm2826_vm10, %v2805_v14, %v2448_v19  ;;  %v11614_v14 = vld [vmem:[%s12807_s5] ss:$0 sm:$0xff] }
 0x394   :  { %v4143_v25 = vrot.slane %v3993_v48, 1  ;;  %v3808_v31 = vadd.f32 %v8496_v53, %v3519_v38  ;;  %3594 = vmatmul.mubr.bf16.gmra.mxu1 %v2891_v41  ;;  %v11577_v36 = vrot.slane %v2099_v60, 1  ;;  %v11581_v55 = vrot.slane %v2096_v20, 7 }
 0x395   :  { %v2968_v5 = vsel %vm2664_vm8, %v10658_v10, %v2515_v23 }
 0x396   :  { %v4144_v21 = vsel %vm4099_vm11, %v4141_v61, %v4143_v25  ;;  %v3994_v33 = vmax.f32 %v3808_v31, 0.0  ;;  %v2213_v24 = vsel %vm2131_vm2, %v2211_v45, %v11577_v36  ;;  %v2320_v42 = vpop.permute.xlu0 %2319  ;;  %v2101_v47 = vor.u32 %v2099_v60, %v11581_v55  ;;  %v8500_v61 = vpop.f32.mrf.mxu0 }
 0x397   :  { %v4313_v53 = vmax.f32 %v3992_v50, %v4144_v21  ;;  %v2580_v13 = vpop.permute.xlu1 %2579  ;;  %2394 = vrot.lane.b32.xlu0 %v2213_v24, %s8835_s17  ;;  %2522 = vrot.lane.b32.xlu1 %v2213_v24, %s8833_s29  ;;  %v2733_v12 = vsel %vm2664_vm8, %v10690_v49, %v2320_v42 }
 0x398   :  { %v4145_v22 = vrot.slane %v3994_v33, 1  ;;  %8522 = vmatmul.mubr.msk.bf16.gmra.mxu0 %vm2664_vm8, %v2213_v24  ;;  %v11597_v15 = vsel %vm1879_vm5, %v11508_v52, %v2101_v47  ;;  %v3815_v38 = vpop.f32.mrf.mxu0 }
 0x399   :  { %v4375_v7 = vmax.f32 %v11541_v62, %v4313_v53  ;;  %v3523_v43 = vpop.f32.mrf.mxu1  ;;  %v3032_v62 = vsel %vm2761_vm9, %v2968_v5, %v2580_v13 }
 0x39a   :  { %v4146_v8 = vsel %vm4099_vm11, %v4143_v25, %v4145_v22  ;;  %v3524_v50 = vadd.f32 %v11206_v11, %v3523_v43  ;;  %v2385_v9 = vpop.permute.xlu0 %2384  ;;  %v4696_v18 = vld [vmem:[#allocation2 + $0x91] sm:$0x1]  ;;  %v4711_v11 = vld [vmem:[#allocation2 + $0x95] sm:$0x1]  ;;  %v8503_v43 = vpop.f32.mrf.mxu0 }
 0x39b   :  { %4439 = vst.msk [vmem:[#allocation2 + $0x98] sm:$0xff] %vm2761_vm9, %v4375_v7  ;;  %v4314_v57 = vmax.f32 %v3993_v48, %v4146_v8  ;;  %v2645_v32 = vpop.permute.xlu1 %2644  ;;  %2459 = vrot.lane.b32.xlu0 %v11597_v15, %s8834_s25  ;;  %2587 = vrot.lane.b32.xlu1 %v11597_v15, %s8835_s17  ;;  %v3525_v10 = vpop.f32.mrf.mxu1  ;;  %v2807_v6 = vsel %vm2761_vm9, %v2733_v12, %v2385_v9 }
 0x39c   :  { %4697 = vst.msk [vmem:[#allocation3 + $0x1c] sm:$0x1] %vm4485_vm12, %v4696_v18  ;;  %v3813_v52 = vadd.f32 %v3812_v63, %v3524_v50  ;;  %v3118_v54 = vsel %vm2826_vm10, %v3032_v62, %v2645_v32  ;;  %4712 = vst.msk [vmem:[#allocation3 + $0x1e] sm:$0x1] %vm4485_vm12, %v4711_v11  ;;  %v3828_v18 = vpop.f32.mrf.mxu0 }
 0x39d   :  { %3601 = vmatprep.mubr.bf16.mxu1 %v3118_v54  ;;  %v3526_v37 = vpop.f32.mrf.mxu1 }
 0x39e   :  { %v3995_v51 = vmax.f32 %v3813_v52, 0.0  ;;  %v3527_v56 = vadd.f32 %v11614_v14, %v3526_v37  ;;  %v2450_v48 = vpop.permute.xlu0 %2449 }
 0x39f   :  { %2331 = vrot.lane.b32.xlu0 %v11560_v39, %s8833_s29  ;;  %2652 = vrot.lane.b32.xlu1 %v11560_v39, %s8834_s25  ;;  %v3528_v49 = vpop.f32.mrf.mxu1  ;;  %v2894_v19 = vsel %vm2826_vm10, %v2807_v6, %v2450_v48 }
 0x3a0   :  { %v4147_v60 = vrot.slane %v3995_v51, 1  ;;  %v3816_v23 = vadd.f32 %v3815_v38, %v3527_v56  ;;  %3602 = vmatmul.mubr.bf16.gmra.mxu1 %v2894_v19 }
 0x3a2   :  { %v4148_v27 = vsel %vm4099_vm11, %v4145_v22, %v4147_v60  ;;  %v3996_v41 = vmax.f32 %v3816_v23, 0.0  ;;  %v4726_v31 = vld [vmem:[#allocation2 + $0x99] sm:$0x1]  ;;  %v4741_v45 = vld [vmem:[#allocation2 + $0x9d] sm:$0x1] }
 0x3a3   :  { %v4315_v25 = vmax.f32 %v3994_v33, %v4148_v27  ;;  %4727 = vst.msk [vmem:[#allocation3 + $0x20] sm:$0x1] %vm4485_vm12, %v4726_v31  ;;  %4742 = vst.msk [vmem:[#allocation3 + $0x22] sm:$0x1] %vm4485_vm12, %v4741_v45 }
 0x3a4   :  { %v4149_v63 = vrot.slane %v3996_v41, 1 }
 0x3a5   :  { %v3531_v21 = vpop.f32.mrf.mxu1 }
 0x3a6   :  { %v4150_v24 = vsel %vm4099_vm11, %v4147_v60, %v4149_v63  ;;  %v3532_v42 = vadd.f32 %v11614_v14, %v3531_v21 }
 0x3a7   :  { %v4316_v53 = vmax.f32 %v3995_v51, %v4150_v24  ;;  %v3533_v13 = vpop.f32.mrf.mxu1 }
 0x3a8   :  { %v3821_v47 = vadd.f32 %v11567_v44, %v3532_v42  ;;  %v8504_v44 = vpop.f32.mrf.mxu0  ;;  %v1746_v19 = vpop.permute.xlu1 %1745 }
 0x3a9   :  { %v4378_v7 = vmax.f32 %v4314_v57, %v4316_v53  ;;  %v3534_v22 = vpop.f32.mrf.mxu1 }
 0x3aa   :  { %v3997_v33 = vmax.f32 %v3821_v47, 0.0  ;;  %v3535_v8 = vadd.f32 %v11614_v14, %v3534_v22  ;;  %v3831_v49 = vpop.f32.mrf.mxu0 }
 0x3ab   :  { %4442 = vst.msk [vmem:[#allocation2 + $0xb0] sm:$0xff] %vm2761_vm9, %v4378_v7  ;;  %v3536_v5 = vpop.f32.mrf.mxu1  ;;  %v1751_v6 = vpop.permute.xlu0 %1750 }
 0x3ac   :  { %v4151_v50 = vrot.slane %v3997_v33, 1  ;;  %v3824_v9 = vadd.f32 %v8500_v61, %v3535_v8 }
 0x3ae   :  { %v4152_v62 = vsel %vm4099_vm11, %v4149_v63, %v4151_v50  ;;  %v3998_v32 = vmax.f32 %v3824_v9, 0.0 }
 0x3af   :  { %v4317_v10 = vmax.f32 %v3996_v41, %v4152_v62 }
 0x3b0   :  { %v4153_v11 = vrot.slane %v3998_v32, 1 }
 0x3b1   :  { %v4379_v52 = vmax.f32 %v4315_v25, %v4317_v10  ;;  %v3539_v54 = vpop.f32.mrf.mxu1 }
 0x3b2   :  { %v4154_v57 = vsel %vm4099_vm11, %v4151_v50, %v4153_v11  ;;  %v3540_v12 = vadd.f32 %v11614_v14, %v3539_v54  ;;  %v4756_v37 = vld [vmem:[#allocation2 + $0xb3] sm:$0x1]  ;;  %v4771_v61 = vld [vmem:[#allocation2 + $0xb7] sm:$0x1]  ;;  %v11647_v54 = vpop.f32.mrf.mxu0 }
 0x3b3   :  { %4443 = vst.msk [vmem:[#allocation2 + $0xb8] sm:$0xff] %vm2761_vm9, %v4379_v52  ;;  %v4318_v51 = vmax.f32 %v3997_v33, %v4154_v57  ;;  %v3541_v56 = vpop.f32.mrf.mxu1  ;;  %v1258_v27 = vpop.permute.xlu0 %1257  ;;  %v2214_v57 = vor.u32 %v11577_v36, %v2096_v20 }
 0x3b4   :  { %4757 = vst.msk [vmem:[#allocation3 + $0x24] sm:$0x1] %vm4485_vm12, %v4756_v37  ;;  %v3829_v48 = vadd.f32 %v3828_v18, %v3540_v12  ;;  %4772 = vst.msk [vmem:[#allocation3 + $0x26] sm:$0x1] %vm4485_vm12, %v4771_v61  ;;  %v1392_v63 = vmax.f32 %v11301_v26, %v1258_v27 }
 0x3b5   :  { %v3542_v38 = vpop.f32.mrf.mxu1 }
 0x3b6   :  { %v3999_v60 = vmax.f32 %v3829_v48, 0.0  ;;  %v3543_v23 = vadd.f32 %v11614_v14, %v3542_v38  ;;  %v1840_v22 = vmul.f32 %v1751_v6, %v1392_v63  ;;  %v3844_v48 = vpop.f32.mrf.mxu0 }
 0x3b7   :  { %v3544_v41 = vpop.f32.mrf.mxu1 }
 0x3b8   :  { %v4155_v25 = vrot.slane %v3999_v60, 1  ;;  %v3832_v31 = vadd.f32 %v3831_v49, %v3543_v23  ;;  %v8508_v27 = vpop.f32.mrf.mxu0 }
 0x3ba   :  { %v4156_v45 = vsel %vm4099_vm11, %v4153_v11, %v4155_v25  ;;  %v4000_v21 = vmax.f32 %v3832_v31, 0.0  ;;  %v4786_v53 = vld [vmem:[#allocation2 + $0xbb] sm:$0x1] }
 0x3bb   :  { %v4319_v24 = vmax.f32 %v3998_v32, %v4156_v45  ;;  %v1256_v42 = vpop.permute.xlu1 %1255  ;;  %4787 = vst.msk [vmem:[#allocation3 + $0x28] sm:$0x1] %vm4485_vm12, %v4786_v53 }
 0x3bc   :  { %v4157_v13 = vrot.slane %v4000_v21, 1  ;;  %v1391_v47 = vmax.f32 %v11317_v34, %v1256_v42 }
 0x3bd   :  { %v3547_v7 = vpop.f32.mrf.mxu1 }
 0x3be   :  { %v4158_v33 = vsel %vm4099_vm11, %v4155_v25, %v4157_v13  ;;  %v1839_v8 = vmul.f32 %v1746_v19, %v1391_v47  ;;  %v3548_v5 = vadd.f32 %v11614_v14, %v3547_v7 }
 0x3bf   :  { %v4320_v50 = vmax.f32 %v3999_v60, %v4158_v33  ;;  %v3549_v9 = vpop.f32.mrf.mxu1 }
 0x3c0   :  { %v11643_v18 = vpack.c.bf16 %v1840_v22, %v1839_v8  ;;  %v3837_v26 = vadd.f32 %v8503_v43, %v3548_v5  ;;  %v1761_v62 = vpop.permute.xlu0 %1760 }
 0x3c1   :  { %v4382_v32 = vmax.f32 %v4318_v51, %v4320_v50  ;;  %v3550_v10 = vpop.f32.mrf.mxu1 }
 0x3c2   :  { %v4001_v11 = vmax.f32 %v3837_v26, 0.0  ;;  %v2107_v34 = vshll.u32 %v11643_v18, 16  ;;  %v2104_v52 = vshrl.u32 %v11643_v18, 16 }
 0x3c3   :  { %4446 = vst.msk [vmem:[#allocation2 + $0xd0] sm:$0xff] %vm2761_vm9, %v4382_v32  ;;  %v3552_v44 = vpop.f32.mrf.mxu1 }
 0x3c4   :  { %v4159_v12 = vrot.slane %v4001_v11, 1  ;;  %v1262_v37 = vpop.permute.xlu0 %1261  ;;  %v2215_v43 = vrot.slane %v2107_v34, 1  ;;  %v11653_v6 = vrot.slane %v2104_v52, 7 }
 0x3c5   :  { %v1394_v41 = vmax.f32 %v11333_v58, %v1262_v37 }
 0x3c6   :  { %v4160_v51 = vsel %vm4099_vm11, %v4157_v13, %v4159_v12  ;;  %v2216_v56 = vsel %vm2131_vm2, %v2214_v57, %v2215_v43  ;;  %v2109_v61 = vor.u32 %v2107_v34, %v11653_v6  ;;  %v2217_v9 = vor.u32 %v2215_v43, %v2104_v52 }
 0x3c7   :  { %v4321_v38 = vmax.f32 %v4000_v21, %v4160_v51  ;;  %2396 = vrot.lane.b32.xlu0 %v2216_v56, %s8835_s17  ;;  %2524 = vrot.lane.b32.xlu1 %v2216_v56, %s8833_s29  ;;  %v3847_v21 = vpop.f32.mrf.mxu0 }
 0x3c8   :  { %8525 = vmatprep.mubr.msk.bf16.mxu0 %vm2664_vm8, %v2216_v56  ;;  %v1756_v20 = vpop.permute.xlu1 %1755  ;;  %v2322_v19 = vpop.permute.xlu0 %2321  ;;  %v11663_v60 = vsel %vm1879_vm5, %v11581_v55, %v2109_v61 }
 0x3c9   :  { %v4383_v36 = vmax.f32 %v4319_v24, %v4321_v38  ;;  %v3555_v49 = vpop.f32.mrf.mxu1  ;;  %v1842_v24 = vmul.f32 %v1761_v62, %v1394_v41  ;;  %v2736_v32 = vsel %vm2664_vm8, %v10712_v40, %v2322_v19  ;;  %v8511_v38 = vpop.f32.mrf.mxu0 }
 0x3ca   :  { %v4816_v23 = vld [vmem:[#allocation2 + $0xd5] sm:$0x1]  ;;  %v4801_v31 = vld [vmem:[#allocation2 + $0xd1] sm:$0x1] }
 0x3cb   :  { %4447 = vst.msk [vmem:[#allocation2 + $0xd8] sm:$0xff] %vm2761_vm9, %v4383_v36  ;;  %v3557_v25 = vpop.f32.mrf.mxu1  ;;  %2461 = vrot.lane.b32.xlu0 %v11663_v60, %s8834_s25  ;;  %2589 = vrot.lane.b32.xlu1 %v11663_v60, %s8835_s17  ;;  %v3860_v41 = vpop.f32.mrf.mxu0 }
 0x3cc   :  { %4817 = vst.msk [vmem:[#allocation3 + $0x2c] sm:$0x1] %vm4485_vm12, %v4816_v23  ;;  %v1260_v45 = vpop.permute.xlu1 %1259  ;;  %4802 = vst.msk [vmem:[#allocation3 + $0x2a] sm:$0x1] %vm4485_vm12, %v4801_v31  ;;  %v2387_v53 = vpop.permute.xlu0 %2386 }
 0x3cd   :  { %v1393_v55 = vmax.f32 %v11353_v0, %v1260_v45  ;;  %v3558_v63 = vpop.f32.mrf.mxu1  ;;  %v2809_v57 = vsel %vm2761_vm9, %v2736_v32, %v2387_v53 }
 0x3ce   :  { %v8512_v63 = vpop.f32.mrf.mxu0 }
 0x3cf   :  { %v1841_v42 = vmul.f32 %v1756_v20, %v1393_v55  ;;  %v3560_v58 = vpop.f32.mrf.mxu1  ;;  %2333 = vrot.lane.b32.xlu0 %v11643_v18, %s8833_s29  ;;  %2654 = vrot.lane.b32.xlu1 %v11643_v18, %s8834_s25 }
 0x3d0   :  { %v2517_v13 = vpop.permute.xlu1 %2516 }
 0x3d1   :  { %v11678_v47 = vpack.c.bf16 %v1842_v24, %v1841_v42  ;;  %v2970_v11 = vsel %vm2664_vm8, %v10685_v59, %v2517_v13 }
 0x3d2   :  { %v4846_v7 = vld [vmem:[#allocation2 + $0xdd] sm:$0x1]  ;;  %v4831_v22 = vld [vmem:[#allocation2 + $0xd9] sm:$0x1] }
 0x3d3   :  { %4847 = vst.msk [vmem:[#allocation3 + $0x30] sm:$0x1] %vm4485_vm12, %v4846_v7  ;;  %v2115_v0 = vshll.u32 %v11678_v47, 16  ;;  %v2112_v33 = vshrl.u32 %v11678_v47, 16  ;;  %4832 = vst.msk [vmem:[#allocation3 + $0x2e] sm:$0x1] %vm4485_vm12, %v4831_v22 }
 0x3d4   :  { %v2582_v8 = vpop.permute.xlu1 %2581  ;;  %v1766_v5 = vpop.permute.xlu0 %1765 }
 0x3d5   :  { %v3563_v50 = vpop.f32.mrf.mxu1  ;;  %v11684_v26 = vrot.slane %v2115_v0, 1  ;;  %v11688_v62 = vrot.slane %v2112_v33, 7  ;;  %v3034_v12 = vsel %vm2761_vm9, %v2970_v11, %v2582_v8 }
 0x3d6   :  { %v3564_v10 = vadd.f32 %v11614_v14, %v3563_v50  ;;  %v3863_v50 = vpop.f32.mrf.mxu0 }
 0x3d7   :  { %v3565_v34 = vpop.f32.mrf.mxu1  ;;  %v2219_v44 = vsel %vm2131_vm2, %v2217_v9, %v11684_v26  ;;  %v2117_v52 = vor.u32 %v2115_v0, %v11688_v62 }
 0x3d8   :  { %v3853_v37 = vadd.f32 %v11647_v54, %v3564_v10  ;;  %v2647_v43 = vpop.permute.xlu1 %2646  ;;  %2398 = vrot.lane.b32.xlu0 %v2219_v44, %s8835_s17  ;;  %2526 = vrot.lane.b32.xlu1 %v2219_v44, %s8833_s29  ;;  %v2452_v40 = vpop.permute.xlu0 %2451 }
 0x3d9   :  { %8526 = vmatmul.mubr.msk.bf16.gmra.mxu0 %vm2664_vm8, %v2219_v44  ;;  %v3566_v59 = vpop.f32.mrf.mxu1  ;;  %v3121_v51 = vsel %vm2826_vm10, %v3034_v12, %v2647_v43  ;;  %v2897_v56 = vsel %vm2826_vm10, %v2809_v57, %v2452_v40  ;;  %v11709_v54 = vsel %vm1879_vm5, %v11653_v6, %v2117_v52 }
 0x3da   :  { %v4005_v61 = vmax.f32 %v3853_v37, 0.0  ;;  %v3567_v48 = vadd.f32 %v11614_v14, %v3566_v59  ;;  %3609 = vmatprep.mubr.bf16.mxu1 %v3121_v51 }
 0x3db   :  { %v3568_v20 = vpop.f32.mrf.mxu1  ;;  %3610 = vmatmul.mubr.bf16.gmra.mxu1 %v2897_v56 }
 0x3dc   :  { %v4167_v36 = vrot.slane %v4005_v61, 1  ;;  %v3856_v49 = vadd.f32 %v8508_v27, %v3567_v48  ;;  %2463 = vrot.lane.b32.xlu0 %v11709_v54, %s8834_s25  ;;  %2591 = vrot.lane.b32.xlu1 %v11709_v54, %s8835_s17  ;;  %v1266_v19 = vpop.permute.xlu0 %1265 }
 0x3dd   :  { %v1396_v13 = vmax.f32 %v11398_v16, %v1266_v19 }
 0x3de   :  { %v4006_v23 = vmax.f32 %v3856_v49, 0.0 }
 0x3e0   :  { %v4169_v25 = vrot.slane %v4006_v23, 1  ;;  %v1771_v31 = vpop.permute.xlu1 %1770  ;;  %2335 = vrot.lane.b32.xlu0 %v11678_v47, %s8833_s29  ;;  %2656 = vrot.lane.b32.xlu1 %v11678_v47, %s8834_s25  ;;  %v2324_v6 = vpop.permute.xlu0 %2323 }
 0x3e1   :  { %v3571_v45 = vpop.f32.mrf.mxu1  ;;  %v1844_v9 = vmul.f32 %v1771_v31, %v1396_v13  ;;  %v2739_v20 = vsel %vm2664_vm8, %v10726_v2, %v2324_v6  ;;  %v8597_v13 = vld [vmem:[%s12808_s6 + $0x178] sm:$0xff]  }
 0x3e2   :  { %v4170_v27 = vsel %vm4099_vm11, %v4167_v36, %v4169_v25  ;;  %v3572_v55 = vadd.f32 %v11614_v14, %v3571_v45  ;;  %8129 = vmatprep.subr.bf16.mxu1 %v8597_v13 }
 0x3e3   :  { %v4326_v21 = vmax.f32 %v4005_v61, %v4170_v27  ;;  %v3573_v24 = vpop.f32.mrf.mxu1  ;;  %v2220_v61 = vor.u32 %v11684_v26, %v2112_v33  ;;  %v11753_v27 = vpop.f32.mrf.mxu0 }
 0x3e4   :  { %v3861_v42 = vadd.f32 %v3860_v41, %v3572_v55  ;;  %v1264_v58 = vpop.permute.xlu1 %1263  ;;  %v2389_v53 = vpop.permute.xlu0 %2388 }
 0x3e5   :  { %v1395_v7 = vmax.f32 %v11429_v17, %v1264_v58  ;;  %v3574_v22 = vpop.f32.mrf.mxu1  ;;  %v2811_v26 = vsel %vm2761_vm9, %v2739_v20, %v2389_v53 }
 0x3e6   :  { %v4007_v0 = vmax.f32 %v3861_v42, 0.0  ;;  %v3575_v8 = vadd.f32 %v11614_v14, %v3574_v22 }
 0x3e7   :  { %v1843_v32 = vmul.f32 %v1766_v5, %v1395_v7  ;;  %v3576_v10 = vpop.f32.mrf.mxu1 }
 0x3e8   :  { %v4171_v11 = vrot.slane %v4007_v0, 1  ;;  %v3864_v34 = vadd.f32 %v3863_v50, %v3575_v8  ;;  %v2519_v44 = vpop.permute.xlu1 %2518  ;;  %v2454_v52 = vpop.permute.xlu0 %2453 }
 0x3e9   :  { %v11724_v57 = vpack.c.bf16 %v1844_v9, %v1843_v32  ;;  %v2972_v41 = vsel %vm2664_vm8, %v11338_v29, %v2519_v44  ;;  %v2900_v53 = vsel %vm2826_vm10, %v2811_v26, %v2454_v52  ;;  %v3876_v50 = vpop.f32.mrf.mxu0 }
 0x3ea   :  { %v4172_v12 = vsel %vm4099_vm11, %v4169_v25, %v4171_v11  ;;  %v4008_v37 = vmax.f32 %v3864_v34, 0.0 }
 0x3eb   :  { %v11727_v16 = vmax.f32 %v4006_v23, %v4172_v12  ;;  %v2123_v17 = vshll.u32 %v11724_v57, 16  ;;  %v2120_v43 = vshrl.u32 %v11724_v57, 16  ;;  %v11781_v12 = vpop.f32.mrf.mxu0 }
 0x3ec   :  { %v4173_v40 = vrot.slane %v4008_v37, 1  ;;  %v3579_v59 = vpop.f32.mrf.mxu1  ;;  %v2584_v51 = vpop.permute.xlu1 %2583 }
 0x3ed   :  { %v3580_v5 = vadd.f32 %v11614_v14, %v3579_v59  ;;  %v1781_v56 = vpop.permute.xlu0 %1780  ;;  %v11735_v48 = vrot.slane %v2123_v17, 1  ;;  %v11742_v19 = vrot.slane %v2120_v43, 7  ;;  %v3036_v31 = vsel %vm2761_vm9, %v2972_v41, %v2584_v51  ;;  %v3879_v41 = vpop.f32.mrf.mxu0 }
 0x3ee   :  { %v4174_v36 = vsel %vm4099_vm11, %v4171_v11, %v4173_v40  ;;  %v3581_v49 = vpop.f32.mrf.mxu1 }
 0x3ef   :  { %v4328_v23 = vmax.f32 %v4007_v0, %v4174_v36  ;;  %v3869_v25 = vadd.f32 %v8511_v38, %v3580_v5  ;;  %v2222_v33 = vsel %vm2131_vm2, %v2220_v61, %v11735_v48  ;;  %v2125_v45 = vor.u32 %v2123_v17, %v11742_v19 }
 0x3f0   :  { %v3582_v2 = vpop.f32.mrf.mxu1  ;;  %v2649_v6 = vpop.permute.xlu1 %2648  ;;  %2400 = vrot.lane.b32.xlu0 %v2222_v33, %s8835_s17  ;;  %2528 = vrot.lane.b32.xlu1 %v2222_v33, %s8833_s29 }
 0x3f1   :  { %v4390_v55 = vmax.f32 %v4326_v21, %v4328_v23  ;;  %v4009_v29 = vmax.f32 %v3869_v25, 0.0  ;;  %v3583_v38 = vadd.f32 %v11614_v14, %v3582_v2  ;;  %8529 = vmatprep.mubr.msk.bf16.mxu0 %vm2664_vm8, %v2222_v33  ;;  %v1270_v24 = vpop.permute.xlu0 %1269  ;;  %v3124_v42 = vsel %vm2826_vm10, %v3036_v31, %v2649_v6  ;;  %v8598_v21 = vld [vmem:[%s12808_s6 + $0x138] sm:$0xff]  }
 0x3f2   :  { %v3584_v58 = vpop.f32.mrf.mxu1  ;;  %3617 = vmatprep.mubr.bf16.mxu1 %v3124_v42  ;;  %v11768_v0 = vsel %vm1879_vm5, %v11688_v62, %v2125_v45  ;;  %8130 = vmatpush3.bf16.msra.mxu1 %v8598_v21  ;;  %v1398_v34 = vmax.f32 %v11481_v4, %v1270_v24  ;;  %v2223_v24 = vor.u32 %v11735_v48, %v2120_v43 }
 0x3f3   :  { %4454 = vst.msk [vmem:[#allocation2 + $0x110] sm:$0xff] %vm2761_vm9, %v4390_v55  ;;  %v4175_v7 = vrot.slane %v4009_v29, 1  ;;  %v3872_v22 = vadd.f32 %v8512_v63, %v3583_v38  ;;  %3618 = vmatmul.mubr.bf16.gmra.mxu1 %v2900_v53 }
 0x3f4   :  { %v1776_v8 = vpop.permute.xlu1 %1775  ;;  %2465 = vrot.lane.b32.xlu0 %v11768_v0, %s8834_s25  ;;  %2593 = vrot.lane.b32.xlu1 %v11768_v0, %s8835_s17  ;;  %v1846_v5 = vmul.f32 %v1781_v56, %v1398_v34  ;;  %v8616_v34 = vld [vmem:[%s12808_s6 + $0x40] sm:$0xff]  }
 0x3f5   :  { %v4176_v9 = vsel %vm4099_vm11, %v4173_v40, %v4175_v7  ;;  %v4010_v32 = vmax.f32 %v3872_v22, 0.0  ;;  %v2326_v10 = vpop.permute.xlu0 %2325 }
 0x3f6   :  { %v4329_v11 = vmax.f32 %v4008_v37, %v4176_v9  ;;  %v2742_v58 = vsel %vm2664_vm8, %v11386_v28, %v2326_v10  ;;  %v8599_v28 = vld [vmem:[%s12808_s6 + $0x170] sm:$0xff]  }
 0x3f7   :  { %v4177_v63 = vrot.slane %v4010_v32, 1  ;;  %8131 = vmatprep.subr.bf16.mxu1 %v8599_v28  ;;  %v7733_v28 = vld.sshfl [vmem:[#allocation2 + $0x53] sm:$0x1 pattern:$0x76325410] }
 0x3f8   :  { %v4391_v62 = vmax.f32 %v11727_v16, %v4329_v11  ;;  %v3587_v44 = vpop.f32.mrf.mxu1  ;;  %v1268_v52 = vpop.permute.xlu1 %1267  ;;  %2337 = vrot.lane.b32.xlu0 %v11724_v57, %s8833_s29  ;;  %2658 = vrot.lane.b32.xlu1 %v11724_v57, %s8834_s25 }
 0x3f9   :  { %v4178_v17 = vsel %vm4099_vm11, %v4175_v7, %v4177_v63  ;;  %v3588_v37 = vadd.f32 %v11614_v14, %v3587_v44  ;;  %v1397_v40 = vmax.f32 %v11503_v35, %v1268_v52  ;;  %v2391_v59 = vpop.permute.xlu0 %2390  ;;  %v8600_v44 = vld [vmem:[%s12808_s6 + $0x130] sm:$0xff]  }
 0x3fa   :  { %4455 = vst.msk [vmem:[#allocation2 + $0x118] sm:$0xff] %vm2761_vm9, %v4391_v62  ;;  %v11787_v4 = vmax.f32 %v4009_v29, %v4178_v17  ;;  %v3589_v16 = vpop.f32.mrf.mxu1  ;;  %v4863_v51 = vld [vmem:[#allocation2 + $0x115] sm:$0x1]  ;;  %v4848_v36 = vld [vmem:[#allocation2 + $0x111] sm:$0x1]  ;;  %v2813_v10 = vsel %vm2761_vm9, %v2742_v58, %v2391_v59  ;;  %v8601_v59 = vld [vmem:[%s12808_s6 + $0x78] sm:$0xff]   ;;  %8132 = vmatpush3.bf16.msra.mxu1 %v8600_v44 }
 0x3fb   :  { %v3877_v61 = vadd.f32 %v3876_v50, %v3588_v37  ;;  %v1845_v20 = vmul.f32 %v1776_v8, %v1397_v40  ;;  %4864 = vst.msk [vmem:[#allocation3 + $0x3] sm:$0x1] %vm4485_vm12, %v4863_v51  ;;  %4849 = vst.msk [vmem:[#allocation3 + $0x1] sm:$0x1] %vm4485_vm12, %v4848_v36  ;;  %v8602_v16 = vld [vmem:[%s12808_s6 + $0x38] sm:$0xff]   ;;  %8085 = vmatprep.subr.bf16.mxu0 %v8601_v59  ;;  %v8604_v36 = vld [vmem:[%s12808_s6 + $0x30] sm:$0xff]  }
 0x3fc   :  { %v3590_v49 = vpop.f32.mrf.mxu1  ;;  %v2521_v23 = vpop.permute.xlu1 %2520  ;;  %8086 = vmatpush3.bf16.msra.mxu0 %v8602_v16  ;;  %v8607_v58 = vld [vmem:[%s12808_s6 + $0x60] sm:$0xff]   ;;  %v7730_v44 = vld.sshfl [vmem:[#allocation2 + $0x35] sm:$0x1 pattern:$0x76325410] }
 0x3fd   :  { %v4011_v25 = vmax.f32 %v3877_v61, 0.0  ;;  %v11791_v35 = vpack.c.bf16 %v1846_v5, %v1845_v20  ;;  %v3591_v33 = vadd.f32 %v11614_v14, %v3590_v49  ;;  %v2456_v26 = vpop.permute.xlu0 %2455  ;;  %v2974_v8 = vsel %vm2664_vm8, %v11382_v1, %v2521_v23  ;;  %v8603_v20 = vld [vmem:[%s12808_s6 + $0x70] sm:$0xff]   ;;  %v7732_v59 = vld.sshfl [vmem:[#allocation2 + $0x3d] sm:$0x1 pattern:$0x76325410] }
 0x3fe   :  { %v3592_v31 = vpop.f32.mrf.mxu1  ;;  %v2903_v17 = vsel %vm2826_vm10, %v2813_v10, %v2456_v26  ;;  %v13169_v61 = vmov 0   ;;  %v7729_v49 = vld.sshfl [vmem:[#allocation2 + $0x31] sm:$0x1 pattern:$0x76325410]  ;;  %8087 = vmatprep.subr.bf16.mxu0 %v8603_v20  ;;  %v8613_v10 = vld [vmem:[%s12808_s6 + $0x48] sm:$0xff]  }
 0x3ff   :  { %v4179_v2 = vrot.slane %v4011_v25, 1  ;;  %v11794_v6 = vadd.f32 %v3879_v41, %v3591_v33  ;;  %v2225_v56 = vshll.u32 %v11791_v35, 16  ;;  %v2233_v45 = vshrl.u32 %v11791_v35, 16 }
 0x400   :  { %v2586_v55 = vpop.permute.xlu1 %2585  ;;  %8088 = vmatpush3.bf16.msra.mxu0 %v8604_v36 }
 0x401   :  { %v4180_v29 = vsel %vm4099_vm11, %v4177_v63, %v4179_v2  ;;  %v4012_v38 = vmax.f32 %v11794_v6, 0.0  ;;  %v2227_v42 = vrot.slane %v2225_v56, 1  ;;  %v11807_v13 = vrot.slane %v2233_v45, 7  ;;  %v4893_v21 = vld [vmem:[#allocation2 + $0x11d] sm:$0x1]  ;;  %v2328_v9 = vpop.permute.xlu0 %2327 }
 0x402   :  { %v11805_v53 = vmax.f32 %v4010_v32, %v4180_v29  ;;  %v4878_v7 = vld [vmem:[#allocation2 + $0x119] sm:$0x1]  ;;  %4894 = vst.msk [vmem:[#allocation3 + $0x7] sm:$0x1] %vm4485_vm12, %v4893_v21  ;;  %v3038_v48 = vsel %vm2761_vm9, %v2974_v8, %v2586_v55  ;;  %v2745_v33 = vsel %vm2664_vm8, %v11472_v3, %v2328_v9  ;;  %v8608_v21 = vld [vmem:[%s12808_s6 + $0x20] sm:$0xff]   ;;  %v8611_v9 = vld [vmem:[%s12808_s6 + $0x50] sm:$0xff]  }
 0x403   :  { %v11811_v22 = vrot.slane %v4012_v38, 1  ;;  %v2228_v50 = vsel %vm2131_vm2, %v2223_v24, %v2227_v42  ;;  %v2238_v43 = vor.u32 %v2233_v45, %v2227_v42  ;;  %4879 = vst.msk [vmem:[#allocation3 + $0x5] sm:$0x1] %vm4485_vm12, %v4878_v7  ;;  %v2236_v1 = vor.u32 %v11807_v13, %v2225_v56  ;;  %v8606_v45 = vld [vmem:[%s12808_s6 + $0x28] sm:$0xff]  }
 0x404   :  { %v2651_v32 = vpop.permute.xlu1 %2650  ;;  %2402 = vrot.lane.b32.xlu0 %v2228_v50, %s8835_s17  ;;  %2530 = vrot.lane.b32.xlu1 %v2228_v50, %s8833_s29  ;;  %v7751_v29 = vld.sshfl [vmem:[#allocation2 + $0x117] sm:$0x1 pattern:$0x76325410]  ;;  %v2242_v42 = vsel %vm10211_vm7, %v11807_v13, 0  ;;  %v8609_v13 = vld [vmem:[%s12808_s6 + $0x58] sm:$0xff]  }
 0x405   :  { %v4182_v11 = vsel %vm4099_vm11, %v4179_v2, %v11811_v22  ;;  %8530 = vmatmul.mubr.msk.bf16.gmra.mxu0 %vm2664_vm8, %v2228_v50  ;;  %v3127_v63 = vsel %vm2826_vm10, %v3038_v48, %v2651_v32  ;;  %v2240_v62 = vsel %vm10190_vm4, %v2238_v43, 0  ;;  %v2237_v37 = vsel %vm1879_vm5, %v11742_v19, %v2236_v1  ;;  %v2393_v5 = vpop.permute.xlu0 %2392  ;;  %v7727_v19 = vld.sshfl [vmem:[#allocation2 + $0x17] sm:$0x1 pattern:$0x76325410]  ;;  %v8610_v50 = vld [vmem:[%s12808_s6 + $0x18] sm:$0xff]  }
 0x406   :  { %v4332_v52 = vmax.f32 %v4011_v25, %v4182_v11  ;;  %3625 = vmatprep.mubr.bf16.mxu1 %v3127_v63  ;;  %8533 = vmatprep.mubr.msk.bf16.mxu0 %vm2664_vm8, %v2240_v62  ;;  %v8605_v25 = vld [vmem:[%s12808_s6 + $0x68] sm:$0xff]   ;;  %v2815_v56 = vsel %vm2761_vm9, %v2745_v33, %v2393_v5  ;;  %v7731_v8 = vld.sshfl [vmem:[#allocation2 + $0x39] sm:$0x1 pattern:$0x76325410]  ;;  %v8612_v32 = vld [vmem:[%s12808_s6 + $0x10] sm:$0xff]  }
 0x407   :  { %3626 = vmatmul.mubr.bf16.gmra.mxu1 %v2903_v17  ;;  %8089 = vmatprep.subr.bf16.mxu0 %v8605_v25  ;;  %v7726_v43 = vld.sshfl [vmem:[#allocation2 + $0x13] sm:$0x1 pattern:$0x76325410]  ;;  %v8614_v11 = vld [vmem:[%s12808_s6 + $0x8] sm:$0xff]  }
 0x408   :  { %v4394_v40 = vmax.f32 %v11787_v4, %v4332_v52  ;;  %2467 = vrot.lane.b32.xlu0 %v2237_v37, %s8834_s25  ;;  %2595 = vrot.lane.b32.xlu1 %v2237_v37, %s8835_s17  ;;  %v7728_v48 = vld.sshfl [vmem:[#allocation2 + $0x1b] sm:$0x1 pattern:$0x76325410]  ;;  %v8615_v17 = vld [vmem:[%s12808_s6 + $0x168] sm:$0xff]  }
 0x409   :  { %v2523_v51 = vpop.permute.xlu1 %2522  ;;  %v2458_v41 = vpop.permute.xlu0 %2457  ;;  %8090 = vmatpush3.bf16.msra.mxu0 %v8606_v45  ;;  %v7750_v1 = vld.sshfl [vmem:[#allocation2 + $0x113] sm:$0x1 pattern:$0x76325410]  ;;  %v8619_v52 = vld [vmem:[%s12808_s6 + $0xf8] sm:$0xff]   ;;  %v8617_v37 = vld [vmem:[%s12808_s6 + $0x128] sm:$0xff]   ;;  %8133 = vmatprep.subr.bf16.mxu1 %v8615_v17 }
 0x40a   :  { %4458 = vst.msk [vmem:[#allocation2 + $0x130] sm:$0xff] %vm2761_vm9, %v4394_v40  ;;  %v2976_v23 = vsel %vm2664_vm8, %v11431_v46, %v2523_v51  ;;  %v2906_v3 = vsel %vm2826_vm10, %v2815_v56, %v2458_v41  ;;  %8091 = vmatprep.subr.bf16.mxu0 %v8607_v58  ;;  %v7752_v63 = vld.sshfl [vmem:[#allocation2 + $0x11b] sm:$0x1 pattern:$0x76325410]  ;;  %8134 = vmatpush3.bf16.msra.mxu1 %v8617_v37 }
 0x40c   :  { %4512 = vrot.lane.b32.xlu0 %v7727_v19, %s8835_s17  ;;  %2660 = vrot.lane.b32.xlu1 %v11791_v35, %s8834_s25 }
 0x40d   :  { %v2588_v4 = vpop.permute.xlu1 %2587  ;;  %8534 = vmatmul.mubr.bf16.gmra.mxu0 %v13169_v61  ;;  %v2330_v40 = vpop.permute.xlu0 %2329 }
 0x40e   :  { %v3040_v26 = vsel %vm2761_vm9, %v2976_v23, %v2588_v4  ;;  %8092 = vmatpush3.bf16.msra.mxu0 %v8608_v21  ;;  %v2748_v20 = vsel %vm2664_vm8, %v11528_v30, %v2330_v40  ;;  %v8636_v30 = vld [vmem:[%s12808_s6 + $0x120] sm:$0xff]  }
 0x40f   :  { %8093 = vmatprep.subr.bf16.mxu0 %v8609_v13 }
 0x410   :  { %4542 = vrot.lane.b32.xlu0 %v7729_v49, %s8835_s17  ;;  %2532 = vrot.lane.b32.xlu1 %v2240_v62, %s8833_s29  ;;  %v8618_v62 = vld [vmem:[%s12808_s6] sm:$0xff]  }
 0x411   :  { %v2653_v31 = vpop.permute.xlu1 %2652  ;;  %v4908_v2 = vld [vmem:[#allocation2 + $0x133] sm:$0x1]  ;;  %v4923_v55 = vld [vmem:[#allocation2 + $0x137] sm:$0x1]  ;;  %v2395_v51 = vpop.permute.xlu0 %2394 }
 0x412   :  { %v3130_v46 = vsel %vm2826_vm10, %v3040_v26, %v2653_v31  ;;  %4909 = vst.msk [vmem:[#allocation3 + $0x9] sm:$0x1] %vm4485_vm12, %v4908_v2  ;;  %4924 = vst.msk [vmem:[#allocation3 + $0xb] sm:$0x1] %vm4485_vm12, %v4923_v55  ;;  %8094 = vmatpush3.bf16.msra.mxu0 %v8610_v50  ;;  %v2817_v41 = vsel %vm2761_vm9, %v2748_v20, %v2395_v51  ;;  %v8643_v20 = vld [vmem:[%s12808_s6 + $0x118] sm:$0xff]  }
 0x413   :  { %3633 = vmatprep.mubr.bf16.mxu1 %v3130_v46  ;;  %v7753_v7 = vld.sshfl [vmem:[#allocation2 + $0x131] sm:$0x1 pattern:$0x76325410]  ;;  %8095 = vmatprep.subr.bf16.mxu0 %v8611_v9 }
 0x414   :  { %3634 = vmatmul.mubr.bf16.gmra.mxu1 %v2906_v3  ;;  %4874 = vrot.lane.b32.xlu0 %v7751_v29, %s8835_s17  ;;  %v7754_v16 = vld.sshfl [vmem:[#allocation2 + $0x135] sm:$0x1 pattern:$0x76325410] }
 0x415   :  { %2597 = vrot.lane.b32.xlu1 %v2242_v42, %s8835_s17  ;;  %v2460_v19 = vpop.permute.xlu0 %2459 }
 0x416   :  { %8096 = vmatpush3.bf16.msra.mxu0 %v8612_v32  ;;  %v2909_v33 = vsel %vm2826_vm10, %v2817_v41, %v2460_v19 }
 0x417   :  { %8097 = vmatprep.subr.bf16.mxu0 %v8613_v10 }
 0x418   :  { %4904 = vrot.lane.b32.xlu0 %v7753_v7, %s8835_s17 }
 0x419   :  { %2662 = vrot.lane.b32.xlu1 %v13169_v61, %s8834_s25  ;;  %v2332_v36 = vpop.permute.xlu0 %2331 }
 0x41a   :  { %8098 = vmatpush3.bf16.msra.mxu0 %v8614_v11  ;;  %v2751_v55 = vsel %vm2664_vm8, %v11597_v15, %v2332_v36 }
 0x41b   :  { %8099 = vmatprep.subr.bf16.mxu0 %v8616_v34 }
 0x41c   :  { %4572 = vrot.lane.b32.xlu0 %v7731_v8, %s8835_s17 }
 0x41d   :  { %4496 = vrot.lane.b32.xlu1 %v7726_v43, %s8835_s17 }
 0x41e   :  { %8100 = vmatpush3.bf16.msra.mxu0 %v8618_v62 }
 0x41f   :  { %8107 = vmatprep.subr.bf16.mxu0 %v8619_v52 }
 0x420   :  { %4602 = vrot.lane.b32.xlu0 %v7733_v28, %s8835_s17 }
 0x421   :  { %4527 = vrot.lane.b32.xlu1 %v7728_v48, %s8835_s17 }
 0x422   :  { %v11957_v15 = vpop.f32.mrf.mxu0 }
 0x424   :  { %v3892_v10 = vpop.f32.mrf.mxu0 }
 0x425   :  { %4859 = vrot.lane.b32.xlu1 %v7750_v1, %s8835_s17 }
 0x426   :  { %v11966_v52 = vpop.f32.mrf.mxu0 }
 0x429   :  { %4889 = vrot.lane.b32.xlu1 %v7752_v63, %s8835_s17 }
 0x42d   :  { %4557 = vrot.lane.b32.xlu1 %v7730_v44, %s8835_s17 }
 0x431   :  { %4587 = vrot.lane.b32.xlu1 %v7732_v59, %s8835_s17  ;;  %v3895_v59 = vpop.f32.mrf.mxu0 }
 0x435   :  { %4919 = vrot.lane.b32.xlu1 %v7754_v16, %s8835_s17 }
 0x439   :  { %v2525_v5 = vpop.permute.xlu1 %2524  ;;  %v2397_v26 = vpop.permute.xlu0 %2396 }
 0x43a   :  { %v2978_v61 = vsel %vm2664_vm8, %v11560_v39, %v2525_v5  ;;  %v8634_v39 = vld [vmem:[%s12808_s6 + $0x160] sm:$0xff]   ;;  %v2819_v24 = vsel %vm2761_vm9, %v2751_v55, %v2397_v26 }
 0x43b   :  { %8135 = vmatprep.subr.bf16.mxu1 %v8634_v39 }
 0x43c   :  { %8136 = vmatpush3.bf16.msra.mxu1 %v8636_v30 }
 0x43d   :  { %v2590_v4 = vpop.permute.xlu1 %2589  ;;  %v2462_v2 = vpop.permute.xlu0 %2461 }
 0x43e   :  { %v3042_v49 = vsel %vm2761_vm9, %v2978_v61, %v2590_v4  ;;  %v2912_v58 = vsel %vm2826_vm10, %v2819_v24, %v2462_v2  ;;  %v8642_v61 = vld [vmem:[%s12808_s6 + $0x158] sm:$0xff]   ;;  %v7734_v24 = vld.sshfl [vmem:[#allocation2 + $0x57] sm:$0x1 pattern:$0x76325410] }
 0x43f   :  { %8137 = vmatprep.subr.bf16.mxu1 %v8642_v61 }
 0x440   :  { %8138 = vmatpush3.bf16.msra.mxu1 %v8643_v20 }
 0x441   :  { %v2655_v23 = vpop.permute.xlu1 %2654  ;;  %v2334_v46 = vpop.permute.xlu0 %2333 }
 0x442   :  { %v3133_v25 = vsel %vm2826_vm10, %v3042_v49, %v2655_v23  ;;  %v2754_v26 = vsel %vm2664_vm8, %v11663_v60, %v2334_v46 }
 0x443   :  { %3641 = vmatprep.mubr.bf16.mxu1 %v3133_v25 }
 0x444   :  { %3642 = vmatmul.mubr.bf16.gmra.mxu1 %v2909_v33 }
 0x44a   :  { %v2527_v31 = vpop.permute.xlu1 %2526  ;;  %v2399_v7 = vpop.permute.xlu0 %2398 }
 0x44b   :  { %v2980_v45 = vsel %vm2664_vm8, %v11643_v18, %v2527_v31 }
 0x44e   :  { %v2592_v56 = vpop.permute.xlu1 %2591  ;;  %v2464_v9 = vpop.permute.xlu0 %2463 }
 0x44f   :  { %v3044_v3 = vsel %vm2761_vm9, %v2980_v45, %v2592_v56  ;;  %v2821_v45 = vsel %vm2761_vm9, %v2754_v26, %v2399_v7 }
 0x450   :  { %v2915_v60 = vsel %vm2826_vm10, %v2821_v45, %v2464_v9 }
 0x452   :  { %v2657_v29 = vpop.permute.xlu1 %2656 }
 0x453   :  { %v3136_v42 = vsel %vm2826_vm10, %v3044_v3, %v2657_v29 }
 0x454   :  { %v3595_v21 = vpop.f32.mrf.mxu1  ;;  %3649 = vmatprep.mubr.bf16.mxu1 %v3136_v42  ;;  %v8650_v42 = vld [vmem:[%s12808_s6 + $0x150] sm:$0xff]  }
 0x455   :  { %v3596_v13 = vadd.f32 %v11614_v14, %v3595_v21  ;;  %3650 = vmatmul.mubr.bf16.gmra.mxu1 %v2912_v58  ;;  %8139 = vmatprep.subr.bf16.mxu1 %v8650_v42  ;;  %v8651_v21 = vld [vmem:[%s12808_s6 + $0x110] sm:$0xff]  }
 0x456   :  { %v3597_v8 = vpop.f32.mrf.mxu1  ;;  %8140 = vmatpush3.bf16.msra.mxu1 %v8651_v21 }
 0x457   :  { %v3885_v18 = vadd.f32 %v11753_v27, %v3596_v13  ;;  %v7736_v13 = vld.sshfl [vmem:[#allocation2 + $0x71] sm:$0x1 pattern:$0x76325410]  ;;  %v8654_v8 = vld [vmem:[%s12808_s6 + $0x148] sm:$0xff]  }
 0x458   :  { %v3598_v50 = vpop.f32.mrf.mxu1  ;;  %8141 = vmatprep.subr.bf16.mxu1 %v8654_v8 }
 0x459   :  { %v4013_v43 = vmax.f32 %v3885_v18, 0.0  ;;  %v3599_v28 = vadd.f32 %v11614_v14, %v3598_v50  ;;  %v11968_v14 = vpop.permute.xlu0 %2335  ;;  %v8655_v18 = vld [vmem:[%s12808_s6 + $0x108] sm:$0xff]  }
 0x45a   :  { %v3600_v48 = vpop.f32.mrf.mxu1  ;;  %8142 = vmatpush3.bf16.msra.mxu1 %v8655_v18 }
 0x45b   :  { %v4183_v32 = vrot.slane %v4013_v43, 1  ;;  %v3888_v1 = vadd.f32 %v11781_v12, %v3599_v28  ;;  %v11974_v12 = vld [vmem:[%s12807_s5] ss:$0 sm:$0xff] }
 0x45c   :  { %v8658_v28 = vld [vmem:[%s12808_s6 + $0x140] sm:$0xff]  }
 0x45d   :  { %v4184_v11 = vsel %vm4099_vm11, %v11811_v22, %v4183_v32  ;;  %v4014_v63 = vmax.f32 %v3888_v1, 0.0  ;;  %v8659_v48 = vld [vmem:[%s12808_s6 + $0x100] sm:$0xff]   ;;  %8143 = vmatprep.subr.bf16.mxu1 %v8658_v28 }
 0x45e   :  { %v4333_v34 = vmax.f32 %v4012_v38, %v4184_v11  ;;  %8144 = vmatpush3.bf16.msra.mxu1 %v8659_v48 }
 0x45f   :  { %v4185_v27 = vrot.slane %v4014_v63, 1 }
 0x460   :  { %v4395_v62 = vmax.f32 %v11805_v53, %v4333_v34  ;;  %v3603_v44 = vpop.f32.mrf.mxu1 }
 0x461   :  { %v4186_v17 = vsel %vm4099_vm11, %v4183_v32, %v4185_v27  ;;  %v3604_v22 = vadd.f32 %v11974_v12, %v3603_v44 }
 0x462   :  { %4459 = vst.msk [vmem:[#allocation2 + $0x138] sm:$0xff] %vm2761_vm9, %v4395_v62  ;;  %v4334_v6 = vmax.f32 %v4013_v43, %v4186_v17  ;;  %v3605_v38 = vpop.f32.mrf.mxu1  ;;  %v2529_v37 = vpop.permute.xlu1 %2528  ;;  %v2757_v62 = vsel %vm2664_vm8, %v11709_v54, %v11968_v14 }
 0x463   :  { %v3893_v53 = vadd.f32 %v3892_v10, %v3604_v22  ;;  %v11978_v51 = vpop.permute.xlu0 %2400  ;;  %v2982_v41 = vsel %vm2664_vm8, %v11678_v47, %v2529_v37  ;;  %v7737_v37 = vld.sshfl [vmem:[#allocation2 + $0x75] sm:$0x1 pattern:$0x76325410] }
 0x464   :  { %v3606_v40 = vpop.f32.mrf.mxu1 }
 0x465   :  { %v4015_v16 = vmax.f32 %v3893_v53, 0.0  ;;  %v3607_v5 = vadd.f32 %v11974_v12, %v3606_v40 }
 0x466   :  { %v3608_v19 = vpop.f32.mrf.mxu1  ;;  %v2594_v4 = vpop.permute.xlu1 %2593 }
 0x467   :  { %v4187_v36 = vrot.slane %v4015_v16, 1  ;;  %v11987_v49 = vadd.f32 %v3895_v59, %v3607_v5  ;;  %v3046_v30 = vsel %vm2761_vm9, %v2982_v41, %v2594_v4  ;;  %v2466_v46 = vpop.permute.xlu0 %2465 }
 0x469   :  { %v4188_v23 = vsel %vm4099_vm11, %v4185_v27, %v4187_v36  ;;  %v4016_v25 = vmax.f32 %v11987_v49, 0.0  ;;  %v7755_v33 = vld.sshfl [vmem:[#allocation2 + $0x139] sm:$0x1 pattern:$0x76325410] }
 0x46a   :  { %v11995_v39 = vmax.f32 %v4014_v63, %v4188_v23  ;;  %v2659_v31 = vpop.permute.xlu1 %2658  ;;  %4934 = vrot.lane.b32.xlu0 %v7755_v33, %s8835_s17  ;;  %v7756_v2 = vld.sshfl [vmem:[#allocation2 + $0x13d] sm:$0x1 pattern:$0x76325410]  ;;  %v4938_v56 = vld [vmem:[#allocation2 + $0x13b] sm:$0x1] }
 0x46b   :  { %v12002_v47 = vrot.slane %v4016_v25, 1  ;;  %4949 = vrot.lane.b32.xlu1 %v7756_v2, %s8835_s17  ;;  %v3139_v55 = vsel %vm2826_vm10, %v3046_v30, %v2659_v31  ;;  %4939 = vst.msk [vmem:[#allocation3 + $0xd] sm:$0x1] %vm4485_vm12, %v4938_v56  ;;  %v2338_v7 = vpop.permute.xlu0 %2337  ;;  %v8836_v33 = vmov 1983009808   ;;  %v5228_v30 = vlaneseq }
 0x46c   :  { %3657 = vmatprep.mubr.bf16.mxu1 %v3139_v55  ;;  %v7735_v27 = vld.sshfl [vmem:[#allocation2 + $0x5b] sm:$0x1 pattern:$0x76325410]  ;;  %v5226_v26 = vunpack.c.l.s4 %v8836_v33 }
 0x46d   :  { %v4190_v3 = vsel %vm4099_vm11, %v4187_v36, %v12002_v47  ;;  %3658 = vmatmul.mubr.bf16.gmra.mxu1 %v2915_v60  ;;  %v5229_v45 = vshrl.u32 %v5228_v30, 7 }
 0x46e   :  { %v4336_v29 = vmax.f32 %v4015_v16, %v4190_v3  ;;  %v5227_v56 = vunpack.c.0.s8 %v5226_v26 }
 0x46f   :  { %4617 = vrot.lane.b32.xlu1 %v7734_v24, %s8835_s17 }
 0x470   :  { %v4398_v58 = vmax.f32 %v4334_v6, %v4336_v29  ;;  %v2823_v6 = vsel %vm2761_vm9, %v2757_v62, %v11978_v51  ;;  %v2760_v51 = vsel %vm2664_vm8, %v11768_v0, %v2338_v7  ;;  %v12068_v24 = vsub.s32 %v5227_v56, %v5229_v45  ;;  %v8623_v62 = vld [vmem:[%s12808_s6 + $0xb0] sm:$0xff]   ;;  %v8632_v56 = vld [vmem:[%s12808_s6 + $0xc8] sm:$0xff]  }
 0x472   :  { %4462 = vst.msk [vmem:[#allocation2 + $0x150] sm:$0xff] %vm2761_vm9, %v4398_v58 }
 0x473   :  { %4647 = vrot.lane.b32.xlu1 %v7736_v13, %s8835_s17 }
 0x476   :  { %v2531_v50 = vpop.permute.xlu1 %2530  ;;  %v2403_v43 = vpop.permute.xlu0 %2402 }
 0x477   :  { %v2984_v34 = vsel %vm2664_vm8, %v11724_v57, %v2531_v50  ;;  %v2918_v57 = vsel %vm2826_vm10, %v2823_v6, %v2466_v46  ;;  %v2825_v4 = vsel %vm2761_vm9, %v2760_v51, %v2403_v43  ;;  %v8626_v6 = vld [vmem:[%s12808_s6 + $0xe0] sm:$0xff]  }
 0x479   :  { %v7757_v9 = vld.sshfl [vmem:[#allocation2 + $0x153] sm:$0x1 pattern:$0x76325410]  ;;  %v4968_v32 = vld [vmem:[#allocation2 + $0x155] sm:$0x1] }
 0x47a   :  { %4964 = vrot.lane.b32.xlu0 %v7757_v9, %s8835_s17  ;;  %v7758_v1 = vld.sshfl [vmem:[#allocation2 + $0x157] sm:$0x1 pattern:$0x76325410]  ;;  %v2596_v10 = vpop.permute.xlu1 %2595  ;;  %v2468_v11 = vpop.permute.xlu0 %2467  ;;  %4969 = vst.msk [vmem:[#allocation3 + $0x11] sm:$0x1] %vm4485_vm12, %v4968_v32 }
 0x47b   :  { %v4953_v63 = vld [vmem:[#allocation2 + $0x151] sm:$0x1]  ;;  %4979 = vrot.lane.b32.xlu1 %v7758_v1, %s8835_s17  ;;  %v3048_v44 = vsel %vm2761_vm9, %v2984_v34, %v2596_v10  ;;  %v2921_v20 = vsel %vm2826_vm10, %v2825_v4, %v2468_v11 }
 0x47c   :  { %4954 = vst.msk [vmem:[#allocation3 + $0xf] sm:$0x1] %vm4485_vm12, %v4953_v63  ;;  %v8622_v34 = vld [vmem:[%s12808_s6 + $0xf0] sm:$0xff]  }
 0x47e   :  { %4632 = vrot.lane.b32.xlu0 %v7735_v27, %s8835_s17  ;;  %v2661_v17 = vpop.permute.xlu1 %2660  ;;  %v4513_v22 = vpop.permute.xlu0 %4512 }
 0x47f   :  { %4515 = vst.msk [vmem:[#allocation3 + $0x2] sm:$0x1] %vm4499_vm13, %v4513_v22  ;;  %v3142_v38 = vsel %vm2826_vm10, %v3048_v44, %v2661_v17  ;;  %v12099_v44 = vpop.f32.mrf.mxu0  ;;  %v8624_v17 = vld [vmem:[%s12808_s6 + $0xe8] sm:$0xff]  }
 0x480   :  { %3665 = vmatprep.mubr.bf16.mxu1 %v3142_v38  ;;  %v8625_v22 = vld [vmem:[%s12808_s6 + $0xa8] sm:$0xff]  }
 0x481   :  { %3666 = vmatmul.mubr.bf16.gmra.mxu1 %v2918_v57  ;;  %v3908_v38 = vpop.f32.mrf.mxu0 }
 0x482   :  { %4662 = vrot.lane.b32.xlu0 %v7737_v37, %s8835_s17  ;;  %v2533_v54 = vpop.permute.xlu1 %2532  ;;  %v4543_v14 = vpop.permute.xlu0 %4542 }
 0x483   :  { %4545 = vst.msk [vmem:[#allocation3 + $0x6] sm:$0x1] %vm4499_vm13, %v4543_v14  ;;  %v2986_v59 = vsel %vm2664_vm8, %v11791_v35, %v2533_v54  ;;  %v8663_v54 = vld [vmem:[%s12808_s6 + $0x278] sm:$0xff]  }
 0x484   :  { %8173 = vmatprep.subr.bf16.mxu1 %v8663_v54 }
 0x486   :  { %v4875_v53 = vpop.permute.xlu0 %4874 }
 0x487   :  { %v2598_v40 = vpop.permute.xlu1 %2597  ;;  %4877 = vst.msk [vmem:[#allocation3 + $0x3] sm:$0x1] %vm4499_vm13, %v4875_v53 }
 0x488   :  { %v3050_v5 = vsel %vm2761_vm9, %v2986_v59, %v2598_v40  ;;  %v8627_v59 = vld [vmem:[%s12808_s6 + $0xa0] sm:$0xff]  }
 0x48a   :  { %v4905_v16 = vpop.permute.xlu0 %4904 }
 0x48b   :  { %v2663_v19 = vpop.permute.xlu1 %2662  ;;  %4907 = vst.msk [vmem:[#allocation3 + $0x7] sm:$0x1] %vm4499_vm13, %v4905_v16  ;;  %v8524_v16 = vpop.f32.mrf.mxu0 }
 0x48c   :  { %v3145_v61 = vsel %vm2826_vm10, %v3050_v5, %v2663_v19  ;;  %v8628_v5 = vld [vmem:[%s12808_s6 + $0xd8] sm:$0xff]  }
 0x48d   :  { %3673 = vmatprep.mubr.bf16.mxu1 %v3145_v61 }
 0x48e   :  { %3674 = vmatmul.mubr.bf16.gmra.mxu1 %v2921_v20  ;;  %v4573_v36 = vpop.permute.xlu0 %4572 }
 0x48f   :  { %v4497_v23 = vpop.permute.xlu1 %4496  ;;  %4575 = vst.msk [vmem:[#allocation3 + $0xa] sm:$0x1] %vm4499_vm13, %v4573_v36  ;;  %v8629_v36 = vld [vmem:[%s12808_s6 + $0x98] sm:$0xff]  }
 0x490   :  { %4500 = vst.msk [vmem:[#allocation3] sm:$0x1] %vm4499_vm13, %v4497_v23  ;;  %v3911_v23 = vpop.f32.mrf.mxu0 }
 0x492   :  { %v4603_v0 = vpop.permute.xlu0 %4602 }
 0x493   :  { %v4528_v35 = vpop.permute.xlu1 %4527  ;;  %4605 = vst.msk [vmem:[#allocation3 + $0xe] sm:$0x1] %vm4499_vm13, %v4603_v0 }
 0x494   :  { %4530 = vst.msk [vmem:[#allocation3 + $0x4] sm:$0x1] %vm4499_vm13, %v4528_v35  ;;  %v8630_v35 = vld [vmem:[%s12808_s6 + $0xd0] sm:$0xff]  }
 0x497   :  { %v4860_v41 = vpop.permute.xlu1 %4859 }
 0x498   :  { %4862 = vst.msk [vmem:[#allocation3 + $0x1] sm:$0x1] %vm4499_vm13, %v4860_v41 }
 0x49b   :  { %v4890_v31 = vpop.permute.xlu1 %4889  ;;  %v3611_v2 = vpop.f32.mrf.mxu1 }
 0x49c   :  { %4892 = vst.msk [vmem:[#allocation3 + $0x5] sm:$0x1] %vm4499_vm13, %v4890_v31  ;;  %v3612_v55 = vadd.f32 %v11974_v12, %v3611_v2  ;;  %v8631_v31 = vld [vmem:[%s12808_s6 + $0x90] sm:$0xff]  }
 0x49d   :  { %v3613_v60 = vpop.f32.mrf.mxu1 }
 0x49e   :  { %v3901_v46 = vadd.f32 %v11957_v15, %v3612_v55  ;;  %v8633_v60 = vld [vmem:[%s12808_s6 + $0x88] sm:$0xff]  }
 0x49f   :  { %v4558_v3 = vpop.permute.xlu1 %4557  ;;  %v3614_v29 = vpop.f32.mrf.mxu1 }
 0x4a0   :  { %4560 = vst.msk [vmem:[#allocation3 + $0x8] sm:$0x1] %vm4499_vm13, %v4558_v3  ;;  %v4017_v42 = vmax.f32 %v3901_v46, 0.0  ;;  %v3615_v58 = vadd.f32 %v11974_v12, %v3614_v29  ;;  %v8635_v3 = vld [vmem:[%s12808_s6 + $0xc0] sm:$0xff]  }
 0x4a1   :  { %v3616_v21 = vpop.f32.mrf.mxu1 }
 0x4a2   :  { %v4191_v7 = vrot.slane %v4017_v42, 1  ;;  %v12072_v13 = vadd.f32 %v11966_v52, %v3615_v58  ;;  %v8638_v58 = vld [vmem:[%s12808_s6 + $0x1f8] sm:$0xff]  }
 0x4a3   :  { %v4588_v8 = vpop.permute.xlu1 %4587  ;;  %v5210_v18 = vld [vmem:[#allocation3] sm:$0xff] }
 0x4a4   :  { %4590 = vst.msk [vmem:[#allocation3 + $0xc] sm:$0x1] %vm4499_vm13, %v4588_v8  ;;  %v5231_v15 = vrot.slane %v5210_v18, %v12068_v24  ;;  %v5224_v50 = vcombine.high %v5210_v18, %v5210_v18  ;;  %v4192_v43 = vsel %vm4099_vm11, %v12002_v47, %v4191_v7  ;;  %v4018_v28 = vmax.f32 %v12072_v13, 0.0  ;;  %v8620_v47 = vld [vmem:[%s12808_s6 + $0xb8] sm:$0xff]  }
 0x4a5   :  { %v4337_v48 = vmax.f32 %v4016_v25, %v4192_v43  ;;  %v8639_v13 = vld [vmem:[%s12808_s6 + $0x1b8] sm:$0xff]  }
 0x4a6   :  { %v5239_v9 = vcombine.high %v5231_v15, %v5231_v15  ;;  %v12082_v32 = vrot.slane %v5224_v50, %v12068_v24  ;;  %v4193_v52 = vrot.slane %v4018_v28, 1  ;;  %v5358_v25 = vpack.c.bf16 %v5231_v15, %v5231_v15  ;;  %v8640_v15 = vld [vmem:[%s12808_s6 + $0x1f0] sm:$0xff]  }
 0x4a7   :  { %v4920_v1 = vpop.permute.xlu1 %4919  ;;  %v4399_v10 = vmax.f32 %v11995_v39, %v4337_v48 }
 0x4a8   :  { %4922 = vst.msk [vmem:[#allocation3 + $0x9] sm:$0x1] %vm4499_vm13, %v4920_v1  ;;  %v5359_v11 = vpack.c.bf16 %v5239_v9, %v5239_v9  ;;  %v5240_v63 = vcombine.high %v12082_v32, %v12082_v32  ;;  %v4194_v49 = vsel %vm4099_vm11, %v4191_v7, %v4193_v52  ;;  %v5360_v8 = vpack.c.bf16 %v12082_v32, %v12082_v32  ;;  %v8644_v32 = vld [vmem:[%s12808_s6 + $0x1e8] sm:$0xff]  }
 0x4a9   :  { %4463 = vst.msk [vmem:[#allocation2 + $0x158] sm:$0xff] %vm2761_vm9, %v4399_v10  ;;  %v4338_v39 = vmax.f32 %v4017_v42, %v4194_v49  ;;  %v8637_v42 = vld [vmem:[%s12808_s6 + $0x80] sm:$0xff]  }
 0x4aa   :  { %6993 = vmatprep.mubr.bf16.mxu0 %v5359_v11  ;;  %v5361_v27 = vpack.c.bf16 %v5240_v63, %v5240_v63 }
 0x4ab   :  { %6994 = vmatmul.mubr.bf16.vlgmr.msra.gmra.mxu0 %v5358_v25 }
 0x4ac   :  { %8108 = vmatpush3.bf16.msra.mxu0 %v8620_v47  ;;  %7033 = vmatprep.mubr.bf16.mxu0 %v5361_v27  ;;  %v12171_v47 = vpop.f32.mrf.mxu0  ;;  %v7739_v27 = vld.sshfl [vmem:[#allocation2 + $0x7d] sm:$0x1 pattern:$0x76325410] }
 0x4ad   :  { %8109 = vmatprep.subr.bf16.mxu0 %v8622_v34 }
 0x4b0   :  { %8110 = vmatpush3.bf16.msra.mxu0 %v8623_v62  ;;  %v7759_v57 = vld.sshfl [vmem:[#allocation2 + $0x15b] sm:$0x1 pattern:$0x76325410]  ;;  %v4983_v37 = vld [vmem:[#allocation2 + $0x159] sm:$0x1] }
 0x4b1   :  { %8111 = vmatprep.subr.bf16.mxu0 %v8624_v17  ;;  %4994 = vrot.lane.b32.xlu0 %v7759_v57, %s8835_s17  ;;  %4984 = vst.msk [vmem:[#allocation3 + $0x13] sm:$0x1] %vm4485_vm12, %v4983_v37  ;;  %v4998_v14 = vld [vmem:[#allocation2 + $0x15d] sm:$0x1]  ;;  %v8645_v62 = vld [vmem:[%s12808_s6 + $0x1a8] sm:$0xff]  }
 0x4b2   :  { %4999 = vst.msk [vmem:[#allocation3 + $0x15] sm:$0x1] %vm4485_vm12, %v4998_v14  ;;  %v7738_v17 = vld.sshfl [vmem:[#allocation2 + $0x79] sm:$0x1 pattern:$0x76325410] }
 0x4b3   :  { %v3619_v53 = vpop.f32.mrf.mxu1  ;;  %v7741_v14 = vld.sshfl [vmem:[#allocation2 + $0x97] sm:$0x1 pattern:$0x76325410] }
 0x4b4   :  { %8112 = vmatpush3.bf16.msra.mxu0 %v8625_v22  ;;  %v3620_v40 = vadd.f32 %v11974_v12, %v3619_v53  ;;  %v8646_v22 = vld [vmem:[%s12808_s6 + $0x1e0] sm:$0xff]  }
 0x4b5   :  { %v3621_v51 = vpop.f32.mrf.mxu1  ;;  %8113 = vmatprep.subr.bf16.mxu0 %v8626_v6  ;;  %v3924_v6 = vpop.f32.mrf.mxu0  ;;  %v8647_v53 = vld [vmem:[%s12808_s6 + $0x1a0] sm:$0xff]  }
 0x4b6   :  { %v3909_v19 = vadd.f32 %v3908_v38, %v3620_v40  ;;  %v8648_v51 = vld [vmem:[%s12808_s6 + $0x1d8] sm:$0xff]  }
 0x4b7   :  { %v3622_v4 = vpop.f32.mrf.mxu1 }
 0x4b8   :  { %v4019_v61 = vmax.f32 %v3909_v19, 0.0  ;;  %8114 = vmatpush3.bf16.msra.mxu0 %v8627_v59  ;;  %v3623_v20 = vadd.f32 %v11974_v12, %v3622_v4 }
 0x4b9   :  { %v3624_v0 = vpop.f32.mrf.mxu1  ;;  %8115 = vmatprep.subr.bf16.mxu0 %v8628_v5  ;;  %v12196_v5 = vpop.f32.mrf.mxu0 }
 0x4ba   :  { %v4195_v41 = vrot.slane %v4019_v61, 1  ;;  %v3912_v33 = vadd.f32 %v3911_v23, %v3623_v20  ;;  %v8649_v20 = vld [vmem:[%s12808_s6 + $0x198] sm:$0xff]   ;;  %v8652_v0 = vld [vmem:[%s12808_s6 + $0x1d0] sm:$0xff]  }
 0x4bc   :  { %v4196_v26 = vsel %vm4099_vm11, %v4193_v52, %v4195_v41  ;;  %v4020_v30 = vmax.f32 %v3912_v33, 0.0  ;;  %8116 = vmatpush3.bf16.msra.mxu0 %v8629_v36 }
 0x4bd   :  { %v12134_v2 = vmax.f32 %v4018_v28, %v4196_v26  ;;  %8117 = vmatprep.subr.bf16.mxu0 %v8630_v35  ;;  %v8641_v28 = vld [vmem:[%s12808_s6 + $0x1b0] sm:$0xff]   ;;  %v3927_v35 = vpop.f32.mrf.mxu0 }
 0x4be   :  { %v4197_v45 = vrot.slane %v4020_v30, 1 }
 0x4c0   :  { %v4198_v55 = vsel %vm4099_vm11, %v4195_v41, %v4197_v45  ;;  %8118 = vmatpush3.bf16.msra.mxu0 %v8631_v31 }
 0x4c1   :  { %v4340_v46 = vmax.f32 %v4019_v61, %v4198_v55  ;;  %8119 = vmatprep.subr.bf16.mxu0 %v8632_v56 }
 0x4c3   :  { %v4402_v29 = vmax.f32 %v4338_v39, %v4340_v46 }
 0x4c4   :  { %8120 = vmatpush3.bf16.msra.mxu0 %v8633_v60 }
 0x4c5   :  { %4466 = vst.msk [vmem:[#allocation2 + $0x170] sm:$0xff] %vm2761_vm9, %v4402_v29  ;;  %8121 = vmatprep.subr.bf16.mxu0 %v8635_v3  ;;  %v8656_v3 = vld [vmem:[%s12808_s6 + $0x1c8] sm:$0xff]  }
 0x4c7   :  { %v3627_v21 = vpop.f32.mrf.mxu1 }
 0x4c8   :  { %8122 = vmatpush3.bf16.msra.mxu0 %v8637_v42  ;;  %v3628_v7 = vadd.f32 %v11974_v12, %v3627_v21 }
 0x4c9   :  { %v3629_v18 = vpop.f32.mrf.mxu1  ;;  %8151 = vmatprep.subr.bf16.mxu0 %v8638_v58  ;;  %v8657_v58 = vld [vmem:[%s12808_s6 + $0x188] sm:$0xff]  }
 0x4ca   :  { %v3917_v50 = vadd.f32 %v12099_v44, %v3628_v7 }
 0x4cb   :  { %7034 = vmatmul.mubr.bf16.vlgmr.msra.gmra.mxu0 %v5360_v8  ;;  %v3630_v43 = vpop.f32.mrf.mxu1 }
 0x4cc   :  { %v4021_v48 = vmax.f32 %v3917_v50, 0.0  ;;  %v3631_v9 = vadd.f32 %v11974_v12, %v3630_v43  ;;  %v7761_v52 = vld.sshfl [vmem:[#allocation2 + $0x175] sm:$0x1 pattern:$0x76325410]  ;;  %8152 = vmatpush3.bf16.msra.mxu0 %v8639_v13  ;;  %v8660_v13 = vld [vmem:[%s12808_s6 + $0x1c0] sm:$0xff]  }
 0x4cd   :  { %5024 = vrot.lane.b32.xlu0 %v7761_v52, %s8835_s17  ;;  %v7760_v1 = vld.sshfl [vmem:[#allocation2 + $0x171] sm:$0x1 pattern:$0x76325410]  ;;  %v3632_v10 = vpop.f32.mrf.mxu1  ;;  %8153 = vmatprep.subr.bf16.mxu0 %v8640_v15  ;;  %v5013_v11 = vld [vmem:[#allocation2 + $0x173] sm:$0x1] }
 0x4ce   :  { %v4199_v63 = vrot.slane %v4021_v48, 1  ;;  %v3920_v49 = vadd.f32 %v8524_v16, %v3631_v9  ;;  %5009 = vrot.lane.b32.xlu1 %v7760_v1, %s8835_s17  ;;  %5014 = vst.msk [vmem:[#allocation3 + $0x17] sm:$0x1] %vm4485_vm12, %v5013_v11  ;;  %v5028_v25 = vld [vmem:[#allocation2 + $0x177] sm:$0x1]  ;;  %v8661_v15 = vld [vmem:[%s12808_s6 + $0x180] sm:$0xff]  }
 0x4cf   :  { %5029 = vst.msk [vmem:[#allocation3 + $0x19] sm:$0x1] %vm4485_vm12, %v5028_v25  ;;  %v7740_v16 = vld.sshfl [vmem:[#allocation2 + $0x93] sm:$0x1 pattern:$0x76325410] }
 0x4d0   :  { %v4200_v34 = vsel %vm4099_vm11, %v4197_v45, %v4199_v63  ;;  %v4022_v39 = vmax.f32 %v3920_v49, 0.0  ;;  %8154 = vmatpush3.bf16.msra.mxu0 %v8641_v28  ;;  %v8665_v43 = vld [vmem:[%s12808_s6 + $0x2f8] sm:$0xff]   ;;  %v7743_v11 = vld.sshfl [vmem:[#allocation2 + $0xb1] sm:$0x1 pattern:$0x76325410] }
 0x4d1   :  { %v4341_v44 = vmax.f32 %v4020_v30, %v4200_v34  ;;  %4692 = vrot.lane.b32.xlu0 %v7739_v27, %s8835_s17  ;;  %8155 = vmatprep.subr.bf16.mxu0 %v8644_v32  ;;  %v8653_v30 = vld [vmem:[%s12808_s6 + $0x190] sm:$0xff]   ;;  %v7745_v34 = vld.sshfl [vmem:[#allocation2 + $0xb9] sm:$0x1 pattern:$0x76325410] }
 0x4d2   :  { %v4201_v38 = vrot.slane %v4022_v39, 1  ;;  %4677 = vrot.lane.b32.xlu1 %v7738_v17, %s8835_s17 }
 0x4d3   :  { %v4403_v57 = vmax.f32 %v12134_v2, %v4341_v44 }
 0x4d4   :  { %v4202_v37 = vsel %vm4099_vm11, %v4199_v63, %v4201_v38  ;;  %v3635_v54 = vpop.f32.mrf.mxu1  ;;  %8156 = vmatpush3.bf16.msra.mxu0 %v8645_v62  ;;  %v7742_v63 = vld.sshfl [vmem:[#allocation2 + $0x9b] sm:$0x1 pattern:$0x76325410] }
 0x4d5   :  { %4467 = vst.msk [vmem:[#allocation2 + $0x178] sm:$0xff] %vm2761_vm9, %v4403_v57  ;;  %v4342_v40 = vmax.f32 %v4021_v48, %v4202_v37  ;;  %v3636_v59 = vadd.f32 %v11974_v12, %v3635_v54  ;;  %4722 = vrot.lane.b32.xlu0 %v7741_v14, %s8835_s17  ;;  %8157 = vmatprep.subr.bf16.mxu0 %v8646_v22  ;;  %v7744_v62 = vld.sshfl [vmem:[#allocation2 + $0xb5] sm:$0x1 pattern:$0x76325410]  ;;  %v8666_v14 = vld [vmem:[%s12808_s6 + $0x2b8] sm:$0xff]  }
 0x4d6   :  { %4707 = vrot.lane.b32.xlu1 %v7740_v16, %s8835_s17  ;;  %v3637_v19 = vpop.f32.mrf.mxu1  ;;  %v8667_v37 = vld [vmem:[%s12808_s6 + $0x270] sm:$0xff]   ;;  %v8671_v16 = vld [vmem:[%s12808_s6 + $0x268] sm:$0xff]  }
 0x4d7   :  { %v3925_v4 = vadd.f32 %v3924_v6, %v3636_v59  ;;  %v8668_v59 = vld [vmem:[%s12808_s6 + $0x230] sm:$0xff]   ;;  %v8673_v19 = vld [vmem:[%s12808_s6 + $0x2e8] sm:$0xff]  }
 0x4d8   :  { %v3638_v61 = vpop.f32.mrf.mxu1  ;;  %8158 = vmatpush3.bf16.msra.mxu0 %v8647_v53 }
 0x4d9   :  { %v4023_v36 = vmax.f32 %v3925_v4, 0.0  ;;  %v3639_v23 = vadd.f32 %v11974_v12, %v3638_v61  ;;  %8159 = vmatprep.subr.bf16.mxu0 %v8648_v51  ;;  %v8670_v51 = vld [vmem:[%s12808_s6 + $0x2b0] sm:$0xff]   ;;  %v8672_v4 = vld [vmem:[%s12808_s6 + $0x228] sm:$0xff]   ;;  %v8675_v61 = vld [vmem:[%s12808_s6 + $0x260] sm:$0xff]  }
 0x4da   :  { %v3640_v41 = vpop.f32.mrf.mxu1 }
 0x4db   :  { %v4203_v33 = vrot.slane %v4023_v36, 1  ;;  %v12206_v26 = vadd.f32 %v3927_v35, %v3639_v23  ;;  %v8677_v23 = vld [vmem:[%s12808_s6 + $0x2e0] sm:$0xff]  }
 0x4dc   :  { %v4935_v31 = vpop.permute.xlu0 %4934  ;;  %v7763_v2 = vld.sshfl [vmem:[#allocation2 + $0x17d] sm:$0x1 pattern:$0x76325410]  ;;  %8160 = vmatpush3.bf16.msra.mxu0 %v8649_v20  ;;  %v5043_v56 = vld [vmem:[#allocation2 + $0x17b] sm:$0x1] }
 0x4dd   :  { %v4204_v45 = vsel %vm4099_vm11, %v4201_v38, %v4203_v33  ;;  %v4024_v55 = vmax.f32 %v12206_v26, 0.0  ;;  %v4950_v60 = vpop.permute.xlu1 %4949  ;;  %4937 = vst.msk [vmem:[#allocation3 + $0xb] sm:$0x1] %vm4499_vm13, %v4935_v31  ;;  %5054 = vrot.lane.b32.xlu0 %v7763_v2, %s8835_s17  ;;  %8161 = vmatprep.subr.bf16.mxu0 %v8652_v0  ;;  %v8664_v38 = vld [vmem:[%s12808_s6 + $0x238] sm:$0xff]   ;;  %v8674_v20 = vld [vmem:[%s12808_s6 + $0x2a8] sm:$0xff]   ;;  %v8676_v35 = vld [vmem:[%s12808_s6 + $0x220] sm:$0xff]  }
 0x4de   :  { %v7762_v46 = vld.sshfl [vmem:[#allocation2 + $0x179] sm:$0x1 pattern:$0x76325410]  ;;  %5044 = vst.msk [vmem:[#allocation3 + $0x1b] sm:$0x1] %vm4485_vm12, %v5043_v56  ;;  %v12219_v29 = vmax.f32 %v4022_v39, %v4204_v45 }
 0x4df   :  { %4952 = vst.msk [vmem:[#allocation3 + $0xd] sm:$0x1] %vm4499_vm13, %v4950_v60  ;;  %5039 = vrot.lane.b32.xlu1 %v7762_v46, %s8835_s17  ;;  %v12225_v42 = vrot.slane %v4024_v55, 1  ;;  %v8678_v31 = vld [vmem:[%s12808_s6 + $0x2a0] sm:$0xff]   ;;  %v8681_v56 = vld [vmem:[%s12808_s6 + $0x2d8] sm:$0xff]   ;;  %v8689_v26 = vld [vmem:[%s12808_s6 + $0x2c8] sm:$0xff]  }
 0x4e0   :  { %8162 = vmatpush3.bf16.msra.mxu0 %v8653_v30  ;;  %v8680_v46 = vld [vmem:[%s12808_s6 + $0x218] sm:$0xff]  }
 0x4e1   :  { %v4206_v21 = vsel %vm4099_vm11, %v4203_v33, %v12225_v42  ;;  %v4618_v7 = vpop.permute.xlu1 %4617  ;;  %8163 = vmatprep.subr.bf16.mxu0 %v8656_v3  ;;  %v8679_v33 = vld [vmem:[%s12808_s6 + $0x258] sm:$0xff]   ;;  %v8683_v3 = vld [vmem:[%s12808_s6 + $0x250] sm:$0xff]  }
 0x4e2   :  { %v4344_v8 = vmax.f32 %v4023_v36, %v4206_v21  ;;  %4620 = vst.msk [vmem:[#allocation3 + $0x10] sm:$0x1] %vm4499_vm13, %v4618_v7  ;;  %v8682_v7 = vld [vmem:[%s12808_s6 + $0x298] sm:$0xff]  }
 0x4e4   :  { %v4406_v18 = vmax.f32 %v4342_v40, %v4344_v8  ;;  %8164 = vmatpush3.bf16.msra.mxu0 %v8657_v58  ;;  %v8669_v40 = vld [vmem:[%s12808_s6 + $0x2f0] sm:$0xff]  }
 0x4e5   :  { %v4648_v50 = vpop.permute.xlu1 %4647  ;;  %8165 = vmatprep.subr.bf16.mxu0 %v8660_v13  ;;  %v8685_v13 = vld [vmem:[%s12808_s6 + $0x2d0] sm:$0xff]  }
 0x4e6   :  { %4470 = vst.msk [vmem:[#allocation2 + $0x190] sm:$0xff] %vm2761_vm9, %v4406_v18 }
 0x4e7   :  { %4650 = vst.msk [vmem:[#allocation3 + $0x14] sm:$0x1] %vm4499_vm13, %v4648_v50  ;;  %v8687_v50 = vld [vmem:[%s12808_s6 + $0x248] sm:$0xff]  }
 0x4e8   :  { %8166 = vmatpush3.bf16.msra.mxu0 %v8661_v15 }
 0x4e9   :  { %8195 = vmatprep.subr.bf16.mxu0 %v8665_v43  ;;  %v12335_v43 = vpop.f32.mrf.mxu0 }
 0x4ec   :  { %v4965_v28 = vpop.permute.xlu0 %4964 }
 0x4ed   :  { %v4980_v48 = vpop.permute.xlu1 %4979  ;;  %4967 = vst.msk [vmem:[#allocation3 + $0xf] sm:$0x1] %vm4499_vm13, %v4965_v28  ;;  %v7765_v9 = vld.sshfl [vmem:[#allocation2 + $0x197] sm:$0x1 pattern:$0x76325410] }
 0x4ee   :  { %v5058_v52 = vld [vmem:[#allocation2 + $0x191] sm:$0x1]  ;;  %4982 = vst.msk [vmem:[#allocation3 + $0x11] sm:$0x1] %vm4499_vm13, %v4980_v48  ;;  %5084 = vrot.lane.b32.xlu0 %v7765_v9, %s8835_s17  ;;  %v5073_v1 = vld [vmem:[#allocation2 + $0x195] sm:$0x1] }
 0x4ef   :  { %v7764_v32 = vld.sshfl [vmem:[#allocation2 + $0x193] sm:$0x1 pattern:$0x76325410]  ;;  %5059 = vst.msk [vmem:[#allocation3 + $0x1d] sm:$0x1] %vm4485_vm12, %v5058_v52 }
 0x4f0   :  { %5069 = vrot.lane.b32.xlu1 %v7764_v32, %s8835_s17  ;;  %5074 = vst.msk [vmem:[#allocation3 + $0x1f] sm:$0x1] %vm4485_vm12, %v5073_v1  ;;  %v4633_v10 = vpop.permute.xlu0 %4632  ;;  %v8688_v9 = vld [vmem:[%s12808_s6 + $0x208] sm:$0xff]   ;;  %v3940_v32 = vpop.f32.mrf.mxu0 }
 0x4f1   :  { %4635 = vst.msk [vmem:[#allocation3 + $0x12] sm:$0x1] %vm4499_vm13, %v4633_v10  ;;  %v8690_v1 = vld [vmem:[%s12808_s6 + $0x288] sm:$0xff]   ;;  %v8693_v10 = vld [vmem:[%s12808_s6 + $0x2c0] sm:$0xff]  }
 0x4f2   :  { %4752 = vrot.lane.b32.xlu0 %v7743_v11, %s8835_s17 }
 0x4f4   :  { %4737 = vrot.lane.b32.xlu1 %v7742_v63, %s8835_s17  ;;  %v4663_v49 = vpop.permute.xlu0 %4662  ;;  %v5211_v25 = vld [vmem:[#allocation3 + $0x8] sm:$0xff]  ;;  %v8692_v63 = vld [vmem:[%s12808_s6 + $0x200] sm:$0xff]  }
 0x4f5   :  { %4665 = vst.msk [vmem:[#allocation3 + $0x16] sm:$0x1] %vm4499_vm13, %v4663_v49  ;;  %v5248_v39 = vrot.slane %v5211_v25, %v12068_v24  ;;  %v5241_v27 = vcombine.high %v5211_v25, %v5211_v25  ;;  %v8695_v25 = vld [vmem:[%s12808_s6 + $0x378] sm:$0xff]  }
 0x4f6   :  { %4782 = vrot.lane.b32.xlu0 %v7745_v34, %s8835_s17  ;;  %v8532_v34 = vpop.f32.mrf.mxu0 }
 0x4f7   :  { %v5256_v44 = vcombine.high %v5248_v39, %v5248_v39  ;;  %v5255_v17 = vrot.slane %v5241_v27, %v12068_v24  ;;  %v5362_v57 = vpack.c.bf16 %v5248_v39, %v5248_v39  ;;  %v8694_v27 = vld [vmem:[%s12808_s6 + $0x280] sm:$0xff]  }
 0x4f8   :  { %4767 = vrot.lane.b32.xlu1 %v7744_v62, %s8835_s17 }
 0x4f9   :  { %v5363_v22 = vpack.c.bf16 %v5256_v44, %v5256_v44  ;;  %v5257_v6 = vcombine.high %v5255_v17, %v5255_v17  ;;  %v5364_v53 = vpack.c.bf16 %v5255_v17, %v5255_v17  ;;  %v8697_v44 = vld [vmem:[%s12808_s6 + $0x3f8] sm:$0xff]  }
 0x4fb   :  { %7073 = vmatprep.mubr.bf16.mxu1 %v5363_v22  ;;  %v5365_v54 = vpack.c.bf16 %v5257_v6, %v5257_v6 }
 0x4fc   :  { %7074 = vmatmul.mubr.bf16.vlgmr.msra.gmra.mxu1 %v5362_v57 }
 0x4fd   :  { %7113 = vmatprep.mubr.bf16.mxu0 %v5365_v54  ;;  %8174 = vmatpush3.bf16.msra.mxu1 %v8664_v38  ;;  %v3943_v54 = vpop.f32.mrf.mxu0 }
 0x4fe   :  { %7114 = vmatmul.mubr.bf16.vlgmr.msra.gmra.mxu0 %v5364_v53  ;;  %8175 = vmatprep.subr.bf16.mxu1 %v8667_v37 }
 0x4ff   :  { %8196 = vmatpush3.bf16.msra.mxu0 %v8666_v14 }
 0x500   :  { %8197 = vmatprep.subr.bf16.mxu0 %v8669_v40 }
 0x501   :  { %8176 = vmatpush3.bf16.msra.mxu1 %v8668_v59 }
 0x502   :  { %8177 = vmatprep.subr.bf16.mxu1 %v8671_v16 }
 0x503   :  { %8198 = vmatpush3.bf16.msra.mxu0 %v8670_v51 }
 0x504   :  { %v3643_v36 = vpop.f32.mrf.mxu1  ;;  %8199 = vmatprep.subr.bf16.mxu0 %v8673_v19 }
 0x505   :  { %v3644_v0 = vadd.f32 %v11974_v12, %v3643_v36  ;;  %8178 = vmatpush3.bf16.msra.mxu1 %v8672_v4 }
 0x506   :  { %v3645_v41 = vpop.f32.mrf.mxu1  ;;  %8179 = vmatprep.subr.bf16.mxu1 %v8675_v61 }
 0x507   :  { %v3933_v30 = vadd.f32 %v12171_v47, %v3644_v0  ;;  %8200 = vmatpush3.bf16.msra.mxu0 %v8674_v20 }
 0x508   :  { %v3646_v2 = vpop.f32.mrf.mxu1  ;;  %8201 = vmatprep.subr.bf16.mxu0 %v8677_v23 }
 0x509   :  { %v4025_v45 = vmax.f32 %v3933_v30, 0.0  ;;  %v3647_v60 = vadd.f32 %v11974_v12, %v3646_v2  ;;  %8180 = vmatpush3.bf16.msra.mxu1 %v8676_v35 }
 0x50a   :  { %v3648_v47 = vpop.f32.mrf.mxu1  ;;  %8181 = vmatprep.subr.bf16.mxu1 %v8679_v33 }
 0x50b   :  { %v4207_v58 = vrot.slane %v4025_v45, 1  ;;  %v12316_v21 = vadd.f32 %v12196_v5, %v3647_v60  ;;  %8202 = vmatpush3.bf16.msra.mxu0 %v8678_v31  ;;  %v8684_v5 = vld [vmem:[%s12808_s6 + $0x210] sm:$0xff]  }
 0x50c   :  { %8203 = vmatprep.subr.bf16.mxu0 %v8681_v56 }
 0x50d   :  { %v4208_v8 = vsel %vm4099_vm11, %v12225_v42, %v4207_v58  ;;  %v4026_v18 = vmax.f32 %v12316_v21, 0.0  ;;  %8182 = vmatpush3.bf16.msra.mxu1 %v8680_v46  ;;  %v8686_v42 = vld [vmem:[%s12808_s6 + $0x290] sm:$0xff]   ;;  %v7746_v46 = vld.sshfl [vmem:[#allocation2 + $0xbd] sm:$0x1 pattern:$0x76325410] }
 0x50e   :  { %v4345_v15 = vmax.f32 %v4024_v55, %v4208_v8  ;;  %8183 = vmatprep.subr.bf16.mxu1 %v8683_v3 }
 0x50f   :  { %v4209_v28 = vrot.slane %v4026_v18, 1  ;;  %8204 = vmatpush3.bf16.msra.mxu0 %v8682_v7 }
 0x510   :  { %v4407_v48 = vmax.f32 %v12219_v29, %v4345_v15  ;;  %8205 = vmatprep.subr.bf16.mxu0 %v8685_v13  ;;  %v8691_v29 = vld [vmem:[%s12808_s6 + $0x240] sm:$0xff]   ;;  %v7748_v13 = vld.sshfl [vmem:[#allocation2 + $0xd7] sm:$0x1 pattern:$0x76325410] }
 0x511   :  { %v4210_v55 = vsel %vm4099_vm11, %v4207_v58, %v4209_v28  ;;  %8184 = vmatpush3.bf16.msra.mxu1 %v8684_v5 }
 0x512   :  { %4471 = vst.msk [vmem:[#allocation2 + $0x198] sm:$0xff] %vm2761_vm9, %v4407_v48  ;;  %v4346_v52 = vmax.f32 %v4025_v45, %v4210_v55  ;;  %8185 = vmatprep.subr.bf16.mxu1 %v8687_v50  ;;  %v12390_v50 = vpop.f32.mrf.mxu0 }
 0x513   :  { %8206 = vmatpush3.bf16.msra.mxu0 %v8686_v42 }
 0x514   :  { %8207 = vmatprep.subr.bf16.mxu0 %v8689_v26  ;;  %v8809_v26 = vld [vmem:[%s12807_s5] ss:$0 sm:$0xff] }
 0x515   :  { %v3651_v11 = vpop.f32.mrf.mxu1  ;;  %8186 = vmatpush3.bf16.msra.mxu1 %v8688_v9 }
 0x516   :  { %v3652_v49 = vadd.f32 %v11974_v12, %v3651_v11  ;;  %8187 = vmatprep.subr.bf16.mxu1 %v8691_v29 }
 0x517   :  { %v3653_v39 = vpop.f32.mrf.mxu1  ;;  %8208 = vmatpush3.bf16.msra.mxu0 %v8690_v1 }
 0x518   :  { %v3941_v62 = vadd.f32 %v3940_v32, %v3652_v49  ;;  %8209 = vmatprep.subr.bf16.mxu0 %v8693_v10 }
 0x519   :  { %v3654_v17 = vpop.f32.mrf.mxu1  ;;  %v7766_v22 = vld.sshfl [vmem:[#allocation2 + $0x19b] sm:$0x1 pattern:$0x76325410]  ;;  %8188 = vmatpush3.bf16.msra.mxu1 %v8692_v63  ;;  %v5088_v6 = vld [vmem:[#allocation2 + $0x199] sm:$0x1] }
 0x51a   :  { %v4027_v38 = vmax.f32 %v3941_v62, 0.0  ;;  %v3655_v57 = vadd.f32 %v11974_v12, %v3654_v17  ;;  %5099 = vrot.lane.b32.xlu1 %v7766_v22, %s8835_s17  ;;  %8217 = vmatprep.subr.bf16.mxu1 %v8695_v25  ;;  %5089 = vst.msk [vmem:[#allocation3 + $0x21] sm:$0x1] %vm4485_vm12, %v5088_v6  ;;  %v5103_v37 = vld [vmem:[#allocation2 + $0x19d] sm:$0x1] }
 0x51b   :  { %v3656_v14 = vpop.f32.mrf.mxu1  ;;  %8210 = vmatpush3.bf16.msra.mxu0 %v8694_v27  ;;  %5104 = vst.msk [vmem:[#allocation3 + $0x23] sm:$0x1] %vm4485_vm12, %v5103_v37  ;;  %v7747_v27 = vld.sshfl [vmem:[#allocation2 + $0xd3] sm:$0x1 pattern:$0x76325410] }
 0x51c   :  { %v4211_v53 = vrot.slane %v4027_v38, 1  ;;  %v3944_v40 = vadd.f32 %v3943_v54, %v3655_v57  ;;  %8239 = vmatprep.subr.bf16.mxu0 %v8697_v44 }
 0x51e   :  { %v4212_v59 = vsel %vm4099_vm11, %v4209_v28, %v4211_v53  ;;  %v4028_v16 = vmax.f32 %v3944_v40, 0.0  ;;  %v7749_v40 = vld.sshfl [vmem:[#allocation2 + $0xdb] sm:$0x1 pattern:$0x76325410] }
 0x51f   :  { %v4347_v51 = vmax.f32 %v4026_v18, %v4212_v59 }
 0x520   :  { %v4213_v19 = vrot.slane %v4028_v16, 1 }
 0x522   :  { %v4214_v4 = vsel %vm4099_vm11, %v4211_v53, %v4213_v19 }
 0x523   :  { %v4348_v61 = vmax.f32 %v4027_v38, %v4214_v4  ;;  %v4995_v20 = vpop.permute.xlu0 %4994 }
 0x524   :  { %4997 = vst.msk [vmem:[#allocation3 + $0x13] sm:$0x1] %vm4499_vm13, %v4995_v20 }
 0x525   :  { %v4410_v36 = vmax.f32 %v4346_v52, %v4348_v61  ;;  %v8696_v61 = vld [vmem:[%s12808_s6 + $0x338] sm:$0xff]  }
 0x527   :  { %4474 = vst.msk [vmem:[#allocation2 + $0x1b0] sm:$0xff] %vm2761_vm9, %v4410_v36 }
 0x52d   :  { %v3659_v23 = vpop.f32.mrf.mxu1 }
 0x52e   :  { %v3660_v0 = vadd.f32 %v11974_v12, %v3659_v23  ;;  %v7768_v35 = vld.sshfl [vmem:[#allocation2 + $0x1b5] sm:$0x1 pattern:$0x76325410]  ;;  %v5118_v41 = vld [vmem:[#allocation2 + $0x1b3] sm:$0x1] }
 0x52f   :  { %5129 = vrot.lane.b32.xlu1 %v7768_v35, %s8835_s17  ;;  %v7767_v33 = vld.sshfl [vmem:[#allocation2 + $0x1b1] sm:$0x1 pattern:$0x76325410]  ;;  %v3661_v30 = vpop.f32.mrf.mxu1  ;;  %5119 = vst.msk [vmem:[#allocation3 + $0x25] sm:$0x1] %vm4485_vm12, %v5118_v41 }
 0x530   :  { %v5133_v31 = vld [vmem:[#allocation2 + $0x1b7] sm:$0x1]  ;;  %v3949_v2 = vadd.f32 %v12335_v43, %v3660_v0  ;;  %5114 = vrot.lane.b32.xlu0 %v7767_v33, %s8835_s17  ;;  %v3956_v43 = vpop.f32.mrf.mxu0 }
 0x531   :  { %5134 = vst.msk [vmem:[#allocation3 + $0x27] sm:$0x1] %vm4485_vm12, %v5133_v31  ;;  %v3662_v56 = vpop.f32.mrf.mxu1  ;;  %v8699_v0 = vld [vmem:[%s12808_s6 + $0x370] sm:$0xff]   ;;  %v8698_v31 = vld [vmem:[%s12808_s6 + $0x3b8] sm:$0xff]  }
 0x532   :  { %v4029_v45 = vmax.f32 %v3949_v2, 0.0  ;;  %v3663_v60 = vadd.f32 %v11974_v12, %v3662_v56  ;;  %v8536_v9 = vpop.f32.mrf.mxu0 }
 0x533   :  { %4797 = vrot.lane.b32.xlu1 %v7746_v46, %s8835_s17  ;;  %v3664_v47 = vpop.f32.mrf.mxu1 }
 0x534   :  { %v4215_v3 = vrot.slane %v4029_v45, 1  ;;  %v3952_v58 = vadd.f32 %v8532_v34, %v3663_v60  ;;  %v3959_v39 = vpop.f32.mrf.mxu0  ;;  %v8701_v60 = vld [vmem:[%s12808_s6 + $0x3f0] sm:$0xff]  }
 0x536   :  { %v4216_v21 = vsel %vm4099_vm11, %v4213_v19, %v4215_v3  ;;  %v4030_v7 = vmax.f32 %v3952_v58, 0.0 }
 0x537   :  { %v4349_v8 = vmax.f32 %v4028_v16, %v4216_v21  ;;  %4827 = vrot.lane.b32.xlu1 %v7748_v13, %s8835_s17  ;;  %v8703_v21 = vld [vmem:[%s12808_s6 + $0x368] sm:$0xff]   ;;  %v8702_v13 = vld [vmem:[%s12808_s6 + $0x3b0] sm:$0xff]  }
 0x538   :  { %v4217_v18 = vrot.slane %v4030_v7, 1 }
 0x539   :  { %v4411_v5 = vmax.f32 %v4347_v51, %v4349_v8 }
 0x53a   :  { %v4218_v15 = vsel %vm4099_vm11, %v4215_v3, %v4217_v18  ;;  %v8700_v3 = vld [vmem:[%s12808_s6 + $0x330] sm:$0xff]  }
 0x53b   :  { %4475 = vst.msk [vmem:[#allocation2 + $0x1b8] sm:$0xff] %vm2761_vm9, %v4411_v5  ;;  %v12393_v12 = vmax.f32 %v4029_v45, %v4218_v15  ;;  %v8704_v15 = vld [vmem:[%s12808_s6 + $0x328] sm:$0xff]  }
 0x53f   :  { %v5025_v28 = vpop.permute.xlu0 %5024 }
 0x540   :  { %v5010_v42 = vpop.permute.xlu1 %5009  ;;  %5027 = vst.msk [vmem:[#allocation3 + $0x17] sm:$0x1] %vm4499_vm13, %v5025_v28 }
 0x541   :  { %5012 = vst.msk [vmem:[#allocation3 + $0x15] sm:$0x1] %vm4499_vm13, %v5010_v42  ;;  %v3667_v48 = vpop.f32.mrf.mxu1  ;;  %v8709_v42 = vld [vmem:[%s12808_s6 + $0x3e0] sm:$0xff]  }
 0x542   :  { %v3668_v55 = vadd.f32 %v8809_v26, %v3667_v48  ;;  %v7770_v52 = vld.sshfl [vmem:[#allocation2 + $0x1bd] sm:$0x1 pattern:$0x76325410]  ;;  %v5148_v29 = vld [vmem:[#allocation2 + $0x1bb] sm:$0x1] }
 0x543   :  { %5159 = vrot.lane.b32.xlu1 %v7770_v52, %s8835_s17  ;;  %v7769_v32 = vld.sshfl [vmem:[#allocation2 + $0x1b9] sm:$0x1 pattern:$0x76325410]  ;;  %v3669_v1 = vpop.f32.mrf.mxu1  ;;  %v4693_v10 = vpop.permute.xlu0 %4692  ;;  %5149 = vst.msk [vmem:[#allocation3 + $0x29] sm:$0x1] %vm4485_vm12, %v5148_v29 }
 0x544   :  { %v3957_v11 = vadd.f32 %v3956_v43, %v3668_v55  ;;  %v4678_v63 = vpop.permute.xlu1 %4677  ;;  %5144 = vrot.lane.b32.xlu0 %v7769_v32, %s8835_s17  ;;  %4695 = vst.msk [vmem:[#allocation3 + $0x1a] sm:$0x1] %vm4499_vm13, %v4693_v10  ;;  %v8706_v43 = vld [vmem:[%s12808_s6 + $0x3a8] sm:$0xff]   ;;  %v8708_v48 = vld [vmem:[%s12808_s6 + $0x320] sm:$0xff]   ;;  %v8713_v1 = vld [vmem:[%s12808_s6 + $0x3d8] sm:$0xff]  }
 0x545   :  { %4680 = vst.msk [vmem:[#allocation3 + $0x18] sm:$0x1] %vm4499_vm13, %v4678_v63  ;;  %v3670_v49 = vpop.f32.mrf.mxu1  ;;  %v8710_v32 = vld [vmem:[%s12808_s6 + $0x3a0] sm:$0xff]   ;;  %v8715_v63 = vld [vmem:[%s12808_s6 + $0x350] sm:$0xff]  }
 0x546   :  { %v4031_v25 = vmax.f32 %v3957_v11, 0.0  ;;  %v3671_v34 = vadd.f32 %v8809_v26, %v3670_v49  ;;  %v8712_v11 = vld [vmem:[%s12808_s6 + $0x318] sm:$0xff]  }
 0x547   :  { %v3672_v62 = vpop.f32.mrf.mxu1  ;;  %v4723_v44 = vpop.permute.xlu0 %4722  ;;  %v8714_v49 = vld [vmem:[%s12808_s6 + $0x398] sm:$0xff]  }
 0x548   :  { %v4219_v17 = vrot.slane %v4031_v25, 1  ;;  %v3960_v22 = vadd.f32 %v3959_v39, %v3671_v34  ;;  %v4708_v6 = vpop.permute.xlu1 %4707  ;;  %4812 = vrot.lane.b32.xlu0 %v7747_v27, %s8835_s17  ;;  %4725 = vst.msk [vmem:[#allocation3 + $0x1e] sm:$0x1] %vm4499_vm13, %v4723_v44  ;;  %v5212_v38 = vld [vmem:[#allocation3 + $0x10] sm:$0xff]  ;;  %v8719_v44 = vld [vmem:[%s12808_s6 + $0x348] sm:$0xff]  }
 0x549   :  { %4710 = vst.msk [vmem:[#allocation3 + $0x1c] sm:$0x1] %vm4499_vm13, %v4708_v6  ;;  %v5265_v57 = vrot.slane %v5212_v38, %v12068_v24  ;;  %v5258_v37 = vcombine.high %v5212_v38, %v5212_v38  ;;  %v8717_v34 = vld [vmem:[%s12808_s6 + $0x3d0] sm:$0xff]   ;;  %v8721_v38 = vld [vmem:[%s12808_s6 + $0x3c8] sm:$0xff]  }
 0x54a   :  { %v4220_v54 = vsel %vm4099_vm11, %v4217_v18, %v4219_v17  ;;  %v4032_v14 = vmax.f32 %v3960_v22, 0.0  ;;  %v8705_v18 = vld [vmem:[%s12808_s6 + $0x3e8] sm:$0xff]   ;;  %v8716_v27 = vld [vmem:[%s12808_s6 + $0x310] sm:$0xff]  }
 0x54b   :  { %v12410_v53 = vmax.f32 %v4030_v7, %v4220_v54  ;;  %v5273_v59 = vcombine.high %v5265_v57, %v5265_v57  ;;  %v5272_v16 = vrot.slane %v5258_v37, %v12068_v24  ;;  %v5366_v23 = vpack.c.bf16 %v5265_v57, %v5265_v57  ;;  %v8718_v62 = vld [vmem:[%s12808_s6 + $0x390] sm:$0xff]   ;;  %v8720_v54 = vld [vmem:[%s12808_s6 + $0x308] sm:$0xff]  }
 0x54c   :  { %v4221_v51 = vrot.slane %v4032_v14, 1  ;;  %4842 = vrot.lane.b32.xlu0 %v7749_v40, %s8835_s17 }
 0x54d   :  { %v5367_v19 = vpack.c.bf16 %v5273_v59, %v5273_v59  ;;  %v5274_v4 = vcombine.high %v5272_v16, %v5272_v16  ;;  %v5368_v45 = vpack.c.bf16 %v5272_v16, %v5272_v16  ;;  %v8725_v59 = vld [vmem:[%s12808_s6 + $0x3c0] sm:$0xff]  }
 0x54e   :  { %v4222_v20 = vsel %vm4099_vm11, %v4219_v17, %v4221_v51  ;;  %v3675_v36 = vpop.f32.mrf.mxu1 }
 0x54f   :  { %v4352_v35 = vmax.f32 %v4031_v25, %v4222_v20  ;;  %v3676_v41 = vadd.f32 %v8809_v26, %v3675_v36  ;;  %7153 = vmatprep.mubr.bf16.mxu1 %v5367_v19  ;;  %v5055_v33 = vpop.permute.xlu0 %5054  ;;  %v5369_v30 = vpack.c.bf16 %v5274_v4, %v5274_v4  ;;  %v8711_v26 = vld [vmem:[%s12808_s6 + $0x358] sm:$0xff]  }
 0x550   :  { %v3677_v56 = vpop.f32.mrf.mxu1  ;;  %7154 = vmatmul.mubr.bf16.vlgmr.msra.gmra.mxu1 %v5366_v23  ;;  %5057 = vst.msk [vmem:[#allocation3 + $0x1b] sm:$0x1] %vm4499_vm13, %v5055_v33  ;;  %v8728_v20 = vld [vmem:[%s12808_s6 + $0x478] sm:$0xff]   ;;  %v8726_v23 = vld [vmem:[%s12808_s6 + $0x380] sm:$0xff]  }
 0x551   :  { %v5040_v2 = vpop.permute.xlu1 %5039  ;;  %v4414_v46 = vmax.f32 %v12393_v12, %v4352_v35  ;;  %v3965_v47 = vadd.f32 %v12390_v50, %v3676_v41  ;;  %7193 = vmatprep.mubr.bf16.mxu0 %v5369_v30  ;;  %8218 = vmatpush3.bf16.msra.mxu1 %v8696_v61  ;;  %v8707_v50 = vld [vmem:[%s12808_s6 + $0x360] sm:$0xff]   ;;  %v8730_v41 = vld [vmem:[%s12808_s6 + $0x4f8] sm:$0xff]  }
 0x552   :  { %5042 = vst.msk [vmem:[#allocation3 + $0x19] sm:$0x1] %vm4499_vm13, %v5040_v2  ;;  %v3678_v58 = vpop.f32.mrf.mxu1  ;;  %7194 = vmatmul.mubr.bf16.vlgmr.msra.gmra.mxu0 %v5368_v45  ;;  %8219 = vmatprep.subr.bf16.mxu1 %v8699_v0  ;;  %v8729_v56 = vld [vmem:[%s12808_s6 + $0x438] sm:$0xff]  }
 0x553   :  { %4478 = vst.msk [vmem:[#allocation2 + $0x1d0] sm:$0xff] %vm2761_vm9, %v4414_v46  ;;  %v4033_v7 = vmax.f32 %v3965_v47, 0.0  ;;  %8240 = vmatpush3.bf16.msra.mxu0 %v8698_v31  ;;  %v8731_v46 = vld [vmem:[%s12808_s6 + $0x470] sm:$0xff]  }
 0x554   :  { %v3680_v8 = vpop.f32.mrf.mxu1  ;;  %8241 = vmatprep.subr.bf16.mxu0 %v8701_v60 }
 0x555   :  { %v4223_v5 = vrot.slane %v4033_v7, 1  ;;  %8220 = vmatpush3.bf16.msra.mxu1 %v8700_v3  ;;  %v8732_v3 = vld [vmem:[%s12808_s6 + $0x4b8] sm:$0xff]   ;;  %v8734_v7 = vld [vmem:[%s12808_s6 + $0x4f0] sm:$0xff]   ;;  %v8735_v8 = vld [vmem:[%s12808_s6 + $0x468] sm:$0xff]  }
 0x556   :  { %8221 = vmatprep.subr.bf16.mxu1 %v8703_v21 }
 0x557   :  { %v4224_v12 = vsel %vm4099_vm11, %v4221_v51, %v4223_v5  ;;  %8242 = vmatpush3.bf16.msra.mxu0 %v8702_v13  ;;  %v8724_v51 = vld [vmem:[%s12808_s6 + $0x300] sm:$0xff]   ;;  %v8733_v13 = vld [vmem:[%s12808_s6 + $0x430] sm:$0xff]   ;;  %v8738_v5 = vld [vmem:[%s12808_s6 + $0x4e8] sm:$0xff]  }
 0x558   :  { %v4353_v28 = vmax.f32 %v4032_v14, %v4224_v12  ;;  %8243 = vmatprep.subr.bf16.mxu0 %v8705_v18  ;;  %v8723_v14 = vld [vmem:[%s12808_s6 + $0x340] sm:$0xff]   ;;  %v8736_v18 = vld [vmem:[%s12808_s6 + $0x4b0] sm:$0xff]   ;;  %v8740_v12 = vld [vmem:[%s12808_s6 + $0x4a8] sm:$0xff]  }
 0x559   :  { %8222 = vmatpush3.bf16.msra.mxu1 %v8704_v15  ;;  %v8737_v15 = vld [vmem:[%s12808_s6 + $0x428] sm:$0xff]  }
 0x55a   :  { %v4415_v55 = vmax.f32 %v12410_v53, %v4353_v28  ;;  %v7772_v9 = vld.sshfl [vmem:[#allocation2 + $0x1d7] sm:$0x1 pattern:$0x76325410]  ;;  %8223 = vmatprep.subr.bf16.mxu1 %v8707_v50  ;;  %v5178_v52 = vld [vmem:[#allocation2 + $0x1d5] sm:$0x1] }
 0x55b   :  { %8244 = vmatpush3.bf16.msra.mxu0 %v8706_v43  ;;  %5189 = vrot.lane.b32.xlu1 %v7772_v9, %s8835_s17  ;;  %v7771_v29 = vld.sshfl [vmem:[#allocation2 + $0x1d3] sm:$0x1 pattern:$0x76325410]  ;;  %5179 = vst.msk [vmem:[#allocation3 + $0x2d] sm:$0x1] %vm4485_vm12, %v5178_v52 }
 0x55c   :  { %4479 = vst.msk [vmem:[#allocation2 + $0x1d8] sm:$0xff] %vm2761_vm9, %v4415_v55  ;;  %5174 = vrot.lane.b32.xlu0 %v7771_v29, %s8835_s17  ;;  %8245 = vmatprep.subr.bf16.mxu0 %v8709_v42  ;;  %v5163_v10 = vld [vmem:[#allocation2 + $0x1d1] sm:$0x1]  ;;  %v8722_v53 = vld [vmem:[%s12808_s6 + $0x388] sm:$0xff]   ;;  %v8739_v50 = vld [vmem:[%s12808_s6 + $0x460] sm:$0xff]  }
 0x55d   :  { %8224 = vmatpush3.bf16.msra.mxu1 %v8708_v48  ;;  %5164 = vst.msk [vmem:[#allocation3 + $0x2b] sm:$0x1] %vm4485_vm12, %v5163_v10  ;;  %v8742_v43 = vld [vmem:[%s12808_s6 + $0x4e0] sm:$0xff]   ;;  %v8743_v42 = vld [vmem:[%s12808_s6 + $0x458] sm:$0xff]   ;;  %v8747_v9 = vld [vmem:[%s12808_s6 + $0x450] sm:$0xff]  }
 0x55e   :  { %8225 = vmatprep.subr.bf16.mxu1 %v8711_v26  ;;  %v8741_v28 = vld [vmem:[%s12808_s6 + $0x420] sm:$0xff]   ;;  %v8746_v26 = vld [vmem:[%s12808_s6 + $0x4d8] sm:$0xff]   ;;  %v8750_v29 = vld [vmem:[%s12808_s6 + $0x4d0] sm:$0xff]  }
 0x55f   :  { %8246 = vmatpush3.bf16.msra.mxu0 %v8710_v32  ;;  %v8744_v48 = vld [vmem:[%s12808_s6 + $0x4a0] sm:$0xff]   ;;  %v8745_v55 = vld [vmem:[%s12808_s6 + $0x418] sm:$0xff]   ;;  %v8749_v32 = vld [vmem:[%s12808_s6 + $0x410] sm:$0xff]  }
 0x560   :  { %v5085_v25 = vpop.permute.xlu0 %5084  ;;  %8247 = vmatprep.subr.bf16.mxu0 %v8713_v1  ;;  %v8748_v52 = vld [vmem:[%s12808_s6 + $0x498] sm:$0xff]   ;;  %v8751_v1 = vld [vmem:[%s12808_s6 + $0x448] sm:$0xff]   ;;  %v8752_v10 = vld [vmem:[%s12808_s6 + $0x490] sm:$0xff]  }
 0x561   :  { %5087 = vst.msk [vmem:[#allocation3 + $0x1f] sm:$0x1] %vm4499_vm13, %v5085_v25  ;;  %8226 = vmatpush3.bf16.msra.mxu1 %v8712_v11  ;;  %v8754_v11 = vld [vmem:[%s12808_s6 + $0x4c8] sm:$0xff]  }
 0x562   :  { %v5070_v39 = vpop.permute.xlu1 %5069  ;;  %8227 = vmatprep.subr.bf16.mxu1 %v8715_v63  ;;  %v8753_v63 = vld [vmem:[%s12808_s6 + $0x408] sm:$0xff]  }
 0x563   :  { %5072 = vst.msk [vmem:[#allocation3 + $0x1d] sm:$0x1] %vm4499_vm13, %v5070_v39  ;;  %v5208_v17 = vld [vmem:[#allocation2 + $0x1dd] sm:$0x1]  ;;  %8248 = vmatpush3.bf16.msra.mxu0 %v8714_v49  ;;  %v5193_v57 = vld [vmem:[#allocation2 + $0x1d9] sm:$0x1] }
 0x564   :  { %v7773_v22 = vld.sshfl [vmem:[#allocation2 + $0x1db] sm:$0x1 pattern:$0x76325410]  ;;  %5209 = vst.msk [vmem:[#allocation3 + $0x31] sm:$0x1] %vm4485_vm12, %v5208_v17  ;;  %v4753_v6 = vpop.permute.xlu0 %4752  ;;  %8249 = vmatprep.subr.bf16.mxu0 %v8717_v34 }
 0x565   :  { %5204 = vrot.lane.b32.xlu0 %v7773_v22, %s8835_s17  ;;  %4755 = vst.msk [vmem:[#allocation3 + $0x22] sm:$0x1] %vm4499_vm13, %v4753_v6  ;;  %8228 = vmatpush3.bf16.msra.mxu1 %v8716_v27  ;;  %v8755_v49 = vld [vmem:[%s12808_s6 + $0x440] sm:$0xff]   ;;  %v8756_v25 = vld [vmem:[%s12808_s6 + $0x488] sm:$0xff]  }
 0x566   :  { %v4738_v37 = vpop.permute.xlu1 %4737  ;;  %5194 = vst.msk [vmem:[#allocation3 + $0x2f] sm:$0x1] %vm4485_vm12, %v5193_v57  ;;  %8229 = vmatprep.subr.bf16.mxu1 %v8719_v44  ;;  %v8758_v34 = vld [vmem:[%s12808_s6 + $0x4c0] sm:$0xff]   ;;  %v8760_v44 = vld [vmem:[%s12808_s6 + $0x578] sm:$0xff]  }
 0x567   :  { %4740 = vst.msk [vmem:[#allocation3 + $0x20] sm:$0x1] %vm4499_vm13, %v4738_v37  ;;  %8250 = vmatpush3.bf16.msra.mxu0 %v8718_v62  ;;  %v8757_v39 = vld [vmem:[%s12808_s6 + $0x400] sm:$0xff]  }
 0x568   :  { %v4783_v40 = vpop.permute.xlu0 %4782  ;;  %8251 = vmatprep.subr.bf16.mxu0 %v8721_v38  ;;  %v7775_v27 = vld [vmem:[%s12809_s7] ss:$0 sm:$0xff]  ;;  %v8763_v38 = vld [vmem:[%s12808_s6 + $0x5f8] sm:$0xff]  }
 0x569   :  { %4785 = vst.msk [vmem:[#allocation3 + $0x26] sm:$0x1] %vm4499_vm13, %v4783_v40  ;;  %8230 = vmatpush3.bf16.msra.mxu1 %v8720_v54  ;;  %v8759_v22 = vld [vmem:[%s12808_s6 + $0x480] sm:$0xff]  }
 0x56a   :  { %v4768_v16 = vpop.permute.xlu1 %4767  ;;  %v5213_v19 = vld [vmem:[#allocation3 + $0x18] sm:$0xff]  ;;  %8231 = vmatprep.subr.bf16.mxu1 %v8723_v14 }
 0x56b   :  { %4770 = vst.msk [vmem:[#allocation3 + $0x24] sm:$0x1] %vm4499_vm13, %v4768_v16  ;;  %v5282_v4 = vrot.slane %v5213_v19, %v12068_v24  ;;  %v5275_v61 = vcombine.high %v5213_v19, %v5213_v19  ;;  %v8101_v36 = vpop.f32.mrf.mxu0  ;;  %8252 = vmatpush3.bf16.msra.mxu0 %v8722_v53 }
 0x56c   :  { %8253 = vmatprep.subr.bf16.mxu0 %v8725_v59 }
 0x56d   :  { %v5290_v0 = vcombine.high %v5282_v4, %v5282_v4  ;;  %v5289_v35 = vrot.slane %v5275_v61, %v12068_v24  ;;  %v8102_v33 = vpop.f32.mrf.mxu0  ;;  %8232 = vmatpush3.bf16.msra.mxu1 %v8724_v51  ;;  %v5370_v60 = vpack.c.bf16 %v5282_v4, %v5282_v4 }
 0x56e   :  { %v12534_v30 = vadd.f32 %v8102_v33, %v8101_v36  ;;  %8261 = vmatprep.subr.bf16.mxu1 %v8728_v20 }
 0x56f   :  { %v5371_v31 = vpack.c.bf16 %v5290_v0, %v5290_v0  ;;  %v5291_v2 = vcombine.high %v5289_v35, %v5289_v35  ;;  %v8104_v45 = vpop.f32.mrf.mxu0  ;;  %8254 = vmatpush3.bf16.msra.mxu0 %v8726_v23  ;;  %v5372_v21 = vpack.c.bf16 %v5289_v35, %v5289_v35 }
 0x570   :  { %8283 = vmatprep.subr.bf16.mxu0 %v8730_v41  ;;  %v6996_v57 = vadd.f32 %v12534_v30, %v7775_v27 }
 0x571   :  { %7233 = vmatprep.mubr.bf16.mxu1 %v5371_v31  ;;  %v5373_v47 = vpack.c.bf16 %v5291_v2, %v5291_v2  ;;  %v8105_v58 = vpop.f32.mrf.mxu0 }
 0x572   :  { %7234 = vmatmul.mubr.bf16.vlgmr.msra.gmra.mxu1 %v5370_v60 }
 0x573   :  { %7273 = vmatprep.mubr.bf16.mxu0 %v5373_v47  ;;  %8262 = vmatpush3.bf16.msra.mxu1 %v8729_v56 }
 0x574   :  { %7274 = vmatmul.mubr.bf16.vlgmr.msra.gmra.mxu0 %v5372_v21  ;;  %8263 = vmatprep.subr.bf16.mxu1 %v8731_v46  ;;  %v8761_v21 = vld [vmem:[%s12808_s6 + $0x538] sm:$0xff]  }
 0x575   :  { %8284 = vmatpush3.bf16.msra.mxu0 %v8732_v3 }
 0x576   :  { %8285 = vmatprep.subr.bf16.mxu0 %v8734_v7 }
 0x577   :  { %8264 = vmatpush3.bf16.msra.mxu1 %v8733_v13 }
 0x578   :  { %8265 = vmatprep.subr.bf16.mxu1 %v8735_v8 }
 0x579   :  { %8286 = vmatpush3.bf16.msra.mxu0 %v8736_v18  ;;  %v8764_v18 = vld [vmem:[%s12808_s6 + $0x570] sm:$0xff]  }
 0x57a   :  { %8287 = vmatprep.subr.bf16.mxu0 %v8738_v5 }
 0x57b   :  { %8266 = vmatpush3.bf16.msra.mxu1 %v8737_v15 }
 0x57c   :  { %8267 = vmatprep.subr.bf16.mxu1 %v8739_v50  ;;  %v8765_v50 = vld [vmem:[%s12808_s6 + $0x5b8] sm:$0xff]  }
 0x57d   :  { %8288 = vmatpush3.bf16.msra.mxu0 %v8740_v12 }
 0x57e   :  { %8289 = vmatprep.subr.bf16.mxu0 %v8742_v43  ;;  %v8767_v43 = vld [vmem:[%s12808_s6 + $0x5f0] sm:$0xff]  }
 0x57f   :  { %8268 = vmatpush3.bf16.msra.mxu1 %v8741_v28  ;;  %v8766_v28 = vld [vmem:[%s12808_s6 + $0x530] sm:$0xff]  }
 0x580   :  { %8269 = vmatprep.subr.bf16.mxu1 %v8743_v42  ;;  %v8768_v42 = vld [vmem:[%s12808_s6 + $0x568] sm:$0xff]  }
 0x581   :  { %8290 = vmatpush3.bf16.msra.mxu0 %v8744_v48  ;;  %v8769_v48 = vld [vmem:[%s12808_s6 + $0x5b0] sm:$0xff]  }
 0x582   :  { %8291 = vmatprep.subr.bf16.mxu0 %v8746_v26  ;;  %v8771_v26 = vld [vmem:[%s12808_s6 + $0x5e8] sm:$0xff]  }
 0x583   :  { %8270 = vmatpush3.bf16.msra.mxu1 %v8745_v55  ;;  %v8770_v55 = vld [vmem:[%s12808_s6 + $0x528] sm:$0xff]  }
 0x584   :  { %8271 = vmatprep.subr.bf16.mxu1 %v8747_v9  ;;  %v8772_v9 = vld [vmem:[%s12808_s6 + $0x560] sm:$0xff]  }
 0x585   :  { %8292 = vmatpush3.bf16.msra.mxu0 %v8748_v52 }
 0x586   :  { %8293 = vmatprep.subr.bf16.mxu0 %v8750_v29  ;;  %v8773_v29 = vld [vmem:[%s12808_s6 + $0x5a8] sm:$0xff]  }
 0x587   :  { %8272 = vmatpush3.bf16.msra.mxu1 %v8749_v32 }
 0x588   :  { %8273 = vmatprep.subr.bf16.mxu1 %v8751_v1  ;;  %v8775_v1 = vld [vmem:[%s12808_s6 + $0x5e0] sm:$0xff]  }
 0x589   :  { %8294 = vmatpush3.bf16.msra.mxu0 %v8752_v10  ;;  %v8774_v10 = vld [vmem:[%s12808_s6 + $0x520] sm:$0xff]  }
 0x58a   :  { %8295 = vmatprep.subr.bf16.mxu0 %v8754_v11  ;;  %v8776_v11 = vld [vmem:[%s12808_s6 + $0x558] sm:$0xff]  }
 0x58b   :  { %8274 = vmatpush3.bf16.msra.mxu1 %v8753_v63  ;;  %v8123_v62 = vpop.f32.mrf.mxu0  ;;  %v8777_v63 = vld [vmem:[%s12808_s6 + $0x5a0] sm:$0xff]  }
 0x58c   :  { %8275 = vmatprep.subr.bf16.mxu1 %v8755_v49  ;;  %v5100_v17 = vpop.permute.xlu1 %5099  ;;  %v8779_v49 = vld [vmem:[%s12808_s6 + $0x5d8] sm:$0xff]  }
 0x58d   :  { %8296 = vmatpush3.bf16.msra.mxu0 %v8756_v25  ;;  %v8124_v6 = vpop.f32.mrf.mxu0  ;;  %5102 = vst.msk [vmem:[#allocation3 + $0x21] sm:$0x1] %vm4499_vm13, %v5100_v17  ;;  %v8778_v25 = vld [vmem:[%s12808_s6 + $0x518] sm:$0xff]   ;;  %v8784_v17 = vld [vmem:[%s12808_s6 + $0x548] sm:$0xff]  }
 0x58e   :  { %8297 = vmatprep.subr.bf16.mxu0 %v8758_v34  ;;  %v8125_v37 = vadd.f32 %v8124_v6, %v8123_v62  ;;  %v8780_v34 = vld [vmem:[%s12808_s6 + $0x550] sm:$0xff]   ;;  %v8787_v6 = vld [vmem:[%s12808_s6 + $0x5c8] sm:$0xff]  }
 0x58f   :  { %8276 = vmatpush3.bf16.msra.mxu1 %v8757_v39  ;;  %v8126_v54 = vpop.f32.mrf.mxu0  ;;  %v8781_v39 = vld [vmem:[%s12808_s6 + $0x598] sm:$0xff]   ;;  %v8783_v62 = vld [vmem:[%s12808_s6 + $0x5d0] sm:$0xff]  }
 0x590   :  { %8305 = vmatprep.subr.bf16.mxu1 %v8760_v44  ;;  %v7036_v14 = vadd.f32 %v8125_v37, %v6996_v57  ;;  %v8782_v44 = vld [vmem:[%s12808_s6 + $0x510] sm:$0xff]   ;;  %v8788_v57 = vld [vmem:[%s12808_s6 + $0x540] sm:$0xff]   ;;  %v8789_v37 = vld [vmem:[%s12808_s6 + $0x588] sm:$0xff]  }
 0x591   :  { %8298 = vmatpush3.bf16.msra.mxu0 %v8759_v22  ;;  %v8127_v53 = vpop.f32.mrf.mxu0  ;;  %v8785_v22 = vld [vmem:[%s12808_s6 + $0x590] sm:$0xff]   ;;  %v8791_v54 = vld [vmem:[%s12808_s6 + $0x5c0] sm:$0xff]  }
 0x592   :  { %8327 = vmatprep.subr.bf16.mxu0 %v8763_v38  ;;  %v8786_v38 = vld [vmem:[%s12808_s6 + $0x508] sm:$0xff]   ;;  %v8790_v53 = vld [vmem:[%s12808_s6 + $0x500] sm:$0xff]  }
 0x5a1   :  { %v5130_v40 = vpop.permute.xlu1 %5129 }
 0x5a2   :  { %5132 = vst.msk [vmem:[#allocation3 + $0x25] sm:$0x1] %vm4499_vm13, %v5130_v40  ;;  %v5115_v59 = vpop.permute.xlu0 %5114 }
 0x5a3   :  { %5117 = vst.msk [vmem:[#allocation3 + $0x23] sm:$0x1] %vm4499_vm13, %v5115_v59 }
 0x5a5   :  { %v4798_v16 = vpop.permute.xlu1 %4797 }
 0x5a6   :  { %4800 = vst.msk [vmem:[#allocation3 + $0x28] sm:$0x1] %vm4499_vm13, %v4798_v16 }
 0x5a9   :  { %v4828_v51 = vpop.permute.xlu1 %4827 }
 0x5aa   :  { %4830 = vst.msk [vmem:[#allocation3 + $0x2c] sm:$0x1] %vm4499_vm13, %v4828_v51  ;;  %v8792_v51 = vld [vmem:[%s12808_s6 + $0x580] sm:$0xff]  }
 0x5b5   :  { %v5160_v19 = vpop.permute.xlu1 %5159 }
 0x5b6   :  { %5162 = vst.msk [vmem:[#allocation3 + $0x29] sm:$0x1] %vm4499_vm13, %v5160_v19  ;;  %v5145_v4 = vpop.permute.xlu0 %5144 }
 0x5b7   :  { %5147 = vst.msk [vmem:[#allocation3 + $0x27] sm:$0x1] %vm4499_vm13, %v5145_v4 }
 0x5ba   :  { %v4813_v61 = vpop.permute.xlu0 %4812 }
 0x5bb   :  { %4815 = vst.msk [vmem:[#allocation3 + $0x2a] sm:$0x1] %vm4499_vm13, %v4813_v61  ;;  %v8793_v61 = vld [vmem:[%s12808_s6 + $0x618] sm:$0xff]  }
 0x5bc   :  { %v8145_v20 = vpop.f32.mrf.mxu1 }
 0x5be   :  { %v4843_v36 = vpop.permute.xlu0 %4842  ;;  %v8146_v23 = vpop.f32.mrf.mxu1  ;;  %v5214_v0 = vld [vmem:[#allocation3 + $0x20] sm:$0xff] }
 0x5bf   :  { %4845 = vst.msk [vmem:[#allocation3 + $0x2e] sm:$0x1] %vm4499_vm13, %v4843_v36  ;;  %v8147_v35 = vadd.f32 %v8146_v23, %v8145_v20  ;;  %v8167_v41 = vpop.f32.mrf.mxu0  ;;  %v5299_v33 = vrot.slane %v5214_v0, %v12068_v24  ;;  %v5292_v30 = vcombine.high %v5214_v0, %v5214_v0  ;;  %v8837_v23 = vmov 0.0  }
 0x5c0   :  { %v8148_v31 = vpop.f32.mrf.mxu1 }
 0x5c1   :  { %v7076_v2 = vadd.f32 %v8147_v35, %v7036_v14  ;;  %v8168_v56 = vpop.f32.mrf.mxu0  ;;  %v5307_v45 = vcombine.high %v5299_v33, %v5299_v33  ;;  %v5306_v60 = vrot.slane %v5292_v30, %v12068_v24  ;;  %v5374_v8 = vpack.c.bf16 %v5299_v33, %v5299_v33  ;;  %v8797_v33 = vld [vmem:[%s12808_s6 + $0x600] sm:$0xff]   ;;  %v7774_v30 = vld.sshfl [vmem:[#allocation3 + $0x30] sm:$0x3 pattern:$0x76325410] }
 0x5c2   :  { %v8169_v46 = vadd.f32 %v8168_v56, %v8167_v41  ;;  %v8149_v47 = vpop.f32.mrf.mxu1  ;;  %v8796_v41 = vld [vmem:[%s12808_s6 + $0x608] sm:$0xff]   ;;  %v5382_v31 = vpack.c.bf16 %v7774_v30, %v7774_v30 }
 0x5c3   :  { %v8170_v3 = vpop.f32.mrf.mxu0  ;;  %v5375_v58 = vpack.c.bf16 %v5307_v45, %v5307_v45  ;;  %v5308_v7 = vcombine.high %v5306_v60, %v5306_v60  ;;  %v5376_v12 = vpack.c.bf16 %v5306_v60, %v5306_v60  ;;  %v8799_v45 = vld [vmem:[%s12810_s8 + $0x30] sm:$0xff]  }
 0x5c4   :  { %v12650_v13 = vadd.f32 %v8169_v46, %v7076_v2  ;;  %v8798_v2 = vld [vmem:[%s12810_s8 + $0x38] sm:$0xff]  }
 0x5c5   :  { %v8171_v5 = vpop.f32.mrf.mxu0  ;;  %7313 = vmatprep.mubr.bf16.mxu1 %v5375_v58  ;;  %v5377_v15 = vpack.c.bf16 %v5308_v7, %v5308_v7 }
 0x5c6   :  { %7314 = vmatmul.mubr.bf16.vlgmr.msra.gmra.mxu1 %v5374_v8 }
 0x5c7   :  { %8306 = vmatpush3.bf16.msra.mxu1 %v8761_v21  ;;  %7353 = vmatprep.mubr.bf16.mxu0 %v5377_v15  ;;  %v8800_v21 = vld [vmem:[%s12810_s8 + $0x28] sm:$0xff]  }
 0x5c8   :  { %7354 = vmatmul.mubr.bf16.vlgmr.msra.gmra.mxu0 %v5376_v12  ;;  %8307 = vmatprep.subr.bf16.mxu1 %v8764_v18  ;;  %v8801_v12 = vld [vmem:[%s12810_s8 + $0x20] sm:$0xff]  }
 0x5c9   :  { %8328 = vmatpush3.bf16.msra.mxu0 %v8765_v50 }
 0x5ca   :  { %8329 = vmatprep.subr.bf16.mxu0 %v8767_v43  ;;  %v8802_v43 = vld [vmem:[%s12810_s8 + $0x18] sm:$0xff]  }
 0x5cb   :  { %8308 = vmatpush3.bf16.msra.mxu1 %v8766_v28  ;;  %v8803_v28 = vld [vmem:[%s12810_s8 + $0x10] sm:$0xff]  }
 0x5cc   :  { %8309 = vmatprep.subr.bf16.mxu1 %v8768_v42 }
 0x5cd   :  { %8330 = vmatpush3.bf16.msra.mxu0 %v8769_v48  ;;  %v5190_v52 = vpop.permute.xlu1 %5189 }
 0x5ce   :  { %5192 = vst.msk [vmem:[#allocation3 + $0x2d] sm:$0x1] %vm4499_vm13, %v5190_v52  ;;  %v5175_v32 = vpop.permute.xlu0 %5174  ;;  %8331 = vmatprep.subr.bf16.mxu0 %v8771_v26 }
 0x5cf   :  { %8310 = vmatpush3.bf16.msra.mxu1 %v8770_v55  ;;  %5177 = vst.msk [vmem:[#allocation3 + $0x2b] sm:$0x1] %vm4499_vm13, %v5175_v32 }
 0x5d0   :  { %8311 = vmatprep.subr.bf16.mxu1 %v8772_v9 }
 0x5d1   :  { %8332 = vmatpush3.bf16.msra.mxu0 %v8773_v29 }
 0x5d2   :  { %8333 = vmatprep.subr.bf16.mxu0 %v8775_v1 }
 0x5d3   :  { %8312 = vmatpush3.bf16.msra.mxu1 %v8774_v10  ;;  %v8804_v10 = vld [vmem:[%s12810_s8 + $0x8] sm:$0xff]  }
 0x5d4   :  { %8313 = vmatprep.subr.bf16.mxu1 %v8776_v11 }
 0x5d5   :  { %8334 = vmatpush3.bf16.msra.mxu0 %v8777_v63 }
 0x5d6   :  { %8335 = vmatprep.subr.bf16.mxu0 %v8779_v49  ;;  %v8805_v49 = vld [vmem:[%s12810_s8] sm:$0xff]  }
 0x5d7   :  { %v5205_v27 = vpop.permute.xlu0 %5204  ;;  %8314 = vmatpush3.bf16.msra.mxu1 %v8778_v25 }
 0x5d8   :  { %5207 = vst.msk [vmem:[#allocation3 + $0x2f] sm:$0x1] %vm4499_vm13, %v5205_v27  ;;  %8315 = vmatprep.subr.bf16.mxu1 %v8780_v34 }
 0x5d9   :  { %8336 = vmatpush3.bf16.msra.mxu0 %v8781_v39 }
 0x5da   :  { %8337 = vmatprep.subr.bf16.mxu0 %v8783_v62 }
 0x5db   :  { %8316 = vmatpush3.bf16.msra.mxu1 %v8782_v44 }
 0x5dc   :  { %8317 = vmatprep.subr.bf16.mxu1 %v8784_v17 }
 0x5dd   :  { %8338 = vmatpush3.bf16.msra.mxu0 %v8785_v22 }
 0x5de   :  { %8339 = vmatprep.subr.bf16.mxu0 %v8787_v6 }
 0x5df   :  { %v5215_v14 = vld [vmem:[#allocation3 + $0x28] sm:$0xff]  ;;  %8318 = vmatpush3.bf16.msra.mxu1 %v8786_v38 }
 0x5e0   :  { %v5316_v40 = vrot.slane %v5215_v14, %v12068_v24  ;;  %v5309_v59 = vcombine.high %v5215_v14, %v5215_v14  ;;  %8319 = vmatprep.subr.bf16.mxu1 %v8788_v57 }
 0x5e1   :  { %8340 = vmatpush3.bf16.msra.mxu0 %v8789_v37 }
 0x5e2   :  { %v5324_v16 = vcombine.high %v5316_v40, %v5316_v40  ;;  %v5323_v19 = vrot.slane %v5309_v59, %v12068_v24  ;;  %8341 = vmatprep.subr.bf16.mxu0 %v8791_v54  ;;  %v5378_v36 = vpack.c.bf16 %v5316_v40, %v5316_v40  ;;  %v8795_v24 = vld [vmem:[%s12808_s6 + $0x610] sm:$0xff]  }
 0x5e3   :  { %8320 = vmatpush3.bf16.msra.mxu1 %v8790_v53 }
 0x5e4   :  { %v5379_v4 = vpack.c.bf16 %v5324_v16, %v5324_v16  ;;  %v5325_v20 = vcombine.high %v5323_v19, %v5323_v19  ;;  %8537 = vmatprep.subr.bf16.mxu1 %v8837_v23  ;;  %v5380_v35 = vpack.c.bf16 %v5323_v19, %v5323_v19 }
 0x5e5   :  { %8342 = vmatpush3.bf16.msra.mxu0 %v8792_v51 }
 0x5e6   :  { %7393 = vmatprep.mubr.bf16.mxu1 %v5379_v4  ;;  %v5381_v0 = vpack.c.bf16 %v5325_v20, %v5325_v20  ;;  %8549 = vmatprep.subr.bf16.mxu0 %v8837_v23 }
 0x5e7   :  { %7394 = vmatmul.mubr.bf16.vlgmr.msra.gmra.mxu1 %v5378_v36 }
 0x5e8   :  { %8538 = vmatpush3.bf16.msra.mxu1 %v8793_v61  ;;  %7433 = vmatprep.mubr.bf16.mxu0 %v5381_v0 }
 0x5e9   :  { %7434 = vmatmul.mubr.bf16.vlgmr.msra.gmra.mxu0 %v5380_v35  ;;  %8539 = vmatprep.subr.bf16.mxu1 %v8837_v23 }
 0x5ea   :  { %8545 = vmatprep.mubr.msk.bf16.mxu1 %vm8838_vm14, %v8837_v23  ;;  %8565 = vmatprep.mubr.msk.bf16.mxu0 %vm8838_vm14, %v8837_v23 }
 0x5eb   :  { %8550 = vmatpush3.bf16.msra.mxu0 %v8798_v2 }
 0x5ec   :  { %8540 = vmatpush3.bf16.msra.mxu1 %v8795_v24  ;;  %8551 = vmatprep.subr.bf16.mxu0 %v8837_v23 }
 0x5ed   :  { %8541 = vmatprep.subr.bf16.mxu1 %v8837_v23 }
 0x5ef   :  { %8552 = vmatpush3.bf16.msra.mxu0 %v8799_v45 }
 0x5f0   :  { %8542 = vmatpush3.bf16.msra.mxu1 %v8796_v41  ;;  %8553 = vmatprep.subr.bf16.mxu0 %v8837_v23 }
 0x5f1   :  { %8543 = vmatprep.subr.bf16.mxu1 %v8837_v23 }
 0x5f3   :  { %8554 = vmatpush3.bf16.msra.mxu0 %v8800_v21 }
 0x5f4   :  { %8544 = vmatpush3.bf16.msra.mxu1 %v8797_v33  ;;  %8555 = vmatprep.subr.bf16.mxu0 %v8837_v23 }
 0x5f7   :  { %8546 = vmatmul.mubr.msk.bf16.vlgmr.msra.gmra.mxu1 %vm2761_vm9, %v5382_v31  ;;  %8556 = vmatpush3.bf16.msra.mxu0 %v8801_v12  ;;  %v7973_v31 = vld [vmem:[%s12811_s9] ss:$0 sm:$0xff] }
 0x5f8   :  { %8557 = vmatprep.subr.bf16.mxu0 %v8837_v23 }
 0x5fb   :  { %8558 = vmatpush3.bf16.msra.mxu0 %v8802_v43 }
 0x5fc   :  { %8559 = vmatprep.subr.bf16.mxu0 %v8837_v23 }
 0x5ff   :  { %8560 = vmatpush3.bf16.msra.mxu0 %v8803_v28 }
 0x600   :  { %8561 = vmatprep.subr.bf16.mxu0 %v8837_v23 }
 0x603   :  { %8562 = vmatpush3.bf16.msra.mxu0 %v8804_v10 }
 0x604   :  { %8563 = vmatprep.subr.bf16.mxu0 %v8837_v23 }
 0x607   :  { %8564 = vmatpush3.bf16.msra.mxu0 %v8805_v49 }
 0x610   :  { %v8189_v56 = vpop.f32.mrf.mxu1 }
 0x612   :  { %v8190_v60 = vpop.f32.mrf.mxu1  ;;  %v8211_v46 = vpop.f32.mrf.mxu0 }
 0x613   :  { %v8191_v47 = vadd.f32 %v8190_v60, %v8189_v56 }
 0x614   :  { %v8192_v3 = vpop.f32.mrf.mxu1  ;;  %v8212_v58 = vpop.f32.mrf.mxu0 }
 0x615   :  { %v7156_v7 = vadd.f32 %v8191_v47, %v12650_v13  ;;  %v8213_v8 = vadd.f32 %v8212_v58, %v8211_v46 }
 0x616   :  { %v8193_v18 = vpop.f32.mrf.mxu1  ;;  %v8214_v5 = vpop.f32.mrf.mxu0 }
 0x617   :  { %v7196_v15 = vadd.f32 %v8213_v8, %v7156_v7 }
 0x618   :  { %v8215_v50 = vpop.f32.mrf.mxu0 }
 0x632   :  { %v8233_v13 = vpop.f32.mrf.mxu1 }
 0x634   :  { %v8234_v42 = vpop.f32.mrf.mxu1  ;;  %v8255_v48 = vpop.f32.mrf.mxu0 }
 0x635   :  { %v8235_v26 = vadd.f32 %v8234_v42, %v8233_v13 }
 0x636   :  { %v8236_v55 = vpop.f32.mrf.mxu1  ;;  %v8256_v9 = vpop.f32.mrf.mxu0 }
 0x637   :  { %v7236_v52 = vadd.f32 %v8235_v26, %v7196_v15  ;;  %v8257_v29 = vadd.f32 %v8256_v9, %v8255_v48 }
 0x638   :  { %v8237_v32 = vpop.f32.mrf.mxu1  ;;  %v8258_v1 = vpop.f32.mrf.mxu0 }
 0x639   :  { %v7276_v11 = vadd.f32 %v8257_v29, %v7236_v52 }
 0x63a   :  { %v8259_v63 = vpop.f32.mrf.mxu0 }
 0x686   :  { %v8277_v25 = vpop.f32.mrf.mxu1 }
 0x688   :  { %v8278_v34 = vpop.f32.mrf.mxu1  ;;  %v8299_v39 = vpop.f32.mrf.mxu0 }
 0x689   :  { %v8279_v38 = vadd.f32 %v8278_v34, %v8277_v25 }
 0x68a   :  { %v8280_v27 = vpop.f32.mrf.mxu1  ;;  %v8300_v62 = vpop.f32.mrf.mxu0 }
 0x68b   :  { %v7316_v53 = vadd.f32 %v8279_v38, %v7276_v11  ;;  %v8301_v40 = vadd.f32 %v8300_v62, %v8299_v39 }
 0x68c   :  { %v8281_v44 = vpop.f32.mrf.mxu1  ;;  %v8302_v17 = vpop.f32.mrf.mxu0 }
 0x68d   :  { %v7356_v4 = vadd.f32 %v8301_v40, %v7316_v53 }
 0x68e   :  { %v8303_v22 = vpop.f32.mrf.mxu0 }
 0x6a7   :  { %v8321_v6 = vpop.f32.mrf.mxu1 }
 0x6a9   :  { %v8322_v57 = vpop.f32.mrf.mxu1  ;;  %v8343_v37 = vpop.f32.mrf.mxu0 }
 0x6aa   :  { %v8323_v51 = vadd.f32 %v8322_v57, %v8321_v6 }
 0x6ab   :  { %v8324_v54 = vpop.f32.mrf.mxu1  ;;  %v8344_v14 = vpop.f32.mrf.mxu0 }
 0x6ac   :  { %v7396_v61 = vadd.f32 %v8323_v51, %v7356_v4  ;;  %v8345_v20 = vadd.f32 %v8344_v14, %v8343_v37 }
 0x6ad   :  { %v8325_v59 = vpop.f32.mrf.mxu1  ;;  %v8346_v16 = vpop.f32.mrf.mxu0 }
 0x6ae   :  { %v7436_v36 = vadd.f32 %v8345_v20, %v7396_v61 }
 0x6af   :  { %v8347_v19 = vpop.f32.mrf.mxu0 }
 0x6b7   :  { %v7475_v23 = vpop.f32.mrf.mxu1 }
 0x6b8   :  { %v7476_v0 = vadd.f32 %v7475_v23, %v7436_v36 }
 0x6b9   :  { %v8547_v35 = vpop.f32.mrf.mxu1 }
 0x6ba   :  { %v7481_v24 = vmax.f32 %v7476_v0, 0.0 }
 0x6bb   :  { %v7478_v41 = vpop.f32.mrf.mxu1 }
 0x6bc   :  { %v7482_v33 = vpack.c.bf16 %v7481_v24, %v7481_v24 }
 0x6bd   :  { %v8548_v30 = vpop.f32.mrf.mxu1 }
 0x6be   :  { %8566 = vmatmul.mubr.bf16.vlgmr.msra.gmra.mxu0 %v7482_v33 }
 0x77e   :  { %v7588_v2 = vpop.f32.mrf.mxu0 }
 0x77f   :  { %v7589_v56 = vadd.f32 %v7973_v31, %v7588_v2 }
 0x780   :  { %v8567_v45 = vpop.f32.mrf.mxu0 }
 0x781   :  { %7595 = vst.msk [vmem:[#allocation4] sm:$0x3] %vm7594_vm15, %v7589_v56 }
 0x782   :  { %v7591_v60 = vpop.f32.mrf.mxu0 }
 0x783   :  { %8821 = shalt.err (!%p8818_p4)
}
 0x784   :  { %7605 = dma.vmem_to_hbm [thread:$0]  %s7603_s11, 32, %s12812_s10, [#allocation5]   ;;  %v8568_v46 = vpop.f32.mrf.mxu0 }
 0x785   :  { %8830 = dma.done.wait [#allocation5], 32  }
 0x786   :  { %8831 = vsyncadd [#allocation5], 4294967264 }
 0x787   :  { %7609 = vsyncpa [#allocation5], 1 }

</bundles_post_ra>
